<compile_context>
chip_gen: v5e
topology: v5e:2x2
jax: 0.10.0
libtpu: 0.0.40
codegen_flags: <defaults>
</compile_context>

<pallas_src>
import functools
import math

import jax
import jax.numpy as jnp
from jax import lax
from jax.experimental import pallas as pl
from jax.experimental.pallas import tpu as pltpu

# ----------------- small synthetic DiT config -----------------
IN_CH = 4
OUT_CH = 8                     # learned-sigma DiT: out_channels = 2 * in_channels
PATCH = 2
IMG = 16
NUM_HEADS = 4
HEAD_DIM = 8
HIDDEN = NUM_HEADS * HEAD_DIM  # 32
NUM_LAYERS = 2
NUM_CLASSES = 10
TIME_PROJ_CH = 256             # Timesteps(num_channels=256), downscale_freq_shift=0
FF_MULT = 4
WDT = jnp.bfloat16             # MXU operand dtype (f32 accumulation everywhere)


def _full_spec(arr):
    """Whole-array BlockSpec (block index 0 on every grid step -> DMA'd once)."""
    n = arr.ndim
    return pl.BlockSpec(arr.shape, lambda *_, n=n: (0,) * n)


# ===================== kernel: patch embed (+ pos embed) =====================
def _patch_embed_kernel(pt_ref, w_ref, b_ref, pe_ref, o_ref, *, batch, seq):
    # pt_ref: (C*p*p, B*S) feature-major patches -> lane-dense (last dim 128).
    y = lax.dot_general(pt_ref[...].astype(WDT), w_ref[...],
                        (((0,), (0,)), ((), ())),
                        preferred_element_type=jnp.float32)          # (B*S, D)
    y = y.reshape(batch, seq, y.shape[-1]) + b_ref[...] + pe_ref[...]
    o_ref[...] = y.astype(o_ref.dtype)


def pallas_patch_embed(patches_t, w, b, pos_embed, *, batch, seq):
    D = w.shape[1]
    return pl.pallas_call(
        functools.partial(_patch_embed_kernel, batch=batch, seq=seq),
        out_shape=jax.ShapeDtypeStruct((batch, seq, D), jnp.float32),
    )(patches_t, w, b, pos_embed)


# ===== kernel: batched AdaLN-zero conditioning for ALL layers (one call) =====
def _cond_all_kernel(tproj_ref, cemb_ref, tw1_ref, tb1_ref, tw2_ref, tb2_ref,
                     aw_ref, ab_ref, ada_ref, c0_ref):
    t = tproj_ref[...].astype(WDT)                                   # (B, 256)
    h = jnp.dot(t, tw1_ref[0], preferred_element_type=jnp.float32) + tb1_ref[0]
    h = h * jax.nn.sigmoid(h)                                        # SiLU
    h = jnp.dot(h.astype(WDT), tw2_ref[0],
                preferred_element_type=jnp.float32) + tb2_ref[0]
    cond = h + cemb_ref[0]                                           # + class embedding
    c = cond * jax.nn.sigmoid(cond)                                  # SiLU before adaLN / proj_out_1
    ada_ref[0] = (jnp.dot(c.astype(WDT), aw_ref[0],
                          preferred_element_type=jnp.float32) + ab_ref[0]
                  ).astype(ada_ref.dtype)

    # Cache block-0's SiLU(conditioning): the output head reuses block-0's
    # embedder (as diffusers does), so it never recomputes the timestep MLP.
    @pl.when(pl.program_id(0) == 0)
    def _():
        c0_ref[...] = c.astype(c0_ref.dtype)


def pallas_conditioning_all(t_proj, c_emb_all, tw1, tb1, tw2, tb2, ada_w, ada_b):
    L, B, D = c_emb_all.shape
    N = ada_w.shape[-1]
    return pl.pallas_call(
        _cond_all_kernel,
        out_shape=(jax.ShapeDtypeStruct((L, B, N), jnp.float32),
                   jax.ShapeDtypeStruct((B, D), jnp.float32)),
        grid=(L,),
        in_specs=[
            pl.BlockSpec((B, t_proj.shape[1]), lambda l: (0, 0)),
            pl.BlockSpec((1, B, D), lambda l: (l, 0, 0)),
            pl.BlockSpec((1,) + tw1.shape[1:], lambda l: (l, 0, 0)),
            pl.BlockSpec((1,) + tb1.shape[1:], lambda l: (l, 0, 0)),
            pl.BlockSpec((1,) + tw2.shape[1:], lambda l: (l, 0, 0)),
            pl.BlockSpec((1,) + tb2.shape[1:], lambda l: (l, 0, 0)),
            pl.BlockSpec((1,) + ada_w.shape[1:], lambda l: (l, 0, 0)),
            pl.BlockSpec((1,) + ada_b.shape[1:], lambda l: (l, 0, 0)),
        ],
        out_specs=(pl.BlockSpec((1, B, N), lambda l: (l, 0, 0)),
                   pl.BlockSpec((B, D), lambda l: (0, 0))),
        # "arbitrary": the cond_0 output block is written only on layer 0 and
        # must stay resident on one core.
        compiler_params=pltpu.CompilerParams(dimension_semantics=("arbitrary",)),
    )(t_proj, c_emb_all, tw1, tb1, tw2, tb2, ada_w, ada_b)


# ================ kernel: fully fused DiT transformer block ==================
def _dit_block_kernel(h_ref, ada_ref, wqkv_ref, bqkv_ref, wo_ref, bo_ref,
                      ffw1_ref, ffb1_ref, ffw2_ref, ffb2_ref, o_ref,
                      *, num_heads, head_dim, eps1, eps2, batched_attn):
    D = num_heads * head_dim
    S = h_ref.shape[1]
    x = h_ref[0].astype(jnp.float32)                                 # (S, D)
    ada = ada_ref[0].astype(jnp.float32)                             # (6, D)
    shift_msa, scale_msa, gate_msa = ada[0:1], ada[1:2], ada[2:3]
    shift_mlp, scale_mlp, gate_mlp = ada[3:4], ada[4:5], ada[5:6]

    def _ln(v, eps):
        mu = jnp.mean(v, axis=-1, keepdims=True)
        vc = v - mu
        var = jnp.mean(vc * vc, axis=-1, keepdims=True)
        return vc * lax.rsqrt(var + eps)

    # ---------------- attention branch ----------------
    nh = _ln(x, eps1) * (1.0 + scale_msa) + shift_msa
    # Fused QKV in feature-major ("transposed") orientation: (3D, S).  All
    # per-head views below are leading-dim / sublane indexed, so there is no
    # 128-lane slicing and no lane-axis concatenation anywhere in attention.
    qkv_t = lax.dot_general(wqkv_ref[...], nh.astype(WDT),
                            (((1,), (1,)), ((), ())),
                            preferred_element_type=jnp.float32)      # (3D, S)
    qkv_t = qkv_t + bqkv_ref[...]                                    # (3D, 1) lane-broadcast
    q_t = qkv_t[0 * D:1 * D].reshape(num_heads, head_dim, S)         # (H, hd, S)
    k_t = qkv_t[1 * D:2 * D].reshape(num_heads, head_dim, S)
    v_t = qkv_t[2 * D:3 * D].reshape(num_heads, head_dim, S)
    attn_scale = 1.0 / math.sqrt(head_dim)

    if batched_attn:
        # one head-batched contraction for scores, one for context
        s = lax.dot_general(q_t.astype(WDT), k_t.astype(WDT),
                            (((1,), (1,)), ((0,), (0,))),
                            preferred_element_type=jnp.float32) * attn_scale   # (H, S, S)
        s = s - jnp.max(s, axis=-1, keepdims=True)
        p = jnp.exp(s)
        p = p * pl.reciprocal(jnp.sum(p, axis=-1, keepdims=True), approx=True)
        ctx = lax.dot_general(v_t.astype(WDT), p.astype(WDT),
                              (((2,), (2,)), ((0,), (0,))),
                              preferred_element_type=jnp.float32)               # (H, hd, S)
        ctx = ctx.reshape(D, S)
    else:
        # fallback: per-head loop; head views are leading-dim indexed and the
        # combine is an 8-aligned sublane concat (still no lane reorg ops).
        rows = []
        for h in range(num_heads):
            s = lax.dot_general(q_t[h].astype(WDT), k_t[h].astype(WDT),
                                (((0,), (0,)), ((), ())),
                                preferred_element_type=jnp.float32) * attn_scale
            s = s - jnp.max(s, axis=-1, keepdims=True)
            p = jnp.exp(s)
            p = p * pl.reciprocal(jnp.sum(p, axis=-1, keepdims=True), approx=True)
            rows.append(lax.dot_general(v_t[h].astype(WDT), p.astype(WDT),
                                        (((1,), (1,)), ((), ())),
                                        preferred_element_type=jnp.float32))    # (hd, S)
        ctx = jnp.concatenate(rows, axis=0)                                     # (D, S)

    # out-projection absorbs the (D, S) -> (S, D) transpose (contract on dim 0).
    attn = lax.dot_general(ctx.astype(WDT), wo_ref[...],
                           (((0,), (0,)), ((), ())),
                           preferred_element_type=jnp.float32) + bo_ref[...]    # (S, D)
    x = x + gate_msa * attn                                          # gated residual

    # ---------------- feed-forward branch ----------------
    nh2 = _ln(x, eps2) * (1.0 + scale_mlp) + shift_mlp
    ff = jnp.dot(nh2.astype(WDT), ffw1_ref[...],
                 preferred_element_type=jnp.float32) + ffb1_ref[...]
    ff = jax.nn.gelu(ff, approximate=True)                           # GELU(tanh)
    ff = jnp.dot(ff.astype(WDT), ffw2_ref[...],
                 preferred_element_type=jnp.float32) + ffb2_ref[...]
    x = x + gate_mlp * ff                                            # gated residual
    o_ref[0] = x.astype(o_ref.dtype)


def pallas_dit_block(hidden, ada, wqkv, bqkv, wo, bo, ffw1, ffb1, ffw2, ffb2,
                     *, batched_attn):
    B, S, D = hidden.shape
    kernel = functools.partial(_dit_block_kernel, num_heads=NUM_HEADS,
                               head_dim=HEAD_DIM, eps1=1e-6, eps2=1e-5,
                               batched_attn=batched_attn)
    weights = (wqkv, bqkv, wo, bo, ffw1, ffb1, ffw2, ffb2)
    # TODO(synk): production sizes need K/N/S tiling + Buffered(1) weights +
    # vmem_limit_bytes here (see header comment).
    return pl.pallas_call(
        kernel,
        out_shape=jax.ShapeDtypeStruct((B, S, D), hidden.dtype),
        grid=(B,),
        in_specs=[pl.BlockSpec((1, S, D), lambda b: (b, 0, 0)),
                  pl.BlockSpec((1, 6, D), lambda b: (b, 0, 0))]
                 + [_full_spec(w) for w in weights],
        out_specs=pl.BlockSpec((1, S, D), lambda b: (b, 0, 0)),
        # residual stream updated in place: no new (B,S,D) HBM buffer per layer
        input_output_aliases={0: 0},
        # batch grid shards across v7x's 2 TensorCores; on v5e/v6e it is a
        # cheap 2-step serial loop at this size.
        compiler_params=pltpu.CompilerParams(dimension_semantics=("parallel",)),
    )(hidden, ada, *weights)


# ===== kernel: output head (proj_out_1 from cached cond + LN + proj_out_2) ====
def _head_kernel(h_ref, c0_ref, wsh_ref, bsh_ref, wsc_ref, bsc_ref, w2_ref, b2_ref,
                 o_ref, *, eps):
    B, S, D = h_ref.shape
    x = h_ref[...].astype(jnp.float32)                               # (B, S, D)
    c0 = c0_ref[...].astype(WDT)                                     # (B, D) = SiLU(cond_0)
    shift = jnp.dot(c0, wsh_ref[...], preferred_element_type=jnp.float32) + bsh_ref[...]
    scale = jnp.dot(c0, wsc_ref[...], preferred_element_type=jnp.float32) + bsc_ref[...]
    mu = jnp.mean(x, axis=-1, keepdims=True)
    xc = x - mu
    var = jnp.mean(xc * xc, axis=-1, keepdims=True)
    xn = xc * lax.rsqrt(var + eps)
    y = xn * (1.0 + scale[:, None, :]) + shift[:, None, :]           # (B, S, D)
    y2 = y.reshape(B * S, D).astype(WDT)
    # Emit the projection transposed: (p*p*out_ch, B*S) is lane-dense (last dim
    # a multiple of 128) -> unmasked vst instead of 4x padded masked stores.
    out_t = lax.dot_general(w2_ref[...], y2, (((0,), (1,)), ((), ())),
                            preferred_element_type=jnp.float32)      # (N, B*S)
    o_ref[...] = (out_t + b2_ref[...]).astype(o_ref.dtype)


def pallas_head(hidden, c0, wsh, bsh, wsc, bsc, w2, b2):
    B, S, D = hidden.shape
    N = w2.shape[1]
    return pl.pallas_call(
        functools.partial(_head_kernel, eps=1e-6),
        out_shape=jax.ShapeDtypeStruct((N, B * S), jnp.float32),
    )(hidden, c0, wsh, bsh, wsc, bsc, w2, b2)


# ----------------- plain-JAX glue -----------------
def timestep_sincos_proj(timesteps):
    """diffusers get_timestep_embedding, dim=256, flip_sin_to_cos=True,
    downscale_freq_shift=0 (the PretrainedDiT override)."""
    half = TIME_PROJ_CH // 2
    exponent = -math.log(10000.0) * jnp.arange(half, dtype=jnp.float32) / float(half)
    freqs = jnp.exp(exponent)
    emb = timesteps.astype(jnp.float32)[:, None] * freqs[None, :]
    return jnp.concatenate([jnp.cos(emb), jnp.sin(emb)], axis=-1)    # flip -> [cos, sin]


# ----------------- parameter init (deterministic, synthetic) -----------------
def init_params(key):
    keys = iter(jax.random.split(key, 256))

    def nrm(shape, dtype=jnp.float32, scale=0.02):
        return (scale * jax.random.normal(next(keys), shape, jnp.float32)).astype(dtype)

    D = HIDDEN
    S = (IMG // PATCH) ** 2
    L = NUM_LAYERS

    def init_block():
        return dict(
            # fused QKV stored feature-major (3D, D): rows ordered (q|k|v, head, dim)
            # == the native PyTorch [Wq; Wk; Wv] (out_features, in_features) layout.
            wqkv=nrm((3 * D, D), WDT), bqkv=nrm((3 * D, 1)),
            wo=nrm((D, D), WDT), bo=nrm((1, D)),
            ff_w1=nrm((D, FF_MULT * D), WDT), ff_b1=nrm((1, FF_MULT * D)),
            ff_w2=nrm((FF_MULT * D, D), WDT), ff_b2=nrm((1, D)),
        )

    proj1_w = nrm((D, 2 * D), WDT)        # proj_out_1 -> chunk(2): [shift | scale]
    proj1_b = nrm((1, 2 * D))

    return dict(
        # PatchEmbed conv (D, C, p, p) stored pre-flattened as (C*p*p, D)
        patch_w=nrm((IN_CH * PATCH * PATCH, D), WDT), patch_b=nrm((1, D)),
        # TODO(synk): real DiT uses a fixed 2D sin-cos pos_embed; synthetic init here.
        pos_embed=nrm((S, D)),
        # per-layer AdaLayerNormZero conditioning stacked along a leading layer
        # axis -> all layers run as ONE pallas_call.
        class_table_all=nrm((L, NUM_CLASSES + 1, D)),   # +1 for cfg-dropout row
        t_w1_all=nrm((L, TIME_PROJ_CH, D), WDT), t_b1_all=nrm((L, 1, D)),
        t_w2_all=nrm((L, D, D), WDT), t_b2_all=nrm((L, 1, D)),
        ada_w_all=nrm((L, D, 6 * D), WDT), ada_b_all=nrm((L, 1, 6 * D)),
        blocks=[init_block() for _ in range(L)],
        # proj_out_1 pre-split into shift/scale halves (avoids in-kernel lane slicing)
        proj1_shift_w=proj1_w[:, :D], proj1_shift_b=proj1_b[:, :D],
        proj1_scale_w=proj1_w[:, D:], proj1_scale_b=proj1_b[:, D:],
        proj2_w=nrm((D, PATCH * PATCH * OUT_CH), WDT),
        proj2_b=nrm((PATCH * PATCH * OUT_CH, 1)),
    )


# ----------------- DiT forward -----------------
def dit_forward(params, x, timestep, class_labels, *, batched_attn=True):
    B, C, H, W = x.shape
    p = PATCH
    Hp, Wp = H // p, W // p
    S = Hp * Wp
    D = HIDDEN

    # PatchEmbed: stride-p conv == per-patch matmul.  Patch extraction is XLA
    # glue; patches are handed to the kernel feature-major (C*p*p, B*S) so the
    # input DMA is lane-dense (last dim = B*S = 128) instead of 16-wide.
    patches = x.reshape(B, C, Hp, p, Wp, p).transpose(0, 2, 4, 1, 3, 5)
    patches_t = patches.reshape(B * S, C * p * p).T                  # (C*p*p, B*S)
    hidden = pallas_patch_embed(patches_t, params["patch_w"], params["patch_b"],
                                params["pos_embed"], batch=B, seq=S)  # (B, S, D) f32

    # All per-layer conditioning in one batched pallas_call; SiLU(cond_0) cached
    # for the output head.
    t_proj = timestep_sincos_proj(timestep)                          # (B, 256)
    c_emb_all = params["class_table_all"][:, class_labels]           # (L, B, D), glue gather
    ada_all, cond0_silu = pallas_conditioning_all(
        t_proj, c_emb_all, params["t_w1_all"], params["t_b1_all"],
        params["t_w2_all"], params["t_b2_all"],
        params["ada_w_all"], params["ada_b_all"])                    # (L,B,6D), (B,D)

    for l, bp in enumerate(params["blocks"]):
        ada_l = ada_all[l].reshape(B, 6, D)                          # [shift/scale/gate] x2
        hidden = pallas_dit_block(hidden, ada_l,
                                  bp["wqkv"], bp["bqkv"], bp["wo"], bp["bo"],
                                  bp["ff_w1"], bp["ff_b1"], bp["ff_w2"], bp["ff_b2"],
                                  batched_attn=batched_attn)

    # Output head: proj_out_1 (from cached SiLU(cond_0)) + LN + modulate +
    # proj_out_2, emitted lane-dense as (p*p*out_ch, B*S).
    out_t = pallas_head(hidden, cond0_silu,
                        params["proj1_shift_w"], params["proj1_shift_b"],
                        params["proj1_scale_w"], params["proj1_scale_b"],
                        params["proj2_w"], params["proj2_b"])        # (N, B*S)

    out_tok = out_t.T.reshape(B, Hp, Wp, p, p, OUT_CH)               # glue
    # unpatchify: nhwpqc -> nchpwq -> (B, OUT_CH, H, W)
    out = jnp.einsum("nhwpqc->nchpwq", out_tok)
    return out.reshape(B, OUT_CH, Hp * p, Wp * p)


# ----------------- main -----------------
if __name__ == "__main__":
    root = jax.random.PRNGKey(0)
    k_param, k_x = jax.random.split(root)

    params = init_params(k_param)
    x = jax.random.normal(k_x, (2, IN_CH, IMG, IMG), dtype=jnp.float32)   # NCHW latents
    timestep = jnp.array([10, 500], dtype=jnp.int32)
    class_labels = jnp.array([1, 7], dtype=jnp.int32)

    try:
        fwd = jax.jit(functools.partial(dit_forward, batched_attn=True))
        out = jax.block_until_ready(fwd(params, x, timestep, class_labels))
    except Exception:
        # TODO(synk): fallback for Mosaic builds that reject the head-batched
        # dot_general with sublane-contracting dims; the per-head variant still
        # avoids all lane-axis slicing / concatenation.
        fwd = jax.jit(functools.partial(dit_forward, batched_attn=False))
        out = jax.block_until_ready(fwd(params, x, timestep, class_labels))

    assert out.shape == (2, OUT_CH, IMG, IMG) and out.dtype == jnp.float32
    print("KERNEL_OK")
</pallas_src>

<mosaic_0001>
module attributes {stable_mosaic.version = 11 : i64} {
  func.func @_cond_all_kernel(%arg0: i32, %arg1: memref<2x256xf32, #tpu.memory_space<vmem>>, %arg2: memref<1x2x32xf32, #tpu.memory_space<vmem>>, %arg3: memref<1x256x32xbf16, #tpu.memory_space<vmem>>, %arg4: memref<1x1x32xf32, #tpu.memory_space<vmem>>, %arg5: memref<1x32x32xbf16, #tpu.memory_space<vmem>>, %arg6: memref<1x1x32xf32, #tpu.memory_space<vmem>>, %arg7: memref<1x32x192xbf16, #tpu.memory_space<vmem>>, %arg8: memref<1x1x192xf32, #tpu.memory_space<vmem>>, %arg9: memref<1x2x192xf32, #tpu.memory_space<vmem>>, %arg10: memref<2x32xf32, #tpu.memory_space<vmem>>) attributes {dimension_semantics = [#tpu.dimension_semantics<arbitrary>], iteration_bounds = array<i64: 2>, scalar_prefetch = 0 : i64, scratch_operands = 0 : i64, tpu.core_type = #tpu.core_type<tc>, window_params = [{pipeline_mode = #tpu.pipeline_mode<synchronous>, transform_indices = @transform_0, window_bounds = array<i64: 2, 256>}, {transform_indices = @transform_1, window_bounds = array<i64: 1, 2, 32>}, {transform_indices = @transform_2, window_bounds = array<i64: 1, 256, 32>}, {transform_indices = @transform_3, window_bounds = array<i64: 1, 1, 32>}, {transform_indices = @transform_4, window_bounds = array<i64: 1, 32, 32>}, {transform_indices = @transform_5, window_bounds = array<i64: 1, 1, 32>}, {transform_indices = @transform_6, window_bounds = array<i64: 1, 32, 192>}, {transform_indices = @transform_7, window_bounds = array<i64: 1, 1, 192>}, {transform_indices = @transform_8, window_bounds = array<i64: 1, 2, 192>}, {pipeline_mode = #tpu.pipeline_mode<synchronous>, transform_indices = @transform_9, window_bounds = array<i64: 2, 32>}]} {
    %c0 = arith.constant 0 : index
    %c0_0 = arith.constant 0 : index
    %0 = vector.load %arg1[%c0, %c0_0] : memref<2x256xf32, #tpu.memory_space<vmem>>, vector<2x256xf32>
    %1 = arith.truncf %0 : vector<2x256xf32> to vector<2x256xbf16>
    %c0_1 = arith.constant 0 : index
    %c0_2 = arith.constant 0 : index
    %c0_3 = arith.constant 0 : index
    %2 = vector.load %arg3[%c0_1, %c0_2, %c0_3] : memref<1x256x32xbf16, #tpu.memory_space<vmem>>, vector<1x256x32xbf16>
    %3 = vector.shape_cast %2 : vector<1x256x32xbf16> to vector<256x32xbf16>
    %cst = arith.constant dense<0.000000e+00> : vector<2x32xf32>
    %4 = tpu.matmul %1, %3, %cst {dimension_numbers = #tpu.dot_dimension_numbers<[1], [0], [0], [1], [0, 0, 1, 1], [], []>} : vector<2x256xbf16>, vector<256x32xbf16>, vector<2x32xf32> -> vector<2x32xf32>
    %c0_4 = arith.constant 0 : index
    %c0_5 = arith.constant 0 : index
    %c0_6 = arith.constant 0 : index
    %5 = vector.load %arg4[%c0_4, %c0_5, %c0_6] : memref<1x1x32xf32, #tpu.memory_space<vmem>>, vector<1x1x32xf32>
    %6 = vector.shape_cast %5 : vector<1x1x32xf32> to vector<1x32xf32>
    %7 = vector.broadcast %6 : vector<1x32xf32> to vector<2x32xf32>
    %8 = arith.addf %4, %7 : vector<2x32xf32>
    %9 = arith.negf %8 : vector<2x32xf32>
    %10 = math.exp %9 : vector<2x32xf32>
    %cst_7 = arith.constant 1.000000e+00 : f32
    %11 = vector.broadcast %cst_7 : f32 to vector<2x32xf32>
    %12 = arith.addf %11, %10 : vector<2x32xf32>
    %13 = arith.divf %11, %12 : vector<2x32xf32>
    %14 = arith.mulf %8, %13 : vector<2x32xf32>
    %15 = arith.truncf %14 : vector<2x32xf32> to vector<2x32xbf16>
    %c0_8 = arith.constant 0 : index
    %c0_9 = arith.constant 0 : index
    %c0_10 = arith.constant 0 : index
    %16 = vector.load %arg5[%c0_8, %c0_9, %c0_10] : memref<1x32x32xbf16, #tpu.memory_space<vmem>>, vector<1x32x32xbf16>
    %17 = vector.shape_cast %16 : vector<1x32x32xbf16> to vector<32x32xbf16>
    %cst_11 = arith.constant dense<0.000000e+00> : vector<2x32xf32>
    %18 = tpu.matmul %15, %17, %cst_11 {dimension_numbers = #tpu.dot_dimension_numbers<[1], [0], [0], [1], [0, 0, 1, 1], [], []>} : vector<2x32xbf16>, vector<32x32xbf16>, vector<2x32xf32> -> vector<2x32xf32>
    %c0_12 = arith.constant 0 : index
    %c0_13 = arith.constant 0 : index
    %c0_14 = arith.constant 0 : index
    %19 = vector.load %arg6[%c0_12, %c0_13, %c0_14] : memref<1x1x32xf32, #tpu.memory_space<vmem>>, vector<1x1x32xf32>
    %20 = vector.shape_cast %19 : vector<1x1x32xf32> to vector<1x32xf32>
    %21 = vector.broadcast %20 : vector<1x32xf32> to vector<2x32xf32>
    %22 = arith.addf %18, %21 : vector<2x32xf32>
    %c0_15 = arith.constant 0 : index
    %c0_16 = arith.constant 0 : index
    %c0_17 = arith.constant 0 : index
    %23 = vector.load %arg2[%c0_15, %c0_16, %c0_17] : memref<1x2x32xf32, #tpu.memory_space<vmem>>, vector<1x2x32xf32>
    %24 = vector.shape_cast %23 : vector<1x2x32xf32> to vector<2x32xf32>
    %25 = arith.addf %22, %24 : vector<2x32xf32>
    %26 = arith.negf %25 : vector<2x32xf32>
    %27 = math.exp %26 : vector<2x32xf32>
    %cst_18 = arith.constant 1.000000e+00 : f32
    %28 = vector.broadcast %cst_18 : f32 to vector<2x32xf32>
    %29 = arith.addf %28, %27 : vector<2x32xf32>
    %30 = arith.divf %28, %29 : vector<2x32xf32>
    %31 = arith.mulf %25, %30 : vector<2x32xf32>
    %32 = arith.truncf %31 : vector<2x32xf32> to vector<2x32xbf16>
    %c0_19 = arith.constant 0 : index
    %c0_20 = arith.constant 0 : index
    %c0_21 = arith.constant 0 : index
    %33 = vector.load %arg7[%c0_19, %c0_20, %c0_21] : memref<1x32x192xbf16, #tpu.memory_space<vmem>>, vector<1x32x192xbf16>
    %34 = vector.shape_cast %33 : vector<1x32x192xbf16> to vector<32x192xbf16>
    %cst_22 = arith.constant dense<0.000000e+00> : vector<2x192xf32>
    %35 = tpu.matmul %32, %34, %cst_22 {dimension_numbers = #tpu.dot_dimension_numbers<[1], [0], [0], [1], [0, 0, 1, 1], [], []>} : vector<2x32xbf16>, vector<32x192xbf16>, vector<2x192xf32> -> vector<2x192xf32>
    %c0_23 = arith.constant 0 : index
    %c0_24 = arith.constant 0 : index
    %c0_25 = arith.constant 0 : index
    %36 = vector.load %arg8[%c0_23, %c0_24, %c0_25] : memref<1x1x192xf32, #tpu.memory_space<vmem>>, vector<1x1x192xf32>
    %37 = vector.shape_cast %36 : vector<1x1x192xf32> to vector<1x192xf32>
    %38 = vector.broadcast %37 : vector<1x192xf32> to vector<2x192xf32>
    %39 = arith.addf %35, %38 : vector<2x192xf32>
    %c0_26 = arith.constant 0 : index
    %c0_27 = arith.constant 0 : index
    %c0_28 = arith.constant 0 : index
    %40 = vector.load %arg9[%c0_26, %c0_27, %c0_28] : memref<1x2x192xf32, #tpu.memory_space<vmem>>, vector<1x2x192xf32>
    %41 = vector.shape_cast %40 : vector<1x2x192xf32> to vector<2x192xf32>
    %42 = vector.shape_cast %39 : vector<2x192xf32> to vector<1x2x192xf32>
    tpu.vector_store %arg9[%c0_26, %c0_27, %c0_28], %42 {strides = array<i32>} : memref<1x2x192xf32, #tpu.memory_space<vmem>>, vector<1x2x192xf32>,
    %c0_i32 = arith.constant 0 : i32
    %43 = arith.cmpi eq, %arg0, %c0_i32 : i32
    %44 = arith.extui %43 : i1 to i32
    %c0_i32_29 = arith.constant 0 : i32
    %45 = arith.cmpi ne, %44, %c0_i32_29 : i32
    scf.if %45 {
      %c0_30 = arith.constant 0 : index
      %c0_31 = arith.constant 0 : index
      %46 = vector.load %arg10[%c0_30, %c0_31] : memref<2x32xf32, #tpu.memory_space<vmem>>, vector<2x32xf32>
      tpu.vector_store %arg10[%c0_30, %c0_31], %31 {strides = array<i32>} : memref<2x32xf32, #tpu.memory_space<vmem>>, vector<2x32xf32>,
    } else {
    }
    return
  }
  func.func @transform_0(%arg0: i32) -> (i32, i32) {
    %c0_i32 = arith.constant 0 : i32
    %c0_i32_0 = arith.constant 0 : i32
    %c0_i32_1 = arith.constant 0 : i32
    return %c0_i32, %c0_i32_0 : i32, i32
  }
  func.func @transform_1(%arg0: i32) -> (i32, i32, i32) {
    %c0_i32 = arith.constant 0 : i32
    %c0_i32_0 = arith.constant 0 : i32
    %c0_i32_1 = arith.constant 0 : i32
    return %arg0, %c0_i32, %c0_i32_0 : i32, i32, i32
  }
  func.func @transform_2(%arg0: i32) -> (i32, i32, i32) {
    %c0_i32 = arith.constant 0 : i32
    %c0_i32_0 = arith.constant 0 : i32
    %c0_i32_1 = arith.constant 0 : i32
    return %arg0, %c0_i32, %c0_i32_0 : i32, i32, i32
  }
  func.func @transform_3(%arg0: i32) -> (i32, i32, i32) {
    %c0_i32 = arith.constant 0 : i32
    %c0_i32_0 = arith.constant 0 : i32
    %c0_i32_1 = arith.constant 0 : i32
    return %arg0, %c0_i32, %c0_i32_0 : i32, i32, i32
  }
  func.func @transform_4(%arg0: i32) -> (i32, i32, i32) {
    %c0_i32 = arith.constant 0 : i32
    %c0_i32_0 = arith.constant 0 : i32
    %c0_i32_1 = arith.constant 0 : i32
    return %arg0, %c0_i32, %c0_i32_0 : i32, i32, i32
  }
  func.func @transform_5(%arg0: i32) -> (i32, i32, i32) {
    %c0_i32 = arith.constant 0 : i32
    %c0_i32_0 = arith.constant 0 : i32
    %c0_i32_1 = arith.constant 0 : i32
    return %arg0, %c0_i32, %c0_i32_0 : i32, i32, i32
  }
  func.func @transform_6(%arg0: i32) -> (i32, i32, i32) {
    %c0_i32 = arith.constant 0 : i32
    %c0_i32_0 = arith.constant 0 : i32
    %c0_i32_1 = arith.constant 0 : i32
    return %arg0, %c0_i32, %c0_i32_0 : i32, i32, i32
  }
  func.func @transform_7(%arg0: i32) -> (i32, i32, i32) {
    %c0_i32 = arith.constant 0 : i32
    %c0_i32_0 = arith.constant 0 : i32
    %c0_i32_1 = arith.constant 0 : i32
    return %arg0, %c0_i32, %c0_i32_0 : i32, i32, i32
  }
  func.func @transform_8(%arg0: i32) -> (i32, i32, i32) {
    %c0_i32 = arith.constant 0 : i32
    %c0_i32_0 = arith.constant 0 : i32
    %c0_i32_1 = arith.constant 0 : i32
    return %arg0, %c0_i32, %c0_i32_0 : i32, i32, i32
  }
  func.func @transform_9(%arg0: i32) -> (i32, i32) {
    %c0_i32 = arith.constant 0 : i32
    %c0_i32_0 = arith.constant 0 : i32
    %c0_i32_1 = arith.constant 0 : i32
    return %c0_i32, %c0_i32_0 : i32, i32
  }
}

module attributes {stable_mosaic.version = 11 : i64} {
  func.func @_patch_embed_kernel(%arg0: memref<16x128xf32, #tpu.memory_space<vmem>>, %arg1: memref<16x32xbf16, #tpu.memory_space<vmem>>, %arg2: memref<1x32xf32, #tpu.memory_space<vmem>>, %arg3: memref<64x32xf32, #tpu.memory_space<vmem>>, %arg4: memref<2x64x32xf32, #tpu.memory_space<vmem>>) attributes {dimension_semantics = [], scalar_prefetch = 0 : i64, scratch_operands = 0 : i64, tpu.core_type = #tpu.core_type<tc>} {
    %c0 = arith.constant 0 : index
    %c0_0 = arith.constant 0 : index
    %0 = vector.load %arg0[%c0, %c0_0] : memref<16x128xf32, #tpu.memory_space<vmem>>, vector<16x128xf32>
    %1 = arith.truncf %0 : vector<16x128xf32> to vector<16x128xbf16>
    %c0_1 = arith.constant 0 : index
    %c0_2 = arith.constant 0 : index
    %2 = vector.load %arg1[%c0_1, %c0_2] : memref<16x32xbf16, #tpu.memory_space<vmem>>, vector<16x32xbf16>
    %cst = arith.constant dense<0.000000e+00> : vector<128x32xf32>
    %3 = tpu.matmul %1, %2, %cst {dimension_numbers = #tpu.dot_dimension_numbers<[0], [0], [1], [1], [0, 1, 1, 1], [], []>} : vector<16x128xbf16>, vector<16x32xbf16>, vector<128x32xf32> -> vector<128x32xf32>
    %4 = vector.shape_cast %3 : vector<128x32xf32> to vector<2x64x32xf32>
    %c0_3 = arith.constant 0 : index
    %c0_4 = arith.constant 0 : index
    %5 = vector.load %arg2[%c0_3, %c0_4] : memref<1x32xf32, #tpu.memory_space<vmem>>, vector<1x32xf32>
    %6 = vector.shape_cast %5 : vector<1x32xf32> to vector<1x1x32xf32>
    %7 = vector.broadcast %6 : vector<1x1x32xf32> to vector<2x64x32xf32>
    %8 = arith.addf %4, %7 : vector<2x64x32xf32>
    %c0_5 = arith.constant 0 : index
    %c0_6 = arith.constant 0 : index
    %9 = vector.load %arg3[%c0_5, %c0_6] : memref<64x32xf32, #tpu.memory_space<vmem>>, vector<64x32xf32>
    %10 = vector.shape_cast %9 : vector<64x32xf32> to vector<1x64x32xf32>
    %11 = vector.broadcast %10 : vector<1x64x32xf32> to vector<2x64x32xf32>
    %12 = arith.addf %8, %11 : vector<2x64x32xf32>
    %c0_7 = arith.constant 0 : index
    %c0_8 = arith.constant 0 : index
    %c0_9 = arith.constant 0 : index
    %13 = vector.load %arg4[%c0_7, %c0_8, %c0_9] : memref<2x64x32xf32, #tpu.memory_space<vmem>>, vector<2x64x32xf32>
    tpu.vector_store %arg4[%c0_7, %c0_8, %c0_9], %12 {strides = array<i32>} : memref<2x64x32xf32, #tpu.memory_space<vmem>>, vector<2x64x32xf32>,
    return
  }
}

module attributes {stable_mosaic.version = 11 : i64} {
  func.func @_dit_block_kernel(%arg0: i32, %arg1: memref<1x64x32xf32, #tpu.memory_space<vmem>>, %arg2: memref<1x6x32xf32, #tpu.memory_space<vmem>>, %arg3: memref<96x32xbf16, #tpu.memory_space<vmem>>, %arg4: memref<96x1xf32, #tpu.memory_space<vmem>>, %arg5: memref<32x32xbf16, #tpu.memory_space<vmem>>, %arg6: memref<1x32xf32, #tpu.memory_space<vmem>>, %arg7: memref<32x128xbf16, #tpu.memory_space<vmem>>, %arg8: memref<1x128xf32, #tpu.memory_space<vmem>>, %arg9: memref<128x32xbf16, #tpu.memory_space<vmem>>, %arg10: memref<1x32xf32, #tpu.memory_space<vmem>>, %arg11: memref<1x64x32xf32, #tpu.memory_space<vmem>>) attributes {dimension_semantics = [#tpu.dimension_semantics<parallel>], iteration_bounds = array<i64: 2>, scalar_prefetch = 0 : i64, scratch_operands = 0 : i64, tpu.core_type = #tpu.core_type<tc>, window_params = [{transform_indices = @transform_0, window_bounds = array<i64: 1, 64, 32>}, {transform_indices = @transform_1, window_bounds = array<i64: 1, 6, 32>}, {pipeline_mode = #tpu.pipeline_mode<synchronous>, transform_indices = @transform_2, window_bounds = array<i64: 96, 32>}, {pipeline_mode = #tpu.pipeline_mode<synchronous>, transform_indices = @transform_3, window_bounds = array<i64: 96, 1>}, {pipeline_mode = #tpu.pipeline_mode<synchronous>, transform_indices = @transform_4, window_bounds = array<i64: 32, 32>}, {pipeline_mode = #tpu.pipeline_mode<synchronous>, transform_indices = @transform_5, window_bounds = array<i64: 1, 32>}, {pipeline_mode = #tpu.pipeline_mode<synchronous>, transform_indices = @transform_6, window_bounds = array<i64: 32, 128>}, {pipeline_mode = #tpu.pipeline_mode<synchronous>, transform_indices = @transform_7, window_bounds = array<i64: 1, 128>}, {pipeline_mode = #tpu.pipeline_mode<synchronous>, transform_indices = @transform_8, window_bounds = array<i64: 128, 32>}, {pipeline_mode = #tpu.pipeline_mode<synchronous>, transform_indices = @transform_9, window_bounds = array<i64: 1, 32>}, {transform_indices = @transform_10, window_bounds = array<i64: 1, 64, 32>}]} {
    %c0 = arith.constant 0 : index
    %c0_0 = arith.constant 0 : index
    %c0_1 = arith.constant 0 : index
    %0 = vector.load %arg1[%c0, %c0_0, %c0_1] : memref<1x64x32xf32, #tpu.memory_space<vmem>>, vector<1x64x32xf32>
    %1 = vector.shape_cast %0 : vector<1x64x32xf32> to vector<64x32xf32>
    %c0_2 = arith.constant 0 : index
    %c0_3 = arith.constant 0 : index
    %c0_4 = arith.constant 0 : index
    %2 = vector.load %arg2[%c0_2, %c0_3, %c0_4] : memref<1x6x32xf32, #tpu.memory_space<vmem>>, vector<1x6x32xf32>
    %3 = vector.shape_cast %2 : vector<1x6x32xf32> to vector<6x32xf32>
    %4 = vector.extract_strided_slice %3 {offsets = [0, 0], sizes = [1, 32], strides = [1, 1]} : vector<6x32xf32> to vector<1x32xf32>
    %5 = vector.extract_strided_slice %3 {offsets = [1, 0], sizes = [1, 32], strides = [1, 1]} : vector<6x32xf32> to vector<1x32xf32>
    %6 = vector.extract_strided_slice %3 {offsets = [2, 0], sizes = [1, 32], strides = [1, 1]} : vector<6x32xf32> to vector<1x32xf32>
    %7 = vector.extract_strided_slice %3 {offsets = [3, 0], sizes = [1, 32], strides = [1, 1]} : vector<6x32xf32> to vector<1x32xf32>
    %8 = vector.extract_strided_slice %3 {offsets = [4, 0], sizes = [1, 32], strides = [1, 1]} : vector<6x32xf32> to vector<1x32xf32>
    %9 = vector.extract_strided_slice %3 {offsets = [5, 0], sizes = [1, 32], strides = [1, 1]} : vector<6x32xf32> to vector<1x32xf32>
    %cst = arith.constant dense<0.000000e+00> : vector<64xf32>
    %10 = vector.multi_reduction <add>, %1, %cst [1] : vector<64x32xf32> to vector<64xf32>
    %11 = vector.shape_cast %10 : vector<64xf32> to vector<64x1xf32>
    %cst_5 = arith.constant 3.200000e+01 : f32
    %12 = vector.broadcast %cst_5 : f32 to vector<64x1xf32>
    %13 = arith.divf %11, %12 : vector<64x1xf32>
    %14 = vector.broadcast %13 : vector<64x1xf32> to vector<64x32xf32>
    %15 = arith.subf %1, %14 : vector<64x32xf32>
    %16 = arith.mulf %15, %15 : vector<64x32xf32>
    %cst_6 = arith.constant dense<0.000000e+00> : vector<64xf32>
    %17 = vector.multi_reduction <add>, %16, %cst_6 [1] : vector<64x32xf32> to vector<64xf32>
    %18 = vector.shape_cast %17 : vector<64xf32> to vector<64x1xf32>
    %cst_7 = arith.constant 3.200000e+01 : f32
    %19 = vector.broadcast %cst_7 : f32 to vector<64x1xf32>
    %20 = arith.divf %18, %19 : vector<64x1xf32>
    %cst_8 = arith.constant 9.99999997E-7 : f32
    %21 = vector.broadcast %cst_8 : f32 to vector<64x1xf32>
    %22 = arith.addf %20, %21 : vector<64x1xf32>
    %23 = math.rsqrt %22 : vector<64x1xf32>
    %24 = vector.broadcast %23 : vector<64x1xf32> to vector<64x32xf32>
    %25 = arith.mulf %15, %24 : vector<64x32xf32>
    %cst_9 = arith.constant 1.000000e+00 : f32
    %26 = vector.broadcast %cst_9 : f32 to vector<1x32xf32>
    %27 = arith.addf %26, %5 : vector<1x32xf32>
    %28 = vector.broadcast %27 : vector<1x32xf32> to vector<64x32xf32>
    %29 = arith.mulf %25, %28 : vector<64x32xf32>
    %30 = vector.broadcast %4 : vector<1x32xf32> to vector<64x32xf32>
    %31 = arith.addf %29, %30 : vector<64x32xf32>
    %c0_10 = arith.constant 0 : index
    %c0_11 = arith.constant 0 : index
    %32 = vector.load %arg3[%c0_10, %c0_11] : memref<96x32xbf16, #tpu.memory_space<vmem>>, vector<96x32xbf16>
    %33 = arith.truncf %31 : vector<64x32xf32> to vector<64x32xbf16>
    %cst_12 = arith.constant dense<0.000000e+00> : vector<96x64xf32>
    %34 = tpu.matmul %32, %33, %cst_12 {dimension_numbers = #tpu.dot_dimension_numbers<[1], [1], [0], [0], [0, 0, 1, 0], [], []>} : vector<96x32xbf16>, vector<64x32xbf16>, vector<96x64xf32> -> vector<96x64xf32>
    %c0_13 = arith.constant 0 : index
    %c0_14 = arith.constant 0 : index
    %35 = vector.load %arg4[%c0_13, %c0_14] : memref<96x1xf32, #tpu.memory_space<vmem>>, vector<96x1xf32>
    %36 = vector.broadcast %35 : vector<96x1xf32> to vector<96x64xf32>
    %37 = arith.addf %34, %36 : vector<96x64xf32>
    %38 = vector.extract_strided_slice %37 {offsets = [0, 0], sizes = [32, 64], strides = [1, 1]} : vector<96x64xf32> to vector<32x64xf32>
    %39 = vector.shape_cast %38 : vector<32x64xf32> to vector<4x8x64xf32>
    %40 = vector.extract_strided_slice %37 {offsets = [32, 0], sizes = [32, 64], strides = [1, 1]} : vector<96x64xf32> to vector<32x64xf32>
    %41 = vector.shape_cast %40 : vector<32x64xf32> to vector<4x8x64xf32>
    %42 = vector.extract_strided_slice %37 {offsets = [64, 0], sizes = [32, 64], strides = [1, 1]} : vector<96x64xf32> to vector<32x64xf32>
    %43 = vector.shape_cast %42 : vector<32x64xf32> to vector<4x8x64xf32>
    %44 = arith.truncf %39 : vector<4x8x64xf32> to vector<4x8x64xbf16>
    %45 = arith.truncf %41 : vector<4x8x64xf32> to vector<4x8x64xbf16>
    %cst_15 = arith.constant dense<0.000000e+00> : vector<4x64x64xf32>
    %46 = tpu.matmul %44, %45, %cst_15 {dimension_numbers = #tpu.dot_dimension_numbers<[1], [1], [2], [2], [0, 0, 0, 2, 1, 2], [0], [0]>} : vector<4x8x64xbf16>, vector<4x8x64xbf16>, vector<4x64x64xf32> -> vector<4x64x64xf32>
    %cst_16 = arith.constant 0.353553385 : f32
    %47 = vector.broadcast %cst_16 : f32 to vector<4x64x64xf32>
    %48 = arith.mulf %46, %47 : vector<4x64x64xf32>
    %cst_17 = arith.constant dense<0xFF800000> : vector<4x64xf32>
    %49 = vector.multi_reduction <maximumf>, %48, %cst_17 [2] : vector<4x64x64xf32> to vector<4x64xf32>
    %50 = vector.shape_cast %49 : vector<4x64xf32> to vector<4x64x1xf32>
    %51 = vector.broadcast %50 : vector<4x64x1xf32> to vector<4x64x64xf32>
    %52 = arith.subf %48, %51 : vector<4x64x64xf32>
    %53 = math.exp %52 : vector<4x64x64xf32>
    %cst_18 = arith.constant dense<0.000000e+00> : vector<4x64xf32>
    %54 = vector.multi_reduction <add>, %53, %cst_18 [2] : vector<4x64x64xf32> to vector<4x64xf32>
    %55 = vector.shape_cast %54 : vector<4x64xf32> to vector<4x64x1xf32>
    %56 = tpu.reciprocal %55 {approx = true} : vector<4x64x1xf32> -> vector<4x64x1xf32>
    %57 = vector.broadcast %56 : vector<4x64x1xf32> to vector<4x64x64xf32>
    %58 = arith.mulf %53, %57 : vector<4x64x64xf32>
    %59 = arith.truncf %43 : vector<4x8x64xf32> to vector<4x8x64xbf16>
    %60 = arith.truncf %58 : vector<4x64x64xf32> to vector<4x64x64xbf16>
    %cst_19 = arith.constant dense<0.000000e+00> : vector<4x8x64xf32>
    %61 = tpu.matmul %59, %60, %cst_19 {dimension_numbers = #tpu.dot_dimension_numbers<[2], [2], [1], [1], [0, 0, 0, 1, 1, 1], [0], [0]>} : vector<4x8x64xbf16>, vector<4x64x64xbf16>, vector<4x8x64xf32> -> vector<4x8x64xf32>
    %62 = vector.shape_cast %61 : vector<4x8x64xf32> to vector<32x64xf32>
    %63 = arith.truncf %62 : vector<32x64xf32> to vector<32x64xbf16>
    %c0_20 = arith.constant 0 : index
    %c0_21 = arith.constant 0 : index
    %64 = vector.load %arg5[%c0_20, %c0_21] : memref<32x32xbf16, #tpu.memory_space<vmem>>, vector<32x32xbf16>
    %cst_22 = arith.constant dense<0.000000e+00> : vector<64x32xf32>
    %65 = tpu.matmul %63, %64, %cst_22 {dimension_numbers = #tpu.dot_dimension_numbers<[0], [0], [1], [1], [0, 1, 1, 1], [], []>} : vector<32x64xbf16>, vector<32x32xbf16>, vector<64x32xf32> -> vector<64x32xf32>
    %c0_23 = arith.constant 0 : index
    %c0_24 = arith.constant 0 : index
    %66 = vector.load %arg6[%c0_23, %c0_24] : memref<1x32xf32, #tpu.memory_space<vmem>>, vector<1x32xf32>
    %67 = vector.broadcast %66 : vector<1x32xf32> to vector<64x32xf32>
    %68 = arith.addf %65, %67 : vector<64x32xf32>
    %69 = vector.broadcast %6 : vector<1x32xf32> to vector<64x32xf32>
    %70 = arith.mulf %69, %68 : vector<64x32xf32>
    %71 = arith.addf %1, %70 : vector<64x32xf32>
    %cst_25 = arith.constant dense<0.000000e+00> : vector<64xf32>
    %72 = vector.multi_reduction <add>, %71, %cst_25 [1] : vector<64x32xf32> to vector<64xf32>
    %73 = vector.shape_cast %72 : vector<64xf32> to vector<64x1xf32>
    %cst_26 = arith.constant 3.200000e+01 : f32
    %74 = vector.broadcast %cst_26 : f32 to vector<64x1xf32>
    %75 = arith.divf %73, %74 : vector<64x1xf32>
    %76 = vector.broadcast %75 : vector<64x1xf32> to vector<64x32xf32>
    %77 = arith.subf %71, %76 : vector<64x32xf32>
    %78 = arith.mulf %77, %77 : vector<64x32xf32>
    %cst_27 = arith.constant dense<0.000000e+00> : vector<64xf32>
    %79 = vector.multi_reduction <add>, %78, %cst_27 [1] : vector<64x32xf32> to vector<64xf32>
    %80 = vector.shape_cast %79 : vector<64xf32> to vector<64x1xf32>
    %cst_28 = arith.constant 3.200000e+01 : f32
    %81 = vector.broadcast %cst_28 : f32 to vector<64x1xf32>
    %82 = arith.divf %80, %81 : vector<64x1xf32>
    %cst_29 = arith.constant 9.99999974E-6 : f32
    %83 = vector.broadcast %cst_29 : f32 to vector<64x1xf32>
    %84 = arith.addf %82, %83 : vector<64x1xf32>
    %85 = math.rsqrt %84 : vector<64x1xf32>
    %86 = vector.broadcast %85 : vector<64x1xf32> to vector<64x32xf32>
    %87 = arith.mulf %77, %86 : vector<64x32xf32>
    %cst_30 = arith.constant 1.000000e+00 : f32
    %88 = vector.broadcast %cst_30 : f32 to vector<1x32xf32>
    %89 = arith.addf %88, %8 : vector<1x32xf32>
    %90 = vector.broadcast %89 : vector<1x32xf32> to vector<64x32xf32>
    %91 = arith.mulf %87, %90 : vector<64x32xf32>
    %92 = vector.broadcast %7 : vector<1x32xf32> to vector<64x32xf32>
    %93 = arith.addf %91, %92 : vector<64x32xf32>
    %94 = arith.truncf %93 : vector<64x32xf32> to vector<64x32xbf16>
    %c0_31 = arith.constant 0 : index
    %c0_32 = arith.constant 0 : index
    %95 = vector.load %arg7[%c0_31, %c0_32] : memref<32x128xbf16, #tpu.memory_space<vmem>>, vector<32x128xbf16>
    %cst_33 = arith.constant dense<0.000000e+00> : vector<64x128xf32>
    %96 = tpu.matmul %94, %95, %cst_33 {dimension_numbers = #tpu.dot_dimension_numbers<[1], [0], [0], [1], [0, 0, 1, 1], [], []>} : vector<64x32xbf16>, vector<32x128xbf16>, vector<64x128xf32> -> vector<64x128xf32>
    %c0_34 = arith.constant 0 : index
    %c0_35 = arith.constant 0 : index
    %97 = vector.load %arg8[%c0_34, %c0_35] : memref<1x128xf32, #tpu.memory_space<vmem>>, vector<1x128xf32>
    %98 = vector.broadcast %97 : vector<1x128xf32> to vector<64x128xf32>
    %99 = arith.addf %96, %98 : vector<64x128xf32>
    %100 = arith.mulf %99, %99 : vector<64x128xf32>
    %101 = arith.mulf %99, %100 : vector<64x128xf32>
    %cst_36 = arith.constant 4.471500e-02 : f32
    %102 = vector.broadcast %cst_36 : f32 to vector<64x128xf32>
    %103 = arith.mulf %102, %101 : vector<64x128xf32>
    %104 = arith.addf %99, %103 : vector<64x128xf32>
    %cst_37 = arith.constant 0.797884583 : f32
    %105 = vector.broadcast %cst_37 : f32 to vector<64x128xf32>
    %106 = arith.mulf %105, %104 : vector<64x128xf32>
    %107 = math.tanh %106 : vector<64x128xf32>
    %cst_38 = arith.constant 1.000000e+00 : f32
    %108 = vector.broadcast %cst_38 : f32 to vector<64x128xf32>
    %109 = arith.addf %108, %107 : vector<64x128xf32>
    %cst_39 = arith.constant 5.000000e-01 : f32
    %110 = vector.broadcast %cst_39 : f32 to vector<64x128xf32>
    %111 = arith.mulf %110, %109 : vector<64x128xf32>
    %112 = arith.mulf %99, %111 : vector<64x128xf32>
    %113 = arith.truncf %112 : vector<64x128xf32> to vector<64x128xbf16>
    %c0_40 = arith.constant 0 : index
    %c0_41 = arith.constant 0 : index
    %114 = vector.load %arg9[%c0_40, %c0_41] : memref<128x32xbf16, #tpu.memory_space<vmem>>, vector<128x32xbf16>
    %cst_42 = arith.constant dense<0.000000e+00> : vector<64x32xf32>
    %115 = tpu.matmul %113, %114, %cst_42 {dimension_numbers = #tpu.dot_dimension_numbers<[1], [0], [0], [1], [0, 0, 1, 1], [], []>} : vector<64x128xbf16>, vector<128x32xbf16>, vector<64x32xf32> -> vector<64x32xf32>
    %c0_43 = arith.constant 0 : index
    %c0_44 = arith.constant 0 : index
    %116 = vector.load %arg10[%c0_43, %c0_44] : memref<1x32xf32, #tpu.memory_space<vmem>>, vector<1x32xf32>
    %117 = vector.broadcast %116 : vector<1x32xf32> to vector<64x32xf32>
    %118 = arith.addf %115, %117 : vector<64x32xf32>
    %119 = vector.broadcast %9 : vector<1x32xf32> to vector<64x32xf32>
    %120 = arith.mulf %119, %118 : vector<64x32xf32>
    %121 = arith.addf %71, %120 : vector<64x32xf32>
    %c0_45 = arith.constant 0 : index
    %c0_46 = arith.constant 0 : index
    %c0_47 = arith.constant 0 : index
    %122 = vector.load %arg11[%c0_45, %c0_46, %c0_47] : memref<1x64x32xf32, #tpu.memory_space<vmem>>, vector<1x64x32xf32>
    %123 = vector.shape_cast %122 : vector<1x64x32xf32> to vector<64x32xf32>
    %124 = vector.shape_cast %121 : vector<64x32xf32> to vector<1x64x32xf32>
    tpu.vector_store %arg11[%c0_45, %c0_46, %c0_47], %124 {strides = array<i32>} : memref<1x64x32xf32, #tpu.memory_space<vmem>>, vector<1x64x32xf32>,
    return
  }
  func.func @transform_0(%arg0: i32) -> (i32, i32, i32) {
    %c0_i32 = arith.constant 0 : i32
    %c0_i32_0 = arith.constant 0 : i32
    %c0_i32_1 = arith.constant 0 : i32
    return %arg0, %c0_i32, %c0_i32_0 : i32, i32, i32
  }
  func.func @transform_1(%arg0: i32) -> (i32, i32, i32) {
    %c0_i32 = arith.constant 0 : i32
    %c0_i32_0 = arith.constant 0 : i32
    %c0_i32_1 = arith.constant 0 : i32
    return %arg0, %c0_i32, %c0_i32_0 : i32, i32, i32
  }
  func.func @transform_2(%arg0: i32) -> (i32, i32) {
    %c0_i32 = arith.constant 0 : i32
    %c0_i32_0 = arith.constant 0 : i32
    %c0_i32_1 = arith.constant 0 : i32
    return %c0_i32, %c0_i32_0 : i32, i32
  }
  func.func @transform_3(%arg0: i32) -> (i32, i32) {
    %c0_i32 = arith.constant 0 : i32
    %c0_i32_0 = arith.constant 0 : i32
    %c0_i32_1 = arith.constant 0 : i32
    return %c0_i32, %c0_i32_0 : i32, i32
  }
  func.func @transform_4(%arg0: i32) -> (i32, i32) {
    %c0_i32 = arith.constant 0 : i32
    %c0_i32_0 = arith.constant 0 : i32
    %c0_i32_1 = arith.constant 0 : i32
    return %c0_i32, %c0_i32_0 : i32, i32
  }
  func.func @transform_5(%arg0: i32) -> (i32, i32) {
    %c0_i32 = arith.constant 0 : i32
    %c0_i32_0 = arith.constant 0 : i32
    %c0_i32_1 = arith.constant 0 : i32
    return %c0_i32, %c0_i32_0 : i32, i32
  }
  func.func @transform_6(%arg0: i32) -> (i32, i32) {
    %c0_i32 = arith.constant 0 : i32
    %c0_i32_0 = arith.constant 0 : i32
    %c0_i32_1 = arith.constant 0 : i32
    return %c0_i32, %c0_i32_0 : i32, i32
  }
  func.func @transform_7(%arg0: i32) -> (i32, i32) {
    %c0_i32 = arith.constant 0 : i32
    %c0_i32_0 = arith.constant 0 : i32
    %c0_i32_1 = arith.constant 0 : i32
    return %c0_i32, %c0_i32_0 : i32, i32
  }
  func.func @transform_8(%arg0: i32) -> (i32, i32) {
    %c0_i32 = arith.constant 0 : i32
    %c0_i32_0 = arith.constant 0 : i32
    %c0_i32_1 = arith.constant 0 : i32
    return %c0_i32, %c0_i32_0 : i32, i32
  }
  func.func @transform_9(%arg0: i32) -> (i32, i32) {
    %c0_i32 = arith.constant 0 : i32
    %c0_i32_0 = arith.constant 0 : i32
    %c0_i32_1 = arith.constant 0 : i32
    return %c0_i32, %c0_i32_0 : i32, i32
  }
  func.func @transform_10(%arg0: i32) -> (i32, i32, i32) {
    %c0_i32 = arith.constant 0 : i32
    %c0_i32_0 = arith.constant 0 : i32
    %c0_i32_1 = arith.constant 0 : i32
    return %arg0, %c0_i32, %c0_i32_0 : i32, i32, i32
  }
}

module attributes {stable_mosaic.version = 11 : i64} {
  func.func @_head_kernel(%arg0: memref<2x64x32xf32, #tpu.memory_space<vmem>>, %arg1: memref<2x32xf32, #tpu.memory_space<vmem>>, %arg2: memref<32x32xbf16, #tpu.memory_space<vmem>>, %arg3: memref<1x32xf32, #tpu.memory_space<vmem>>, %arg4: memref<32x32xbf16, #tpu.memory_space<vmem>>, %arg5: memref<1x32xf32, #tpu.memory_space<vmem>>, %arg6: memref<32x32xbf16, #tpu.memory_space<vmem>>, %arg7: memref<32x1xf32, #tpu.memory_space<vmem>>, %arg8: memref<32x128xf32, #tpu.memory_space<vmem>>) attributes {dimension_semantics = [], scalar_prefetch = 0 : i64, scratch_operands = 0 : i64, tpu.core_type = #tpu.core_type<tc>} {
    %c0 = arith.constant 0 : index
    %c0_0 = arith.constant 0 : index
    %c0_1 = arith.constant 0 : index
    %0 = vector.load %arg0[%c0, %c0_0, %c0_1] : memref<2x64x32xf32, #tpu.memory_space<vmem>>, vector<2x64x32xf32>
    %c0_2 = arith.constant 0 : index
    %c0_3 = arith.constant 0 : index
    %1 = vector.load %arg1[%c0_2, %c0_3] : memref<2x32xf32, #tpu.memory_space<vmem>>, vector<2x32xf32>
    %2 = arith.truncf %1 : vector<2x32xf32> to vector<2x32xbf16>
    %c0_4 = arith.constant 0 : index
    %c0_5 = arith.constant 0 : index
    %3 = vector.load %arg2[%c0_4, %c0_5] : memref<32x32xbf16, #tpu.memory_space<vmem>>, vector<32x32xbf16>
    %cst = arith.constant dense<0.000000e+00> : vector<2x32xf32>
    %4 = tpu.matmul %2, %3, %cst {dimension_numbers = #tpu.dot_dimension_numbers<[1], [0], [0], [1], [0, 0, 1, 1], [], []>} : vector<2x32xbf16>, vector<32x32xbf16>, vector<2x32xf32> -> vector<2x32xf32>
    %c0_6 = arith.constant 0 : index
    %c0_7 = arith.constant 0 : index
    %5 = vector.load %arg3[%c0_6, %c0_7] : memref<1x32xf32, #tpu.memory_space<vmem>>, vector<1x32xf32>
    %6 = vector.broadcast %5 : vector<1x32xf32> to vector<2x32xf32>
    %7 = arith.addf %4, %6 : vector<2x32xf32>
    %c0_8 = arith.constant 0 : index
    %c0_9 = arith.constant 0 : index
    %8 = vector.load %arg4[%c0_8, %c0_9] : memref<32x32xbf16, #tpu.memory_space<vmem>>, vector<32x32xbf16>
    %cst_10 = arith.constant dense<0.000000e+00> : vector<2x32xf32>
    %9 = tpu.matmul %2, %8, %cst_10 {dimension_numbers = #tpu.dot_dimension_numbers<[1], [0], [0], [1], [0, 0, 1, 1], [], []>} : vector<2x32xbf16>, vector<32x32xbf16>, vector<2x32xf32> -> vector<2x32xf32>
    %c0_11 = arith.constant 0 : index
    %c0_12 = arith.constant 0 : index
    %10 = vector.load %arg5[%c0_11, %c0_12] : memref<1x32xf32, #tpu.memory_space<vmem>>, vector<1x32xf32>
    %11 = vector.broadcast %10 : vector<1x32xf32> to vector<2x32xf32>
    %12 = arith.addf %9, %11 : vector<2x32xf32>
    %cst_13 = arith.constant dense<0.000000e+00> : vector<2x64xf32>
    %13 = vector.multi_reduction <add>, %0, %cst_13 [2] : vector<2x64x32xf32> to vector<2x64xf32>
    %14 = vector.shape_cast %13 : vector<2x64xf32> to vector<2x64x1xf32>
    %cst_14 = arith.constant 3.200000e+01 : f32
    %15 = vector.broadcast %cst_14 : f32 to vector<2x64x1xf32>
    %16 = arith.divf %14, %15 : vector<2x64x1xf32>
    %17 = vector.broadcast %16 : vector<2x64x1xf32> to vector<2x64x32xf32>
    %18 = arith.subf %0, %17 : vector<2x64x32xf32>
    %19 = arith.mulf %18, %18 : vector<2x64x32xf32>
    %cst_15 = arith.constant dense<0.000000e+00> : vector<2x64xf32>
    %20 = vector.multi_reduction <add>, %19, %cst_15 [2] : vector<2x64x32xf32> to vector<2x64xf32>
    %21 = vector.shape_cast %20 : vector<2x64xf32> to vector<2x64x1xf32>
    %cst_16 = arith.constant 3.200000e+01 : f32
    %22 = vector.broadcast %cst_16 : f32 to vector<2x64x1xf32>
    %23 = arith.divf %21, %22 : vector<2x64x1xf32>
    %cst_17 = arith.constant 9.99999997E-7 : f32
    %24 = vector.broadcast %cst_17 : f32 to vector<2x64x1xf32>
    %25 = arith.addf %23, %24 : vector<2x64x1xf32>
    %26 = math.rsqrt %25 : vector<2x64x1xf32>
    %27 = vector.broadcast %26 : vector<2x64x1xf32> to vector<2x64x32xf32>
    %28 = arith.mulf %18, %27 : vector<2x64x32xf32>
    %29 = vector.shape_cast %12 : vector<2x32xf32> to vector<2x1x32xf32>
    %cst_18 = arith.constant 1.000000e+00 : f32
    %30 = vector.broadcast %cst_18 : f32 to vector<2x1x32xf32>
    %31 = arith.addf %30, %29 : vector<2x1x32xf32>
    %32 = vector.broadcast %31 : vector<2x1x32xf32> to vector<2x64x32xf32>
    %33 = arith.mulf %28, %32 : vector<2x64x32xf32>
    %34 = vector.shape_cast %7 : vector<2x32xf32> to vector<2x1x32xf32>
    %35 = vector.broadcast %34 : vector<2x1x32xf32> to vector<2x64x32xf32>
    %36 = arith.addf %33, %35 : vector<2x64x32xf32>
    %37 = vector.shape_cast %36 : vector<2x64x32xf32> to vector<128x32xf32>
    %38 = arith.truncf %37 : vector<128x32xf32> to vector<128x32xbf16>
    %c0_19 = arith.constant 0 : index
    %c0_20 = arith.constant 0 : index
    %39 = vector.load %arg6[%c0_19, %c0_20] : memref<32x32xbf16, #tpu.memory_space<vmem>>, vector<32x32xbf16>
    %cst_21 = arith.constant dense<0.000000e+00> : vector<32x128xf32>
    %40 = tpu.matmul %39, %38, %cst_21 {dimension_numbers = #tpu.dot_dimension_numbers<[0], [1], [1], [0], [0, 1, 1, 0], [], []>} : vector<32x32xbf16>, vector<128x32xbf16>, vector<32x128xf32> -> vector<32x128xf32>
    %c0_22 = arith.constant 0 : index
    %c0_23 = arith.constant 0 : index
    %41 = vector.load %arg7[%c0_22, %c0_23] : memref<32x1xf32, #tpu.memory_space<vmem>>, vector<32x1xf32>
    %42 = vector.broadcast %41 : vector<32x1xf32> to vector<32x128xf32>
    %43 = arith.addf %40, %42 : vector<32x128xf32>
    %c0_24 = arith.constant 0 : index
    %c0_25 = arith.constant 0 : index
    %44 = vector.load %arg8[%c0_24, %c0_25] : memref<32x128xf32, #tpu.memory_space<vmem>>, vector<32x128xf32>
    tpu.vector_store %arg8[%c0_24, %c0_25], %43 {strides = array<i32>} : memref<32x128xf32, #tpu.memory_space<vmem>>, vector<32x128xf32>,
    return
  }
}

module attributes {stable_mosaic.version = 11 : i64} {
  func.func @_cond_all_kernel(%arg0: i32, %arg1: memref<2x256xf32, #tpu.memory_space<vmem>>, %arg2: memref<1x2x32xf32, #tpu.memory_space<vmem>>, %arg3: memref<1x256x32xbf16, #tpu.memory_space<vmem>>, %arg4: memref<1x1x32xf32, #tpu.memory_space<vmem>>, %arg5: memref<1x32x32xbf16, #tpu.memory_space<vmem>>, %arg6: memref<1x1x32xf32, #tpu.memory_space<vmem>>, %arg7: memref<1x32x192xbf16, #tpu.memory_space<vmem>>, %arg8: memref<1x1x192xf32, #tpu.memory_space<vmem>>, %arg9: memref<1x2x192xf32, #tpu.memory_space<vmem>>, %arg10: memref<2x32xf32, #tpu.memory_space<vmem>>) attributes {dimension_semantics = [#tpu.dimension_semantics<arbitrary>], iteration_bounds = array<i64: 2>, scalar_prefetch = 0 : i64, scratch_operands = 0 : i64, tpu.core_type = #tpu.core_type<tc>, window_params = [{pipeline_mode = #tpu.pipeline_mode<synchronous>, transform_indices = @transform_0, window_bounds = array<i64: 2, 256>}, {transform_indices = @transform_1, window_bounds = array<i64: 1, 2, 32>}, {transform_indices = @transform_2, window_bounds = array<i64: 1, 256, 32>}, {transform_indices = @transform_3, window_bounds = array<i64: 1, 1, 32>}, {transform_indices = @transform_4, window_bounds = array<i64: 1, 32, 32>}, {transform_indices = @transform_5, window_bounds = array<i64: 1, 1, 32>}, {transform_indices = @transform_6, window_bounds = array<i64: 1, 32, 192>}, {transform_indices = @transform_7, window_bounds = array<i64: 1, 1, 192>}, {transform_indices = @transform_8, window_bounds = array<i64: 1, 2, 192>}, {pipeline_mode = #tpu.pipeline_mode<synchronous>, transform_indices = @transform_9, window_bounds = array<i64: 2, 32>}]} {
    %c0 = arith.constant 0 : index
    %c0_0 = arith.constant 0 : index
    %0 = vector.load %arg1[%c0, %c0_0] : memref<2x256xf32, #tpu.memory_space<vmem>>, vector<2x256xf32>
    %1 = arith.truncf %0 : vector<2x256xf32> to vector<2x256xbf16>
    %c0_1 = arith.constant 0 : index
    %c0_2 = arith.constant 0 : index
    %c0_3 = arith.constant 0 : index
    %2 = vector.load %arg3[%c0_1, %c0_2, %c0_3] : memref<1x256x32xbf16, #tpu.memory_space<vmem>>, vector<1x256x32xbf16>
    %3 = vector.shape_cast %2 : vector<1x256x32xbf16> to vector<256x32xbf16>
    %cst = arith.constant dense<0.000000e+00> : vector<2x32xf32>
    %4 = tpu.matmul %1, %3, %cst {dimension_numbers = #tpu.dot_dimension_numbers<[1], [0], [0], [1], [0, 0, 1, 1], [], []>} : vector<2x256xbf16>, vector<256x32xbf16>, vector<2x32xf32> -> vector<2x32xf32>
    %c0_4 = arith.constant 0 : index
    %c0_5 = arith.constant 0 : index
    %c0_6 = arith.constant 0 : index
    %5 = vector.load %arg4[%c0_4, %c0_5, %c0_6] : memref<1x1x32xf32, #tpu.memory_space<vmem>>, vector<1x1x32xf32>
    %6 = vector.shape_cast %5 : vector<1x1x32xf32> to vector<1x32xf32>
    %7 = vector.broadcast %6 : vector<1x32xf32> to vector<2x32xf32>
    %8 = arith.addf %4, %7 : vector<2x32xf32>
    %9 = arith.negf %8 : vector<2x32xf32>
    %10 = math.exp %9 : vector<2x32xf32>
    %cst_7 = arith.constant 1.000000e+00 : f32
    %11 = vector.broadcast %cst_7 : f32 to vector<2x32xf32>
    %12 = arith.addf %11, %10 : vector<2x32xf32>
    %13 = arith.divf %11, %12 : vector<2x32xf32>
    %14 = arith.mulf %8, %13 : vector<2x32xf32>
    %15 = arith.truncf %14 : vector<2x32xf32> to vector<2x32xbf16>
    %c0_8 = arith.constant 0 : index
    %c0_9 = arith.constant 0 : index
    %c0_10 = arith.constant 0 : index
    %16 = vector.load %arg5[%c0_8, %c0_9, %c0_10] : memref<1x32x32xbf16, #tpu.memory_space<vmem>>, vector<1x32x32xbf16>
    %17 = vector.shape_cast %16 : vector<1x32x32xbf16> to vector<32x32xbf16>
    %cst_11 = arith.constant dense<0.000000e+00> : vector<2x32xf32>
    %18 = tpu.matmul %15, %17, %cst_11 {dimension_numbers = #tpu.dot_dimension_numbers<[1], [0], [0], [1], [0, 0, 1, 1], [], []>} : vector<2x32xbf16>, vector<32x32xbf16>, vector<2x32xf32> -> vector<2x32xf32>
    %c0_12 = arith.constant 0 : index
    %c0_13 = arith.constant 0 : index
    %c0_14 = arith.constant 0 : index
    %19 = vector.load %arg6[%c0_12, %c0_13, %c0_14] : memref<1x1x32xf32, #tpu.memory_space<vmem>>, vector<1x1x32xf32>
    %20 = vector.shape_cast %19 : vector<1x1x32xf32> to vector<1x32xf32>
    %21 = vector.broadcast %20 : vector<1x32xf32> to vector<2x32xf32>
    %22 = arith.addf %18, %21 : vector<2x32xf32>
    %c0_15 = arith.constant 0 : index
    %c0_16 = arith.constant 0 : index
    %c0_17 = arith.constant 0 : index
    %23 = vector.load %arg2[%c0_15, %c0_16, %c0_17] : memref<1x2x32xf32, #tpu.memory_space<vmem>>, vector<1x2x32xf32>
    %24 = vector.shape_cast %23 : vector<1x2x32xf32> to vector<2x32xf32>
    %25 = arith.addf %22, %24 : vector<2x32xf32>
    %26 = arith.negf %25 : vector<2x32xf32>
    %27 = math.exp %26 : vector<2x32xf32>
    %cst_18 = arith.constant 1.000000e+00 : f32
    %28 = vector.broadcast %cst_18 : f32 to vector<2x32xf32>
    %29 = arith.addf %28, %27 : vector<2x32xf32>
    %30 = arith.divf %28, %29 : vector<2x32xf32>
    %31 = arith.mulf %25, %30 : vector<2x32xf32>
    %32 = arith.truncf %31 : vector<2x32xf32> to vector<2x32xbf16>
    %c0_19 = arith.constant 0 : index
    %c0_20 = arith.constant 0 : index
    %c0_21 = arith.constant 0 : index
    %33 = vector.load %arg7[%c0_19, %c0_20, %c0_21] : memref<1x32x192xbf16, #tpu.memory_space<vmem>>, vector<1x32x192xbf16>
    %34 = vector.shape_cast %33 : vector<1x32x192xbf16> to vector<32x192xbf16>
    %cst_22 = arith.constant dense<0.000000e+00> : vector<2x192xf32>
    %35 = tpu.matmul %32, %34, %cst_22 {dimension_numbers = #tpu.dot_dimension_numbers<[1], [0], [0], [1], [0, 0, 1, 1], [], []>} : vector<2x32xbf16>, vector<32x192xbf16>, vector<2x192xf32> -> vector<2x192xf32>
    %c0_23 = arith.constant 0 : index
    %c0_24 = arith.constant 0 : index
    %c0_25 = arith.constant 0 : index
    %36 = vector.load %arg8[%c0_23, %c0_24, %c0_25] : memref<1x1x192xf32, #tpu.memory_space<vmem>>, vector<1x1x192xf32>
    %37 = vector.shape_cast %36 : vector<1x1x192xf32> to vector<1x192xf32>
    %38 = vector.broadcast %37 : vector<1x192xf32> to vector<2x192xf32>
    %39 = arith.addf %35, %38 : vector<2x192xf32>
    %c0_26 = arith.constant 0 : index
    %c0_27 = arith.constant 0 : index
    %c0_28 = arith.constant 0 : index
    %40 = vector.load %arg9[%c0_26, %c0_27, %c0_28] : memref<1x2x192xf32, #tpu.memory_space<vmem>>, vector<1x2x192xf32>
    %41 = vector.shape_cast %40 : vector<1x2x192xf32> to vector<2x192xf32>
    %42 = vector.shape_cast %39 : vector<2x192xf32> to vector<1x2x192xf32>
    tpu.vector_store %arg9[%c0_26, %c0_27, %c0_28], %42 {strides = array<i32>} : memref<1x2x192xf32, #tpu.memory_space<vmem>>, vector<1x2x192xf32>,
    %c0_i32 = arith.constant 0 : i32
    %43 = arith.cmpi eq, %arg0, %c0_i32 : i32
    %44 = arith.extui %43 : i1 to i32
    %c0_i32_29 = arith.constant 0 : i32
    %45 = arith.cmpi ne, %44, %c0_i32_29 : i32
    scf.if %45 {
      %c0_30 = arith.constant 0 : index
      %c0_31 = arith.constant 0 : index
      %46 = vector.load %arg10[%c0_30, %c0_31] : memref<2x32xf32, #tpu.memory_space<vmem>>, vector<2x32xf32>
      tpu.vector_store %arg10[%c0_30, %c0_31], %31 {strides = array<i32>} : memref<2x32xf32, #tpu.memory_space<vmem>>, vector<2x32xf32>,
    } else {
    }
    return
  }
  func.func @transform_0(%arg0: i32) -> (i32, i32) {
    %c0_i32 = arith.constant 0 : i32
    %c0_i32_0 = arith.constant 0 : i32
    %c0_i32_1 = arith.constant 0 : i32
    return %c0_i32, %c0_i32_0 : i32, i32
  }
  func.func @transform_1(%arg0: i32) -> (i32, i32, i32) {
    %c0_i32 = arith.constant 0 : i32
    %c0_i32_0 = arith.constant 0 : i32
    %c0_i32_1 = arith.constant 0 : i32
    return %arg0, %c0_i32, %c0_i32_0 : i32, i32, i32
  }
  func.func @transform_2(%arg0: i32) -> (i32, i32, i32) {
    %c0_i32 = arith.constant 0 : i32
    %c0_i32_0 = arith.constant 0 : i32
    %c0_i32_1 = arith.constant 0 : i32
    return %arg0, %c0_i32, %c0_i32_0 : i32, i32, i32
  }
  func.func @transform_3(%arg0: i32) -> (i32, i32, i32) {
    %c0_i32 = arith.constant 0 : i32
    %c0_i32_0 = arith.constant 0 : i32
    %c0_i32_1 = arith.constant 0 : i32
    return %arg0, %c0_i32, %c0_i32_0 : i32, i32, i32
  }
  func.func @transform_4(%arg0: i32) -> (i32, i32, i32) {
    %c0_i32 = arith.constant 0 : i32
    %c0_i32_0 = arith.constant 0 : i32
    %c0_i32_1 = arith.constant 0 : i32
    return %arg0, %c0_i32, %c0_i32_0 : i32, i32, i32
  }
  func.func @transform_5(%arg0: i32) -> (i32, i32, i32) {
    %c0_i32 = arith.constant 0 : i32
    %c0_i32_0 = arith.constant 0 : i32
    %c0_i32_1 = arith.constant 0 : i32
    return %arg0, %c0_i32, %c0_i32_0 : i32, i32, i32
  }
  func.func @transform_6(%arg0: i32) -> (i32, i32, i32) {
    %c0_i32 = arith.constant 0 : i32
    %c0_i32_0 = arith.constant 0 : i32
    %c0_i32_1 = arith.constant 0 : i32
    return %arg0, %c0_i32, %c0_i32_0 : i32, i32, i32
  }
  func.func @transform_7(%arg0: i32) -> (i32, i32, i32) {
    %c0_i32 = arith.constant 0 : i32
    %c0_i32_0 = arith.constant 0 : i32
    %c0_i32_1 = arith.constant 0 : i32
    return %arg0, %c0_i32, %c0_i32_0 : i32, i32, i32
  }
  func.func @transform_8(%arg0: i32) -> (i32, i32, i32) {
    %c0_i32 = arith.constant 0 : i32
    %c0_i32_0 = arith.constant 0 : i32
    %c0_i32_1 = arith.constant 0 : i32
    return %arg0, %c0_i32, %c0_i32_0 : i32, i32, i32
  }
  func.func @transform_9(%arg0: i32) -> (i32, i32) {
    %c0_i32 = arith.constant 0 : i32
    %c0_i32_0 = arith.constant 0 : i32
    %c0_i32_1 = arith.constant 0 : i32
    return %c0_i32, %c0_i32_0 : i32, i32
  }
}

module attributes {stable_mosaic.version = 11 : i64} {
  func.func @_patch_embed_kernel(%arg0: memref<16x128xf32, #tpu.memory_space<vmem>>, %arg1: memref<16x32xbf16, #tpu.memory_space<vmem>>, %arg2: memref<1x32xf32, #tpu.memory_space<vmem>>, %arg3: memref<64x32xf32, #tpu.memory_space<vmem>>, %arg4: memref<2x64x32xf32, #tpu.memory_space<vmem>>) attributes {dimension_semantics = [], scalar_prefetch = 0 : i64, scratch_operands = 0 : i64, tpu.core_type = #tpu.core_type<tc>} {
    %c0 = arith.constant 0 : index
    %c0_0 = arith.constant 0 : index
    %0 = vector.load %arg0[%c0, %c0_0] : memref<16x128xf32, #tpu.memory_space<vmem>>, vector<16x128xf32>
    %1 = arith.truncf %0 : vector<16x128xf32> to vector<16x128xbf16>
    %c0_1 = arith.constant 0 : index
    %c0_2 = arith.constant 0 : index
    %2 = vector.load %arg1[%c0_1, %c0_2] : memref<16x32xbf16, #tpu.memory_space<vmem>>, vector<16x32xbf16>
    %cst = arith.constant dense<0.000000e+00> : vector<128x32xf32>
    %3 = tpu.matmul %1, %2, %cst {dimension_numbers = #tpu.dot_dimension_numbers<[0], [0], [1], [1], [0, 1, 1, 1], [], []>} : vector<16x128xbf16>, vector<16x32xbf16>, vector<128x32xf32> -> vector<128x32xf32>
    %4 = vector.shape_cast %3 : vector<128x32xf32> to vector<2x64x32xf32>
    %c0_3 = arith.constant 0 : index
    %c0_4 = arith.constant 0 : index
    %5 = vector.load %arg2[%c0_3, %c0_4] : memref<1x32xf32, #tpu.memory_space<vmem>>, vector<1x32xf32>
    %6 = vector.shape_cast %5 : vector<1x32xf32> to vector<1x1x32xf32>
    %7 = vector.broadcast %6 : vector<1x1x32xf32> to vector<2x64x32xf32>
    %8 = arith.addf %4, %7 : vector<2x64x32xf32>
    %c0_5 = arith.constant 0 : index
    %c0_6 = arith.constant 0 : index
    %9 = vector.load %arg3[%c0_5, %c0_6] : memref<64x32xf32, #tpu.memory_space<vmem>>, vector<64x32xf32>
    %10 = vector.shape_cast %9 : vector<64x32xf32> to vector<1x64x32xf32>
    %11 = vector.broadcast %10 : vector<1x64x32xf32> to vector<2x64x32xf32>
    %12 = arith.addf %8, %11 : vector<2x64x32xf32>
    %c0_7 = arith.constant 0 : index
    %c0_8 = arith.constant 0 : index
    %c0_9 = arith.constant 0 : index
    %13 = vector.load %arg4[%c0_7, %c0_8, %c0_9] : memref<2x64x32xf32, #tpu.memory_space<vmem>>, vector<2x64x32xf32>
    tpu.vector_store %arg4[%c0_7, %c0_8, %c0_9], %12 {strides = array<i32>} : memref<2x64x32xf32, #tpu.memory_space<vmem>>, vector<2x64x32xf32>,
    return
  }
}

module attributes {stable_mosaic.version = 11 : i64} {
  func.func @_dit_block_kernel(%arg0: i32, %arg1: memref<1x64x32xf32, #tpu.memory_space<vmem>>, %arg2: memref<1x6x32xf32, #tpu.memory_space<vmem>>, %arg3: memref<96x32xbf16, #tpu.memory_space<vmem>>, %arg4: memref<96x1xf32, #tpu.memory_space<vmem>>, %arg5: memref<32x32xbf16, #tpu.memory_space<vmem>>, %arg6: memref<1x32xf32, #tpu.memory_space<vmem>>, %arg7: memref<32x128xbf16, #tpu.memory_space<vmem>>, %arg8: memref<1x128xf32, #tpu.memory_space<vmem>>, %arg9: memref<128x32xbf16, #tpu.memory_space<vmem>>, %arg10: memref<1x32xf32, #tpu.memory_space<vmem>>, %arg11: memref<1x64x32xf32, #tpu.memory_space<vmem>>) attributes {dimension_semantics = [#tpu.dimension_semantics<parallel>], iteration_bounds = array<i64: 2>, scalar_prefetch = 0 : i64, scratch_operands = 0 : i64, tpu.core_type = #tpu.core_type<tc>, window_params = [{transform_indices = @transform_0, window_bounds = array<i64: 1, 64, 32>}, {transform_indices = @transform_1, window_bounds = array<i64: 1, 6, 32>}, {pipeline_mode = #tpu.pipeline_mode<synchronous>, transform_indices = @transform_2, window_bounds = array<i64: 96, 32>}, {pipeline_mode = #tpu.pipeline_mode<synchronous>, transform_indices = @transform_3, window_bounds = array<i64: 96, 1>}, {pipeline_mode = #tpu.pipeline_mode<synchronous>, transform_indices = @transform_4, window_bounds = array<i64: 32, 32>}, {pipeline_mode = #tpu.pipeline_mode<synchronous>, transform_indices = @transform_5, window_bounds = array<i64: 1, 32>}, {pipeline_mode = #tpu.pipeline_mode<synchronous>, transform_indices = @transform_6, window_bounds = array<i64: 32, 128>}, {pipeline_mode = #tpu.pipeline_mode<synchronous>, transform_indices = @transform_7, window_bounds = array<i64: 1, 128>}, {pipeline_mode = #tpu.pipeline_mode<synchronous>, transform_indices = @transform_8, window_bounds = array<i64: 128, 32>}, {pipeline_mode = #tpu.pipeline_mode<synchronous>, transform_indices = @transform_9, window_bounds = array<i64: 1, 32>}, {transform_indices = @transform_10, window_bounds = array<i64: 1, 64, 32>}]} {
    %c0 = arith.constant 0 : index
    %c0_0 = arith.constant 0 : index
    %c0_1 = arith.constant 0 : index
    %0 = vector.load %arg1[%c0, %c0_0, %c0_1] : memref<1x64x32xf32, #tpu.memory_space<vmem>>, vector<1x64x32xf32>
    %1 = vector.shape_cast %0 : vector<1x64x32xf32> to vector<64x32xf32>
    %c0_2 = arith.constant 0 : index
    %c0_3 = arith.constant 0 : index
    %c0_4 = arith.constant 0 : index
    %2 = vector.load %arg2[%c0_2, %c0_3, %c0_4] : memref<1x6x32xf32, #tpu.memory_space<vmem>>, vector<1x6x32xf32>
    %3 = vector.shape_cast %2 : vector<1x6x32xf32> to vector<6x32xf32>
    %4 = vector.extract_strided_slice %3 {offsets = [0, 0], sizes = [1, 32], strides = [1, 1]} : vector<6x32xf32> to vector<1x32xf32>
    %5 = vector.extract_strided_slice %3 {offsets = [1, 0], sizes = [1, 32], strides = [1, 1]} : vector<6x32xf32> to vector<1x32xf32>
    %6 = vector.extract_strided_slice %3 {offsets = [2, 0], sizes = [1, 32], strides = [1, 1]} : vector<6x32xf32> to vector<1x32xf32>
    %7 = vector.extract_strided_slice %3 {offsets = [3, 0], sizes = [1, 32], strides = [1, 1]} : vector<6x32xf32> to vector<1x32xf32>
    %8 = vector.extract_strided_slice %3 {offsets = [4, 0], sizes = [1, 32], strides = [1, 1]} : vector<6x32xf32> to vector<1x32xf32>
    %9 = vector.extract_strided_slice %3 {offsets = [5, 0], sizes = [1, 32], strides = [1, 1]} : vector<6x32xf32> to vector<1x32xf32>
    %cst = arith.constant dense<0.000000e+00> : vector<64xf32>
    %10 = vector.multi_reduction <add>, %1, %cst [1] : vector<64x32xf32> to vector<64xf32>
    %11 = vector.shape_cast %10 : vector<64xf32> to vector<64x1xf32>
    %cst_5 = arith.constant 3.200000e+01 : f32
    %12 = vector.broadcast %cst_5 : f32 to vector<64x1xf32>
    %13 = arith.divf %11, %12 : vector<64x1xf32>
    %14 = vector.broadcast %13 : vector<64x1xf32> to vector<64x32xf32>
    %15 = arith.subf %1, %14 : vector<64x32xf32>
    %16 = arith.mulf %15, %15 : vector<64x32xf32>
    %cst_6 = arith.constant dense<0.000000e+00> : vector<64xf32>
    %17 = vector.multi_reduction <add>, %16, %cst_6 [1] : vector<64x32xf32> to vector<64xf32>
    %18 = vector.shape_cast %17 : vector<64xf32> to vector<64x1xf32>
    %cst_7 = arith.constant 3.200000e+01 : f32
    %19 = vector.broadcast %cst_7 : f32 to vector<64x1xf32>
    %20 = arith.divf %18, %19 : vector<64x1xf32>
    %cst_8 = arith.constant 9.99999997E-7 : f32
    %21 = vector.broadcast %cst_8 : f32 to vector<64x1xf32>
    %22 = arith.addf %20, %21 : vector<64x1xf32>
    %23 = math.rsqrt %22 : vector<64x1xf32>
    %24 = vector.broadcast %23 : vector<64x1xf32> to vector<64x32xf32>
    %25 = arith.mulf %15, %24 : vector<64x32xf32>
    %cst_9 = arith.constant 1.000000e+00 : f32
    %26 = vector.broadcast %cst_9 : f32 to vector<1x32xf32>
    %27 = arith.addf %26, %5 : vector<1x32xf32>
    %28 = vector.broadcast %27 : vector<1x32xf32> to vector<64x32xf32>
    %29 = arith.mulf %25, %28 : vector<64x32xf32>
    %30 = vector.broadcast %4 : vector<1x32xf32> to vector<64x32xf32>
    %31 = arith.addf %29, %30 : vector<64x32xf32>
    %c0_10 = arith.constant 0 : index
    %c0_11 = arith.constant 0 : index
    %32 = vector.load %arg3[%c0_10, %c0_11] : memref<96x32xbf16, #tpu.memory_space<vmem>>, vector<96x32xbf16>
    %33 = arith.truncf %31 : vector<64x32xf32> to vector<64x32xbf16>
    %cst_12 = arith.constant dense<0.000000e+00> : vector<96x64xf32>
    %34 = tpu.matmul %32, %33, %cst_12 {dimension_numbers = #tpu.dot_dimension_numbers<[1], [1], [0], [0], [0, 0, 1, 0], [], []>} : vector<96x32xbf16>, vector<64x32xbf16>, vector<96x64xf32> -> vector<96x64xf32>
    %c0_13 = arith.constant 0 : index
    %c0_14 = arith.constant 0 : index
    %35 = vector.load %arg4[%c0_13, %c0_14] : memref<96x1xf32, #tpu.memory_space<vmem>>, vector<96x1xf32>
    %36 = vector.broadcast %35 : vector<96x1xf32> to vector<96x64xf32>
    %37 = arith.addf %34, %36 : vector<96x64xf32>
    %38 = vector.extract_strided_slice %37 {offsets = [0, 0], sizes = [32, 64], strides = [1, 1]} : vector<96x64xf32> to vector<32x64xf32>
    %39 = vector.shape_cast %38 : vector<32x64xf32> to vector<4x8x64xf32>
    %40 = vector.extract_strided_slice %37 {offsets = [32, 0], sizes = [32, 64], strides = [1, 1]} : vector<96x64xf32> to vector<32x64xf32>
    %41 = vector.shape_cast %40 : vector<32x64xf32> to vector<4x8x64xf32>
    %42 = vector.extract_strided_slice %37 {offsets = [64, 0], sizes = [32, 64], strides = [1, 1]} : vector<96x64xf32> to vector<32x64xf32>
    %43 = vector.shape_cast %42 : vector<32x64xf32> to vector<4x8x64xf32>
    %44 = vector.extract_strided_slice %39 {offsets = [0, 0, 0], sizes = [1, 8, 64], strides = [1, 1, 1]} : vector<4x8x64xf32> to vector<1x8x64xf32>
    %45 = vector.shape_cast %44 : vector<1x8x64xf32> to vector<8x64xf32>
    %46 = arith.truncf %45 : vector<8x64xf32> to vector<8x64xbf16>
    %47 = vector.extract_strided_slice %41 {offsets = [0, 0, 0], sizes = [1, 8, 64], strides = [1, 1, 1]} : vector<4x8x64xf32> to vector<1x8x64xf32>
    %48 = vector.shape_cast %47 : vector<1x8x64xf32> to vector<8x64xf32>
    %49 = arith.truncf %48 : vector<8x64xf32> to vector<8x64xbf16>
    %cst_15 = arith.constant dense<0.000000e+00> : vector<64x64xf32>
    %50 = tpu.matmul %46, %49, %cst_15 {dimension_numbers = #tpu.dot_dimension_numbers<[0], [0], [1], [1], [0, 1, 1, 1], [], []>} : vector<8x64xbf16>, vector<8x64xbf16>, vector<64x64xf32> -> vector<64x64xf32>
    %cst_16 = arith.constant 0.353553385 : f32
    %51 = vector.broadcast %cst_16 : f32 to vector<64x64xf32>
    %52 = arith.mulf %50, %51 : vector<64x64xf32>
    %cst_17 = arith.constant dense<0xFF800000> : vector<64xf32>
    %53 = vector.multi_reduction <maximumf>, %52, %cst_17 [1] : vector<64x64xf32> to vector<64xf32>
    %54 = vector.shape_cast %53 : vector<64xf32> to vector<64x1xf32>
    %55 = vector.broadcast %54 : vector<64x1xf32> to vector<64x64xf32>
    %56 = arith.subf %52, %55 : vector<64x64xf32>
    %57 = math.exp %56 : vector<64x64xf32>
    %cst_18 = arith.constant dense<0.000000e+00> : vector<64xf32>
    %58 = vector.multi_reduction <add>, %57, %cst_18 [1] : vector<64x64xf32> to vector<64xf32>
    %59 = vector.shape_cast %58 : vector<64xf32> to vector<64x1xf32>
    %60 = tpu.reciprocal %59 {approx = true} : vector<64x1xf32> -> vector<64x1xf32>
    %61 = vector.broadcast %60 : vector<64x1xf32> to vector<64x64xf32>
    %62 = arith.mulf %57, %61 : vector<64x64xf32>
    %63 = vector.extract_strided_slice %43 {offsets = [0, 0, 0], sizes = [1, 8, 64], strides = [1, 1, 1]} : vector<4x8x64xf32> to vector<1x8x64xf32>
    %64 = vector.shape_cast %63 : vector<1x8x64xf32> to vector<8x64xf32>
    %65 = arith.truncf %64 : vector<8x64xf32> to vector<8x64xbf16>
    %66 = arith.truncf %62 : vector<64x64xf32> to vector<64x64xbf16>
    %cst_19 = arith.constant dense<0.000000e+00> : vector<8x64xf32>
    %67 = tpu.matmul %65, %66, %cst_19 {dimension_numbers = #tpu.dot_dimension_numbers<[1], [1], [0], [0], [0, 0, 1, 0], [], []>} : vector<8x64xbf16>, vector<64x64xbf16>, vector<8x64xf32> -> vector<8x64xf32>
    %68 = vector.extract_strided_slice %39 {offsets = [1, 0, 0], sizes = [1, 8, 64], strides = [1, 1, 1]} : vector<4x8x64xf32> to vector<1x8x64xf32>
    %69 = vector.shape_cast %68 : vector<1x8x64xf32> to vector<8x64xf32>
    %70 = arith.truncf %69 : vector<8x64xf32> to vector<8x64xbf16>
    %71 = vector.extract_strided_slice %41 {offsets = [1, 0, 0], sizes = [1, 8, 64], strides = [1, 1, 1]} : vector<4x8x64xf32> to vector<1x8x64xf32>
    %72 = vector.shape_cast %71 : vector<1x8x64xf32> to vector<8x64xf32>
    %73 = arith.truncf %72 : vector<8x64xf32> to vector<8x64xbf16>
    %cst_20 = arith.constant dense<0.000000e+00> : vector<64x64xf32>
    %74 = tpu.matmul %70, %73, %cst_20 {dimension_numbers = #tpu.dot_dimension_numbers<[0], [0], [1], [1], [0, 1, 1, 1], [], []>} : vector<8x64xbf16>, vector<8x64xbf16>, vector<64x64xf32> -> vector<64x64xf32>
    %cst_21 = arith.constant 0.353553385 : f32
    %75 = vector.broadcast %cst_21 : f32 to vector<64x64xf32>
    %76 = arith.mulf %74, %75 : vector<64x64xf32>
    %cst_22 = arith.constant dense<0xFF800000> : vector<64xf32>
    %77 = vector.multi_reduction <maximumf>, %76, %cst_22 [1] : vector<64x64xf32> to vector<64xf32>
    %78 = vector.shape_cast %77 : vector<64xf32> to vector<64x1xf32>
    %79 = vector.broadcast %78 : vector<64x1xf32> to vector<64x64xf32>
    %80 = arith.subf %76, %79 : vector<64x64xf32>
    %81 = math.exp %80 : vector<64x64xf32>
    %cst_23 = arith.constant dense<0.000000e+00> : vector<64xf32>
    %82 = vector.multi_reduction <add>, %81, %cst_23 [1] : vector<64x64xf32> to vector<64xf32>
    %83 = vector.shape_cast %82 : vector<64xf32> to vector<64x1xf32>
    %84 = tpu.reciprocal %83 {approx = true} : vector<64x1xf32> -> vector<64x1xf32>
    %85 = vector.broadcast %84 : vector<64x1xf32> to vector<64x64xf32>
    %86 = arith.mulf %81, %85 : vector<64x64xf32>
    %87 = vector.extract_strided_slice %43 {offsets = [1, 0, 0], sizes = [1, 8, 64], strides = [1, 1, 1]} : vector<4x8x64xf32> to vector<1x8x64xf32>
    %88 = vector.shape_cast %87 : vector<1x8x64xf32> to vector<8x64xf32>
    %89 = arith.truncf %88 : vector<8x64xf32> to vector<8x64xbf16>
    %90 = arith.truncf %86 : vector<64x64xf32> to vector<64x64xbf16>
    %cst_24 = arith.constant dense<0.000000e+00> : vector<8x64xf32>
    %91 = tpu.matmul %89, %90, %cst_24 {dimension_numbers = #tpu.dot_dimension_numbers<[1], [1], [0], [0], [0, 0, 1, 0], [], []>} : vector<8x64xbf16>, vector<64x64xbf16>, vector<8x64xf32> -> vector<8x64xf32>
    %92 = vector.extract_strided_slice %39 {offsets = [2, 0, 0], sizes = [1, 8, 64], strides = [1, 1, 1]} : vector<4x8x64xf32> to vector<1x8x64xf32>
    %93 = vector.shape_cast %92 : vector<1x8x64xf32> to vector<8x64xf32>
    %94 = arith.truncf %93 : vector<8x64xf32> to vector<8x64xbf16>
    %95 = vector.extract_strided_slice %41 {offsets = [2, 0, 0], sizes = [1, 8, 64], strides = [1, 1, 1]} : vector<4x8x64xf32> to vector<1x8x64xf32>
    %96 = vector.shape_cast %95 : vector<1x8x64xf32> to vector<8x64xf32>
    %97 = arith.truncf %96 : vector<8x64xf32> to vector<8x64xbf16>
    %cst_25 = arith.constant dense<0.000000e+00> : vector<64x64xf32>
    %98 = tpu.matmul %94, %97, %cst_25 {dimension_numbers = #tpu.dot_dimension_numbers<[0], [0], [1], [1], [0, 1, 1, 1], [], []>} : vector<8x64xbf16>, vector<8x64xbf16>, vector<64x64xf32> -> vector<64x64xf32>
    %cst_26 = arith.constant 0.353553385 : f32
    %99 = vector.broadcast %cst_26 : f32 to vector<64x64xf32>
    %100 = arith.mulf %98, %99 : vector<64x64xf32>
    %cst_27 = arith.constant dense<0xFF800000> : vector<64xf32>
    %101 = vector.multi_reduction <maximumf>, %100, %cst_27 [1] : vector<64x64xf32> to vector<64xf32>
    %102 = vector.shape_cast %101 : vector<64xf32> to vector<64x1xf32>
    %103 = vector.broadcast %102 : vector<64x1xf32> to vector<64x64xf32>
    %104 = arith.subf %100, %103 : vector<64x64xf32>
    %105 = math.exp %104 : vector<64x64xf32>
    %cst_28 = arith.constant dense<0.000000e+00> : vector<64xf32>
    %106 = vector.multi_reduction <add>, %105, %cst_28 [1] : vector<64x64xf32> to vector<64xf32>
    %107 = vector.shape_cast %106 : vector<64xf32> to vector<64x1xf32>
    %108 = tpu.reciprocal %107 {approx = true} : vector<64x1xf32> -> vector<64x1xf32>
    %109 = vector.broadcast %108 : vector<64x1xf32> to vector<64x64xf32>
    %110 = arith.mulf %105, %109 : vector<64x64xf32>
    %111 = vector.extract_strided_slice %43 {offsets = [2, 0, 0], sizes = [1, 8, 64], strides = [1, 1, 1]} : vector<4x8x64xf32> to vector<1x8x64xf32>
    %112 = vector.shape_cast %111 : vector<1x8x64xf32> to vector<8x64xf32>
    %113 = arith.truncf %112 : vector<8x64xf32> to vector<8x64xbf16>
    %114 = arith.truncf %110 : vector<64x64xf32> to vector<64x64xbf16>
    %cst_29 = arith.constant dense<0.000000e+00> : vector<8x64xf32>
    %115 = tpu.matmul %113, %114, %cst_29 {dimension_numbers = #tpu.dot_dimension_numbers<[1], [1], [0], [0], [0, 0, 1, 0], [], []>} : vector<8x64xbf16>, vector<64x64xbf16>, vector<8x64xf32> -> vector<8x64xf32>
    %116 = vector.extract_strided_slice %39 {offsets = [3, 0, 0], sizes = [1, 8, 64], strides = [1, 1, 1]} : vector<4x8x64xf32> to vector<1x8x64xf32>
    %117 = vector.shape_cast %116 : vector<1x8x64xf32> to vector<8x64xf32>
    %118 = arith.truncf %117 : vector<8x64xf32> to vector<8x64xbf16>
    %119 = vector.extract_strided_slice %41 {offsets = [3, 0, 0], sizes = [1, 8, 64], strides = [1, 1, 1]} : vector<4x8x64xf32> to vector<1x8x64xf32>
    %120 = vector.shape_cast %119 : vector<1x8x64xf32> to vector<8x64xf32>
    %121 = arith.truncf %120 : vector<8x64xf32> to vector<8x64xbf16>
    %cst_30 = arith.constant dense<0.000000e+00> : vector<64x64xf32>
    %122 = tpu.matmul %118, %121, %cst_30 {dimension_numbers = #tpu.dot_dimension_numbers<[0], [0], [1], [1], [0, 1, 1, 1], [], []>} : vector<8x64xbf16>, vector<8x64xbf16>, vector<64x64xf32> -> vector<64x64xf32>
    %cst_31 = arith.constant 0.353553385 : f32
    %123 = vector.broadcast %cst_31 : f32 to vector<64x64xf32>
    %124 = arith.mulf %122, %123 : vector<64x64xf32>
    %cst_32 = arith.constant dense<0xFF800000> : vector<64xf32>
    %125 = vector.multi_reduction <maximumf>, %124, %cst_32 [1] : vector<64x64xf32> to vector<64xf32>
    %126 = vector.shape_cast %125 : vector<64xf32> to vector<64x1xf32>
    %127 = vector.broadcast %126 : vector<64x1xf32> to vector<64x64xf32>
    %128 = arith.subf %124, %127 : vector<64x64xf32>
    %129 = math.exp %128 : vector<64x64xf32>
    %cst_33 = arith.constant dense<0.000000e+00> : vector<64xf32>
    %130 = vector.multi_reduction <add>, %129, %cst_33 [1] : vector<64x64xf32> to vector<64xf32>
    %131 = vector.shape_cast %130 : vector<64xf32> to vector<64x1xf32>
    %132 = tpu.reciprocal %131 {approx = true} : vector<64x1xf32> -> vector<64x1xf32>
    %133 = vector.broadcast %132 : vector<64x1xf32> to vector<64x64xf32>
    %134 = arith.mulf %129, %133 : vector<64x64xf32>
    %135 = vector.extract_strided_slice %43 {offsets = [3, 0, 0], sizes = [1, 8, 64], strides = [1, 1, 1]} : vector<4x8x64xf32> to vector<1x8x64xf32>
    %136 = vector.shape_cast %135 : vector<1x8x64xf32> to vector<8x64xf32>
    %137 = arith.truncf %136 : vector<8x64xf32> to vector<8x64xbf16>
    %138 = arith.truncf %134 : vector<64x64xf32> to vector<64x64xbf16>
    %cst_34 = arith.constant dense<0.000000e+00> : vector<8x64xf32>
    %139 = tpu.matmul %137, %138, %cst_34 {dimension_numbers = #tpu.dot_dimension_numbers<[1], [1], [0], [0], [0, 0, 1, 0], [], []>} : vector<8x64xbf16>, vector<64x64xbf16>, vector<8x64xf32> -> vector<8x64xf32>
    %140 = tpu.concatenate %67, %91, %115, %139 in 0 : vector<8x64xf32>, vector<8x64xf32>, vector<8x64xf32>, vector<8x64xf32> -> vector<32x64xf32>
    %141 = arith.truncf %140 : vector<32x64xf32> to vector<32x64xbf16>
    %c0_35 = arith.constant 0 : index
    %c0_36 = arith.constant 0 : index
    %142 = vector.load %arg5[%c0_35, %c0_36] : memref<32x32xbf16, #tpu.memory_space<vmem>>, vector<32x32xbf16>
    %cst_37 = arith.constant dense<0.000000e+00> : vector<64x32xf32>
    %143 = tpu.matmul %141, %142, %cst_37 {dimension_numbers = #tpu.dot_dimension_numbers<[0], [0], [1], [1], [0, 1, 1, 1], [], []>} : vector<32x64xbf16>, vector<32x32xbf16>, vector<64x32xf32> -> vector<64x32xf32>
    %c0_38 = arith.constant 0 : index
    %c0_39 = arith.constant 0 : index
    %144 = vector.load %arg6[%c0_38, %c0_39] : memref<1x32xf32, #tpu.memory_space<vmem>>, vector<1x32xf32>
    %145 = vector.broadcast %144 : vector<1x32xf32> to vector<64x32xf32>
    %146 = arith.addf %143, %145 : vector<64x32xf32>
    %147 = vector.broadcast %6 : vector<1x32xf32> to vector<64x32xf32>
    %148 = arith.mulf %147, %146 : vector<64x32xf32>
    %149 = arith.addf %1, %148 : vector<64x32xf32>
    %cst_40 = arith.constant dense<0.000000e+00> : vector<64xf32>
    %150 = vector.multi_reduction <add>, %149, %cst_40 [1] : vector<64x32xf32> to vector<64xf32>
    %151 = vector.shape_cast %150 : vector<64xf32> to vector<64x1xf32>
    %cst_41 = arith.constant 3.200000e+01 : f32
    %152 = vector.broadcast %cst_41 : f32 to vector<64x1xf32>
    %153 = arith.divf %151, %152 : vector<64x1xf32>
    %154 = vector.broadcast %153 : vector<64x1xf32> to vector<64x32xf32>
    %155 = arith.subf %149, %154 : vector<64x32xf32>
    %156 = arith.mulf %155, %155 : vector<64x32xf32>
    %cst_42 = arith.constant dense<0.000000e+00> : vector<64xf32>
    %157 = vector.multi_reduction <add>, %156, %cst_42 [1] : vector<64x32xf32> to vector<64xf32>
    %158 = vector.shape_cast %157 : vector<64xf32> to vector<64x1xf32>
    %cst_43 = arith.constant 3.200000e+01 : f32
    %159 = vector.broadcast %cst_43 : f32 to vector<64x1xf32>
    %160 = arith.divf %158, %159 : vector<64x1xf32>
    %cst_44 = arith.constant 9.99999974E-6 : f32
    %161 = vector.broadcast %cst_44 : f32 to vector<64x1xf32>
    %162 = arith.addf %160, %161 : vector<64x1xf32>
    %163 = math.rsqrt %162 : vector<64x1xf32>
    %164 = vector.broadcast %163 : vector<64x1xf32> to vector<64x32xf32>
    %165 = arith.mulf %155, %164 : vector<64x32xf32>
    %cst_45 = arith.constant 1.000000e+00 : f32
    %166 = vector.broadcast %cst_45 : f32 to vector<1x32xf32>
    %167 = arith.addf %166, %8 : vector<1x32xf32>
    %168 = vector.broadcast %167 : vector<1x32xf32> to vector<64x32xf32>
    %169 = arith.mulf %165, %168 : vector<64x32xf32>
    %170 = vector.broadcast %7 : vector<1x32xf32> to vector<64x32xf32>
    %171 = arith.addf %169, %170 : vector<64x32xf32>
    %172 = arith.truncf %171 : vector<64x32xf32> to vector<64x32xbf16>
    %c0_46 = arith.constant 0 : index
    %c0_47 = arith.constant 0 : index
    %173 = vector.load %arg7[%c0_46, %c0_47] : memref<32x128xbf16, #tpu.memory_space<vmem>>, vector<32x128xbf16>
    %cst_48 = arith.constant dense<0.000000e+00> : vector<64x128xf32>
    %174 = tpu.matmul %172, %173, %cst_48 {dimension_numbers = #tpu.dot_dimension_numbers<[1], [0], [0], [1], [0, 0, 1, 1], [], []>} : vector<64x32xbf16>, vector<32x128xbf16>, vector<64x128xf32> -> vector<64x128xf32>
    %c0_49 = arith.constant 0 : index
    %c0_50 = arith.constant 0 : index
    %175 = vector.load %arg8[%c0_49, %c0_50] : memref<1x128xf32, #tpu.memory_space<vmem>>, vector<1x128xf32>
    %176 = vector.broadcast %175 : vector<1x128xf32> to vector<64x128xf32>
    %177 = arith.addf %174, %176 : vector<64x128xf32>
    %178 = arith.mulf %177, %177 : vector<64x128xf32>
    %179 = arith.mulf %177, %178 : vector<64x128xf32>
    %cst_51 = arith.constant 4.471500e-02 : f32
    %180 = vector.broadcast %cst_51 : f32 to vector<64x128xf32>
    %181 = arith.mulf %180, %179 : vector<64x128xf32>
    %182 = arith.addf %177, %181 : vector<64x128xf32>
    %cst_52 = arith.constant 0.797884583 : f32
    %183 = vector.broadcast %cst_52 : f32 to vector<64x128xf32>
    %184 = arith.mulf %183, %182 : vector<64x128xf32>
    %185 = math.tanh %184 : vector<64x128xf32>
    %cst_53 = arith.constant 1.000000e+00 : f32
    %186 = vector.broadcast %cst_53 : f32 to vector<64x128xf32>
    %187 = arith.addf %186, %185 : vector<64x128xf32>
    %cst_54 = arith.constant 5.000000e-01 : f32
    %188 = vector.broadcast %cst_54 : f32 to vector<64x128xf32>
    %189 = arith.mulf %188, %187 : vector<64x128xf32>
    %190 = arith.mulf %177, %189 : vector<64x128xf32>
    %191 = arith.truncf %190 : vector<64x128xf32> to vector<64x128xbf16>
    %c0_55 = arith.constant 0 : index
    %c0_56 = arith.constant 0 : index
    %192 = vector.load %arg9[%c0_55, %c0_56] : memref<128x32xbf16, #tpu.memory_space<vmem>>, vector<128x32xbf16>
    %cst_57 = arith.constant dense<0.000000e+00> : vector<64x32xf32>
    %193 = tpu.matmul %191, %192, %cst_57 {dimension_numbers = #tpu.dot_dimension_numbers<[1], [0], [0], [1], [0, 0, 1, 1], [], []>} : vector<64x128xbf16>, vector<128x32xbf16>, vector<64x32xf32> -> vector<64x32xf32>
    %c0_58 = arith.constant 0 : index
    %c0_59 = arith.constant 0 : index
    %194 = vector.load %arg10[%c0_58, %c0_59] : memref<1x32xf32, #tpu.memory_space<vmem>>, vector<1x32xf32>
    %195 = vector.broadcast %194 : vector<1x32xf32> to vector<64x32xf32>
    %196 = arith.addf %193, %195 : vector<64x32xf32>
    %197 = vector.broadcast %9 : vector<1x32xf32> to vector<64x32xf32>
    %198 = arith.mulf %197, %196 : vector<64x32xf32>
    %199 = arith.addf %149, %198 : vector<64x32xf32>
    %c0_60 = arith.constant 0 : index
    %c0_61 = arith.constant 0 : index
    %c0_62 = arith.constant 0 : index
    %200 = vector.load %arg11[%c0_60, %c0_61, %c0_62] : memref<1x64x32xf32, #tpu.memory_space<vmem>>, vector<1x64x32xf32>
    %201 = vector.shape_cast %200 : vector<1x64x32xf32> to vector<64x32xf32>
    %202 = vector.shape_cast %199 : vector<64x32xf32> to vector<1x64x32xf32>
    tpu.vector_store %arg11[%c0_60, %c0_61, %c0_62], %202 {strides = array<i32>} : memref<1x64x32xf32, #tpu.memory_space<vmem>>, vector<1x64x32xf32>,
    return
  }
  func.func @transform_0(%arg0: i32) -> (i32, i32, i32) {
    %c0_i32 = arith.constant 0 : i32
    %c0_i32_0 = arith.constant 0 : i32
    %c0_i32_1 = arith.constant 0 : i32
    return %arg0, %c0_i32, %c0_i32_0 : i32, i32, i32
  }
  func.func @transform_1(%arg0: i32) -> (i32, i32, i32) {
    %c0_i32 = arith.constant 0 : i32
    %c0_i32_0 = arith.constant 0 : i32
    %c0_i32_1 = arith.constant 0 : i32
    return %arg0, %c0_i32, %c0_i32_0 : i32, i32, i32
  }
  func.func @transform_2(%arg0: i32) -> (i32, i32) {
    %c0_i32 = arith.constant 0 : i32
    %c0_i32_0 = arith.constant 0 : i32
    %c0_i32_1 = arith.constant 0 : i32
    return %c0_i32, %c0_i32_0 : i32, i32
  }
  func.func @transform_3(%arg0: i32) -> (i32, i32) {
    %c0_i32 = arith.constant 0 : i32
    %c0_i32_0 = arith.constant 0 : i32
    %c0_i32_1 = arith.constant 0 : i32
    return %c0_i32, %c0_i32_0 : i32, i32
  }
  func.func @transform_4(%arg0: i32) -> (i32, i32) {
    %c0_i32 = arith.constant 0 : i32
    %c0_i32_0 = arith.constant 0 : i32
    %c0_i32_1 = arith.constant 0 : i32
    return %c0_i32, %c0_i32_0 : i32, i32
  }
  func.func @transform_5(%arg0: i32) -> (i32, i32) {
    %c0_i32 = arith.constant 0 : i32
    %c0_i32_0 = arith.constant 0 : i32
    %c0_i32_1 = arith.constant 0 : i32
    return %c0_i32, %c0_i32_0 : i32, i32
  }
  func.func @transform_6(%arg0: i32) -> (i32, i32) {
    %c0_i32 = arith.constant 0 : i32
    %c0_i32_0 = arith.constant 0 : i32
    %c0_i32_1 = arith.constant 0 : i32
    return %c0_i32, %c0_i32_0 : i32, i32
  }
  func.func @transform_7(%arg0: i32) -> (i32, i32) {
    %c0_i32 = arith.constant 0 : i32
    %c0_i32_0 = arith.constant 0 : i32
    %c0_i32_1 = arith.constant 0 : i32
    return %c0_i32, %c0_i32_0 : i32, i32
  }
  func.func @transform_8(%arg0: i32) -> (i32, i32) {
    %c0_i32 = arith.constant 0 : i32
    %c0_i32_0 = arith.constant 0 : i32
    %c0_i32_1 = arith.constant 0 : i32
    return %c0_i32, %c0_i32_0 : i32, i32
  }
  func.func @transform_9(%arg0: i32) -> (i32, i32) {
    %c0_i32 = arith.constant 0 : i32
    %c0_i32_0 = arith.constant 0 : i32
    %c0_i32_1 = arith.constant 0 : i32
    return %c0_i32, %c0_i32_0 : i32, i32
  }
  func.func @transform_10(%arg0: i32) -> (i32, i32, i32) {
    %c0_i32 = arith.constant 0 : i32
    %c0_i32_0 = arith.constant 0 : i32
    %c0_i32_1 = arith.constant 0 : i32
    return %arg0, %c0_i32, %c0_i32_0 : i32, i32, i32
  }
}

module attributes {stable_mosaic.version = 11 : i64} {
  func.func @_head_kernel(%arg0: memref<2x64x32xf32, #tpu.memory_space<vmem>>, %arg1: memref<2x32xf32, #tpu.memory_space<vmem>>, %arg2: memref<32x32xbf16, #tpu.memory_space<vmem>>, %arg3: memref<1x32xf32, #tpu.memory_space<vmem>>, %arg4: memref<32x32xbf16, #tpu.memory_space<vmem>>, %arg5: memref<1x32xf32, #tpu.memory_space<vmem>>, %arg6: memref<32x32xbf16, #tpu.memory_space<vmem>>, %arg7: memref<32x1xf32, #tpu.memory_space<vmem>>, %arg8: memref<32x128xf32, #tpu.memory_space<vmem>>) attributes {dimension_semantics = [], scalar_prefetch = 0 : i64, scratch_operands = 0 : i64, tpu.core_type = #tpu.core_type<tc>} {
    %c0 = arith.constant 0 : index
    %c0_0 = arith.constant 0 : index
    %c0_1 = arith.constant 0 : index
    %0 = vector.load %arg0[%c0, %c0_0, %c0_1] : memref<2x64x32xf32, #tpu.memory_space<vmem>>, vector<2x64x32xf32>
    %c0_2 = arith.constant 0 : index
    %c0_3 = arith.constant 0 : index
    %1 = vector.load %arg1[%c0_2, %c0_3] : memref<2x32xf32, #tpu.memory_space<vmem>>, vector<2x32xf32>
    %2 = arith.truncf %1 : vector<2x32xf32> to vector<2x32xbf16>
    %c0_4 = arith.constant 0 : index
    %c0_5 = arith.constant 0 : index
    %3 = vector.load %arg2[%c0_4, %c0_5] : memref<32x32xbf16, #tpu.memory_space<vmem>>, vector<32x32xbf16>
    %cst = arith.constant dense<0.000000e+00> : vector<2x32xf32>
    %4 = tpu.matmul %2, %3, %cst {dimension_numbers = #tpu.dot_dimension_numbers<[1], [0], [0], [1], [0, 0, 1, 1], [], []>} : vector<2x32xbf16>, vector<32x32xbf16>, vector<2x32xf32> -> vector<2x32xf32>
    %c0_6 = arith.constant 0 : index
    %c0_7 = arith.constant 0 : index
    %5 = vector.load %arg3[%c0_6, %c0_7] : memref<1x32xf32, #tpu.memory_space<vmem>>, vector<1x32xf32>
    %6 = vector.broadcast %5 : vector<1x32xf32> to vector<2x32xf32>
    %7 = arith.addf %4, %6 : vector<2x32xf32>
    %c0_8 = arith.constant 0 : index
    %c0_9 = arith.constant 0 : index
    %8 = vector.load %arg4[%c0_8, %c0_9] : memref<32x32xbf16, #tpu.memory_space<vmem>>, vector<32x32xbf16>
    %cst_10 = arith.constant dense<0.000000e+00> : vector<2x32xf32>
    %9 = tpu.matmul %2, %8, %cst_10 {dimension_numbers = #tpu.dot_dimension_numbers<[1], [0], [0], [1], [0, 0, 1, 1], [], []>} : vector<2x32xbf16>, vector<32x32xbf16>, vector<2x32xf32> -> vector<2x32xf32>
    %c0_11 = arith.constant 0 : index
    %c0_12 = arith.constant 0 : index
    %10 = vector.load %arg5[%c0_11, %c0_12] : memref<1x32xf32, #tpu.memory_space<vmem>>, vector<1x32xf32>
    %11 = vector.broadcast %10 : vector<1x32xf32> to vector<2x32xf32>
    %12 = arith.addf %9, %11 : vector<2x32xf32>
    %cst_13 = arith.constant dense<0.000000e+00> : vector<2x64xf32>
    %13 = vector.multi_reduction <add>, %0, %cst_13 [2] : vector<2x64x32xf32> to vector<2x64xf32>
    %14 = vector.shape_cast %13 : vector<2x64xf32> to vector<2x64x1xf32>
    %cst_14 = arith.constant 3.200000e+01 : f32
    %15 = vector.broadcast %cst_14 : f32 to vector<2x64x1xf32>
    %16 = arith.divf %14, %15 : vector<2x64x1xf32>
    %17 = vector.broadcast %16 : vector<2x64x1xf32> to vector<2x64x32xf32>
    %18 = arith.subf %0, %17 : vector<2x64x32xf32>
    %19 = arith.mulf %18, %18 : vector<2x64x32xf32>
    %cst_15 = arith.constant dense<0.000000e+00> : vector<2x64xf32>
    %20 = vector.multi_reduction <add>, %19, %cst_15 [2] : vector<2x64x32xf32> to vector<2x64xf32>
    %21 = vector.shape_cast %20 : vector<2x64xf32> to vector<2x64x1xf32>
    %cst_16 = arith.constant 3.200000e+01 : f32
    %22 = vector.broadcast %cst_16 : f32 to vector<2x64x1xf32>
    %23 = arith.divf %21, %22 : vector<2x64x1xf32>
    %cst_17 = arith.constant 9.99999997E-7 : f32
    %24 = vector.broadcast %cst_17 : f32 to vector<2x64x1xf32>
    %25 = arith.addf %23, %24 : vector<2x64x1xf32>
    %26 = math.rsqrt %25 : vector<2x64x1xf32>
    %27 = vector.broadcast %26 : vector<2x64x1xf32> to vector<2x64x32xf32>
    %28 = arith.mulf %18, %27 : vector<2x64x32xf32>
    %29 = vector.shape_cast %12 : vector<2x32xf32> to vector<2x1x32xf32>
    %cst_18 = arith.constant 1.000000e+00 : f32
    %30 = vector.broadcast %cst_18 : f32 to vector<2x1x32xf32>
    %31 = arith.addf %30, %29 : vector<2x1x32xf32>
    %32 = vector.broadcast %31 : vector<2x1x32xf32> to vector<2x64x32xf32>
    %33 = arith.mulf %28, %32 : vector<2x64x32xf32>
    %34 = vector.shape_cast %7 : vector<2x32xf32> to vector<2x1x32xf32>
    %35 = vector.broadcast %34 : vector<2x1x32xf32> to vector<2x64x32xf32>
    %36 = arith.addf %33, %35 : vector<2x64x32xf32>
    %37 = vector.shape_cast %36 : vector<2x64x32xf32> to vector<128x32xf32>
    %38 = arith.truncf %37 : vector<128x32xf32> to vector<128x32xbf16>
    %c0_19 = arith.constant 0 : index
    %c0_20 = arith.constant 0 : index
    %39 = vector.load %arg6[%c0_19, %c0_20] : memref<32x32xbf16, #tpu.memory_space<vmem>>, vector<32x32xbf16>
    %cst_21 = arith.constant dense<0.000000e+00> : vector<32x128xf32>
    %40 = tpu.matmul %39, %38, %cst_21 {dimension_numbers = #tpu.dot_dimension_numbers<[0], [1], [1], [0], [0, 1, 1, 0], [], []>} : vector<32x32xbf16>, vector<128x32xbf16>, vector<32x128xf32> -> vector<32x128xf32>
    %c0_22 = arith.constant 0 : index
    %c0_23 = arith.constant 0 : index
    %41 = vector.load %arg7[%c0_22, %c0_23] : memref<32x1xf32, #tpu.memory_space<vmem>>, vector<32x1xf32>
    %42 = vector.broadcast %41 : vector<32x1xf32> to vector<32x128xf32>
    %43 = arith.addf %40, %42 : vector<32x128xf32>
    %c0_24 = arith.constant 0 : index
    %c0_25 = arith.constant 0 : index
    %44 = vector.load %arg8[%c0_24, %c0_25] : memref<32x128xf32, #tpu.memory_space<vmem>>, vector<32x128xf32>
    tpu.vector_store %arg8[%c0_24, %c0_25], %43 {strides = array<i32>} : memref<32x128xf32, #tpu.memory_space<vmem>>, vector<32x128xf32>,
    return
  }
}

</mosaic_0001>

<bundles_post_ra>
// kernel: squeeze.2
= control target key start
LH: loop header
LB: loop body
LE: loop exit
PB: predicated region body
PF: predicated region fallthrough
CT: control target
= control target key end

     0   :  { %vm11_vm0 = vcmask 261120   ;;  %s44_s11 = smov 96   ;;  %s45_s12 = smov 32   ;;  %s83_s0 = inlined_call_operand.vmem [shape: f32[1,2,192], index: 0, kind: input, shape index: {}]   ;;  %s84_s1 = inlined_call_operand.vmem [shape: f32[2,6,32], index: 1, kind: output, shape index: {}]  }
   0x1   :  { %v36_v0 = vld [vmem:[%s83_s0 + $0x2] sm:$0x3]  ;;  %v8_v1 = vld [vmem:[%s83_s0] sm:$0x3]  ;;  %s46_s15 = smov 64  }
   0x2   :  { %7 = vst [vmem:[#allocation0 + $0x8] sm:$0x3] %v36_v0 }
   0x3   :  { %9 = vst [vmem:[#allocation0] sm:$0x3] %v8_v1 }
   0x9   :  { %v14_v2 = vld [vmem:[#allocation0 + $0x8] sm:$0x3]  }
   0xa   :  { %v18_v3 = vld.sshfl [vmem:[#allocation0] sm:$0xff pattern:$0x99999180]   ;;  %37 = vst.msk [vmem:[%s84_s1 + $0x4] ss:$8 sm:$0x3] %vm11_vm0, %v14_v2  }
   0xb   :  { %19 = vrot.lane.b32.xlu0 %v18_v3, %s44_s11  ;;  %v30_v4 = vld [vmem:[#allocation0] sm:$0x3]  }
   0xc   :  { %v10_v5 = vld [vmem:[#allocation0] sm:$0x3]   ;;  %31 = vrot.lane.b32.xlu1 %v30_v4, %s45_s12 }
   0xd   :  { %12 = vst.msk [vmem:[%s84_s1] ss:$8 sm:$0x3] %vm11_vm0, %v10_v5   ;;  %v24_v6 = vld [vmem:[#allocation0] sm:$0x3]  }
  0x13   :  { %25 = vrot.lane.b32.xlu0 %v24_v6, %s46_s15 }
  0x7d   :  { %v20_v7 = vpop.permute.xlu0 %19  }
  0x7e   :  { %38 = vst.msk [vmem:[%s84_s1 + $0x1] ss:$4 sm:$0xf] %vm11_vm0, %v20_v7   ;;  %v32_v8 = vpop.permute.xlu1 %31  }
  0x7f   :  { %40 = vst.msk [vmem:[%s84_s1 + $0x3] ss:$8 sm:$0x3] %vm11_vm0, %v32_v8  }
  0x85   :  { %v26_v9 = vpop.permute.xlu0 %25  }
  0x86   :  { %39 = vst.msk [vmem:[%s84_s1 + $0x2] ss:$8 sm:$0x3] %vm11_vm0, %v26_v9  }

// kernel: dit_forward.5
= control target key start
LH: loop header
LB: loop body
LE: loop exit
PB: predicated region body
PF: predicated region fallthrough
CT: control target
= control target key end

     0   :  { %vm45_vm0 = vcmask 130048   ;;  %vm163_vm1 = vcmask 261120   ;;  %s353_s0 = inlined_call_operand.vmem [shape: f32[16,128], index: 0, kind: input, shape index: {}]   ;;  %s354_s1 = inlined_call_operand.vmem [shape: bf16[16,32], index: 1, kind: input, shape index: {}]   ;;  %s355_s2 = inlined_call_operand.vmem [shape: f32[1,32], index: 2, kind: input, shape index: {}]   ;;  %s356_s3 = inlined_call_operand.vmem [shape: f32[64,32], index: 3, kind: input, shape index: {}]   ;;  %s357_s4 = inlined_call_operand.vmem [shape: f32[2,64,32], index: 4, kind: output, shape index: {}]  }
   0x1   :  { %v18_v0 = vld [vmem:[%s353_s0] sm:$0xff]  ;;  %v19_v1 = vld [vmem:[%s353_s0 + $0x8] sm:$0xff]  ;;  %v141_v22 = vld [vmem:[%s356_s3 + $0x10] sm:$0xff] }
   0x2   :  { %v196_v2 = vld [vmem:[%s354_s1] sm:$0xff]  ;;  %v20_v3 = vpack.c.bf16 %v19_v1, %v18_v0  ;;  %v140_v18 = vld [vmem:[%s356_s3 + $0x8] sm:$0xff]  ;;  %v142_v26 = vld [vmem:[%s356_s3 + $0x18] sm:$0xff] }
   0x3   :  { %77 = vmatpush.bf16.msra.mxu0 %v196_v2  ;;  %197 = vmatpush.bf16.msra.mxu1 %v196_v2  ;;  %v247_v12 = vld [vmem:[%s355_s2] ss:$0 sm:$0xff]  ;;  %v144_v34 = vld [vmem:[%s356_s3 + $0x28] sm:$0xff]  ;;  %v145_v38 = vld [vmem:[%s356_s3 + $0x30] sm:$0xff] }
   0x4   :  { %23 = vxpose.xlu0.c.b16.start.end [1/1] (short) %v20_v3, 128  ;;  %198 = vmatpush.bf16.msra.mxu2 %v196_v2  ;;  %v139_v14 = vld [vmem:[%s356_s3] sm:$0xff]  ;;  %v146_v42 = vld [vmem:[%s356_s3 + $0x38] sm:$0xff] }
   0x5   :  { %199 = vmatpush.bf16.msra.mxu3 %v196_v2  ;;  %v143_v30 = vld [vmem:[%s356_s3 + $0x20] sm:$0xff] }
  0xb0   :  { %v31_v4 = vpop.trf.xlu0 }
  0xb1   :  { %188 = vmatmul.msk.bf16.vlgmr.msra.gmra.mxu0 %vm45_vm0, %v31_v4 }
  0xc0   :  { %v32_v5 = vpop.trf.xlu0 }
  0xc1   :  { %189 = vmatmul.msk.bf16.gmra.mxu0 %vm45_vm0, %v32_v5 }
  0xd0   :  { %v33_v6 = vpop.trf.xlu0 }
  0xd1   :  { %190 = vmatmul.msk.bf16.vlgmr.msra.gmra.mxu1 %vm45_vm0, %v33_v6 }
  0xe0   :  { %v34_v7 = vpop.trf.xlu0 }
  0xe1   :  { %191 = vmatmul.msk.bf16.gmra.mxu1 %vm45_vm0, %v34_v7 }
  0xf0   :  { %v35_v8 = vpop.trf.xlu0 }
  0xf1   :  { %192 = vmatmul.msk.bf16.vlgmr.msra.gmra.mxu2 %vm45_vm0, %v35_v8 }
 0x100   :  { %v36_v9 = vpop.trf.xlu0 }
 0x101   :  { %193 = vmatmul.msk.bf16.gmra.mxu2 %vm45_vm0, %v36_v9 }
 0x110   :  { %v37_v10 = vpop.trf.xlu0 }
 0x111   :  { %194 = vmatmul.msk.bf16.vlgmr.msra.gmra.mxu3 %vm45_vm0, %v37_v10 }
 0x120   :  { %v38_v11 = vpop.trf.xlu0 }
 0x121   :  { %195 = vmatmul.msk.bf16.gmra.mxu3 %vm45_vm0, %v38_v11 }
 0x12e   :  { %v79_v13 = vpop.f32.mrf.mxu0 }
 0x12f   :  { %v123_v15 = vadd.f32 %v247_v12, %v79_v13 }
 0x131   :  { %v147_v16 = vadd.f32 %v139_v14, %v123_v15 }
 0x133   :  { %164 = vst.msk [vmem:[%s357_s4] sm:$0xff] %vm163_vm1, %v147_v16 }
 0x136   :  { %v81_v17 = vpop.f32.mrf.mxu0 }
 0x137   :  { %v124_v19 = vadd.f32 %v247_v12, %v81_v17 }
 0x139   :  { %v148_v20 = vadd.f32 %v140_v18, %v124_v19 }
 0x13b   :  { %165 = vst.msk [vmem:[%s357_s4 + $0x8] sm:$0xff] %vm163_vm1, %v148_v20 }
 0x13e   :  { %v84_v21 = vpop.f32.mrf.mxu0 }
 0x13f   :  { %v125_v23 = vadd.f32 %v247_v12, %v84_v21 }
 0x141   :  { %v149_v24 = vadd.f32 %v141_v22, %v125_v23 }
 0x143   :  { %166 = vst.msk [vmem:[%s357_s4 + $0x10] sm:$0xff] %vm163_vm1, %v149_v24 }
 0x146   :  { %v86_v25 = vpop.f32.mrf.mxu0 }
 0x147   :  { %v126_v27 = vadd.f32 %v247_v12, %v86_v25 }
 0x149   :  { %v150_v28 = vadd.f32 %v142_v26, %v126_v27 }
 0x14b   :  { %167 = vst.msk [vmem:[%s357_s4 + $0x18] sm:$0xff] %vm163_vm1, %v150_v28 }
 0x14e   :  { %v89_v29 = vpop.f32.mrf.mxu1 }
 0x14f   :  { %v127_v31 = vadd.f32 %v247_v12, %v89_v29 }
 0x151   :  { %v151_v32 = vadd.f32 %v143_v30, %v127_v31 }
 0x153   :  { %168 = vst.msk [vmem:[%s357_s4 + $0x20] sm:$0xff] %vm163_vm1, %v151_v32 }
 0x156   :  { %v91_v33 = vpop.f32.mrf.mxu1 }
 0x157   :  { %v128_v35 = vadd.f32 %v247_v12, %v91_v33 }
 0x159   :  { %v152_v36 = vadd.f32 %v144_v34, %v128_v35 }
 0x15b   :  { %169 = vst.msk [vmem:[%s357_s4 + $0x28] sm:$0xff] %vm163_vm1, %v152_v36 }
 0x15e   :  { %v94_v37 = vpop.f32.mrf.mxu1 }
 0x15f   :  { %v129_v39 = vadd.f32 %v247_v12, %v94_v37 }
 0x161   :  { %v153_v40 = vadd.f32 %v145_v38, %v129_v39 }
 0x163   :  { %170 = vst.msk [vmem:[%s357_s4 + $0x30] sm:$0xff] %vm163_vm1, %v153_v40 }
 0x166   :  { %v96_v41 = vpop.f32.mrf.mxu1 }
 0x167   :  { %v130_v43 = vadd.f32 %v247_v12, %v96_v41 }
 0x169   :  { %v154_v44 = vadd.f32 %v146_v42, %v130_v43 }
 0x16b   :  { %171 = vst.msk [vmem:[%s357_s4 + $0x38] sm:$0xff] %vm163_vm1, %v154_v44 }
 0x174   :  { %v99_v45 = vpop.f32.mrf.mxu2 }
 0x175   :  { %v131_v46 = vadd.f32 %v247_v12, %v99_v45 }
 0x177   :  { %v155_v47 = vadd.f32 %v139_v14, %v131_v46 }
 0x179   :  { %172 = vst.msk [vmem:[%s357_s4 + $0x40] sm:$0xff] %vm163_vm1, %v155_v47 }
 0x17c   :  { %v101_v48 = vpop.f32.mrf.mxu2 }
 0x17d   :  { %v132_v49 = vadd.f32 %v247_v12, %v101_v48 }
 0x17f   :  { %v156_v50 = vadd.f32 %v140_v18, %v132_v49 }
 0x181   :  { %173 = vst.msk [vmem:[%s357_s4 + $0x48] sm:$0xff] %vm163_vm1, %v156_v50 }
 0x184   :  { %v104_v51 = vpop.f32.mrf.mxu2 }
 0x185   :  { %v133_v52 = vadd.f32 %v247_v12, %v104_v51 }
 0x187   :  { %v157_v53 = vadd.f32 %v141_v22, %v133_v52 }
 0x189   :  { %174 = vst.msk [vmem:[%s357_s4 + $0x50] sm:$0xff] %vm163_vm1, %v157_v53 }
 0x18c   :  { %v106_v54 = vpop.f32.mrf.mxu2 }
 0x18d   :  { %v134_v55 = vadd.f32 %v247_v12, %v106_v54 }
 0x18f   :  { %v158_v56 = vadd.f32 %v142_v26, %v134_v55 }
 0x191   :  { %175 = vst.msk [vmem:[%s357_s4 + $0x58] sm:$0xff] %vm163_vm1, %v158_v56 }
 0x194   :  { %v109_v57 = vpop.f32.mrf.mxu3 }
 0x195   :  { %v135_v58 = vadd.f32 %v247_v12, %v109_v57 }
 0x197   :  { %v159_v59 = vadd.f32 %v143_v30, %v135_v58 }
 0x199   :  { %176 = vst.msk [vmem:[%s357_s4 + $0x60] sm:$0xff] %vm163_vm1, %v159_v59 }
 0x19c   :  { %v111_v60 = vpop.f32.mrf.mxu3 }
 0x19d   :  { %v136_v61 = vadd.f32 %v247_v12, %v111_v60 }
 0x19f   :  { %v160_v62 = vadd.f32 %v144_v34, %v136_v61 }
 0x1a1   :  { %177 = vst.msk [vmem:[%s357_s4 + $0x68] sm:$0xff] %vm163_vm1, %v160_v62 }
 0x1a4   :  { %v114_v63 = vpop.f32.mrf.mxu3 }
 0x1a5   :  { %v137_v0 = vadd.f32 %v247_v12, %v114_v63 }
 0x1a7   :  { %v161_v1 = vadd.f32 %v145_v38, %v137_v0 }
 0x1a9   :  { %178 = vst.msk [vmem:[%s357_s4 + $0x70] sm:$0xff] %vm163_vm1, %v161_v1 }
 0x1ac   :  { %v116_v2 = vpop.f32.mrf.mxu3 }
 0x1ad   :  { %v138_v3 = vadd.f32 %v247_v12, %v116_v2 }
 0x1af   :  { %v162_v4 = vadd.f32 %v146_v42, %v138_v3 }
 0x1b1   :  { %179 = vst.msk [vmem:[%s357_s4 + $0x78] sm:$0xff] %vm163_vm1, %v162_v4 }

// kernel: dit_forward.6
= control target key start
LH: loop header
LB: loop body
LE: loop exit
PB: predicated region body
PF: predicated region fallthrough
CT: control target
= control target key end

     0   :  { %s1096_s30 = smov 0   ;;  %s1168_s0 = inlined_call_operand.vmem [shape: f32[2,256], index: 0, kind: input, shape index: {}]   ;;  %s1169_s1 = inlined_call_operand.vmem [shape: f32[2,2,32], index: 1, kind: input, shape index: {}]   ;;  %s1170_s2 = inlined_call_operand.vmem [shape: bf16[2,256,32], index: 2, kind: input, shape index: {}]   ;;  %s1171_s3 = inlined_call_operand.vmem [shape: f32[2,1,32], index: 3, kind: input, shape index: {}]   ;;  %s1172_s4 = inlined_call_operand.vmem [shape: bf16[2,32,32], index: 4, kind: input, shape index: {}]   ;;  %s1173_s5 = inlined_call_operand.vmem [shape: f32[2,1,32], index: 5, kind: input, shape index: {}]   ;;  %s1174_s6 = inlined_call_operand.vmem [shape: bf16[2,32,192], index: 6, kind: input, shape index: {}]   ;;  %s1175_s7 = inlined_call_operand.vmem [shape: f32[2,1,192], index: 7, kind: input, shape index: {}]   ;;  %s1176_s8 = inlined_call_operand.vmem [shape: f32[2,2,192], index: 8, kind: output, shape index: {0}]   ;;  %s1177_s9 = inlined_call_operand.vmem [shape: f32[2,32], index: 9, kind: output, shape index: {1}]  }
   0x1 LB: > { %s1102_s10 = sadd.s32 4294967295, %s1044_s30   ;;  %p887_p0 = scmp.ge.s32.totalorder %s1044_s30, 1  ;;  %s1044_s30 = sphi %s1096_s30, %s20_s30  }
   0x2   : > { %p339_p1 = scmp.lt.s32.totalorder %s1044_s30, 3 }
   0x4   : > { %p340_p2 = pnand %p887_p0, %p339_p1 }
   0x5   : > { %p399_p3 = scmp.lt.s32.totalorder (!%p340_p2), %s1102_s10, 1  ;;  %p991_p4 = scmp.ne.s32.totalorder (!%p340_p2), %s1102_s10, 0 }
   0x6   : > { %343 = sbr.rel (%p340_p2) target bundleno = 519 (0x207), region = 52 }
   0xb   : > { %v434_v0 = vld [vmem:[%s1168_s0] sm:$0xf]  ;;  %s1111_s13 = scalar_select %p399_p3, %s1102_s10, 1  ;;  %vm642_vm4 = vcmask 261120   ;;  %vm744_vm9 = vcmask 1041408   ;;  %vm747_vm10 = vcmask 519170  }
   0xc   : > { %436 = vst [vmem:[#allocation1] ss:$4 sm:$0xff] %v434_v0  ;;  %vm748_vm11 = vmor %vm747_vm10, %vm744_vm9 }
   0xd   : > { %s994_s14 = sshll.u32 %s1111_s13, 7  ;;  %s410_s17 = scalar_lea.vmem %s1171_s3, %s1111_s13 }
   0xe   : > { %s407_s20 = scalar_lea.vmem %s1170_s2, %s994_s14  ;;  %s418_s23 = scalar_lea.vmem %s1173_s5, %s1111_s13  ;;  %v1028_v22 = vld [vmem:[%s410_s17] ss:$0 sm:$0xff] }
   0xf   : > { %v1005_v1 = vld [vmem:[%s407_s20 + $0x38] sm:$0xff]  ;;  %v1004_v3 = vld [vmem:[%s407_s20 + $0x30] sm:$0xff]  ;;  %v1003_v5 = vld [vmem:[%s407_s20 + $0x28] sm:$0xff]  ;;  %s995_s24 = sshll.u32 %s1111_s13, 4  ;;  %s996_s11 = sshll.u32 %s1111_s13, 5 }
  0x10   : > { %v1013_v2 = vld [vmem:[%s407_s20 + $0x78] sm:$0xff]  ;;  %575 = vmatpush.bf16.msra.mxu0 %v1005_v1  ;;  %v1012_v4 = vld [vmem:[%s407_s20 + $0x70] sm:$0xff]  ;;  %v1011_v6 = vld [vmem:[%s407_s20 + $0x68] sm:$0xff]  ;;  %s415_s27 = scalar_lea.vmem %s1172_s4, %s995_s24  ;;  %s423_s15 = scalar_lea.vmem %s1174_s6, %s996_s11 }
  0x11   : > { %588 = vmatpush.bf16.msra.mxu1 %v1013_v2  ;;  %v1002_v7 = vld [vmem:[%s407_s20 + $0x20] sm:$0xff]  ;;  %v1001_v9 = vld [vmem:[%s407_s20 + $0x18] sm:$0xff]  ;;  %v1000_v11 = vld [vmem:[%s407_s20 + $0x10] sm:$0xff]  ;;  %s888_s16 = sshll.u32 %s1111_s13, 1  ;;  %s997_s25 = sshll.u32 %s1111_s13, 2 }
  0x12   : > { %v1010_v8 = vld [vmem:[%s407_s20 + $0x60] sm:$0xff]  ;;  %v1009_v10 = vld [vmem:[%s407_s20 + $0x58] sm:$0xff]  ;;  %v1008_v12 = vld [vmem:[%s407_s20 + $0x50] sm:$0xff]  ;;  %s402_s19 = scalar_lea.vmem %s1169_s1, %s888_s16  ;;  %s427_s24 = scalar_lea.vmem %s1175_s7, %s888_s16 }
  0x13   : > { %v999_v13 = vld [vmem:[%s407_s20 + $0x8] sm:$0xff]  ;;  %v998_v15 = vld [vmem:[%s407_s20] sm:$0xff]  ;;  %v1018_v45 = vld [vmem:[%s423_s15 + $0x14] sm:$0xf]  ;;  %s432_s28 = scalar_lea.vmem %s1176_s8, %s997_s25 }
  0x14   : > { %576 = vmatpush.bf16.msra.mxu0 %v1004_v3  ;;  %v1007_v14 = vld [vmem:[%s407_s20 + $0x48] sm:$0xff]  ;;  %v1006_v16 = vld [vmem:[%s407_s20 + $0x40] sm:$0xff]  ;;  %v985_v46 = vld [vmem:[%s423_s15 + $0x18] sm:$0xf0] }
  0x15   : > { %589 = vmatpush.bf16.msra.mxu1 %v1012_v4  ;;  %v437_v17 = vld.sshfl [vmem:[#allocation1] sm:$0xff pattern:$0x73625140]  ;;  %v438_v18 = vld.sshfl [vmem:[#allocation1 + $0x8] sm:$0xff pattern:$0x73625140]  ;;  %v988_v48 = vor.u32 %v1018_v45, %v985_v46 }
  0x16   : > { %v441_v19 = vpack.c.bf16 %v437_v17, %v437_v17  ;;  %v442_v20 = vpack.c.bf16 %v438_v18, %v438_v18  ;;  %v1015_v21 = vld [vmem:[%s415_s27 + $0x8] sm:$0xff]  ;;  %v1014_v25 = vld [vmem:[%s415_s27] sm:$0xff]  ;;  %v983_v50 = vld [vmem:[%s423_s15 + $0x10] sm:$0xf] }
  0x17   : > { %652 = vmatpush.bf16.msra.mxu2 %v1015_v21  ;;  %v1016_v47 = vld [vmem:[%s423_s15 + $0x4] sm:$0xf]  ;;  %v977_v49 = vld [vmem:[%s423_s15 + $0x8] sm:$0xf0]  ;;  %v1019_v51 = vld [vmem:[%s423_s15 + $0x14] sm:$0xf0] }
  0x18   : > { %577 = vmatpush.bf16.msra.mxu0 %v1003_v5  ;;  %v984_v52 = vor.u32 %v1019_v51, %v983_v50  ;;  %v975_v53 = vld [vmem:[%s423_s15] sm:$0xf]  ;;  %v1017_v54 = vld [vmem:[%s423_s15 + $0x4] sm:$0xf0]  ;;  %v980_v55 = vor.u32 %v1016_v47, %v977_v49 }
  0x19   : > { %590 = vmatpush.bf16.msra.mxu1 %v1011_v6  ;;  %v976_v56 = vor.u32 %v1017_v54, %v975_v53  ;;  %v1029_v57 = vld [vmem:[%s418_s23] ss:$0 sm:$0xff] }
  0x1a   : > { %721 = vmatpush.bf16.msra.mxu3 %v984_v52  ;;  %v659_v59 = vld [vmem:[%s402_s19] sm:$0x3] }
  0x1b   : > { %653 = vmatpush.bf16.msra.mxu2 %v1014_v25 }
  0x1c   : > { %578 = vmatpush.bf16.msra.mxu0 %v1002_v7 }
  0x1d   : > { %591 = vmatpush.bf16.msra.mxu1 %v1010_v8 }
  0x1e   : > { %722 = vmatpush.bf16.msra.mxu3 %v976_v56 }
  0x1f   : > { %734 = vmatpush.bf16.msrb.mxu2 %v988_v48 }
  0x20   : > { %579 = vmatpush.bf16.msra.mxu0 %v1001_v9 }
  0x21   : > { %592 = vmatpush.bf16.msra.mxu1 %v1009_v10 }
  0x23   : > { %735 = vmatpush.bf16.msrb.mxu2 %v980_v55 }
  0x24   : > { %580 = vmatpush.bf16.msra.mxu0 %v1000_v11 }
  0x25   : > { %593 = vmatpush.bf16.msra.mxu1 %v1008_v12 }
  0x28   : > { %581 = vmatpush.bf16.msra.mxu0 %v999_v13 }
  0x29   : > { %594 = vmatpush.bf16.msra.mxu1 %v1007_v14  ;;  %v686_v14 = vld [vmem:[%s427_s24] sm:$0x3] }
  0x2c   : > { %582 = vmatpush.bf16.msra.mxu0 %v998_v15  ;;  %v689_v15 = vperm.slane %v686_v14, 1 }
  0x2d   : > { %595 = vmatpush.bf16.msra.mxu1 %v1006_v16  ;;  %v688_v16 = vperm.slane %v686_v14, 0 }
  0x2f   : > { %583 = vmatmul.bf16.vlgmr.msra.gmra.mxu0 %v441_v19 }
  0x30   : > { %596 = vmatmul.bf16.vlgmr.msra.gmra.mxu1 %v442_v20 }
  0xac   : > { %v584_v23 = vpop.f32.mrf.mxu0 }
  0xad   : > { %v597_v24 = vpop.f32.mrf.mxu1  ;;  %v585_v26 = vadd.f32 %v1028_v22, %v584_v23 }
  0xaf   : > { %v598_v27 = vadd.f32 %v597_v24, %v585_v26 }
  0xb1   : > { %v962_v28 = vmul.f32 -1.442695, %v598_v27 }
  0xb3   : > { %1030 = vpow2.f32 %v962_v28 }
  0xb4   : > { %v586_v29 = vpop.f32.mrf.mxu0 }
  0xb5   : > { %v599_v30 = vpop.f32.mrf.mxu1 }
  0xb9   : > { %v1031_v31 = vpop.eup %1030 }
  0xba   : > { %v604_v32 = vadd.f32 1.0, %v1031_v31 }
  0xbc   : > { %1032 = vrcp.f32 %v604_v32  ;;  %v616_v36 = vand.u32 2147483648, %v604_v32  ;;  %v614_v38 = vand.u32 2147483647, %v604_v32  ;;  %vm610_vm1 = vweird.f32 %v604_v32 }
  0xbe   : > { %v617_v40 = vor.u32 1.1754944e-38, %v616_v36  ;;  %vm615_vm3 = vcmp.eq.f32.partialorder %v614_v38, 8.507059e+37 }
  0xc2   : > { %v1033_v33 = vpop.eup %1032 }
  0xc3   : > { %v606_v34 = vmul.f32 %v1033_v33, %v604_v32  ;;  %vm611_vm0 = vweird.f32 %v1033_v33 }
  0xc4   : > { %vm612_vm2 = vmor %vm610_vm1, %vm611_vm0 }
  0xc5   : > { %v607_v35 = vsub.f32 1.0, %v606_v34 }
  0xc7   : > { %v608_v37 = vmul.f32 %v1033_v33, %v607_v35 }
  0xc9   : > { %v609_v39 = vadd.f32 %v1033_v33, %v608_v37 }
  0xcb   : > { %v613_v41 = vsel %vm612_vm2, %v1033_v33, %v609_v39 }
  0xcc   : > { %v618_v42 = vsel %vm615_vm3, %v617_v40, %v613_v41 }
  0xcd   : > { %v620_v43 = vmul.f32 %v618_v42, %v598_v27 }
  0xcf   : > { %v621_v44 = vpack.c.bf16 %v620_v43, %v620_v43 }
  0xd1   : > { %971 = vmatmul.msk.bf16.vlgmr.msra.gmra.mxu2 %vm642_vm4, %v621_v44 }
 0x154   : > { %v655_v58 = vpop.f32.mrf.mxu2 }
 0x155   : > { %v656_v60 = vadd.f32 %v1029_v57, %v655_v58 }
 0x157   : > { %v660_v61 = vadd.f32 %v659_v59, %v656_v60 }
 0x159   : > { %v972_v62 = vmul.f32 -1.442695, %v660_v61 }
 0x15b   : > { %1034 = vpow2.f32 %v972_v62 }
 0x15c   : > { %v657_v63 = vpop.f32.mrf.mxu2 }
 0x161   : > { %v1035_v0 = vpop.eup %1034 }
 0x162   : > { %v664_v1 = vadd.f32 1.0, %v1035_v0 }
 0x164   : > { %1036 = vrcp.f32 %v664_v1  ;;  %v676_v5 = vand.u32 2147483648, %v664_v1  ;;  %v674_v7 = vand.u32 2147483647, %v664_v1  ;;  %vm670_vm6 = vweird.f32 %v664_v1 }
 0x166   : > { %v677_v9 = vor.u32 1.1754944e-38, %v676_v5  ;;  %vm675_vm8 = vcmp.eq.f32.partialorder %v674_v7, 8.507059e+37 }
 0x16a   : > { %v1037_v2 = vpop.eup %1036 }
 0x16b   : > { %v666_v3 = vmul.f32 %v1037_v2, %v664_v1  ;;  %vm671_vm5 = vweird.f32 %v1037_v2 }
 0x16c   : > { %vm672_vm7 = vmor %vm670_vm6, %vm671_vm5 }
 0x16d   : > { %v667_v4 = vsub.f32 1.0, %v666_v3 }
 0x16f   : > { %v668_v6 = vmul.f32 %v1037_v2, %v667_v4 }
 0x171   : > { %v669_v8 = vadd.f32 %v1037_v2, %v668_v6 }
 0x173   : > { %v673_v10 = vsel %vm672_vm7, %v1037_v2, %v669_v8 }
 0x174   : > { %v678_v11 = vsel %vm675_vm8, %v677_v9, %v673_v10 }
 0x175   : > { %v680_v12 = vmul.f32 %v678_v11, %v660_v61 }
 0x177   : > { %v681_v13 = vpack.c.bf16 %v680_v12, %v680_v12 }
 0x179   : > { %989 = vmatmul.msk.bf16.vlgmr.msra.gmra.mxu3 %vm642_vm4, %v681_v13  ;;  %990 = vmatmul.msk.bf16.vlgmr.msrb.gmra.mxu2 %vm642_vm4, %v681_v13 }
 0x1fc   : > { %v724_v17 = vpop.f32.mrf.mxu3  ;;  %v737_v18 = vpop.f32.mrf.mxu2 }
 0x1fd   : > { %v738_v19 = vadd.f32 %v737_v18, %v689_v15  ;;  %v725_v20 = vadd.f32 %v724_v17, %v688_v16 }
 0x1ff   : > { %v743_v21 = vrot.slane %v738_v19, 6 }
 0x200   : > { %753 = sbr.rel (%p991_p4) target bundleno = 519 (0x207), region = 56 }
 0x201   : > { %v745_v22 = vsel %vm744_vm9, %v725_v20, %v743_v21 }
 0x202   : > { %749 = vst.msk [vmem:[%s432_s28] sm:$0xf] %vm748_vm11, %v745_v22 }
 0x204   : > { %v726_v23 = vpop.f32.mrf.mxu3  ;;  %v739_v24 = vpop.f32.mrf.mxu2 }
 0x205   : > { %vm754_vm12 = vcmask 254976  }
 0x206   : > { %755 = vst.msk [vmem:[%s1177_s9] sm:$0x3] %vm754_vm12, %v680_v12 }
 0x207 PF: > { %s20_s30 = sadd.s32 1, %s1044_s30  }
 0x208   : > { %p17_p5 = scmp.ge.s32.totalorder %s20_s30, 4  }
 0x20a   :  { %19 = sbr.rel (!%p17_p5) target bundleno = 1 (0x1), region = 112 }

// kernel: dit_forward.9
= control target key start
LH: loop header
LB: loop body
LE: loop exit
PB: predicated region body
PF: predicated region fallthrough
CT: control target
= control target key end

     0   :  { %vm68_vm0 = vcmask 261120   ;;  %v729_v29 = vmov 32.0   ;;  %s1368_s0 = inlined_call_operand.vmem [shape: f32[2,64,32], index: 0, kind: input, shape index: {}]   ;;  %s1369_s4 = inlined_call_operand.vmem [shape: bf16[32,32], index: 4, kind: input, shape index: {}]   ;;  %s1370_s2 = inlined_call_operand.vmem [shape: bf16[32,32], index: 2, kind: input, shape index: {}]   ;;  %s1371_s1 = inlined_call_operand.vmem [shape: f32[2,32], index: 1, kind: input, shape index: {}]   ;;  %s1372_s5 = inlined_call_operand.vmem [shape: f32[1,32], index: 5, kind: input, shape index: {}]   ;;  %s1373_s3 = inlined_call_operand.vmem [shape: f32[1,32], index: 3, kind: input, shape index: {}]   ;;  %s1374_s6 = inlined_call_operand.vmem [shape: bf16[32,32], index: 6, kind: input, shape index: {}]   ;;  %s1375_s7 = inlined_call_operand.vmem [shape: f32[32,1], index: 7, kind: input, shape index: {}]   ;;  %s1376_s8 = inlined_call_operand.vmem [shape: f32[32,128], index: 8, kind: output, shape index: {}]  }
   0x1   :  { %v779_v0 = vld [vmem:[%s1368_s0 + $0x70] sm:$0xff]  ;;  %v784_v1 = vld [vmem:[%s1368_s0 + $0x60] sm:$0xff]  ;;  %v800_v6 = vld [vmem:[%s1368_s0 + $0x78] sm:$0xff]  ;;  %695 = vrcp.f32 %v729_v29 }
   0x2   :  { %v160_v2 = vsel %vm68_vm0, %v779_v0, 0.0  ;;  %v154_v3 = vsel %vm68_vm0, %v784_v1, 0.0  ;;  %v793_v4 = vld [vmem:[%s1368_s0 + $0x50] sm:$0xff]  ;;  %v805_v7 = vld [vmem:[%s1368_s0 + $0x68] sm:$0xff]  ;;  %v810_v8 = vld [vmem:[%s1368_s0 + $0x58] sm:$0xff]  ;;  %v163_v9 = vsel %vm68_vm0, %v800_v6, 0.0 }
   0x3   :  { %161 = vadd.xlane.f32.xlu0 %v160_v2  ;;  %155 = vadd.xlane.f32.xlu1 %v154_v3  ;;  %v148_v5 = vsel %vm68_vm0, %v793_v4, 0.0  ;;  %v157_v10 = vsel %vm68_vm0, %v805_v7, 0.0  ;;  %v151_v11 = vsel %vm68_vm0, %v810_v8, 0.0  ;;  %v821_v12 = vld [vmem:[%s1368_s0 + $0x48] sm:$0xff]  ;;  %v826_v13 = vld [vmem:[%s1368_s0 + $0x40] sm:$0xff]  ;;  %v831_v14 = vld [vmem:[%s1368_s0 + $0x30] sm:$0xff] }
   0x4   :  { %149 = vadd.xlane.f32.xlu2 %v148_v5  ;;  %v145_v15 = vsel %vm68_vm0, %v821_v12, 0.0  ;;  %v142_v16 = vsel %vm68_vm0, %v826_v13, 0.0  ;;  %v136_v17 = vsel %vm68_vm0, %v831_v14, 0.0  ;;  %v842_v18 = vld [vmem:[%s1368_s0 + $0x38] sm:$0xff]  ;;  %v847_v19 = vld [vmem:[%s1368_s0 + $0x20] sm:$0xff]  ;;  %v852_v20 = vld [vmem:[%s1368_s0 + $0x28] sm:$0xff] }
   0x5   :  { %v139_v21 = vsel %vm68_vm0, %v842_v18, 0.0  ;;  %v130_v22 = vsel %vm68_vm0, %v847_v19, 0.0  ;;  %v133_v23 = vsel %vm68_vm0, %v852_v20, 0.0  ;;  %v863_v24 = vld [vmem:[%s1368_s0 + $0x18] sm:$0xff]  ;;  %v868_v25 = vld [vmem:[%s1368_s0 + $0x10] sm:$0xff]  ;;  %v678_v28 = vld [vmem:[%s1369_s4 + $0x8] sm:$0xff] }
   0x6   :  { %v127_v26 = vsel %vm68_vm0, %v863_v24, 0.0  ;;  %v124_v27 = vsel %vm68_vm0, %v868_v25, 0.0  ;;  %111 = vmatpush.bf16.msra.mxu1 %v678_v28  ;;  %v676_v30 = vld [vmem:[%s1370_s2 + $0x8] sm:$0xff]  ;;  %v677_v31 = vld [vmem:[%s1369_s4] sm:$0xff] }
   0x7   :  { %v696_v32 = vpop.eup %695  ;;  %78 = vmatpush.bf16.msra.mxu0 %v676_v30  ;;  %v46_v33 = vld [vmem:[%s1371_s1] sm:$0x3] }
   0x8   :  { %v675_v34 = vld [vmem:[%s1370_s2] sm:$0xff]  ;;  %v47_v35 = vpack.c.bf16 %v46_v33, %v46_v33  ;;  %v167_v36 = vmul.f32 32.0, %v696_v32  ;;  %vm171_vm1 = vweird.f32 %v696_v32 }
   0x9   :  { %v914_v58 = vld [vmem:[%s1368_s0] sm:$0xff] }
   0xa   :  { %112 = vmatpush.bf16.msra.mxu1 %v677_v31  ;;  %v168_v37 = vsub.f32 1.0, %v167_v36 }
   0xb   :  { %164 = vadd.xlane.f32.xlu0 %v163_v9  ;;  %158 = vadd.xlane.f32.xlu1 %v157_v10 }
   0xc   :  { %152 = vadd.xlane.f32.xlu2 %v151_v11  ;;  %79 = vmatpush.bf16.msra.mxu0 %v675_v34  ;;  %v169_v38 = vmul.f32 %v696_v32, %v168_v37 }
   0xd   :  { %664 = vmatmul.msk.bf16.vlgmr.msra.gmra.mxu1 %vm68_vm0, %v47_v35 }
   0xe   :  { %v170_v39 = vadd.f32 %v696_v32, %v169_v38 }
   0xf   :  { %655 = vmatmul.msk.bf16.vlgmr.msra.gmra.mxu0 %vm68_vm0, %v47_v35 }
  0x10   :  { %v891_v40 = vsel %vm171_vm1, %v696_v32, %v170_v39 }
  0x13   :  { %146 = vadd.xlane.f32.xlu1 %v145_v15  ;;  %143 = vadd.xlane.f32.xlu0 %v142_v16 }
  0x14   :  { %137 = vadd.xlane.f32.xlu2 %v136_v17 }
  0x1b   :  { %140 = vadd.xlane.f32.xlu0 %v139_v21  ;;  %131 = vadd.xlane.f32.xlu1 %v130_v22 }
  0x1c   :  { %134 = vadd.xlane.f32.xlu2 %v133_v23 }
  0x23   :  { %128 = vadd.xlane.f32.xlu0 %v127_v26 }
  0x24   :  { %125 = vadd.xlane.f32.xlu2 %v124_v27 }
  0x76   :  { %v162_v41 = vpop.xlane.xlu0 %161  ;;  %v156_v42 = vpop.xlane.xlu1 %155 }
  0x77   :  { %v187_v43 = vmul.f32 %v891_v40, %v162_v41  ;;  %v150_v44 = vpop.xlane.xlu2 %149  ;;  %v185_v50 = vmul.f32 %v891_v40, %v156_v42 }
  0x78   :  { %v183_v53 = vmul.f32 %v891_v40, %v150_v44 }
  0x79   :  { %v895_v45 = vsub.f32 %v779_v0, %v187_v43  ;;  %v917_v59 = vsub.f32 %v784_v1, %v185_v50  ;;  %v118_v0 = vsel %vm68_vm0, %v914_v58, 0.0 }
  0x7a   :  { %v920_v60 = vsub.f32 %v793_v4, %v183_v53 }
  0x7b   :  { %v219_v46 = vmul.f32 %v895_v45, %v895_v45 }
  0x7d   :  { %v263_v47 = vsel %vm68_vm0, %v219_v46, 0.0 }
  0x7e   :  { %v165_v48 = vpop.xlane.xlu0 %164  ;;  %v159_v49 = vpop.xlane.xlu1 %158  ;;  %264 = vadd.xlane.f32.xlu0 %v263_v47 }
  0x7f   :  { %v188_v51 = vmul.f32 %v891_v40, %v165_v48  ;;  %v186_v52 = vmul.f32 %v891_v40, %v159_v49  ;;  %v153_v54 = vpop.xlane.xlu2 %152 }
  0x80   :  { %v184_v55 = vmul.f32 %v891_v40, %v153_v54  ;;  %v679_v54 = vld [vmem:[%s1374_s6] sm:$0xff] }
  0x81   :  { %v906_v56 = vsub.f32 %v800_v6, %v188_v51  ;;  %v909_v57 = vsub.f32 %v805_v7, %v186_v52  ;;  %v217_v7 = vmul.f32 %v917_v59, %v917_v59 }
  0x82   :  { %v927_v63 = vsub.f32 %v810_v8, %v184_v55  ;;  %v215_v8 = vmul.f32 %v920_v60, %v920_v60 }
  0x83   :  { %v220_v61 = vmul.f32 %v906_v56, %v906_v56  ;;  %v218_v62 = vmul.f32 %v909_v57, %v909_v57  ;;  %v257_v15 = vsel %vm68_vm0, %v217_v7, 0.0 }
  0x84   :  { %v216_v10 = vmul.f32 %v927_v63, %v927_v63  ;;  %v251_v16 = vsel %vm68_vm0, %v215_v8, 0.0 }
  0x85   :  { %v266_v2 = vsel %vm68_vm0, %v220_v61, 0.0  ;;  %v260_v1 = vsel %vm68_vm0, %v218_v62, 0.0 }
  0x86   :  { %267 = vadd.xlane.f32.xlu1 %v266_v2  ;;  %261 = vadd.xlane.f32.xlu2 %v260_v1  ;;  %v147_v3 = vpop.xlane.xlu1 %146  ;;  %v144_v4 = vpop.xlane.xlu0 %143  ;;  %v254_v21 = vsel %vm68_vm0, %v216_v10, 0.0 }
  0x87   :  { %119 = vadd.xlane.f32.xlu0 %v118_v0  ;;  %v182_v5 = vmul.f32 %v891_v40, %v147_v3  ;;  %v138_v6 = vpop.xlane.xlu2 %137  ;;  %v181_v26 = vmul.f32 %v891_v40, %v144_v4 }
  0x88   :  { %v179_v9 = vmul.f32 %v891_v40, %v138_v6 }
  0x89   :  { %v942_v11 = vsub.f32 %v821_v12, %v182_v5  ;;  %v963_v31 = vsub.f32 %v826_v13, %v181_v26 }
  0x8a   :  { %v947_v17 = vsub.f32 %v831_v14, %v179_v9  ;;  %v958_v14 = vld [vmem:[%s1368_s0 + $0x8] sm:$0xff]  ;;  %v114_v55 = vpop.f32.mrf.mxu1 }
  0x8b   :  { %v214_v28 = vmul.f32 %v942_v11, %v942_v11  ;;  %v121_v34 = vsel %vm68_vm0, %v958_v14, 0.0  ;;  %v213_v39 = vmul.f32 %v963_v31, %v963_v31 }
  0x8c   :  { %v211_v30 = vmul.f32 %v947_v17, %v947_v17  ;;  %v81_v61 = vpop.f32.mrf.mxu0 }
  0x8d   :  { %v248_v33 = vsel %vm68_vm0, %v214_v28, 0.0  ;;  %v245_v44 = vsel %vm68_vm0, %v213_v39, 0.0 }
  0x8e   :  { %258 = vadd.xlane.f32.xlu1 %v257_v15  ;;  %252 = vadd.xlane.f32.xlu2 %v251_v16  ;;  %v141_v22 = vpop.xlane.xlu0 %140  ;;  %v132_v23 = vpop.xlane.xlu1 %131  ;;  %v239_v36 = vsel %vm68_vm0, %v211_v30, 0.0 }
  0x8f   :  { %255 = vadd.xlane.f32.xlu0 %v254_v21  ;;  %v135_v27 = vpop.xlane.xlu2 %134  ;;  %v177_v12 = vmul.f32 %v891_v40, %v132_v23  ;;  %v180_v38 = vmul.f32 %v891_v40, %v141_v22  ;;  %v693_v21 = vld [vmem:[%s1372_s5] ss:$0 sm:$0xff] }
  0x90   :  { %v178_v29 = vmul.f32 %v891_v40, %v135_v27 }
  0x91   :  { %v966_v32 = vsub.f32 %v847_v19, %v177_v12  ;;  %v984_v41 = vsub.f32 %v842_v18, %v180_v38  ;;  %v1029_v12 = vadd.f32 %v693_v21, %v114_v55 }
  0x92   :  { %v972_v35 = vsub.f32 %v852_v20, %v178_v29  ;;  %v116_v62 = vpop.f32.mrf.mxu1 }
  0x93   :  { %v209_v19 = vmul.f32 %v966_v32, %v966_v32  ;;  %v212_v18 = vmul.f32 %v984_v41, %v984_v41  ;;  %v478_v39 = vrot.slane %v1029_v12, 1 }
  0x94   :  { %v210_v20 = vmul.f32 %v972_v35, %v972_v35  ;;  %v83_v0 = vpop.f32.mrf.mxu0 }
  0x95   :  { %v233_v43 = vsel %vm68_vm0, %v209_v19, 0.0  ;;  %v242_v51 = vsel %vm68_vm0, %v212_v18, 0.0 }
  0x96   :  { %249 = vadd.xlane.f32.xlu2 %v248_v33  ;;  %122 = vadd.xlane.f32.xlu1 %v121_v34  ;;  %v129_v37 = vpop.xlane.xlu0 %128  ;;  %v236_v46 = vsel %vm68_vm0, %v210_v20, 0.0 }
  0x97   :  { %240 = vadd.xlane.f32.xlu0 %v239_v36  ;;  %v176_v13 = vmul.f32 %v891_v40, %v129_v37  ;;  %v126_v47 = vpop.xlane.xlu2 %125  ;;  %v694_v37 = vld [vmem:[%s1373_s3] ss:$0 sm:$0xff] }
  0x98   :  { %v175_v49 = vmul.f32 %v891_v40, %v126_v47  ;;  %v1054_v18 = vadd.f32 %v694_v37, %v81_v61 }
  0x99   :  { %v987_v42 = vsub.f32 %v863_v24, %v176_v13 }
  0x9a   :  { %v999_v50 = vsub.f32 %v868_v25, %v175_v49  ;;  %v680_v25 = vld [vmem:[%s1374_s6 + $0x8] sm:$0xff]  ;;  %v505_v62 = vrot.slane %v1054_v18, 1 }
  0x9b   :  { %v208_v48 = vmul.f32 %v987_v42, %v987_v42 }
  0x9c   :  { %v207_v52 = vmul.f32 %v999_v50, %v999_v50 }
  0x9d   :  { %v230_v24 = vsel %vm68_vm0, %v208_v48, 0.0 }
  0x9e   :  { %234 = vadd.xlane.f32.xlu2 %v233_v43  ;;  %246 = vadd.xlane.f32.xlu1 %v245_v44  ;;  %v227_v53 = vsel %vm68_vm0, %v207_v52, 0.0 }
  0x9f   :  { %237 = vadd.xlane.f32.xlu0 %v236_v46 }
  0xa6   :  { %231 = vadd.xlane.f32.xlu2 %v230_v24  ;;  %243 = vadd.xlane.f32.xlu1 %v242_v51 }
  0xae   :  { %228 = vadd.xlane.f32.xlu1 %v227_v53  ;;  %v481_v53 = vadd.f32 1.0, %v478_v39 }
  0xcf   :  { %574 = vxpose.xlu2.c.b16.start [1/2] (short) (narrow) %v679_v54, 32 }
  0xdf   :  { %575 = vxpose.xlu2.c.b16.end [2/2] (short) (narrow) %v680_v25, 32 }
  0xf1   :  { %v265_v2 = vpop.xlane.xlu0 %264 }
  0xf2   :  { %v283_v1 = vmul.f32 %v265_v2, %v891_v40 }
  0xf4   :  { %v299_v3 = vadd.f32 1e-06, %v283_v1 }
  0xf6   :  { %697 = vrsqrt.f32 %v299_v3  ;;  %vm447_vm3 = vweird.f32 %v299_v3 }
  0xf9   :  { %v268_v4 = vpop.xlane.xlu1 %267  ;;  %v262_v5 = vpop.xlane.xlu2 %261 }
  0xfa   :  { %v284_v6 = vmul.f32 %v268_v4, %v891_v40  ;;  %v282_v7 = vmul.f32 %v262_v5, %v891_v40  ;;  %v120_v8 = vpop.xlane.xlu0 %119 }
  0xfb   :  { %v173_v9 = vmul.f32 %v891_v40, %v120_v8 }
  0xfc   :  { %v698_v10 = vpop.eup %697  ;;  %v1015_v15 = vadd.f32 1e-06, %v284_v6  ;;  %v1017_v16 = vadd.f32 1e-06, %v282_v7  ;;  %v1074_v7 = vperm.slane %v481_v53, 0 }
  0xfd   :  { %v442_v22 = vmul.f32 %v698_v10, %v299_v3  ;;  %v1023_v23 = vsub.f32 %v914_v58, %v173_v9  ;;  %vm448_vm2 = vweird.f32 %v698_v10 }
  0xfe   :  { %699 = vrsqrt.f32 %v1015_v15  ;;  %vm1058_vm4 = vmor %vm447_vm3, %vm448_vm2  ;;  %vm457_vm6 = vweird.f32 %v1015_v15  ;;  %vm437_vm8 = vweird.f32 %v1017_v16 }
  0xff   :  { %v443_v26 = vmul.f32 %v698_v10, %v442_v22  ;;  %701 = vrsqrt.f32 %v1017_v16  ;;  %v205_v27 = vmul.f32 %v1023_v23, %v1023_v23 }
 0x101   :  { %v444_v28 = vmul.f32 0.5, %v443_v26  ;;  %v259_v29 = vpop.xlane.xlu1 %258  ;;  %v253_v30 = vpop.xlane.xlu2 %252  ;;  %v221_v33 = vsel %vm68_vm0, %v205_v27, 0.0 }
 0x102   :  { %v281_v34 = vmul.f32 %v259_v29, %v891_v40  ;;  %v279_v58 = vmul.f32 %v253_v30, %v891_v40  ;;  %222 = vadd.xlane.f32.xlu0 %v221_v33  ;;  %v256_v36 = vpop.xlane.xlu0 %255  ;;  %v1097_v29 = vperm.slane %v505_v62, 0 }
 0x103   :  { %v445_v38 = vsub.f32 1.5, %v444_v28  ;;  %v280_v13 = vmul.f32 %v256_v36, %v891_v40 }
 0x104   :  { %v1038_v19 = vpop.eup %699  ;;  %v1041_v20 = vadd.f32 1e-06, %v281_v34  ;;  %v1043_v43 = vadd.f32 1e-06, %v279_v58 }
 0x105   :  { %v1045_v44 = vpop.eup %701  ;;  %v446_v46 = vmul.f32 %v698_v10, %v445_v38  ;;  %v452_v47 = vmul.f32 %v1038_v19, %v1015_v15  ;;  %v1049_v48 = vadd.f32 1e-06, %v280_v13  ;;  %vm458_vm5 = vweird.f32 %v1038_v19 }
 0x106   :  { %v432_v49 = vmul.f32 %v1045_v44, %v1017_v16  ;;  %703 = vrsqrt.f32 %v1041_v20  ;;  %vm1091_vm7 = vmor %vm457_vm6, %vm458_vm5  ;;  %vm438_vm9 = vweird.f32 %v1045_v44  ;;  %vm427_vm12 = vweird.f32 %v1041_v20 }
 0x107   :  { %v453_v24 = vmul.f32 %v1038_v19, %v452_v47  ;;  %705 = vrsqrt.f32 %v1043_v43  ;;  %v450_v54 = vsel %vm1058_vm4, %v698_v10, %v446_v46  ;;  %vm1131_vm11 = vmor %vm437_vm8, %vm438_vm9  ;;  %vm407_vm13 = vweird.f32 %v1043_v43 }
 0x108   :  { %v433_v52 = vmul.f32 %v1045_v44, %v432_v49  ;;  %707 = vrsqrt.f32 %v1049_v48  ;;  %v475_v9 = vmul.f32 %v450_v54, %v895_v45  ;;  %vm417_vm14 = vweird.f32 %v1049_v48 }
 0x109   :  { %v454_v55 = vmul.f32 0.5, %v453_v24  ;;  %v250_v61 = vpop.xlane.xlu2 %249  ;;  %v123_v25 = vpop.xlane.xlu1 %122 }
 0x10a   :  { %v278_v0 = vmul.f32 %v250_v61, %v891_v40  ;;  %v174_v2 = vmul.f32 %v891_v40, %v123_v25  ;;  %v241_v1 = vpop.xlane.xlu0 %240  ;;  %v434_v4 = vmul.f32 0.5, %v433_v52  ;;  %v502_v39 = vmul.f32 %v1074_v7, %v475_v9 }
 0x10b   :  { %v455_v3 = vsub.f32 1.5, %v454_v55  ;;  %v275_v5 = vmul.f32 %v241_v1, %v891_v40 }
 0x10c   :  { %v1071_v6 = vpop.eup %703  ;;  %v1076_v8 = vadd.f32 1e-06, %v278_v0  ;;  %v1085_v26 = vsub.f32 %v958_v14, %v174_v2  ;;  %v435_v30 = vsub.f32 1.5, %v434_v4 }
 0x10d   :  { %v1079_v10 = vpop.eup %705  ;;  %v456_v21 = vmul.f32 %v1038_v19, %v455_v3  ;;  %v422_v22 = vmul.f32 %v1071_v6, %v1041_v20  ;;  %v1087_v27 = vadd.f32 1e-06, %v275_v5  ;;  %vm428_vm10 = vweird.f32 %v1071_v6 }
 0x10e   :  { %v1089_v28 = vpop.eup %707  ;;  %v402_v45 = vmul.f32 %v1079_v10, %v1043_v43  ;;  %709 = vrsqrt.f32 %v1076_v8  ;;  %v206_v13 = vmul.f32 %v1085_v26, %v1085_v26  ;;  %v436_v52 = vmul.f32 %v1045_v44, %v435_v30  ;;  %vm1155_vm1 = vmor %vm427_vm12, %vm428_vm10 }
 0x10f   :  { %v460_v14 = vsel %vm1091_vm7, %v1038_v19, %v456_v21  ;;  %v423_v33 = vmul.f32 %v1071_v6, %v422_v22  ;;  %v412_v34 = vmul.f32 %v1089_v28, %v1049_v48  ;;  %711 = vrsqrt.f32 %v1087_v27 }
 0x110   :  { %v403_v58 = vmul.f32 %v1079_v10, %v402_v45  ;;  %v476_v51 = vmul.f32 %v460_v14, %v906_v56  ;;  %v224_v54 = vsel %vm68_vm0, %v206_v13, 0.0  ;;  %vm408_vm15 = vweird.f32 %v1079_v10 }
 0x111   :  { %v424_v36 = vmul.f32 0.5, %v423_v33  ;;  %v413_v37 = vmul.f32 %v1089_v28, %v412_v34  ;;  %v235_v38 = vpop.xlane.xlu2 %234  ;;  %v247_v19 = vpop.xlane.xlu1 %246  ;;  %225 = vadd.xlane.f32.xlu1 %v224_v54  ;;  %v524_v21 = vadd.f32 %v1097_v29, %v502_v39  ;;  %v440_v22 = vsel %vm1131_vm11, %v1045_v44, %v436_v52  ;;  %vm1171_vm2 = vmor %vm407_vm13, %vm408_vm15 }
 0x112   :  { %v404_v46 = vmul.f32 0.5, %v403_v58  ;;  %v273_v47 = vmul.f32 %v235_v38, %v891_v40  ;;  %v277_v49 = vmul.f32 %v247_v19, %v891_v40  ;;  %v238_v24 = vpop.xlane.xlu0 %237  ;;  %v503_v4 = vmul.f32 %v1074_v7, %v476_v51 }
 0x113   :  { %v425_v53 = vsub.f32 1.5, %v424_v36  ;;  %v414_v61 = vmul.f32 0.5, %v413_v37  ;;  %v274_v0 = vmul.f32 %v238_v24, %v891_v40  ;;  %vm418_vm3 = vweird.f32 %v1089_v28 }
 0x114   :  { %v1120_v55 = vpop.eup %709  ;;  %v1122_v25 = vadd.f32 1e-06, %v273_v47  ;;  %v1124_v62 = vadd.f32 1e-06, %v277_v49  ;;  %v405_v1 = vsub.f32 1.5, %v404_v46  ;;  %v525_v44 = vadd.f32 %v1097_v29, %v503_v4  ;;  %vm1198_vm6 = vmor %vm417_vm14, %vm418_vm3 }
 0x115   :  { %v426_v2 = vmul.f32 %v1071_v6, %v425_v53  ;;  %v392_v3 = vmul.f32 %v1120_v55, %v1076_v8  ;;  %v1139_v5 = vpop.eup %711  ;;  %v415_v15 = vsub.f32 1.5, %v414_v61  ;;  %v1160_v45 = vadd.f32 1e-06, %v274_v0 }
 0x116   :  { %713 = vrsqrt.f32 %v1122_v25  ;;  %v362_v9 = vmul.f32 %v1139_v5, %v1087_v27  ;;  %v406_v30 = vmul.f32 %v1079_v10, %v405_v1  ;;  %vm397_vm4 = vweird.f32 %v1076_v8 }
 0x117   :  { %v393_v16 = vmul.f32 %v1120_v55, %v392_v3  ;;  %715 = vrsqrt.f32 %v1124_v62  ;;  %v430_v14 = vsel %vm1155_vm1, %v1071_v6, %v426_v2  ;;  %v533_v19 = vpack.c.bf16 %v525_v44, %v524_v21 }
 0x118   :  { %v363_v37 = vmul.f32 %v1139_v5, %v362_v9  ;;  %717 = vrsqrt.f32 %v1160_v45  ;;  %v473_v47 = vmul.f32 %v430_v14, %v917_v59  ;;  %v474_v49 = vmul.f32 %v440_v22, %v909_v57 }
 0x119   :  { %v394_v33 = vmul.f32 0.5, %v393_v16  ;;  %v232_v34 = vpop.xlane.xlu2 %231  ;;  %v244_v58 = vpop.xlane.xlu1 %243  ;;  %v410_v24 = vsel %vm1171_vm2, %v1079_v10, %v406_v30  ;;  %v416_v51 = vmul.f32 %v1089_v28, %v415_v15  ;;  %vm398_vm5 = vweird.f32 %v1120_v55 }
 0x11a   :  { %v272_v6 = vmul.f32 %v232_v34, %v891_v40  ;;  %v276_v38 = vmul.f32 %v244_v58, %v891_v40  ;;  %v364_v59 = vmul.f32 0.5, %v363_v37  ;;  %v618_v57 = vsel %vm68_vm0, %v533_v19, 0  ;;  %vm1211_vm8 = vmor %vm397_vm4, %vm398_vm5 }
 0x11b   :  { %v395_v13 = vsub.f32 1.5, %v394_v33  ;;  %vm387_vm7 = vweird.f32 %v1124_v62  ;;  %620 = vmatpush.bf16.xpose.msra.mxu2 %v618_v57  ;;  %681 = vmatpush.bf16.xpose.msra.mxu3 %v618_v57  ;;  %v500_v56 = vmul.f32 %v1074_v7, %v473_v47  ;;  %v501_v2 = vmul.f32 %v1074_v7, %v474_v49 }
 0x11c   :  { %v1181_v39 = vpop.eup %713  ;;  %v1183_v43 = vadd.f32 1e-06, %v272_v6  ;;  %v1185_v46 = vadd.f32 1e-06, %v276_v38  ;;  %v471_v1 = vmul.f32 %v410_v24, %v920_v60  ;;  %v420_v3 = vsel %vm1198_vm6, %v1089_v28, %v416_v51 }
 0x11d   :  { %v342_v52 = vmul.f32 %v1181_v39, %v1122_v25  ;;  %v716_v53 = vpop.eup %715  ;;  %v396_v61 = vmul.f32 %v1120_v55, %v395_v13  ;;  %v365_v21 = vsub.f32 1.5, %v364_v59  ;;  %v522_v22 = vadd.f32 %v1097_v29, %v500_v56 }
 0x11e   :  { %v382_v10 = vmul.f32 %v716_v53, %v1124_v62  ;;  %719 = vrsqrt.f32 %v1183_v43  ;;  %v1207_v0 = vpop.eup %717  ;;  %v523_v20 = vadd.f32 %v1097_v29, %v501_v2  ;;  %vm388_vm9 = vweird.f32 %v716_v53 }
 0x11f   :  { %721 = vrsqrt.f32 %v1185_v46  ;;  %v343_v4 = vmul.f32 %v1181_v39, %v342_v52  ;;  %v352_v16 = vmul.f32 %v1207_v0, %v1160_v45  ;;  %v400_v60 = vsel %vm1211_vm8, %v1120_v55, %v396_v61  ;;  %vm1242_vm12 = vmor %vm387_vm7, %vm388_vm9 }
 0x120   :  { %v383_v8 = vmul.f32 %v716_v53, %v382_v10  ;;  %v532_v30 = vpack.c.bf16 %v523_v20, %v522_v22  ;;  %v472_v44 = vmul.f32 %v420_v3, %v927_v63  ;;  %v498_v34 = vmul.f32 %v1074_v7, %v471_v1 }
 0x121   :  { %v229_v9 = vpop.xlane.xlu1 %228  ;;  %v353_v28 = vmul.f32 %v1207_v0, %v352_v16  ;;  %vm367_vm10 = vweird.f32 %v1087_v27  ;;  %vm368_vm11 = vweird.f32 %v1139_v5  ;;  %v344_v36 = vmul.f32 0.5, %v343_v4 }
 0x122   :  { %v271_v15 = vmul.f32 %v229_v9, %v891_v40  ;;  %v384_v14 = vmul.f32 0.5, %v383_v8  ;;  %v615_v38 = vsel %vm68_vm0, %v532_v30, 0  ;;  %v470_v63 = vmul.f32 %v400_v60, %v942_v11  ;;  %vm1251_vm13 = vmor %vm367_vm10, %vm368_vm11 }
 0x123   :  { %v480_v13 = vadd.f32 1.0, %v1029_v12  ;;  %v366_v27 = vmul.f32 %v1139_v5, %v365_v21  ;;  %v354_v47 = vmul.f32 0.5, %v353_v28  ;;  %621 = vmatpush.bf16.xpose.msra.mxu2 %v615_v38  ;;  %vm347_vm14 = vweird.f32 %v1122_v25  ;;  %682 = vmatpush.bf16.xpose.msra.mxu3 %v615_v38 }
 0x124   :  { %v1232_v33 = vadd.f32 1e-06, %v271_v15  ;;  %v1236_v58 = vpop.eup %719  ;;  %v385_v37 = vsub.f32 1.5, %v384_v14  ;;  %v499_v24 = vmul.f32 %v1074_v7, %v472_v44  ;;  %v520_v11 = vadd.f32 %v1097_v29, %v498_v34 }
 0x125   :  { %v722_v55 = vpop.eup %721  ;;  %v345_v51 = vsub.f32 1.5, %v344_v36  ;;  %vm357_vm15 = vweird.f32 %v1160_v45  ;;  %v332_v52 = vmul.f32 %v1236_v58, %v1183_v43  ;;  %v497_v61 = vmul.f32 %v1074_v7, %v470_v63 }
 0x126   :  { %723 = vrsqrt.f32 %v1232_v33  ;;  %v386_v19 = vmul.f32 %v716_v53, %v385_v37  ;;  %v372_v62 = vmul.f32 %v722_v55, %v1185_v46  ;;  %v521_v59 = vadd.f32 %v1097_v29, %v499_v24 }
 0x127   :  { %v370_v10 = vsel %vm1251_vm13, %v1139_v5, %v366_v27  ;;  %vm348_vm1 = vweird.f32 %v1181_v39  ;;  %v355_v48 = vsub.f32 1.5, %v354_v47  ;;  %vm377_vm2 = vweird.f32 %v1185_v46  ;;  %v538_v5 = vld [vmem:[%s1375_s7] sm:$0xff] }
 0x128   :  { %v390_v12 = vsel %vm1242_vm12, %v716_v53, %v386_v19  ;;  %v373_v54 = vmul.f32 %v722_v55, %v372_v62  ;;  %vm378_vm3 = vweird.f32 %v722_v55  ;;  %v531_v2 = vpack.c.bf16 %v521_v59, %v520_v11  ;;  %vm1279_vm5 = vmor %vm347_vm14, %vm348_vm1 }
 0x129   :  { %v469_v57 = vmul.f32 %v390_v12, %v963_v31  ;;  %v346_v3 = vmul.f32 %v1181_v39, %v345_v51  ;;  %vm358_vm4 = vweird.f32 %v1207_v0  ;;  %v333_v31 = vmul.f32 %v1236_v58, %v332_v52  ;;  %vm379_vm6 = vmor %vm377_vm2, %vm378_vm3 }
 0x12a   :  { %v374_v56 = vmul.f32 0.5, %v373_v54  ;;  %v612_v16 = vsel %vm68_vm0, %v531_v2, 0  ;;  %v1286_v21 = vperm.slane %v480_v13, 0  ;;  %v356_v22 = vmul.f32 %v1207_v0, %v355_v48  ;;  %vm1294_vm7 = vmor %vm357_vm15, %vm358_vm4 }
 0x12b   :  { %v496_v1 = vmul.f32 %v1074_v7, %v469_v57  ;;  %v519_v7 = vadd.f32 %v1097_v29, %v497_v61  ;;  %622 = vmatpush.bf16.xpose.msra.mxu2 %v612_v16  ;;  %v467_v25 = vmul.f32 %v370_v10, %v947_v17  ;;  %683 = vmatpush.bf16.xpose.msra.mxu3 %v612_v16  ;;  %v334_v14 = vmul.f32 0.5, %v333_v31  ;;  %v539_v61 = vld [vmem:[%s1375_s7 + $0x8] sm:$0xff] }
 0x12c   :  { %v724_v53 = vpop.eup %723  ;;  %v375_v8 = vsub.f32 1.5, %v374_v56  ;;  %v1299_v30 = vperm.slane %v1054_v18, 0  ;;  %v350_v46 = vsel %vm1279_vm5, %v1181_v39, %v346_v3  ;;  %v360_v17 = vsel %vm1294_vm7, %v1207_v0, %v356_v22 }
 0x12d   :  { %v322_v4 = vmul.f32 %v724_v53, %v1232_v33  ;;  %v518_v9 = vadd.f32 %v1097_v29, %v496_v1  ;;  %v494_v36 = vmul.f32 %v1286_v21, %v467_v25  ;;  %v335_v6 = vsub.f32 1.5, %v334_v14 }
 0x12e   :  { %v376_v60 = vmul.f32 %v722_v55, %v375_v8  ;;  %vm327_vm8 = vweird.f32 %v1232_v33  ;;  %vm328_vm9 = vweird.f32 %v724_v53  ;;  %vm337_vm10 = vweird.f32 %v1183_v43 }
 0x12f   :  { %v323_v20 = vmul.f32 %v724_v53, %v322_v4  ;;  %v530_v29 = vpack.c.bf16 %v519_v7, %v518_v9  ;;  %v465_v39 = vmul.f32 %v350_v46, %v966_v32  ;;  %vm338_vm11 = vweird.f32 %v1236_v58  ;;  %vm329_vm12 = vmor %vm327_vm8, %vm328_vm9  ;;  %v540_v4 = vld [vmem:[%s1375_s7 + $0x10] sm:$0xff] }
 0x130   :  { %v380_v44 = vsel %vm379_vm6, %v722_v55, %v376_v60  ;;  %v466_v55 = vmul.f32 %v360_v17, %v972_v35  ;;  %v336_v33 = vmul.f32 %v1236_v58, %v335_v6  ;;  %vm339_vm13 = vmor %vm337_vm10, %vm338_vm11  ;;  %v730_v10 = vmov 0  }
 0x131   :  { %v324_v28 = vmul.f32 0.5, %v323_v20  ;;  %v468_v34 = vmul.f32 %v380_v44, %v984_v41  ;;  %v609_v37 = vsel %vm68_vm0, %v530_v29, 0  ;;  %v516_v41 = vadd.f32 %v1299_v30, %v494_v36  ;;  %692 = vset.pattern.permute.xlu1 %v730_v10  ;;  %691 = vset.pattern.permute.xlu0 %v730_v10 }
 0x132   :  { %v492_v43 = vmul.f32 %v1286_v21, %v465_v39  ;;  %v493_v32 = vmul.f32 %v1286_v21, %v466_v55  ;;  %v340_v27 = vsel %vm339_vm13, %v1236_v58, %v336_v33  ;;  %549 = vperm.xlu1 %692, %v539_v61   ;;  %544 = vperm.xlu0 %691, %v538_v5  }
 0x133   :  { %v325_v45 = vsub.f32 1.5, %v324_v28  ;;  %v495_v18 = vmul.f32 %v1286_v21, %v468_v34  ;;  %623 = vmatpush.bf16.xpose.msra.mxu2 %v609_v37  ;;  %684 = vmatpush.bf16.xpose.msra.mxu3 %v609_v37  ;;  %v464_v62 = vmul.f32 %v340_v27, %v987_v42 }
 0x134   :  { %v514_v19 = vadd.f32 %v1299_v30, %v492_v43  ;;  %v515_v47 = vadd.f32 %v1299_v30, %v493_v32 }
 0x135   :  { %v326_v0 = vmul.f32 %v724_v53, %v325_v45  ;;  %v517_v38 = vadd.f32 %v1299_v30, %v495_v18  ;;  %v491_v51 = vmul.f32 %v1286_v21, %v464_v62 }
 0x136   :  { %v528_v24 = vpack.c.bf16 %v515_v47, %v514_v19 }
 0x137   :  { %v529_v63 = vpack.c.bf16 %v517_v38, %v516_v41  ;;  %v330_v13 = vsel %vm329_vm12, %v724_v53, %v326_v0  ;;  %v513_v58 = vadd.f32 %v1299_v30, %v491_v51 }
 0x138   :  { %v463_v49 = vmul.f32 %v330_v13, %v999_v50  ;;  %v603_v12 = vsel %vm68_vm0, %v528_v24, 0 }
 0x139   :  { %v606_v35 = vsel %vm68_vm0, %v529_v63, 0 }
 0x13a   :  { %v490_v11 = vmul.f32 %v1286_v21, %v463_v49  ;;  %554 = vperm.xlu1 %692, %v540_v4  }
 0x13b   :  { %624 = vmatpush.bf16.xpose.msra.mxu2 %v606_v35  ;;  %685 = vmatpush.bf16.xpose.msra.mxu3 %v606_v35 }
 0x13c   :  { %v512_v52 = vadd.f32 %v1299_v30, %v490_v11 }
 0x13e   :  { %v527_v54 = vpack.c.bf16 %v513_v58, %v512_v52 }
 0x140   :  { %v600_v50 = vsel %vm68_vm0, %v527_v54, 0 }
 0x143   :  { %625 = vmatpush.bf16.xpose.msra.mxu2 %v603_v12  ;;  %686 = vmatpush.bf16.xpose.msra.mxu3 %v603_v12 }
 0x14b   :  { %626 = vmatpush.bf16.xpose.msra.mxu2 %v600_v50  ;;  %687 = vmatpush.bf16.xpose.msra.mxu3 %v600_v50 }
 0x170   :  { %v582_v17 = vpop.trf.xlu2 }
 0x175   :  { %v223_v59 = vpop.xlane.xlu0 %222 }
 0x176   :  { %v269_v42 = vmul.f32 %v223_v59, %v891_v40 }
 0x178   :  { %v285_v57 = vadd.f32 1e-06, %v269_v42 }
 0x17a   :  { %725 = vrsqrt.f32 %v285_v57  ;;  %vm307_vm14 = vweird.f32 %v285_v57 }
 0x180   :  { %v726_v48 = vpop.eup %725 }
 0x181   :  { %v302_v53 = vmul.f32 %v726_v48, %v285_v57  ;;  %vm308_vm15 = vweird.f32 %v726_v48 }
 0x182   :  { %vm309_vm1 = vmor %vm307_vm14, %vm308_vm15 }
 0x183   :  { %v303_v56 = vmul.f32 %v726_v48, %v302_v53 }
 0x184   :  { %v226_v2 = vpop.xlane.xlu1 %225 }
 0x185   :  { %v270_v1 = vmul.f32 %v226_v2, %v891_v40  ;;  %v304_v31 = vmul.f32 0.5, %v303_v56  ;;  %v541_v40 = vld [vmem:[%s1375_s7 + $0x18] sm:$0xff] }
 0x186   :  { %559 = vperm.xlu1 %692, %v541_v40  }
 0x187   :  { %v286_v3 = vadd.f32 1e-06, %v270_v1  ;;  %v305_v8 = vsub.f32 1.5, %v304_v31 }
 0x189   :  { %727 = vrsqrt.f32 %v286_v3  ;;  %v306_v9 = vmul.f32 %v726_v48, %v305_v8  ;;  %vm317_vm3 = vweird.f32 %v286_v3 }
 0x18b   :  { %v310_v20 = vsel %vm309_vm1, %v726_v48, %v306_v9 }
 0x18c   :  { %v461_v60 = vmul.f32 %v310_v20, %v1023_v23  ;;  %v583_v23 = vpop.trf.xlu2 }
 0x18e   :  { %v488_v46 = vmul.f32 %v1286_v21, %v461_v60 }
 0x18f   :  { %v728_v16 = vpop.eup %727 }
 0x190   :  { %v312_v7 = vmul.f32 %v728_v16, %v286_v3  ;;  %vm318_vm2 = vweird.f32 %v728_v16  ;;  %v510_v45 = vadd.f32 %v1299_v30, %v488_v46 }
 0x191   :  { %vm319_vm4 = vmor %vm317_vm3, %vm318_vm2 }
 0x192   :  { %v313_v22 = vmul.f32 %v728_v16, %v312_v7 }
 0x194   :  { %v314_v25 = vmul.f32 0.5, %v313_v22 }
 0x196   :  { %v315_v15 = vsub.f32 1.5, %v314_v25 }
 0x198   :  { %v316_v29 = vmul.f32 %v728_v16, %v315_v15 }
 0x19a   :  { %v320_v14 = vsel %vm319_vm4, %v728_v16, %v316_v29 }
 0x19b   :  { %v462_v28 = vmul.f32 %v320_v14, %v1085_v26 }
 0x19d   :  { %v489_v44 = vmul.f32 %v1286_v21, %v462_v28 }
 0x19f   :  { %v511_v34 = vadd.f32 %v1299_v30, %v489_v44 }
 0x1a1   :  { %v526_v36 = vpack.c.bf16 %v511_v34, %v510_v45 }
 0x1a3   :  { %v597_v37 = vsel %vm68_vm0, %v526_v36, 0 }
 0x1a4   :  { %627 = vmatpush.bf16.xpose.msra.mxu2 %v597_v37  ;;  %688 = vmatpush.bf16.xpose.msra.mxu3 %v597_v37  ;;  %v550_v26 = vpop.permute.xlu1 %549  ;;  %v545_v18 = vpop.permute.xlu0 %544 }
 0x1ab   :  { %673 = vmatmul.msk.bf16.vlgmr.msra.gmra.mxu2 %vm68_vm0, %v582_v17  ;;  %674 = vmatmul.msk.bf16.vlgmr.msra.gmra.mxu3 %vm68_vm0, %v583_v23 }
 0x1ac   :  { %v555_v6 = vpop.permute.xlu1 %554 }
 0x1f8   :  { %v560_v30 = vpop.permute.xlu1 %559 }
 0x22e   :  { %v629_v39 = vpop.f32.mrf.mxu2  ;;  %v634_v21 = vpop.f32.mrf.mxu3 }
 0x22f   :  { %v635_v55 = vadd.f32 %v634_v21, %v555_v6  ;;  %v630_v0 = vadd.f32 %v629_v39, %v545_v18 }
 0x231   :  { %641 = vst [vmem:[%s1376_s8 + $0x10] sm:$0xff] %v635_v55 }
 0x232   :  { %639 = vst [vmem:[%s1376_s8] sm:$0xff] %v630_v0 }
 0x236   :  { %v631_v41 = vpop.f32.mrf.mxu2  ;;  %v636_v38 = vpop.f32.mrf.mxu3 }
 0x237   :  { %v632_v33 = vadd.f32 %v631_v41, %v550_v26  ;;  %v637_v63 = vadd.f32 %v636_v38, %v560_v30 }
 0x239   :  { %640 = vst [vmem:[%s1376_s8 + $0x8] sm:$0xff] %v632_v33 }
 0x23a   :  { %642 = vst [vmem:[%s1376_s8 + $0x18] sm:$0xff] %v637_v63 }

// kernel: dit_forward.7
= control target key start
LH: loop header
LB: loop body
LE: loop exit
PB: predicated region body
PF: predicated region fallthrough
CT: control target
= control target key end

     0   :  { %s2683_s13 = smov 0   ;;  %s3626_s0 = inlined_call_operand.vmem [shape: f32[2,64,32], index: 0, kind: input, shape index: {}, may-alias: {0,10}]   ;;  %s3627_s1 = inlined_call_operand.vmem [shape: f32[2,6,32], index: 1, kind: input, shape index: {}]   ;;  %s3628_s2 = inlined_call_operand.vmem [shape: bf16[96,32], index: 2, kind: input, shape index: {}]   ;;  %s3629_s3 = inlined_call_operand.vmem [shape: f32[96,1], index: 3, kind: input, shape index: {}]   ;;  %s3630_s4 = inlined_call_operand.vmem [shape: bf16[32,32], index: 4, kind: input, shape index: {}]   ;;  %s3631_s5 = inlined_call_operand.vmem [shape: f32[1,32], index: 5, kind: input, shape index: {}]   ;;  %s3632_s6 = inlined_call_operand.vmem [shape: bf16[32,128], index: 6, kind: input, shape index: {}]   ;;  %s3633_s7 = inlined_call_operand.vmem [shape: f32[1,128], index: 7, kind: input, shape index: {}]   ;;  %s3634_s8 = inlined_call_operand.vmem [shape: bf16[128,32], index: 8, kind: input, shape index: {}]   ;;  %s3635_s9 = inlined_call_operand.vmem [shape: f32[1,32], index: 9, kind: input, shape index: {}]   ;;  %s3636_s10 = inlined_call_operand.vmem [shape: f32[2,64,32], index: 10, kind: output, shape index: {}, may-alias: {0,10}]  }
   0x1 LB: > { %s2260_s14 = sadd.s32 4294967295, %s2624_s13   ;;  %p2264_p0 = scmp.ge.s32.totalorder %s2624_s13, 1  ;;  %s2624_s13 = sphi %s2683_s13, %s20_s13  }
   0x2   : > { %p321_p1 = scmp.lt.s32.totalorder %s2624_s13, 3 }
   0x4   : > { %p322_p2 = pnand %p2264_p0, %p321_p1 }
   0x5   : > { %p363_p3 = scmp.lt.s32.totalorder (!%p322_p2), %s2260_s14, 1 }
   0x6   : > { %325 = sbr.rel (%p322_p2) target bundleno = 2322 (0x912), region = 60 }
   0xb   : > { %s3646_s14 = smov (!%p363_p3, %s2260_s14), 1  ;;  %vm387_vm0 = vcmask 261120   ;;  %v2626_v16 = vmov 32.0  }
   0xc   : > { %s2378_s15 = sshll.u32 %s3646_s14, 6  ;;  %2431 = vrcp.f32 %v2626_v16  ;;  %s2267_s19 = sshll.u32 %s3646_s14, 3 }
   0xd   : > { %s2699_s18 = scalar_lea.vmem %s3626_s0, %s2378_s15  ;;  %s2799_s22 = scalar_lea.vmem %s3627_s1, %s2267_s19 }
   0xe   : > { %v384_v0 = vld [vmem:[%s2699_s18 + $0x30] sm:$0xff]  ;;  %v382_v1 = vld [vmem:[%s2699_s18 + $0x20] sm:$0xff]  ;;  %v385_v6 = vld [vmem:[%s2699_s18 + $0x38] sm:$0xff]  ;;  %s3597_s27 = scalar_lea.vmem %s3636_s10, %s2378_s15 }
   0xf   : > { %v380_v2 = vld [vmem:[%s2699_s18 + $0x10] sm:$0xff]  ;;  %v406_v3 = vsel %vm387_vm0, %v384_v0, 0.0  ;;  %v400_v4 = vsel %vm387_vm0, %v382_v1, 0.0  ;;  %v383_v7 = vld [vmem:[%s2699_s18 + $0x28] sm:$0xff]  ;;  %v381_v8 = vld [vmem:[%s2699_s18 + $0x18] sm:$0xff]  ;;  %v409_v9 = vsel %vm387_vm0, %v385_v6, 0.0 }
  0x10   : > { %v394_v5 = vsel %vm387_vm0, %v380_v2, 0.0  ;;  %407 = vadd.xlane.f32.xlu0 %v406_v3  ;;  %401 = vadd.xlane.f32.xlu1 %v400_v4  ;;  %v403_v10 = vsel %vm387_vm0, %v383_v7, 0.0  ;;  %v397_v11 = vsel %vm387_vm0, %v381_v8, 0.0  ;;  %v378_v12 = vld [vmem:[%s2699_s18] sm:$0xff]  ;;  %v379_v13 = vld [vmem:[%s2699_s18 + $0x8] sm:$0xff] }
  0x11   : > { %395 = vadd.xlane.f32.xlu2 %v394_v5  ;;  %v388_v14 = vsel %vm387_vm0, %v378_v12, 0.0  ;;  %v391_v15 = vsel %vm387_vm0, %v379_v13, 0.0 }
  0x12   : > { %v2432_v17 = vpop.eup %2431 }
  0x13   : > { %v413_v18 = vmul.f32 32.0, %v2432_v17  ;;  %vm417_vm1 = vweird.f32 %v2432_v17 }
  0x15   : > { %v414_v19 = vsub.f32 1.0, %v413_v18 }
  0x17   : > { %v415_v20 = vmul.f32 %v2432_v17, %v414_v19 }
  0x18   : > { %410 = vadd.xlane.f32.xlu0 %v409_v9  ;;  %404 = vadd.xlane.f32.xlu1 %v403_v10 }
  0x19   : > { %398 = vadd.xlane.f32.xlu2 %v397_v11  ;;  %v416_v21 = vadd.f32 %v2432_v17, %v415_v20 }
  0x1b   : > { %v2717_v22 = vsel %vm417_vm1, %v2432_v17, %v416_v21 }
  0x20   : > { %389 = vadd.xlane.f32.xlu0 %v388_v14  ;;  %392 = vadd.xlane.f32.xlu1 %v391_v15 }
  0x83   : > { %v408_v23 = vpop.xlane.xlu0 %407  ;;  %v402_v24 = vpop.xlane.xlu1 %401 }
  0x84   : > { %v425_v25 = vmul.f32 %v2717_v22, %v408_v23  ;;  %v423_v26 = vmul.f32 %v2717_v22, %v402_v24  ;;  %v396_v27 = vpop.xlane.xlu2 %395 }
  0x85   : > { %v421_v36 = vmul.f32 %v2717_v22, %v396_v27 }
  0x86   : > { %v2721_v28 = vsub.f32 %v384_v0, %v425_v25  ;;  %v2723_v29 = vsub.f32 %v382_v1, %v423_v26 }
  0x87   : > { %v2741_v44 = vsub.f32 %v380_v2, %v421_v36 }
  0x88   : > { %v441_v30 = vmul.f32 %v2721_v28, %v2721_v28  ;;  %v439_v31 = vmul.f32 %v2723_v29, %v2723_v29 }
  0x89   : > { %v437_v55 = vmul.f32 %v2741_v44, %v2741_v44 }
  0x8a   : > { %v461_v32 = vsel %vm387_vm0, %v441_v30, 0.0  ;;  %v455_v33 = vsel %vm387_vm0, %v439_v31, 0.0 }
  0x8b   : > { %v411_v34 = vpop.xlane.xlu0 %410  ;;  %v405_v35 = vpop.xlane.xlu1 %404  ;;  %462 = vadd.xlane.f32.xlu2 %v461_v32  ;;  %456 = vadd.xlane.f32.xlu1 %v455_v33  ;;  %v449_v58 = vsel %vm387_vm0, %v437_v55, 0.0 }
  0x8c   : > { %v426_v37 = vmul.f32 %v2717_v22, %v411_v34  ;;  %v424_v38 = vmul.f32 %v2717_v22, %v405_v35  ;;  %v399_v39 = vpop.xlane.xlu2 %398 }
  0x8d   : > { %v422_v40 = vmul.f32 %v2717_v22, %v399_v39 }
  0x8e   : > { %v2735_v41 = vsub.f32 %v385_v6, %v426_v37  ;;  %v2737_v42 = vsub.f32 %v383_v7, %v424_v38  ;;  %v386_v37 = vld [vmem:[%s2799_s22] sm:$0x3f] }
  0x8f   : > { %v2739_v43 = vsub.f32 %v381_v8, %v422_v40 }
  0x90   : > { %v440_v45 = vmul.f32 %v2737_v42, %v2737_v42  ;;  %v442_v46 = vmul.f32 %v2735_v41, %v2735_v41 }
  0x91   : > { %v438_v47 = vmul.f32 %v2739_v43, %v2739_v43 }
  0x92   : > { %v458_v48 = vsel %vm387_vm0, %v440_v45, 0.0  ;;  %v464_v49 = vsel %vm387_vm0, %v442_v46, 0.0 }
  0x93   : > { %459 = vadd.xlane.f32.xlu2 %v458_v48  ;;  %v452_v50 = vsel %vm387_vm0, %v438_v47, 0.0  ;;  %465 = vadd.xlane.f32.xlu0 %v464_v49  ;;  %v390_v51 = vpop.xlane.xlu0 %389  ;;  %v393_v52 = vpop.xlane.xlu1 %392 }
  0x94   : > { %453 = vadd.xlane.f32.xlu1 %v452_v50  ;;  %v419_v53 = vmul.f32 %v2717_v22, %v390_v51  ;;  %v420_v54 = vmul.f32 %v2717_v22, %v393_v52  ;;  %v2821_v50 = vadd.f32 1.0, %v386_v37 }
  0x96   : > { %v2756_v56 = vsub.f32 %v378_v12, %v419_v53  ;;  %v2758_v57 = vsub.f32 %v379_v13, %v420_v54 }
  0x98   : > { %v435_v59 = vmul.f32 %v2756_v56, %v2756_v56  ;;  %v436_v61 = vmul.f32 %v2758_v57, %v2758_v57 }
  0x9a   : > { %v443_v60 = vsel %vm387_vm0, %v435_v59, 0.0  ;;  %v446_v62 = vsel %vm387_vm0, %v436_v61, 0.0 }
  0x9b   : > { %450 = vadd.xlane.f32.xlu0 %v449_v58  ;;  %444 = vadd.xlane.f32.xlu2 %v443_v60  ;;  %v606_v58 = vld [vmem:[%s3629_s3] sm:$0xff] }
  0xa3   : > { %447 = vadd.xlane.f32.xlu0 %v446_v62 }
  0xfe   : > { %v463_v63 = vpop.xlane.xlu2 %462  ;;  %v457_v0 = vpop.xlane.xlu1 %456 }
  0xff   : > { %v473_v1 = vmul.f32 %v463_v63, %v2717_v22  ;;  %v471_v2 = vmul.f32 %v457_v0, %v2717_v22  ;;  %v2627_v63 = vmov 0  }
 0x100   : > { %2416 = vset.pattern.permute.xlu1 %v2627_v63  ;;  %2418 = vset.pattern.permute.xlu0 %v2627_v63 }
 0x101   : > { %v481_v3 = vadd.f32 1e-06, %v473_v1  ;;  %v2769_v4 = vadd.f32 1e-06, %v471_v2  ;;  %620 = vperm.xlu1 %2416, %v606_v58   ;;  %2417 = vset.pattern.permute.xlu2 %v2627_v63 }
 0x103   : > { %2433 = vrsqrt.f32 %v481_v3  ;;  %vm549_vm3 = vweird.f32 %v481_v3  ;;  %vm529_vm5 = vweird.f32 %v2769_v4 }
 0x104   : > { %2435 = vrsqrt.f32 %v2769_v4 }
 0x106   : > { %v460_v5 = vpop.xlane.xlu2 %459  ;;  %v466_v6 = vpop.xlane.xlu0 %465 }
 0x107   : > { %v472_v7 = vmul.f32 %v460_v5, %v2717_v22  ;;  %v454_v8 = vpop.xlane.xlu1 %453  ;;  %v474_v9 = vmul.f32 %v466_v6, %v2717_v22 }
 0x108   : > { %v470_v10 = vmul.f32 %v454_v8, %v2717_v22  ;;  %v607_v8 = vld [vmem:[%s3629_s3 + $0x8] sm:$0xff] }
 0x109   : > { %v2775_v11 = vpop.eup %2433  ;;  %v2777_v12 = vadd.f32 1e-06, %v472_v7  ;;  %v2779_v13 = vadd.f32 1e-06, %v474_v9  ;;  %v2857_v7 = vperm.slane %v2821_v50, 1  ;;  %625 = vperm.xlu0 %2418, %v607_v8  }
 0x10a   : > { %v2781_v14 = vpop.eup %2435  ;;  %v544_v15 = vmul.f32 %v2775_v11, %v481_v3  ;;  %v2784_v16 = vadd.f32 1e-06, %v470_v10  ;;  %vm550_vm2 = vweird.f32 %v2775_v11 }
 0x10b   : > { %v524_v17 = vmul.f32 %v2781_v14, %v2769_v4  ;;  %2437 = vrsqrt.f32 %v2777_v12  ;;  %vm2823_vm4 = vmor %vm549_vm3, %vm550_vm2  ;;  %vm539_vm6 = vweird.f32 %v2777_v12  ;;  %vm530_vm8 = vweird.f32 %v2781_v14 }
 0x10c   : > { %v545_v18 = vmul.f32 %v2775_v11, %v544_v15  ;;  %2439 = vrsqrt.f32 %v2784_v16  ;;  %vm2863_vm11 = vmor %vm529_vm5, %vm530_vm8  ;;  %vm559_vm12 = vweird.f32 %v2779_v13  ;;  %vm519_vm14 = vweird.f32 %v2784_v16 }
 0x10d   : > { %v525_v19 = vmul.f32 %v2781_v14, %v524_v17  ;;  %2441 = vrsqrt.f32 %v2779_v13 }
 0x10e   : > { %v546_v20 = vmul.f32 0.5, %v545_v18  ;;  %v445_v21 = vpop.xlane.xlu2 %444  ;;  %v451_v23 = vpop.xlane.xlu0 %450 }
 0x10f   : > { %v467_v24 = vmul.f32 %v445_v21, %v2717_v22  ;;  %v469_v25 = vmul.f32 %v451_v23, %v2717_v22  ;;  %v526_v30 = vmul.f32 0.5, %v525_v19 }
 0x110   : > { %v547_v26 = vsub.f32 1.5, %v546_v20  ;;  %v2879_v20 = vperm.slane %v386_v37, 0 }
 0x111   : > { %v2801_v27 = vpop.eup %2437  ;;  %v2803_v31 = vadd.f32 1e-06, %v467_v24  ;;  %v2805_v32 = vadd.f32 1e-06, %v469_v25  ;;  %v527_v45 = vsub.f32 1.5, %v526_v30 }
 0x112   : > { %v2807_v33 = vpop.eup %2439  ;;  %v534_v34 = vmul.f32 %v2801_v27, %v2777_v12  ;;  %v548_v38 = vmul.f32 %v2775_v11, %v547_v26  ;;  %vm540_vm7 = vweird.f32 %v2801_v27 }
 0x113   : > { %v2442_v35 = vpop.eup %2441  ;;  %v514_v36 = vmul.f32 %v2807_v33, %v2784_v16  ;;  %2443 = vrsqrt.f32 %v2803_v31  ;;  %v528_v60 = vmul.f32 %v2781_v14, %v527_v45  ;;  %vm2850_vm10 = vmor %vm539_vm6, %vm540_vm7  ;;  %vm520_vm15 = vweird.f32 %v2807_v33 }
 0x114   : > { %v535_v39 = vmul.f32 %v2801_v27, %v534_v34  ;;  %v554_v40 = vmul.f32 %v2442_v35, %v2779_v13  ;;  %2445 = vrsqrt.f32 %v2805_v32  ;;  %v552_v55 = vsel %vm2823_vm4, %v2775_v11, %v548_v38  ;;  %vm2891_vm2 = vmor %vm519_vm14, %vm520_vm15 }
 0x115   : > { %v515_v46 = vmul.f32 %v2807_v33, %v514_v36  ;;  %vm560_vm9 = vweird.f32 %v2442_v35  ;;  %v569_v6 = vmul.f32 %v552_v55, %v2721_v28  ;;  %v532_v4 = vsel %vm2863_vm11, %v2781_v14, %v528_v60  ;;  %v608_v14 = vld [vmem:[%s3629_s3 + $0x10] sm:$0xff] }
 0x116   : > { %v536_v47 = vmul.f32 0.5, %v535_v39  ;;  %v555_v48 = vmul.f32 %v2442_v35, %v554_v40  ;;  %v448_v49 = vpop.xlane.xlu0 %447  ;;  %vm561_vm13 = vmor %vm559_vm12, %vm560_vm9  ;;  %v567_v25 = vmul.f32 %v532_v4, %v2723_v29  ;;  %630 = vperm.xlu1 %2416, %v608_v14   ;;  %vm509_vm3 = vweird.f32 %v2805_v32  ;;  %v610_v4 = vld [vmem:[%s3629_s3 + $0x20] sm:$0xff] }
 0x117   : > { %v468_v52 = vmul.f32 %v448_v49, %v2717_v22  ;;  %v516_v61 = vmul.f32 0.5, %v515_v46  ;;  %v579_v19 = vmul.f32 %v2857_v7, %v569_v6  ;;  %vm489_vm4 = vweird.f32 %v2803_v31  ;;  %v611_v49 = vld [vmem:[%s3629_s3 + $0x28] sm:$0xff]  ;;  %640 = vperm.xlu2 %2417, %v610_v4  }
 0x118   : > { %v537_v53 = vsub.f32 1.5, %v536_v47  ;;  %v556_v54 = vmul.f32 0.5, %v555_v48  ;;  %v577_v38 = vmul.f32 %v2857_v7, %v567_v25  ;;  %vm814_vm11 = vcmask 1043456  }
 0x119   : > { %v2837_v59 = vpop.eup %2443  ;;  %v2841_v62 = vadd.f32 1e-06, %v468_v52  ;;  %v517_v11 = vsub.f32 1.5, %v516_v61  ;;  %v588_v30 = vadd.f32 %v2879_v20, %v579_v19  ;;  %vm801_vm12 = vcmask 64512  }
 0x11a   : > { %v538_v0 = vmul.f32 %v2801_v27, %v537_v53  ;;  %v557_v1 = vsub.f32 1.5, %v556_v54  ;;  %v484_v2 = vmul.f32 %v2837_v59, %v2803_v31  ;;  %v2446_v3 = vpop.eup %2445  ;;  %vm490_vm6 = vweird.f32 %v2837_v59  ;;  %v609_v31 = vld [vmem:[%s3629_s3 + $0x18] sm:$0xff] }
 0x11b   : > { %2447 = vrsqrt.f32 %v2841_v62  ;;  %v504_v28 = vmul.f32 %v2446_v3, %v2805_v32  ;;  %v518_v24 = vmul.f32 %v2807_v33, %v517_v11  ;;  %vm510_vm1 = vweird.f32 %v2446_v3  ;;  %vm491_vm9 = vmor %vm489_vm4, %vm490_vm6  ;;  %v2381_v11 = vld [vmem:[%s3628_s2 + $0x8] sm:$0xff] }
 0x11c   : > { %v542_v9 = vsel %vm2850_vm10, %v2801_v27, %v538_v0  ;;  %v558_v10 = vmul.f32 %v2442_v35, %v557_v1  ;;  %v485_v12 = vmul.f32 %v2837_v59, %v484_v2  ;;  %vm511_vm5 = vmor %vm509_vm3, %vm510_vm1  ;;  %vm499_vm7 = vweird.f32 %v2841_v62 }
 0x11d   : > { %v505_v15 = vmul.f32 %v2446_v3, %v504_v28  ;;  %v568_v13 = vmul.f32 %v542_v9, %v2737_v42  ;;  %v522_v39 = vsel %vm2891_vm2, %v2807_v33, %v518_v24  ;;  %v586_v33 = vadd.f32 %v2879_v20, %v577_v38  ;;  %v2380_v28 = vld [vmem:[%s3628_s2] sm:$0xff] }
 0x11e   : > { %v562_v17 = vsel %vm561_vm13, %v2442_v35, %v558_v10  ;;  %v486_v26 = vmul.f32 0.5, %v485_v12  ;;  %v566_v52 = vmul.f32 %v522_v39, %v2739_v43  ;;  %645 = vperm.xlu1 %2416, %v611_v49   ;;  %v2382_v12 = vld [vmem:[%s3628_s2 + $0x10] sm:$0xff]  ;;  %vm1059_vm13 = vcmask 523264  }
 0x11f   : > { %v570_v18 = vmul.f32 %v562_v17, %v2735_v41  ;;  %v506_v21 = vmul.f32 0.5, %v505_v15  ;;  %v578_v35 = vmul.f32 %v2857_v7, %v568_v13  ;;  %v2383_v15 = vld [vmem:[%s3628_s2 + $0x18] sm:$0xff] }
 0x120   : > { %v487_v40 = vsub.f32 1.5, %v486_v26  ;;  %v576_v60 = vmul.f32 %v2857_v7, %v566_v52 }
 0x121   : > { %v2448_v23 = vpop.eup %2447  ;;  %v580_v41 = vmul.f32 %v2857_v7, %v570_v18  ;;  %v507_v27 = vsub.f32 1.5, %v506_v21  ;;  %v587_v32 = vadd.f32 %v2879_v20, %v578_v35 }
 0x122   : > { %v494_v42 = vmul.f32 %v2448_v23, %v2841_v62  ;;  %vm500_vm8 = vweird.f32 %v2448_v23  ;;  %v488_v53 = vmul.f32 %v2837_v59, %v487_v40  ;;  %v585_v0 = vadd.f32 %v2879_v20, %v576_v60 }
 0x123   : > { %v589_v34 = vadd.f32 %v2879_v20, %v580_v41  ;;  %v508_v36 = vmul.f32 %v2446_v3, %v507_v27  ;;  %vm501_vm10 = vmor %vm499_vm7, %vm500_vm8 }
 0x124   : > { %v495_v29 = vmul.f32 %v2448_v23, %v494_v42  ;;  %v492_v61 = vsel %vm491_vm9, %v2837_v59, %v488_v53 }
 0x125   : > { %v605_v37 = vpack.c.bf16 %v589_v34, %v588_v30  ;;  %v512_v45 = vsel %vm511_vm5, %v2446_v3, %v508_v36  ;;  %v563_v1 = vmul.f32 %v492_v61, %v2756_v56 }
 0x126   : > { %v496_v46 = vmul.f32 0.5, %v495_v29  ;;  %v565_v48 = vmul.f32 %v512_v45, %v2741_v44  ;;  %v604_v44 = vpack.c.bf16 %v587_v32, %v586_v33  ;;  %635 = vperm.xlu1 %2416, %v609_v31  }
 0x127   : > { %v736_v47 = vsel %vm387_vm0, %v605_v37, 0  ;;  %v573_v59 = vmul.f32 %v2857_v7, %v563_v1 }
 0x128   : > { %v497_v51 = vsub.f32 1.5, %v496_v46  ;;  %742 = vmatpush.bf16.xpose.msra.mxu0 %v736_v47  ;;  %v575_v55 = vmul.f32 %v2857_v7, %v565_v48  ;;  %v733_v62 = vsel %vm387_vm0, %v604_v44, 0 }
 0x129   : > { %v582_v56 = vadd.f32 %v2879_v20, %v573_v59 }
 0x12a   : > { %v498_v54 = vmul.f32 %v2448_v23, %v497_v51  ;;  %v584_v43 = vadd.f32 %v2879_v20, %v575_v55 }
 0x12c   : > { %v502_v58 = vsel %vm501_vm10, %v2448_v23, %v498_v54  ;;  %v603_v2 = vpack.c.bf16 %v585_v0, %v584_v43 }
 0x12d   : > { %v564_v63 = vmul.f32 %v502_v58, %v2758_v57  ;;  %v613_v57 = vld [vmem:[%s3629_s3 + $0x38] sm:$0xff] }
 0x12e   : > { %v730_v5 = vsel %vm387_vm0, %v603_v2, 0  ;;  %655 = vperm.xlu1 %2416, %v613_v57  }
 0x12f   : > { %v574_v3 = vmul.f32 %v2857_v7, %v564_v63  ;;  %v612_v7 = vld [vmem:[%s3629_s3 + $0x30] sm:$0xff] }
 0x130   : > { %743 = vmatpush.bf16.xpose.msra.mxu0 %v733_v62  ;;  %650 = vperm.xlu0 %2418, %v612_v7  }
 0x131   : > { %v583_v6 = vadd.f32 %v2879_v20, %v574_v3 }
 0x133   : > { %v602_v9 = vpack.c.bf16 %v583_v6, %v582_v56 }
 0x135   : > { %v727_v10 = vsel %vm387_vm0, %v602_v9, 0 }
 0x138   : > { %744 = vmatpush.bf16.xpose.msra.mxu0 %v730_v5 }
 0x140   : > { %745 = vmatpush.bf16.xpose.msra.mxu0 %v727_v10 }
 0x147   : > { %2294 = vmatmul.msk.bf16.vlgmr.msra.gmra.mxu0 %vm387_vm0, %v2380_v28 }
 0x157   : > { %2295 = vmatmul.msk.bf16.gmra.mxu0 %vm387_vm0, %v2381_v11 }
 0x167   : > { %2296 = vmatmul.msk.bf16.gmra.mxu0 %vm387_vm0, %v2382_v12 }
 0x171   : > { %v641_v35 = vpop.permute.xlu2 %640 }
 0x173   : > { %v621_v17 = vpop.permute.xlu1 %620 }
 0x177   : > { %2297 = vmatmul.msk.bf16.gmra.mxu0 %vm387_vm0, %v2383_v15 }
 0x17b   : > { %v626_v14 = vpop.permute.xlu0 %625 }
 0x188   : > { %v631_v13 = vpop.permute.xlu1 %630 }
 0x190   : > { %v646_v23 = vpop.permute.xlu1 %645 }
 0x198   : > { %v636_v42 = vpop.permute.xlu1 %635 }
 0x1a0   : > { %v656_v33 = vpop.permute.xlu1 %655 }
 0x1a2   : > { %v651_v47 = vpop.permute.xlu0 %650 }
 0x1c4   : > { %v747_v18 = vpop.f32.mrf.mxu0 }
 0x1c5   : > { %v748_v19 = vadd.f32 %v747_v18, %v621_v17 }
 0x1c7   : > { %v777_v20 = vpack.c.bf16 %v748_v19, %v748_v19 }
 0x1c9   : > { %785 = vxpose.xlu2.c.b16.start.end [1/1] (short) (narrow) %v777_v20, 64 }
 0x1cc   : > { %v749_v21 = vpop.f32.mrf.mxu0 }
 0x1cd   : > { %v750_v24 = vadd.f32 %v749_v21, %v626_v14 }
 0x1cf   : > { %v778_v26 = vpack.c.bf16 %v750_v24, %v750_v24 }
 0x1d4   : > { %v752_v41 = vpop.f32.mrf.mxu0 }
 0x1d5   : > { %v753_v25 = vadd.f32 %v752_v41, %v631_v13 }
 0x1d7   : > { %v779_v27 = vpack.c.bf16 %v753_v25, %v753_v25 }
 0x1d9   : > { %2419 = vxpose.binary.xlu0.c.b16.start.end [1/2] (short) (narrow) %v779_v27, %v778_v26, 64 }
 0x1dc   : > { %v754_v16 = vpop.f32.mrf.mxu0 }
 0x1dd   : > { %v755_v30 = vadd.f32 %v754_v16, %v636_v42 }
 0x1df   : > { %v780_v34 = vpack.c.bf16 %v755_v30, %v755_v30 }
 0x1e1   : > { %967 = vxpose.xlu1.c.b16.start.end [1/1] (short) (narrow) %v780_v34, 64 }
 0x1e4   : > { %v757_v36 = vpop.f32.mrf.mxu0 }
 0x1e5   : > { %v758_v29 = vadd.f32 %v757_v36, %v641_v35 }
 0x1e7   : > { %v781_v37 = vpack.c.bf16 %v758_v29, %v758_v29 }
 0x1e9   : > { %v816_v38 = vsel %vm814_vm11, %v781_v37, 0 }
 0x1ea   : > { %825 = vmatpush.bf16.msra.mxu1 %v816_v38 }
 0x1ec   : > { %v759_v39 = vpop.f32.mrf.mxu0 }
 0x1ed   : > { %v760_v40 = vadd.f32 %v759_v39, %v646_v23 }
 0x1ef   : > { %v782_v45 = vpack.c.bf16 %v760_v40, %v760_v40 }
 0x1f1   : > { %v876_v46 = vsel %vm814_vm11, %v782_v45, 0 }
 0x1f2   : > { %885 = vmatpush.bf16.msra.mxu2 %v876_v46 }
 0x1f4   : > { %v762_v32 = vpop.f32.mrf.mxu0 }
 0x1f5   : > { %v763_v48 = vadd.f32 %v762_v32, %v651_v47 }
 0x1f7   : > { %v783_v49 = vpack.c.bf16 %v763_v48, %v763_v48 }
 0x1f9   : > { %v936_v51 = vsel %vm814_vm11, %v783_v49, 0 }
 0x1fa   : > { %945 = vmatpush.bf16.msra.mxu3 %v936_v51 }
 0x1fc   : > { %v764_v52 = vpop.f32.mrf.mxu0 }
 0x1fd   : > { %v765_v53 = vadd.f32 %v764_v52, %v656_v33 }
 0x1ff   : > { %v784_v54 = vpack.c.bf16 %v765_v53, %v765_v53 }
 0x201   : > { %v996_v44 = vsel %vm814_vm11, %v784_v54, 0 }
 0x202   : > { %1005 = vmatpush.bf16.msrb.mxu1 %v996_v44 }
 0x26a   : > { %v793_v55 = vpop.trf.xlu2 }
 0x26b   : > { %2300 = vmatmul.msk.bf16.vlgmr.msra.gmra.mxu1 %vm801_vm12, %v793_v55 }
 0x27a   : > { %v794_v58 = vpop.trf.xlu2 }
 0x27b   : > { %2301 = vmatmul.msk.bf16.gmra.mxu1 %vm801_vm12, %v794_v58 }
 0x285   : > { %v2420_v60 = vpop.trf.xlu0 }
 0x286   : > { %2304 = vmatmul.msk.bf16.vlgmr.msra.gmra.mxu2 %vm801_vm12, %v2420_v60 }
 0x28a   : > { %v795_v61 = vpop.trf.xlu2 }
 0x28b   : > { %2302 = vmatmul.msk.bf16.gmra.mxu1 %vm801_vm12, %v795_v61 }
 0x28d   : > { %v2421_v62 = vpop.trf.xlu0  ;;  %v975_v1 = vpop.trf.xlu1 }
 0x28e   : > { %2308 = vmatmul.msk.bf16.vlgmr.msra.gmra.mxu3 %vm801_vm12, %v2421_v62 }
 0x295   : > { %v2422_v43 = vpop.trf.xlu0 }
 0x296   : > { %2305 = vmatmul.msk.bf16.gmra.mxu2 %vm801_vm12, %v2422_v43 }
 0x29a   : > { %v796_v63 = vpop.trf.xlu2 }
 0x29b   : > { %2303 = vmatmul.msk.bf16.gmra.mxu1 %vm801_vm12, %v796_v63 }
 0x29d   : > { %v2423_v31 = vpop.trf.xlu0  ;;  %v976_v59 = vpop.trf.xlu1 }
 0x29e   : > { %2309 = vmatmul.msk.bf16.gmra.mxu3 %vm801_vm12, %v2423_v31 }
 0x2a5   : > { %v2424_v0 = vpop.trf.xlu0 }
 0x2a6   : > { %2306 = vmatmul.msk.bf16.gmra.mxu2 %vm801_vm12, %v2424_v0 }
 0x2ab   : > { %2312 = vmatmul.msk.bf16.vlgmr.msrb.gmra.mxu1 %vm801_vm12, %v975_v1 }
 0x2ad   : > { %v2425_v2 = vpop.trf.xlu0  ;;  %v977_v6 = vpop.trf.xlu1 }
 0x2ae   : > { %2310 = vmatmul.msk.bf16.gmra.mxu3 %vm801_vm12, %v2425_v2 }
 0x2b5   : > { %v2426_v3 = vpop.trf.xlu0 }
 0x2b6   : > { %2307 = vmatmul.msk.bf16.gmra.mxu2 %vm801_vm12, %v2426_v3 }
 0x2bb   : > { %2313 = vmatmul.msk.bf16.gmra.mxu1 %vm801_vm12, %v976_v59 }
 0x2bd   : > { %v2427_v5 = vpop.trf.xlu0  ;;  %v978_v57 = vpop.trf.xlu1 }
 0x2be   : > { %2311 = vmatmul.msk.bf16.gmra.mxu3 %vm801_vm12, %v2427_v5 }
 0x2cb   : > { %2314 = vmatmul.msk.bf16.gmra.mxu1 %vm801_vm12, %v977_v6 }
 0x2db   : > { %2315 = vmatmul.msk.bf16.gmra.mxu1 %vm801_vm12, %v978_v57 }
 0x2e8   : > { %v827_v8 = vpop.f32.mrf.mxu1 }
 0x2e9   : > { %v2982_v56 = vmul.f32 0.35355338, %v827_v8 }
 0x2eb   : > { %v1060_v9 = vsel %vm1059_vm13, %v2982_v56, -inf }
 0x2ec   : > { %1061 = vmax.xlane.f32.xlu0 %v1060_v9 }
 0x2f0   : > { %v829_v7 = vpop.f32.mrf.mxu1 }
 0x2f1   : > { %v2986_v10 = vmul.f32 0.35355338, %v829_v7 }
 0x2f3   : > { %v1063_v28 = vsel %vm1059_vm13, %v2986_v10, -inf }
 0x2f4   : > { %1064 = vmax.xlane.f32.xlu1 %v1063_v28 }
 0x2f8   : > { %v832_v11 = vpop.f32.mrf.mxu1 }
 0x2f9   : > { %v2990_v4 = vmul.f32 0.35355338, %v832_v11 }
 0x2fb   : > { %v1066_v12 = vsel %vm1059_vm13, %v2990_v4, -inf }
 0x2fc   : > { %1067 = vmax.xlane.f32.xlu1 %v1066_v12 }
 0x300   : > { %v834_v15 = vpop.f32.mrf.mxu1 }
 0x301   : > { %v2998_v13 = vmul.f32 0.35355338, %v834_v15 }
 0x303   : > { %v1069_v41 = vsel %vm1059_vm13, %v2998_v13, -inf }
 0x308   : > { %v837_v17 = vpop.f32.mrf.mxu1 }
 0x309   : > { %v887_v18 = vpop.f32.mrf.mxu2  ;;  %v3006_v26 = vmul.f32 0.35355338, %v837_v17 }
 0x30a   : > { %v2994_v19 = vmul.f32 0.35355338, %v887_v18 }
 0x30b   : > { %v1072_v35 = vsel %vm1059_vm13, %v3006_v26, -inf }
 0x30c   : > { %v1084_v20 = vsel %vm1059_vm13, %v2994_v19, -inf }
 0x30d   : > { %1085 = vmax.xlane.f32.xlu2 %v1084_v20 }
 0x310   : > { %v839_v21 = vpop.f32.mrf.mxu1 }
 0x311   : > { %v889_v14 = vpop.f32.mrf.mxu2  ;;  %v947_v23 = vpop.f32.mrf.mxu3  ;;  %v3030_v49 = vmul.f32 0.35355338, %v839_v21 }
 0x312   : > { %v3000_v24 = vmul.f32 0.35355338, %v889_v14  ;;  %v3008_v27 = vmul.f32 0.35355338, %v947_v23 }
 0x313   : > { %v1075_v54 = vsel %vm1059_vm13, %v3030_v49, -inf }
 0x314   : > { %v1087_v25 = vsel %vm1059_vm13, %v3000_v24, -inf  ;;  %v1108_v36 = vsel %vm1059_vm13, %v3008_v27, -inf }
 0x315   : > { %1070 = vmax.xlane.f32.xlu2 %v1069_v41  ;;  %1088 = vmax.xlane.f32.xlu0 %v1087_v25 }
 0x318   : > { %v842_v42 = vpop.f32.mrf.mxu1 }
 0x319   : > { %v892_v16 = vpop.f32.mrf.mxu2  ;;  %v949_v30 = vpop.f32.mrf.mxu3  ;;  %v3050_v1 = vmul.f32 0.35355338, %v842_v42 }
 0x31a   : > { %v3010_v34 = vmul.f32 0.35355338, %v949_v30  ;;  %v3018_v37 = vmul.f32 0.35355338, %v892_v16 }
 0x31b   : > { %v1078_v57 = vsel %vm1059_vm13, %v3050_v1, -inf }
 0x31c   : > { %v1111_v29 = vsel %vm1059_vm13, %v3010_v34, -inf  ;;  %v1090_v47 = vsel %vm1059_vm13, %v3018_v37, -inf }
 0x31d   : > { %1073 = vmax.xlane.f32.xlu2 %v1072_v35  ;;  %1109 = vmax.xlane.f32.xlu0 %v1108_v36 }
 0x31e   : > { %1112 = vmax.xlane.f32.xlu1 %v1111_v29 }
 0x320   : > { %v844_v38 = vpop.f32.mrf.mxu1 }
 0x321   : > { %v894_v39 = vpop.f32.mrf.mxu2  ;;  %v952_v40 = vpop.f32.mrf.mxu3  ;;  %v3052_v2 = vmul.f32 0.35355338, %v844_v38 }
 0x322   : > { %v3020_v45 = vmul.f32 0.35355338, %v894_v39  ;;  %v3022_v46 = vmul.f32 0.35355338, %v952_v40 }
 0x323   : > { %v1081_v8 = vsel %vm1059_vm13, %v3052_v2, -inf }
 0x324   : > { %v1093_v32 = vsel %vm1059_vm13, %v3020_v45, -inf  ;;  %v1114_v48 = vsel %vm1059_vm13, %v3022_v46, -inf }
 0x325   : > { %1091 = vmax.xlane.f32.xlu0 %v1090_v47  ;;  %1115 = vmax.xlane.f32.xlu2 %v1114_v48 }
 0x326   : > { %1094 = vmax.xlane.f32.xlu1 %v1093_v32 }
 0x328   : > { %v1007_v51 = vpop.f32.mrf.mxu1 }
 0x329   : > { %v897_v33 = vpop.f32.mrf.mxu2  ;;  %v954_v52 = vpop.f32.mrf.mxu3  ;;  %v3074_v21 = vmul.f32 0.35355338, %v1007_v51 }
 0x32a   : > { %v3032_v53 = vmul.f32 0.35355338, %v954_v52  ;;  %v3038_v55 = vmul.f32 0.35355338, %v897_v33 }
 0x32b   : > { %v1132_v25 = vsel %vm1059_vm13, %v3074_v21, -inf }
 0x32c   : > { %v1117_v44 = vsel %vm1059_vm13, %v3032_v53, -inf  ;;  %v1096_v63 = vsel %vm1059_vm13, %v3038_v55, -inf }
 0x32d   : > { %1076 = vmax.xlane.f32.xlu2 %v1075_v54  ;;  %1118 = vmax.xlane.f32.xlu0 %v1117_v44 }
 0x330   : > { %v1009_v58 = vpop.f32.mrf.mxu1 }
 0x331   : > { %v899_v60 = vpop.f32.mrf.mxu2  ;;  %v957_v61 = vpop.f32.mrf.mxu3  ;;  %v3064_v28 = vmul.f32 0.35355338, %v1009_v58 }
 0x332   : > { %v3040_v62 = vmul.f32 0.35355338, %v899_v60  ;;  %v3042_v43 = vmul.f32 0.35355338, %v957_v61 }
 0x333   : > { %v1135_v18 = vsel %vm1059_vm13, %v3064_v28, -inf }
 0x334   : > { %v1099_v31 = vsel %vm1059_vm13, %v3040_v62, -inf  ;;  %v1120_v0 = vsel %vm1059_vm13, %v3042_v43, -inf }
 0x335   : > { %1097 = vmax.xlane.f32.xlu2 %v1096_v63  ;;  %1100 = vmax.xlane.f32.xlu0 %v1099_v31 }
 0x336   : > { %1121 = vmax.xlane.f32.xlu1 %v1120_v0 }
 0x338   : > { %v1012_v3 = vpop.f32.mrf.mxu1 }
 0x339   : > { %v902_v59 = vpop.f32.mrf.mxu2  ;;  %v959_v5 = vpop.f32.mrf.mxu3  ;;  %v3062_v7 = vmul.f32 0.35355338, %v1012_v3 }
 0x33a   : > { %v3054_v6 = vmul.f32 0.35355338, %v902_v59  ;;  %v3066_v11 = vmul.f32 0.35355338, %v959_v5 }
 0x33b   : > { %v1138_v17 = vsel %vm1059_vm13, %v3062_v7, -inf }
 0x33c   : > { %v1102_v9 = vsel %vm1059_vm13, %v3054_v6, -inf  ;;  %v1123_v20 = vsel %vm1059_vm13, %v3066_v11, -inf }
 0x33d   : > { %1079 = vmax.xlane.f32.xlu2 %v1078_v57  ;;  %1082 = vmax.xlane.f32.xlu0 %v1081_v8 }
 0x33e   : > { %1103 = vmax.xlane.f32.xlu1 %v1102_v9 }
 0x340   : > { %v1014_v12 = vpop.f32.mrf.mxu1 }
 0x341   : > { %v962_v15 = vpop.f32.mrf.mxu3  ;;  %v904_v16 = vpop.f32.mrf.mxu2  ;;  %v3102_v52 = vmul.f32 0.35355338, %v1014_v12 }
 0x342   : > { %v3084_v35 = vmul.f32 0.35355338, %v904_v16  ;;  %v3094_v47 = vmul.f32 0.35355338, %v962_v15 }
 0x343   : > { %v1141_v58 = vsel %vm1059_vm13, %v3102_v52, -inf }
 0x344   : > { %v1105_v40 = vsel %vm1059_vm13, %v3084_v35, -inf  ;;  %v1126_v51 = vsel %vm1059_vm13, %v3094_v47, -inf }
 0x345   : > { %1136 = vmax.xlane.f32.xlu0 %v1135_v18  ;;  %1124 = vmax.xlane.f32.xlu2 %v1123_v20 }
 0x346   : > { %1139 = vmax.xlane.f32.xlu1 %v1138_v17 }
 0x348   : > { %v1017_v14 = vpop.f32.mrf.mxu1 }
 0x349   : > { %v964_v23 = vpop.f32.mrf.mxu3  ;;  %v3082_v30 = vmul.f32 0.35355338, %v1017_v14 }
 0x34a   : > { %v3076_v41 = vmul.f32 0.35355338, %v964_v23 }
 0x34b   : > { %v1144_v38 = vsel %vm1059_vm13, %v3082_v30, -inf }
 0x34c   : > { %v1129_v42 = vsel %vm1059_vm13, %v3076_v41, -inf }
 0x34d   : > { %1133 = vmax.xlane.f32.xlu2 %v1132_v25  ;;  %1130 = vmax.xlane.f32.xlu0 %v1129_v42 }
 0x350   : > { %v1019_v36 = vpop.f32.mrf.mxu1 }
 0x351   : > { %v3086_v29 = vmul.f32 0.35355338, %v1019_v36 }
 0x353   : > { %v1147_v39 = vsel %vm1059_vm13, %v3086_v29, -inf }
 0x354   : > { %1148 = vmax.xlane.f32.xlu1 %v1147_v39 }
 0x355   : > { %1106 = vmax.xlane.f32.xlu2 %v1105_v40  ;;  %1145 = vmax.xlane.f32.xlu0 %v1144_v38 }
 0x358   : > { %v1022_v32 = vpop.f32.mrf.mxu1 }
 0x359   : > { %v3096_v48 = vmul.f32 0.35355338, %v1022_v32 }
 0x35b   : > { %v1150_v33 = vsel %vm1059_vm13, %v3096_v48, -inf }
 0x35c   : > { %1151 = vmax.xlane.f32.xlu1 %v1150_v33 }
 0x35d   : > { %1127 = vmax.xlane.f32.xlu2 %v1126_v51 }
 0x35f   : > { %v1062_v54 = vpop.xlane.xlu0 %1061 }
 0x360   : > { %v1156_v44 = vsub.f32 %v2982_v56, %v1062_v54  ;;  %v1024_v60 = vpop.f32.mrf.mxu1 }
 0x361   : > { %v3108_v0 = vmul.f32 0.35355338, %v1024_v60 }
 0x362   : > { %v1188_v61 = vmul.f32 1.442695, %v1156_v44 }
 0x363   : > { %v1153_v59 = vsel %vm1059_vm13, %v3108_v0, -inf }
 0x364   : > { %2449 = vpow2.f32 %v1188_v61 }
 0x365   : > { %1142 = vmax.xlane.f32.xlu2 %v1141_v58 }
 0x367   : > { %v1065_v63 = vpop.xlane.xlu1 %1064 }
 0x368   : > { %v1157_v31 = vsub.f32 %v2986_v10, %v1065_v63 }
 0x36a   : > { %v1190_v3 = vmul.f32 1.442695, %v1157_v31  ;;  %v3113_v57 = vpop.eup %2449 }
 0x36b   : > { %v1252_v12 = vsel %vm1059_vm13, %v3113_v57, 0.0 }
 0x36c   : > { %2451 = vpow2.f32 %v1190_v3 }
 0x36d   : > { %1154 = vmax.xlane.f32.xlu2 %v1153_v59 }
 0x36f   : > { %v1068_v5 = vpop.xlane.xlu1 %1067 }
 0x370   : > { %v1158_v56 = vsub.f32 %v2990_v4, %v1068_v5 }
 0x372   : > { %v3115_v8 = vpop.eup %2451  ;;  %v1192_v9 = vmul.f32 1.442695, %v1158_v56 }
 0x373   : > { %v1255_v10 = vsel %vm1059_vm13, %v3115_v8, 0.0 }
 0x374   : > { %2453 = vpow2.f32 %v1192_v9  ;;  %1256 = vadd.xlane.f32.xlu0 %v1255_v10 }
 0x375   : > { %1253 = vadd.xlane.f32.xlu2 %v1252_v12 }
 0x37a   : > { %v3121_v15 = vpop.eup %2453 }
 0x37b   : > { %v1258_v17 = vsel %vm1059_vm13, %v3121_v15, 0.0 }
 0x37c   : > { %1259 = vadd.xlane.f32.xlu0 %v1258_v17 }
 0x380   : > { %v1086_v4 = vpop.xlane.xlu2 %1085 }
 0x381   : > { %v1164_v18 = vsub.f32 %v2994_v19, %v1086_v4 }
 0x383   : > { %v1204_v20 = vmul.f32 1.442695, %v1164_v18 }
 0x385   : > { %2455 = vpow2.f32 %v1204_v20 }
 0x388   : > { %v1071_v14 = vpop.xlane.xlu2 %1070  ;;  %v1089_v23 = vpop.xlane.xlu0 %1088 }
 0x389   : > { %v1159_v25 = vsub.f32 %v2998_v13, %v1071_v14  ;;  %v1165_v42 = vsub.f32 %v3000_v24, %v1089_v23 }
 0x38b   : > { %v3128_v16 = vpop.eup %2455  ;;  %v1194_v36 = vmul.f32 1.442695, %v1159_v25  ;;  %v1206_v38 = vmul.f32 1.442695, %v1165_v42 }
 0x38c   : > { %v1276_v39 = vsel %vm1059_vm13, %v3128_v16, 0.0 }
 0x38d   : > { %2457 = vpow2.f32 %v1194_v36  ;;  %1277 = vadd.xlane.f32.xlu1 %v1276_v39 }
 0x38e   : > { %2459 = vpow2.f32 %v1206_v38 }
 0x390   : > { %v1074_v40 = vpop.xlane.xlu2 %1073  ;;  %v1110_v19 = vpop.xlane.xlu0 %1109 }
 0x391   : > { %v1113_v32 = vpop.xlane.xlu1 %1112  ;;  %v1172_v51 = vsub.f32 %v3008_v27, %v1110_v19  ;;  %v1160_v9 = vsub.f32 %v3006_v26, %v1074_v40 }
 0x392   : > { %v1173_v33 = vsub.f32 %v3010_v34, %v1113_v32 }
 0x393   : > { %v3134_v13 = vpop.eup %2457  ;;  %v1220_v24 = vmul.f32 1.442695, %v1172_v51 }
 0x394   : > { %v3136_v54 = vpop.eup %2459  ;;  %v1222_v44 = vmul.f32 1.442695, %v1173_v33  ;;  %v1261_v58 = vsel %vm1059_vm13, %v3134_v13, 0.0 }
 0x395   : > { %1262 = vadd.xlane.f32.xlu1 %v1261_v58  ;;  %v1279_v60 = vsel %vm1059_vm13, %v3136_v54, 0.0 }
 0x396   : > { %2461 = vpow2.f32 %v1222_v44  ;;  %1280 = vadd.xlane.f32.xlu2 %v1279_v60  ;;  %v2384_v44 = vld [vmem:[%s3628_s2 + $0x20] sm:$0xff] }
 0x397   : > { %2463 = vpow2.f32 %v1220_v24  ;;  %2298 = vmatmul.msk.bf16.gmra.mxu0 %vm387_vm0, %v2384_v44 }
 0x398   : > { %v1116_v61 = vpop.xlane.xlu2 %1115  ;;  %v1092_v27 = vpop.xlane.xlu0 %1091 }
 0x399   : > { %v1095_v63 = vpop.xlane.xlu1 %1094  ;;  %v1174_v34 = vsub.f32 %v3022_v46, %v1116_v61  ;;  %v1166_v31 = vsub.f32 %v3018_v37, %v1092_v27 }
 0x39a   : > { %v1167_v3 = vsub.f32 %v3020_v45, %v1095_v63  ;;  %v1196_v45 = vmul.f32 1.442695, %v1160_v9 }
 0x39b   : > { %v1224_v59 = vmul.f32 1.442695, %v1174_v34  ;;  %v1208_v5 = vmul.f32 1.442695, %v1166_v31 }
 0x39c   : > { %v3145_v56 = vpop.eup %2461  ;;  %v1210_v10 = vmul.f32 1.442695, %v1167_v3 }
 0x39d   : > { %v3148_v12 = vpop.eup %2463  ;;  %2465 = vpow2.f32 %v1224_v59  ;;  %v1303_v17 = vsel %vm1059_vm13, %v3145_v56, 0.0 }
 0x39e   : > { %2467 = vpow2.f32 %v1210_v10  ;;  %1304 = vadd.xlane.f32.xlu0 %v1303_v17  ;;  %v1300_v37 = vsel %vm1059_vm13, %v3148_v12, 0.0 }
 0x39f   : > { %2469 = vpow2.f32 %v1208_v5  ;;  %1301 = vadd.xlane.f32.xlu2 %v1300_v37 }
 0x3a0   : > { %v1077_v46 = vpop.xlane.xlu2 %1076  ;;  %v1119_v4 = vpop.xlane.xlu0 %1118  ;;  %2471 = vpow2.f32 %v1196_v45 }
 0x3a1   : > { %v1161_v18 = vsub.f32 %v3030_v49, %v1077_v46  ;;  %v1175_v23 = vsub.f32 %v3032_v53, %v1119_v4 }
 0x3a3   : > { %v3155_v26 = vpop.eup %2465  ;;  %v1198_v20 = vmul.f32 1.442695, %v1161_v18  ;;  %v1226_v38 = vmul.f32 1.442695, %v1175_v23 }
 0x3a4   : > { %v3157_v14 = vpop.eup %2467  ;;  %v1306_v25 = vsel %vm1059_vm13, %v3155_v26, 0.0 }
 0x3a5   : > { %v3162_v42 = vpop.eup %2469  ;;  %2473 = vpow2.f32 %v1198_v20  ;;  %1307 = vadd.xlane.f32.xlu1 %v1306_v25  ;;  %v1285_v36 = vsel %vm1059_vm13, %v3157_v14, 0.0 }
 0x3a6   : > { %1286 = vadd.xlane.f32.xlu0 %v1285_v36  ;;  %v1282_v49 = vsel %vm1059_vm13, %v3162_v42, 0.0  ;;  %v3169_v32 = vpop.eup %2471  ;;  %2475 = vpow2.f32 %v1226_v38 }
 0x3a7   : > { %1283 = vadd.xlane.f32.xlu2 %v1282_v49  ;;  %v2385_v49 = vld [vmem:[%s3628_s2 + $0x28] sm:$0xff] }
 0x3a8   : > { %v1098_v39 = vpop.xlane.xlu2 %1097  ;;  %v1101_v40 = vpop.xlane.xlu0 %1100  ;;  %2299 = vmatmul.msk.bf16.gmra.mxu0 %vm387_vm0, %v2385_v49 }
 0x3a9   : > { %v1168_v53 = vsub.f32 %v3038_v55, %v1098_v39  ;;  %v1122_v19 = vpop.xlane.xlu1 %1121  ;;  %v1169_v60 = vsub.f32 %v3040_v62, %v1101_v40  ;;  %v1264_v55 = vsel %vm1059_vm13, %v3169_v32, 0.0 }
 0x3aa   : > { %v1176_v51 = vsub.f32 %v3042_v43, %v1122_v19 }
 0x3ab   : > { %v3172_v33 = vpop.eup %2473  ;;  %v1212_v24 = vmul.f32 1.442695, %v1168_v53  ;;  %v1214_v43 = vmul.f32 1.442695, %v1169_v60 }
 0x3ac   : > { %v1228_v58 = vmul.f32 1.442695, %v1176_v51  ;;  %v1267_v61 = vsel %vm1059_vm13, %v3172_v33, 0.0  ;;  %v3184_v3 = vpop.eup %2475 }
 0x3ad   : > { %2477 = vpow2.f32 %v1212_v24 }
 0x3ae   : > { %2479 = vpow2.f32 %v1228_v58  ;;  %1268 = vadd.xlane.f32.xlu0 %v1267_v61 }
 0x3af   : > { %1265 = vadd.xlane.f32.xlu2 %v1264_v55  ;;  %2481 = vpow2.f32 %v1214_v43 }
 0x3b0   : > { %v1080_v27 = vpop.xlane.xlu2 %1079  ;;  %v1083_v63 = vpop.xlane.xlu0 %1082 }
 0x3b1   : > { %v1162_v34 = vsub.f32 %v3050_v1, %v1080_v27  ;;  %v1104_v31 = vpop.xlane.xlu1 %1103  ;;  %v1163_v17 = vsub.f32 %v3052_v2, %v1083_v63 }
 0x3b2   : > { %v1170_v62 = vsub.f32 %v3054_v6, %v1104_v31  ;;  %v1309_v6 = vsel %vm1059_vm13, %v3184_v3, 0.0 }
 0x3b3   : > { %v3187_v59 = vpop.eup %2477  ;;  %v1200_v5 = vmul.f32 1.442695, %v1162_v34  ;;  %v1202_v45 = vmul.f32 1.442695, %v1163_v17 }
 0x3b4   : > { %v3189_v9 = vpop.eup %2479  ;;  %v1216_v10 = vmul.f32 1.442695, %v1170_v62  ;;  %v1288_v37 = vsel %vm1059_vm13, %v3187_v59, 0.0 }
 0x3b5   : > { %2483 = vpow2.f32 %v1200_v5  ;;  %1289 = vadd.xlane.f32.xlu1 %v1288_v37  ;;  %v1312_v1 = vsel %vm1059_vm13, %v3189_v9, 0.0  ;;  %v3199_v20 = vpop.eup %2481 }
 0x3b6   : > { %2485 = vpow2.f32 %v1216_v10  ;;  %1313 = vadd.xlane.f32.xlu0 %v1312_v1  ;;  %v1291_v53 = vsel %vm1059_vm13, %v3199_v20, 0.0 }
 0x3b7   : > { %1310 = vadd.xlane.f32.xlu2 %v1309_v6  ;;  %2487 = vpow2.f32 %v1202_v45 }
 0x3b8   : > { %v1125_v46 = vpop.xlane.xlu2 %1124  ;;  %v1137_v4 = vpop.xlane.xlu0 %1136 }
 0x3b9   : > { %v1177_v18 = vsub.f32 %v3066_v11, %v1125_v46  ;;  %v1140_v2 = vpop.xlane.xlu1 %1139  ;;  %v1181_v40 = vsub.f32 %v3064_v28, %v1137_v4 }
 0x3ba   : > { %v1182_v23 = vsub.f32 %v3062_v7, %v1140_v2 }
 0x3bb   : > { %v3202_v25 = vpop.eup %2483  ;;  %v1230_v36 = vmul.f32 1.442695, %v1177_v18  ;;  %v1238_v19 = vmul.f32 1.442695, %v1181_v40 }
 0x3bc   : > { %v3207_v38 = vpop.eup %2485  ;;  %v1240_v39 = vmul.f32 1.442695, %v1182_v23  ;;  %v1270_v11 = vsel %vm1059_vm13, %v3202_v25, 0.0 }
 0x3bd   : > { %2489 = vpow2.f32 %v1230_v36  ;;  %1271 = vadd.xlane.f32.xlu1 %v1270_v11  ;;  %v1294_v7 = vsel %vm1059_vm13, %v3207_v38, 0.0  ;;  %v3218_v44 = vpop.eup %2487 }
 0x3be   : > { %2491 = vpow2.f32 %v1240_v39  ;;  %1295 = vadd.xlane.f32.xlu0 %v1294_v7 }
 0x3bf   : > { %1292 = vadd.xlane.f32.xlu2 %v1291_v53  ;;  %2493 = vpow2.f32 %v1238_v19 }
 0x3c0   : > { %v1134_v51 = vpop.xlane.xlu2 %1133  ;;  %v1131_v24 = vpop.xlane.xlu0 %1130 }
 0x3c1   : > { %v1180_v28 = vsub.f32 %v3074_v21, %v1134_v51  ;;  %v1179_v61 = vsub.f32 %v3076_v41, %v1131_v24  ;;  %v1273_v21 = vsel %vm1059_vm13, %v3218_v44, 0.0 }
 0x3c3   : > { %v3220_v58 = vpop.eup %2489  ;;  %v1236_v60 = vmul.f32 1.442695, %v1180_v28  ;;  %v1234_v63 = vmul.f32 1.442695, %v1179_v61 }
 0x3c4   : > { %v3223_v55 = vpop.eup %2491  ;;  %v1315_v43 = vsel %vm1059_vm13, %v3220_v58, 0.0 }
 0x3c5   : > { %2495 = vpow2.f32 %v1236_v60  ;;  %1316 = vadd.xlane.f32.xlu1 %v1315_v43  ;;  %v1330_v27 = vsel %vm1059_vm13, %v3223_v55, 0.0  ;;  %v3233_v10 = vpop.eup %2493 }
 0x3c6   : > { %1331 = vadd.xlane.f32.xlu0 %v1330_v27  ;;  %2497 = vpow2.f32 %v1234_v63 }
 0x3c7   : > { %1274 = vadd.xlane.f32.xlu2 %v1273_v21  ;;  %v1149_v34 = vpop.xlane.xlu1 %1148 }
 0x3c8   : > { %v1185_v41 = vsub.f32 %v3086_v29, %v1149_v34  ;;  %v1107_v31 = vpop.xlane.xlu2 %1106  ;;  %v1146_v62 = vpop.xlane.xlu0 %1145  ;;  %v1327_v29 = vsel %vm1059_vm13, %v3233_v10, 0.0 }
 0x3c9   : > { %v1171_v5 = vsub.f32 %v3084_v35, %v1107_v31  ;;  %v1184_v6 = vsub.f32 %v3082_v30, %v1146_v62  ;;  %v614_v31 = vld [vmem:[%s3629_s3 + $0x40] sm:$0xff]  ;;  %v617_v62 = vld [vmem:[%s3629_s3 + $0x58] sm:$0xff] }
 0x3ca   : > { %v1246_v17 = vmul.f32 1.442695, %v1185_v41 }
 0x3cb   : > { %v3235_v37 = vpop.eup %2495  ;;  %v1218_v1 = vmul.f32 1.442695, %v1171_v5  ;;  %v1244_v46 = vmul.f32 1.442695, %v1184_v6  ;;  %v615_v6 = vld [vmem:[%s3629_s3 + $0x48] sm:$0xff] }
 0x3cc   : > { %2499 = vpow2.f32 %v1246_v17  ;;  %v1324_v45 = vsel %vm1059_vm13, %v3235_v37, 0.0  ;;  %v3243_v2 = vpop.eup %2497 }
 0x3cd   : > { %2501 = vpow2.f32 %v1218_v1  ;;  %1325 = vadd.xlane.f32.xlu1 %v1324_v45 }
 0x3ce   : > { %2503 = vpow2.f32 %v1244_v46 }
 0x3cf   : > { %1328 = vadd.xlane.f32.xlu2 %v1327_v29  ;;  %v1152_v35 = vpop.xlane.xlu1 %1151 }
 0x3d0   : > { %v1186_v4 = vsub.f32 %v3096_v48, %v1152_v35  ;;  %v1128_v18 = vpop.xlane.xlu2 %1127 }
 0x3d1   : > { %v1178_v23 = vsub.f32 %v3094_v47, %v1128_v18  ;;  %v1321_v47 = vsel %vm1059_vm13, %v3243_v2, 0.0 }
 0x3d2   : > { %v3246_v30 = vpop.eup %2499  ;;  %v1248_v36 = vmul.f32 1.442695, %v1186_v4 }
 0x3d3   : > { %v3248_v49 = vpop.eup %2501  ;;  %v1232_v39 = vmul.f32 1.442695, %v1178_v23  ;;  %v1339_v40 = vsel %vm1059_vm13, %v3246_v30, 0.0 }
 0x3d4   : > { %2505 = vpow2.f32 %v1248_v36  ;;  %1340 = vadd.xlane.f32.xlu0 %v1339_v40  ;;  %v1297_v48 = vsel %vm1059_vm13, %v3248_v49, 0.0  ;;  %v3256_v7 = vpop.eup %2503 }
 0x3d5   : > { %2507 = vpow2.f32 %v1232_v39  ;;  %1298 = vadd.xlane.f32.xlu1 %v1297_v48  ;;  %v1336_v61 = vsel %vm1059_vm13, %v3256_v7, 0.0 }
 0x3d7   : > { %1322 = vadd.xlane.f32.xlu2 %v1321_v47 }
 0x3d8   : > { %v1143_v11 = vpop.xlane.xlu2 %1142 }
 0x3d9   : > { %v1183_v53 = vsub.f32 %v3102_v52, %v1143_v11 }
 0x3da   : > { %v3259_v19 = vpop.eup %2505 }
 0x3db   : > { %v3261_v51 = vpop.eup %2507  ;;  %v1242_v24 = vmul.f32 1.442695, %v1183_v53  ;;  %v1342_v28 = vsel %vm1059_vm13, %v3259_v19, 0.0 }
 0x3dc   : > { %1343 = vadd.xlane.f32.xlu0 %v1342_v28  ;;  %v1318_v60 = vsel %vm1059_vm13, %v3261_v51, 0.0 }
 0x3dd   : > { %2509 = vpow2.f32 %v1242_v24  ;;  %1319 = vadd.xlane.f32.xlu1 %v1318_v60 }
 0x3df   : > { %1337 = vadd.xlane.f32.xlu2 %v1336_v61 }
 0x3e0   : > { %v1155_v43 = vpop.xlane.xlu2 %1154 }
 0x3e1   : > { %v1187_v52 = vsub.f32 %v3108_v0, %v1155_v43  ;;  %v616_v0 = vld [vmem:[%s3629_s3 + $0x50] sm:$0xff] }
 0x3e3   : > { %v3270_v27 = vpop.eup %2509  ;;  %v1250_v21 = vmul.f32 1.442695, %v1187_v52 }
 0x3e4   : > { %v1333_v63 = vsel %vm1059_vm13, %v3270_v27, 0.0 }
 0x3e5   : > { %2511 = vpow2.f32 %v1250_v21  ;;  %1334 = vadd.xlane.f32.xlu1 %v1333_v63 }
 0x3e7   : > { %v1257_v5 = vpop.xlane.xlu0 %1256 }
 0x3e8   : > { %v3287_v17 = vpop.xlane.xlu2 %1253 }
 0x3eb   : > { %v3274_v34 = vpop.eup %2511 }
 0x3ec   : > { %v1345_v41 = vsel %vm1059_vm13, %v3274_v34, 0.0 }
 0x3ed   : > { %1346 = vadd.xlane.f32.xlu1 %v1345_v41 }
 0x3ef   : > { %v1260_v45 = vpop.xlane.xlu0 %1259 }
 0x3f0   : > { %660 = vperm.xlu0 %2418, %v614_v31  }
 0x3f7   : > { %670 = vperm.xlu2 %2417, %v616_v0  }
 0x3f8   : > { %675 = vperm.xlu0 %2418, %v617_v62  }
 0x400   : > { %v1278_v1 = vpop.xlane.xlu1 %1277 }
 0x401   : > { %2513 = vrcp.f32 %v1278_v1 }
 0x406   : > { %665 = vperm.xlu1 %2416, %v615_v6  }
 0x407   : > { %v2514_v46 = vpop.eup %2513 }
 0x408   : > { %v1388_v35 = vmul.f32 %v2514_v46, %v3128_v16  ;;  %v1263_v24 = vpop.xlane.xlu1 %1262 }
 0x409   : > { %v1281_v29 = vpop.xlane.xlu2 %1280 }
 0x40a   : > { %2515 = vrcp.f32 %v1281_v29  ;;  %v1424_v36 = vpack.c.bf16 %v1388_v35, %v1388_v35 }
 0x40c   : > { %v3294_v48 = vunpack.c.l.b16 %v1424_v36 }
 0x410   : > { %v2516_v4 = vpop.eup %2515 }
 0x411   : > { %v1305_v18 = vpop.xlane.xlu0 %1304  ;;  %v1389_v23 = vmul.f32 %v2516_v4, %v3136_v54 }
 0x412   : > { %v1302_v39 = vpop.xlane.xlu2 %1301  ;;  %2517 = vrcp.f32 %v1305_v18 }
 0x413   : > { %2519 = vrcp.f32 %v1302_v39  ;;  %v1425_v40 = vpack.c.bf16 %v1389_v23, %v1389_v23 }
 0x415   : > { %v3296_v47 = vunpack.c.l.b16 %v1425_v40 }
 0x417   : > { %v1512_v11 = vpack.c.b16 %v3296_v47, %v3294_v48 }
 0x418   : > { %v2518_v53 = vpop.eup %2517  ;;  %v3308_v41 = vpop.xlane.xlu1 %1307 }
 0x419   : > { %v2520_v28 = vpop.eup %2519  ;;  %v1397_v16 = vmul.f32 %v2518_v53, %v3145_v56  ;;  %v1287_v21 = vpop.xlane.xlu0 %1286 }
 0x41a   : > { %v3301_v60 = vpop.xlane.xlu2 %1283  ;;  %v1396_v54 = vmul.f32 %v2520_v28, %v3148_v12 }
 0x41b   : > { %v1433_v61 = vpack.c.bf16 %v1397_v16, %v1397_v16 }
 0x41c   : > { %v1432_v43 = vpack.c.bf16 %v1396_v54, %v1396_v54 }
 0x41d   : > { %v3304_v52 = vunpack.c.l.b16 %v1433_v61 }
 0x41e   : > { %v3306_v63 = vunpack.c.l.b16 %v1432_v43 }
 0x420   : > { %v1560_v31 = vpack.c.b16 %v3304_v52, %v3306_v63 }
 0x421   : > { %v1269_v62 = vpop.xlane.xlu0 %1268 }
 0x422   : > { %v1266_v0 = vpop.xlane.xlu2 %1265 }
 0x428   : > { %v1290_v1 = vpop.xlane.xlu1 %1289 }
 0x429   : > { %v3314_v29 = vpop.xlane.xlu0 %1313 }
 0x42a   : > { %v3312_v56 = vpop.xlane.xlu2 %1310 }
 0x430   : > { %v1272_v6 = vpop.xlane.xlu1 %1271 }
 0x431   : > { %2521 = vrcp.f32 %v1272_v6  ;;  %v1296_v18 = vpop.xlane.xlu0 %1295 }
 0x432   : > { %v1293_v12 = vpop.xlane.xlu2 %1292  ;;  %2523 = vrcp.f32 %v1269_v62 }
 0x433   : > { %2525 = vrcp.f32 %v1266_v0 }
 0x437   : > { %v2522_v4 = vpop.eup %2521 }
 0x438   : > { %v3316_v46 = vpop.xlane.xlu1 %1316  ;;  %v2524_v23 = vpop.eup %2523  ;;  %v1386_v36 = vmul.f32 %v2522_v4, %v3202_v25 }
 0x439   : > { %v2526_v39 = vpop.eup %2525  ;;  %v1385_v43 = vmul.f32 %v2524_v23, %v3172_v33 }
 0x43a   : > { %v1275_v35 = vpop.xlane.xlu2 %1274  ;;  %v1422_v54 = vpack.c.bf16 %v1386_v36, %v1386_v36  ;;  %v1384_v61 = vmul.f32 %v2526_v39, %v3169_v32 }
 0x43b   : > { %2527 = vrcp.f32 %v1275_v35  ;;  %v1421_v35 = vpack.c.bf16 %v1385_v43, %v1385_v43 }
 0x43c   : > { %2529 = vrcp.f32 %v1263_v24  ;;  %v3327_v24 = vpop.xlane.xlu0 %1331  ;;  %v1462_v62 = vunpack.c.l.b16 %v1422_v54 }
 0x43d   : > { %2531 = vrcp.f32 %v1260_v45  ;;  %v1420_v45 = vpack.c.bf16 %v1384_v61, %v1384_v61  ;;  %v1461_v39 = vunpack.c.l.b16 %v1421_v35 }
 0x43e   : > { %2533 = vrcp.f32 %v1296_v18 }
 0x43f   : > { %2535 = vrcp.f32 %v1257_v5  ;;  %v1460_v23 = vunpack.c.l.b16 %v1420_v45 }
 0x440   : > { %v3319_v40 = vpop.xlane.xlu1 %1325  ;;  %2537 = vrcp.f32 %v3287_v17 }
 0x441   : > { %v2528_v53 = vpop.eup %2527  ;;  %2539 = vrcp.f32 %v1293_v12  ;;  %v1466_v43 = vpack.c.b16 %v1461_v39, %v1460_v23 }
 0x442   : > { %v3321_v28 = vpop.xlane.xlu2 %1328  ;;  %v1387_v16 = vmul.f32 %v2528_v53, %v3218_v44  ;;  %v2530_v25 = vpop.eup %2529  ;;  %2541 = vrcp.f32 %v1290_v1 }
 0x443   : > { %v2532_v4 = vpop.eup %2531  ;;  %v1383_v33 = vmul.f32 %v2530_v25, %v3134_v13 }
 0x444   : > { %v1423_v0 = vpack.c.bf16 %v1387_v16, %v1387_v16  ;;  %v2534_v32 = vpop.eup %2533  ;;  %v1382_v16 = vmul.f32 %v2532_v4, %v3121_v15 }
 0x445   : > { %v2536_v5 = vpop.eup %2535  ;;  %v1394_v12 = vmul.f32 %v2534_v32, %v3207_v38  ;;  %v1419_v54 = vpack.c.bf16 %v1383_v33, %v1383_v33 }
 0x446   : > { %v1463_v6 = vunpack.c.l.b16 %v1423_v0  ;;  %v2538_v53 = vpop.eup %2537  ;;  %v1418_v25 = vpack.c.bf16 %v1382_v16, %v1382_v16  ;;  %v1381_v4 = vmul.f32 %v2536_v5, %v3115_v8 }
 0x447   : > { %v2540_v1 = vpop.eup %2539  ;;  %v3334_v13 = vpop.xlane.xlu0 %1340  ;;  %v1430_v45 = vpack.c.bf16 %v1394_v12, %v1394_v12  ;;  %v1459_v38 = vunpack.c.l.b16 %v1419_v54 }
 0x448   : > { %v1299_v44 = vpop.xlane.xlu1 %1298  ;;  %v1467_v36 = vpack.c.b16 %v1463_v6, %v1462_v62  ;;  %v2542_v61 = vpop.eup %2541  ;;  %v1393_v35 = vmul.f32 %v2540_v1, %v3199_v20  ;;  %v1417_v8 = vpack.c.bf16 %v1381_v4, %v1381_v4 }
 0x449   : > { %2543 = vrcp.f32 %v1299_v44 }
 0x44a   : > { %v1323_v18 = vpop.xlane.xlu2 %1322  ;;  %v1481_v17 = vsel %vm1059_vm13, %v1467_v36, 0  ;;  %v1392_v36 = vmul.f32 %v2542_v61, %v3187_v59 }
 0x44b   : > { %2545 = vrcp.f32 %v1323_v18  ;;  %1487 = vmatpush.bf16.xpose.msrb.mxu2 %v1481_v17  ;;  %v1510_v18 = vunpack.c.l.b16 %v1430_v45 }
 0x44c   : > { %2547 = vrcp.f32 %v1287_v21  ;;  %v1380_v21 = vmul.f32 %v2538_v53, %v3113_v57  ;;  %v1429_v57 = vpack.c.bf16 %v1393_v35, %v1393_v35  ;;  %v1428_v39 = vpack.c.bf16 %v1392_v36, %v1392_v36 }
 0x44d   : > { %2549 = vrcp.f32 %v3301_v60  ;;  %v1478_v60 = vsel %vm1059_vm13, %v1466_v43, 0 }
 0x44e   : > { %v1416_v23 = vpack.c.bf16 %v1380_v21, %v1380_v21  ;;  %v1509_v61 = vunpack.c.l.b16 %v1429_v57 }
 0x44f   : > { %v2544_v0 = vpop.eup %2543 }
 0x450   : > { %v1320_v62 = vpop.xlane.xlu1 %1319  ;;  %v1395_v6 = vmul.f32 %v2544_v0, %v3248_v49  ;;  %v1458_v49 = vunpack.c.l.b16 %v1418_v25  ;;  %v1456_v25 = vunpack.c.l.b16 %v1416_v23 }
 0x451   : > { %v2546_v15 = vpop.eup %2545  ;;  %2551 = vrcp.f32 %v1320_v62  ;;  %v1457_v62 = vunpack.c.l.b16 %v1417_v8 }
 0x452   : > { %2553 = vrcp.f32 %v3316_v46  ;;  %v1431_v44 = vpack.c.bf16 %v1395_v6, %v1395_v6  ;;  %v2548_v32 = vpop.eup %2547  ;;  %v1403_v33 = vmul.f32 %v2546_v15, %v3243_v2  ;;  %v1465_v5 = vpack.c.b16 %v1459_v38, %v1458_v49  ;;  %v1338_v4 = vpop.xlane.xlu2 %1337 }
 0x453   : > { %2555 = vrcp.f32 %v3314_v29  ;;  %1488 = vmatpush.bf16.xpose.msrb.mxu2 %v1478_v60  ;;  %v2550_v20 = vpop.eup %2549  ;;  %v1391_v59 = vmul.f32 %v2548_v32, %v3157_v14  ;;  %v1344_v29 = vpop.xlane.xlu0 %1343  ;;  %v1508_v14 = vunpack.c.l.b16 %v1428_v39  ;;  %v1464_v60 = vpack.c.b16 %v1457_v62, %v1456_v25 }
 0x454   : > { %v1511_v17 = vunpack.c.l.b16 %v1431_v44  ;;  %v1390_v16 = vmul.f32 %v2550_v20, %v3162_v42  ;;  %v1439_v43 = vpack.c.bf16 %v1403_v33, %v1403_v33  ;;  %2557 = vrcp.f32 %v3308_v41 }
 0x455   : > { %2559 = vrcp.f32 %v3312_v56  ;;  %v1475_v42 = vsel %vm1059_vm13, %v1465_v5, 0  ;;  %v1514_v35 = vpack.c.b16 %v1509_v61, %v1508_v14  ;;  %v1472_v23 = vsel %vm1059_vm13, %v1464_v60, 0 }
 0x456   : > { %v1515_v46 = vpack.c.b16 %v1511_v17, %v1510_v18  ;;  %2561 = vrcp.f32 %v1344_v29  ;;  %v1559_v38 = vunpack.c.l.b16 %v1439_v43  ;;  %v1426_v21 = vpack.c.bf16 %v1390_v16, %v1390_v16 }
 0x457   : > { %v2552_v53 = vpop.eup %2551  ;;  %2563 = vrcp.f32 %v1338_v4  ;;  %v1526_v20 = vsel %vm1059_vm13, %v1514_v35, 0 }
 0x458   : > { %v2554_v12 = vpop.eup %2553  ;;  %v1402_v1 = vmul.f32 %v2552_v53, %v3261_v51  ;;  %v1335_v54 = vpop.xlane.xlu1 %1334  ;;  %v1529_v2 = vsel %vm1059_vm13, %v1515_v46, 0  ;;  %v1427_v51 = vpack.c.bf16 %v1391_v59, %v1391_v59  ;;  %v1506_v33 = vunpack.c.l.b16 %v1426_v21 }
 0x459   : > { %v2556_v0 = vpop.eup %2555  ;;  %1535 = vmatpush.bf16.xpose.msrb.mxu3 %v1529_v2  ;;  %v1401_v45 = vmul.f32 %v2554_v12, %v3220_v58 }
 0x45a   : > { %v1438_v6 = vpack.c.bf16 %v1402_v1, %v1402_v1  ;;  %v1400_v41 = vmul.f32 %v2556_v0, %v3189_v9  ;;  %v2558_v36 = vpop.eup %2557  ;;  %v1507_v18 = vunpack.c.l.b16 %v1427_v51  ;;  %v767_v9 = vpop.f32.mrf.mxu0 }
 0x45b   : > { %1489 = vmatpush.bf16.xpose.msrb.mxu2 %v1475_v42  ;;  %v1437_v56 = vpack.c.bf16 %v1401_v45, %v1401_v45  ;;  %v2560_v32 = vpop.eup %2559  ;;  %v1398_v12 = vmul.f32 %v2558_v36, %v3155_v26 }
 0x45c   : > { %v1558_v15 = vunpack.c.l.b16 %v1438_v6  ;;  %v2562_v17 = vpop.eup %2561  ;;  %v1436_v57 = vpack.c.bf16 %v1400_v41, %v1400_v41  ;;  %v1399_v39 = vmul.f32 %v2560_v32, %v3184_v3  ;;  %v1513_v16 = vpack.c.b16 %v1507_v18, %v1506_v33 }
 0x45d   : > { %v1557_v46 = vunpack.c.l.b16 %v1437_v56  ;;  %v1410_v53 = vmul.f32 %v2562_v17, %v3259_v19  ;;  %v2564_v29 = vpop.eup %2563  ;;  %v1434_v3 = vpack.c.bf16 %v1398_v12, %v1398_v12 }
 0x45e   : > { %v1563_v44 = vpack.c.b16 %v1559_v38, %v1558_v15  ;;  %v1556_v59 = vunpack.c.l.b16 %v1436_v57  ;;  %v1435_v61 = vpack.c.bf16 %v1399_v39, %v1399_v39  ;;  %v1523_v25 = vsel %vm1059_vm13, %v1513_v16, 0 }
 0x45f   : > { %v1446_v62 = vpack.c.bf16 %v1410_v53, %v1410_v53  ;;  %v1408_v19 = vmul.f32 %v2564_v29, %v3256_v7  ;;  %v1554_v51 = vunpack.c.l.b16 %v1434_v3 }
 0x460   : > { %v1347_v49 = vpop.xlane.xlu1 %1346  ;;  %v1577_v58 = vsel %vm1059_vm13, %v1563_v44, 0  ;;  %v1555_v14 = vunpack.c.l.b16 %v1435_v61 }
 0x461   : > { %2565 = vrcp.f32 %v1347_v49  ;;  %1536 = vmatpush.bf16.xpose.msrb.mxu3 %v1526_v20  ;;  %v1444_v45 = vpack.c.bf16 %v1408_v19, %v1408_v19 }
 0x462   : > { %2567 = vrcp.f32 %v3334_v13  ;;  %v661_v8 = vpop.permute.xlu0 %660  ;;  %v1562_v13 = vpack.c.b16 %v1557_v46, %v1556_v59  ;;  %v1561_v7 = vpack.c.b16 %v1555_v14, %v1554_v51  ;;  %v769_v21 = vpop.f32.mrf.mxu0  ;;  %v3404_v51 = vld [vmem:[%s2799_s22] sm:$0x3f] }
 0x463   : > { %1490 = vmatpush.bf16.xpose.msrb.mxu2 %v1472_v23  ;;  %v768_v5 = vadd.f32 %v767_v9, %v661_v8  ;;  %2569 = vrcp.f32 %v1335_v54  ;;  %v1606_v54 = vunpack.c.l.b16 %v1446_v62  ;;  %v1604_v41 = vunpack.c.l.b16 %v1444_v45 }
 0x464   : > { %2571 = vrcp.f32 %v3327_v24  ;;  %v1574_v42 = vsel %vm1059_vm13, %v1562_v13, 0  ;;  %v2386_v13 = vld [vmem:[%s3630_s4] sm:$0xff]  ;;  %v1719_v45 = vperm.slane %v3404_v51, 2 }
 0x465   : > { %v1412_v1 = vpack.c.bf16 %v768_v5, %v768_v5  ;;  %2573 = vrcp.f32 %v3319_v40  ;;  %v1571_v40 = vsel %vm1059_vm13, %v1561_v7, 0 }
 0x466   : > { %2575 = vrcp.f32 %v3321_v28 }
 0x467   : > { %v2566_v2 = vpop.eup %2565 }
 0x468   : > { %v2568_v43 = vpop.eup %2567  ;;  %v1411_v0 = vmul.f32 %v2566_v2, %v3274_v34  ;;  %v2387_v2 = vld [vmem:[%s3630_s4 + $0x8] sm:$0xff] }
 0x469   : > { %1537 = vmatpush.bf16.xpose.msrb.mxu3 %v1523_v25  ;;  %v1409_v6 = vmul.f32 %v2568_v43, %v3246_v30  ;;  %v2570_v35 = vpop.eup %2569  ;;  %v1520_v30 = vsel %vm1059_vm13, %v1512_v11, 0 }
 0x46a   : > { %2316 = vmatmul.msk.bf16.vlgmr.msrb.gmra.mxu2 %vm1059_vm13, %v1412_v1  ;;  %v1447_v26 = vpack.c.bf16 %v1411_v0, %v1411_v0  ;;  %v2572_v24 = vpop.eup %2571  ;;  %v1407_v60 = vmul.f32 %v2570_v35, %v3270_v27  ;;  %v772_v17 = vpop.f32.mrf.mxu0 }
 0x46b   : > { %1583 = vmatpush.bf16.xpose.msra.mxu2 %v1577_v58  ;;  %v1445_v38 = vpack.c.bf16 %v1409_v6, %v1409_v6  ;;  %v1406_v36 = vmul.f32 %v2572_v24, %v3223_v55  ;;  %v2574_v28 = vpop.eup %2573  ;;  %v671_v58 = vpop.permute.xlu2 %670  ;;  %v1568_v55 = vsel %vm1059_vm13, %v1560_v31, 0 }
 0x46c   : > { %v1607_v34 = vunpack.c.l.b16 %v1447_v26  ;;  %v1443_v32 = vpack.c.bf16 %v1407_v60, %v1407_v60  ;;  %v2576_v49 = vpop.eup %2575  ;;  %v1404_v11 = vmul.f32 %v2574_v28, %v3235_v37  ;;  %v773_v23 = vadd.f32 %v772_v17, %v671_v58  ;;  %v676_v63 = vpop.permute.xlu0 %675  ;;  %v2611_v60 = vld [vmem:[%s2699_s18 + $0x8] sm:$0xff] }
 0x46d   : > { %v1605_v44 = vunpack.c.l.b16 %v1445_v38  ;;  %v1442_v48 = vpack.c.bf16 %v1406_v36, %v1406_v36  ;;  %v1405_v27 = vmul.f32 %v2576_v49, %v3233_v10  ;;  %v2610_v38 = vld [vmem:[%s2699_s18] sm:$0xff] }
 0x46e   : > { %v1611_v15 = vpack.c.b16 %v1607_v34, %v1606_v54  ;;  %v1603_v18 = vunpack.c.l.b16 %v1443_v32  ;;  %v1440_v8 = vpack.c.bf16 %v1404_v11, %v1404_v11  ;;  %v1414_v46 = vpack.c.bf16 %v773_v23, %v773_v23  ;;  %v2428_v34 = vld [vmem:[%s3631_s5] ss:$0 sm:$0xff]  ;;  %v2612_v32 = vld [vmem:[%s2699_s18 + $0x10] sm:$0xff] }
 0x46f   : > { %v1610_v56 = vpack.c.b16 %v1605_v44, %v1604_v41  ;;  %v1602_v9 = vunpack.c.l.b16 %v1442_v48  ;;  %v1441_v5 = vpack.c.bf16 %v1405_v27, %v1405_v27 }
 0x470   : > { %v1625_v4 = vsel %vm1059_vm13, %v1611_v15, 0  ;;  %v1600_v39 = vunpack.c.l.b16 %v1440_v8 }
 0x471   : > { %1538 = vmatpush.bf16.xpose.msrb.mxu3 %v1520_v30  ;;  %v1622_v33 = vsel %vm1059_vm13, %v1610_v56, 0  ;;  %v1609_v37 = vpack.c.b16 %v1603_v18, %v1602_v9  ;;  %v1601_v53 = vunpack.c.l.b16 %v1441_v5 }
 0x472   : > { %v774_v52 = vpop.f32.mrf.mxu0 }
 0x473   : > { %1584 = vmatpush.bf16.xpose.msra.mxu2 %v1574_v42  ;;  %v1619_v10 = vsel %vm1059_vm13, %v1609_v37, 0  ;;  %v1608_v16 = vpack.c.b16 %v1601_v53, %v1600_v39  ;;  %v775_v59 = vadd.f32 %v774_v52, %v676_v63 }
 0x475   : > { %v1616_v31 = vsel %vm1059_vm13, %v1608_v16, 0  ;;  %v1415_v12 = vpack.c.bf16 %v775_v59, %v775_v59 }
 0x478   : > { %v666_v47 = vpop.permute.xlu1 %665 }
 0x479   : > { %1631 = vmatpush.bf16.xpose.msra.mxu3 %v1625_v4  ;;  %v770_v20 = vadd.f32 %v769_v21, %v666_v47 }
 0x47b   : > { %1585 = vmatpush.bf16.xpose.msra.mxu2 %v1571_v40  ;;  %v1413_v57 = vpack.c.bf16 %v770_v20, %v770_v20 }
 0x47d   : > { %2317 = vmatmul.msk.bf16.vlgmr.msrb.gmra.mxu3 %vm1059_vm13, %v1413_v57 }
 0x481   : > { %1632 = vmatpush.bf16.xpose.msra.mxu3 %v1622_v33  ;;  %v2613_v33 = vld [vmem:[%s2699_s18 + $0x18] sm:$0xff] }
 0x483   : > { %1586 = vmatpush.bf16.xpose.msra.mxu2 %v1568_v55  ;;  %v2614_v55 = vld [vmem:[%s2699_s18 + $0x20] sm:$0xff] }
 0x489   : > { %1633 = vmatpush.bf16.xpose.msra.mxu3 %v1619_v10 }
 0x48a   : > { %2318 = vmatmul.msk.bf16.vlgmr.msra.gmra.mxu2 %vm1059_vm13, %v1414_v46  ;;  %v2615_v46 = vld [vmem:[%s2699_s18 + $0x28] sm:$0xff] }
 0x48b   : > { %1696 = vmatpush.bf16.msrb.mxu2 %v2387_v2 }
 0x48f   : > { %1697 = vmatpush.bf16.msrb.mxu2 %v2386_v13 }
 0x491   : > { %1634 = vmatpush.bf16.xpose.msra.mxu3 %v1616_v31 }
 0x498   : > { %2319 = vmatmul.msk.bf16.vlgmr.msra.gmra.mxu3 %vm1059_vm13, %v1415_v12 }
 0x4ed   : > { %v1492_v29 = vpop.f32.mrf.mxu2 }
 0x4f5   : > { %v1494_v1 = vpop.f32.mrf.mxu2 }
 0x500   : > { %v1540_v61 = vpop.f32.mrf.mxu3 }
 0x501   : > { %v1640_v43 = vpack.c.bf16 %v1540_v61, %v1492_v29  ;;  %v2616_v61 = vld [vmem:[%s2699_s18 + $0x30] sm:$0xff] }
 0x503   : > { %1650 = vxpose.xlu0.c.b16.start [1/2] (short) (narrow) %v1640_v43, 64 }
 0x508   : > { %v1542_v25 = vpop.f32.mrf.mxu3 }
 0x50d   : > { %v1588_v0 = vpop.f32.mrf.mxu2 }
 0x515   : > { %v1590_v62 = vpop.f32.mrf.mxu2 }
 0x51b   : > { %v1636_v3 = vpop.f32.mrf.mxu3 }
 0x51c   : > { %v1641_v19 = vpack.c.bf16 %v1636_v3, %v1588_v0 }
 0x51e   : > { %1651 = vxpose.xlu0.c.b16.end [2/2] (short) (narrow) %v1641_v19, 64 }
 0x523   : > { %v1638_v26 = vpop.f32.mrf.mxu3 }
 0x5ba   : > { %v1658_v42 = vpop.trf.xlu0 }
 0x5bb   : > { %2328 = vmatmul.msk.bf16.vlgmr.msrb.gmra.mxu2 %vm387_vm0, %v1658_v42 }
 0x5ca   : > { %v1659_v14 = vpop.trf.xlu0 }
 0x5cb   : > { %2329 = vmatmul.msk.bf16.gmra.mxu2 %vm387_vm0, %v1659_v14 }
 0x5da   : > { %v1660_v6 = vpop.trf.xlu0 }
 0x5db   : > { %2330 = vmatmul.msk.bf16.gmra.mxu2 %vm387_vm0, %v1660_v6 }
 0x5ea   : > { %v1661_v54 = vpop.trf.xlu0 }
 0x5eb   : > { %2331 = vmatmul.msk.bf16.gmra.mxu2 %vm387_vm0, %v1661_v54  ;;  %v2617_v54 = vld [vmem:[%s2699_s18 + $0x38] sm:$0xff] }
 0x63e   : > { %v1699_v35 = vpop.f32.mrf.mxu2 }
 0x63f   : > { %v1700_v15 = vadd.f32 %v2428_v34, %v1699_v35 }
 0x641   : > { %v1720_v7 = vmul.f32 %v1719_v45, %v1700_v15 }
 0x643   : > { %v3408_v24 = vadd.f32 %v2610_v38, %v1720_v7 }
 0x645   : > { %v1736_v21 = vsel %vm387_vm0, %v3408_v24, 0.0 }
 0x646   : > { %v1701_v30 = vpop.f32.mrf.mxu2  ;;  %1737 = vadd.xlane.f32.xlu1 %v1736_v21 }
 0x647   : > { %v1702_v4 = vadd.f32 %v2428_v34, %v1701_v30 }
 0x649   : > { %v1721_v41 = vmul.f32 %v1719_v45, %v1702_v4 }
 0x64b   : > { %v3413_v40 = vadd.f32 %v2611_v60, %v1721_v41 }
 0x64d   : > { %v1739_v44 = vsel %vm387_vm0, %v3413_v40, 0.0 }
 0x64e   : > { %1740 = vadd.xlane.f32.xlu2 %v1739_v44  ;;  %v1704_v36 = vpop.f32.mrf.mxu2 }
 0x64f   : > { %v1705_v28 = vadd.f32 %v2428_v34, %v1704_v36 }
 0x651   : > { %v1722_v56 = vmul.f32 %v1719_v45, %v1705_v28 }
 0x653   : > { %v3418_v49 = vadd.f32 %v2612_v32, %v1722_v56 }
 0x655   : > { %v1742_v48 = vsel %vm387_vm0, %v3418_v49, 0.0 }
 0x656   : > { %v1706_v47 = vpop.f32.mrf.mxu2  ;;  %1743 = vadd.xlane.f32.xlu2 %v1742_v48 }
 0x657   : > { %v1707_v11 = vadd.f32 %v2428_v34, %v1706_v47 }
 0x659   : > { %v1723_v20 = vmul.f32 %v1719_v45, %v1707_v11 }
 0x65b   : > { %v3423_v18 = vadd.f32 %v2613_v33, %v1723_v20  ;;  %v2389_v33 = vld [vmem:[%s3632_s6 + $0x8] sm:$0xff] }
 0x65c   : > { %1972 = vmatpush.bf16.msrb.mxu3 %v2389_v33 }
 0x65d   : > { %v1745_v27 = vsel %vm387_vm0, %v3423_v18, 0.0 }
 0x65e   : > { %1746 = vadd.xlane.f32.xlu1 %v1745_v27  ;;  %v1709_v17 = vpop.f32.mrf.mxu2 }
 0x65f   : > { %v1710_v58 = vadd.f32 %v2428_v34, %v1709_v17 }
 0x661   : > { %v1724_v57 = vmul.f32 %v1719_v45, %v1710_v58  ;;  %v2388_v58 = vld [vmem:[%s3632_s6] sm:$0xff] }
 0x662   : > { %1973 = vmatpush.bf16.msrb.mxu3 %v2388_v58 }
 0x663   : > { %v3428_v9 = vadd.f32 %v2614_v55, %v1724_v57 }
 0x665   : > { %v1748_v23 = vsel %vm387_vm0, %v3428_v9, 0.0 }
 0x666   : > { %v1711_v37 = vpop.f32.mrf.mxu2  ;;  %1749 = vadd.xlane.f32.xlu2 %v1748_v23 }
 0x667   : > { %v1712_v8 = vadd.f32 %v2428_v34, %v1711_v37 }
 0x669   : > { %v1725_v5 = vmul.f32 %v1719_v45, %v1712_v8 }
 0x66b   : > { %v3433_v10 = vadd.f32 %v2615_v46, %v1725_v5 }
 0x66d   : > { %v1751_v39 = vsel %vm387_vm0, %v3433_v10, 0.0 }
 0x66e   : > { %1752 = vadd.xlane.f32.xlu0 %v1751_v39  ;;  %v1714_v53 = vpop.f32.mrf.mxu2 }
 0x66f   : > { %v1715_v63 = vadd.f32 %v2428_v34, %v1714_v53 }
 0x671   : > { %v1726_v12 = vmul.f32 %v1719_v45, %v1715_v63 }
 0x673   : > { %v3446_v43 = vadd.f32 %v2616_v61, %v1726_v12 }
 0x675   : > { %v1754_v3 = vsel %vm387_vm0, %v3446_v43, 0.0 }
 0x676   : > { %v1716_v2 = vpop.f32.mrf.mxu2 }
 0x677   : > { %v1717_v25 = vadd.f32 %v2428_v34, %v1716_v2 }
 0x679   : > { %v1727_v26 = vmul.f32 %v1719_v45, %v1717_v25 }
 0x67b   : > { %v3461_v35 = vadd.f32 %v2617_v54, %v1727_v26 }
 0x67d   : > { %v1757_v15 = vsel %vm387_vm0, %v3461_v35, 0.0 }
 0x6b9   : > { %v1738_v16 = vpop.xlane.xlu1 %1737 }
 0x6ba   : > { %v1760_v52 = vmul.f32 %v1738_v16, %v2717_v22 }
 0x6bc   : > { %v3439_v31 = vsub.f32 %v3408_v24, %v1760_v52 }
 0x6be   : > { %v1776_v59 = vmul.f32 %v3439_v31, %v3439_v31 }
 0x6c0   : > { %v1784_v29 = vsel %vm387_vm0, %v1776_v59, 0.0 }
 0x6c1   : > { %v1741_v1 = vpop.xlane.xlu2 %1740  ;;  %1785 = vadd.xlane.f32.xlu1 %v1784_v29 }
 0x6c2   : > { %v1761_v13 = vmul.f32 %v1741_v1, %v2717_v22 }
 0x6c4   : > { %v3449_v0 = vsub.f32 %v3413_v40, %v1761_v13 }
 0x6c6   : > { %v1777_v62 = vmul.f32 %v3449_v0, %v3449_v0 }
 0x6c8   : > { %v1787_v19 = vsel %vm387_vm0, %v1777_v62, 0.0 }
 0x6c9   : > { %v1744_v42 = vpop.xlane.xlu2 %1743  ;;  %1788 = vadd.xlane.f32.xlu2 %v1787_v19  ;;  %1755 = vadd.xlane.f32.xlu1 %v1754_v3 }
 0x6ca   : > { %v1762_v14 = vmul.f32 %v1744_v42, %v2717_v22 }
 0x6cc   : > { %v3458_v6 = vsub.f32 %v3418_v49, %v1762_v14 }
 0x6ce   : > { %v1778_v34 = vmul.f32 %v3458_v6, %v3458_v6 }
 0x6d0   : > { %v1790_v7 = vsel %vm387_vm0, %v1778_v34, 0.0 }
 0x6d1   : > { %v1747_v45 = vpop.xlane.xlu1 %1746  ;;  %1758 = vadd.xlane.f32.xlu2 %v1757_v15  ;;  %1791 = vadd.xlane.f32.xlu1 %v1790_v7 }
 0x6d2   : > { %v1763_v38 = vmul.f32 %v1747_v45, %v2717_v22 }
 0x6d4   : > { %v3470_v21 = vsub.f32 %v3423_v18, %v1763_v38  ;;  %v3514_v38 = vperm.slane %v2821_v50, 4 }
 0x6d6   : > { %v1779_v30 = vmul.f32 %v3470_v21, %v3470_v21 }
 0x6d8   : > { %v1793_v4 = vsel %vm387_vm0, %v1779_v30, 0.0 }
 0x6d9   : > { %v1750_v41 = vpop.xlane.xlu2 %1749  ;;  %1794 = vadd.xlane.f32.xlu2 %v1793_v4 }
 0x6da   : > { %v1764_v60 = vmul.f32 %v1750_v41, %v2717_v22 }
 0x6dc   : > { %v3477_v44 = vsub.f32 %v3428_v9, %v1764_v60 }
 0x6de   : > { %v1780_v36 = vmul.f32 %v3477_v44, %v3477_v44 }
 0x6e0   : > { %v1796_v28 = vsel %vm387_vm0, %v1780_v36, 0.0 }
 0x6e1   : > { %1797 = vadd.xlane.f32.xlu1 %v1796_v28  ;;  %v1753_v56 = vpop.xlane.xlu0 %1752 }
 0x6e2   : > { %v1765_v32 = vmul.f32 %v1753_v56, %v2717_v22  ;;  %v3518_v56 = vperm.slane %v3404_v51, 3 }
 0x6e4   : > { %v3484_v48 = vsub.f32 %v3433_v10, %v1765_v32 }
 0x6e6   : > { %v1781_v47 = vmul.f32 %v3484_v48, %v3484_v48 }
 0x6e8   : > { %v1799_v11 = vsel %vm387_vm0, %v1781_v47, 0.0 }
 0x6e9   : > { %1800 = vadd.xlane.f32.xlu2 %v1799_v11 }
 0x734   : > { %v1786_v20 = vpop.xlane.xlu1 %1785 }
 0x735   : > { %v1808_v27 = vmul.f32 %v1786_v20, %v2717_v22 }
 0x737   : > { %v1816_v17 = vadd.f32 1e-05, %v1808_v27 }
 0x739   : > { %2577 = vrsqrt.f32 %v1816_v17  ;;  %vm1830_vm15 = vweird.f32 %v1816_v17 }
 0x73c   : > { %v1789_v57 = vpop.xlane.xlu2 %1788  ;;  %v1756_v55 = vpop.xlane.xlu1 %1755 }
 0x73d   : > { %v1809_v23 = vmul.f32 %v1789_v57, %v2717_v22  ;;  %v1766_v37 = vmul.f32 %v1756_v55, %v2717_v22 }
 0x73f   : > { %v2578_v8 = vpop.eup %2577  ;;  %v1817_v5 = vadd.f32 1e-05, %v1809_v23  ;;  %v3499_v46 = vsub.f32 %v3446_v43, %v1766_v37 }
 0x740   : > { %v1825_v39 = vmul.f32 %v2578_v8, %v1816_v17  ;;  %vm1831_vm14 = vweird.f32 %v2578_v8 }
 0x741   : > { %2579 = vrsqrt.f32 %v1817_v5  ;;  %v1782_v53 = vmul.f32 %v3499_v46, %v3499_v46  ;;  %vm1832_vm1 = vmor %vm1830_vm15, %vm1831_vm14  ;;  %vm1840_vm3 = vweird.f32 %v1817_v5 }
 0x742   : > { %v1826_v16 = vmul.f32 %v2578_v8, %v1825_v39 }
 0x743   : > { %v1802_v52 = vsel %vm387_vm0, %v1782_v53, 0.0 }
 0x744   : > { %v1827_v63 = vmul.f32 0.5, %v1826_v16  ;;  %v1759_v59 = vpop.xlane.xlu2 %1758  ;;  %1803 = vadd.xlane.f32.xlu1 %v1802_v52  ;;  %v1792_v12 = vpop.xlane.xlu1 %1791 }
 0x745   : > { %v1767_v29 = vmul.f32 %v1759_v59, %v2717_v22  ;;  %v1810_v1 = vmul.f32 %v1792_v12, %v2717_v22 }
 0x746   : > { %v1828_v2 = vsub.f32 1.5, %v1827_v63 }
 0x747   : > { %v2580_v13 = vpop.eup %2579  ;;  %v3507_v61 = vsub.f32 %v3461_v35, %v1767_v29  ;;  %v1818_v25 = vadd.f32 1e-05, %v1810_v1 }
 0x748   : > { %v1829_v62 = vmul.f32 %v2578_v8, %v1828_v2  ;;  %v1835_v3 = vmul.f32 %v2580_v13, %v1817_v5  ;;  %vm1841_vm2 = vweird.f32 %v2580_v13 }
 0x749   : > { %2581 = vrsqrt.f32 %v1818_v25  ;;  %v1783_v19 = vmul.f32 %v3507_v61, %v3507_v61  ;;  %vm1842_vm4 = vmor %vm1840_vm3, %vm1841_vm2  ;;  %vm1850_vm6 = vweird.f32 %v1818_v25 }
 0x74a   : > { %v1836_v26 = vmul.f32 %v2580_v13, %v1835_v3  ;;  %v1833_v14 = vsel %vm1832_vm1, %v2578_v8, %v1829_v62 }
 0x74b   : > { %v1805_v42 = vsel %vm387_vm0, %v1783_v19, 0.0  ;;  %v1904_v30 = vmul.f32 %v1833_v14, %v3439_v31 }
 0x74c   : > { %v1837_v54 = vmul.f32 0.5, %v1836_v26  ;;  %v1795_v34 = vpop.xlane.xlu2 %1794  ;;  %1806 = vadd.xlane.f32.xlu2 %v1805_v42 }
 0x74d   : > { %v1811_v15 = vmul.f32 %v1795_v34, %v2717_v22  ;;  %v1913_v32 = vmul.f32 %v3514_v38, %v1904_v30 }
 0x74e   : > { %v1838_v7 = vsub.f32 1.5, %v1837_v54 }
 0x74f   : > { %v2582_v45 = vpop.eup %2581  ;;  %v1819_v4 = vadd.f32 1e-05, %v1811_v15  ;;  %v1922_v17 = vadd.f32 %v3518_v56, %v1913_v32 }
 0x750   : > { %v1839_v41 = vmul.f32 %v2580_v13, %v1838_v7  ;;  %v1845_v60 = vmul.f32 %v2582_v45, %v1818_v25  ;;  %vm1851_vm5 = vweird.f32 %v2582_v45 }
 0x751   : > { %2583 = vrsqrt.f32 %v1819_v4  ;;  %vm1852_vm7 = vmor %vm1850_vm6, %vm1851_vm5  ;;  %vm1860_vm9 = vweird.f32 %v1819_v4 }
 0x752   : > { %v1843_v36 = vsel %vm1842_vm4, %v2580_v13, %v1839_v41  ;;  %v1846_v28 = vmul.f32 %v2582_v45, %v1845_v60 }
 0x753   : > { %v1905_v47 = vmul.f32 %v1843_v36, %v3449_v0 }
 0x754   : > { %v1847_v11 = vmul.f32 0.5, %v1846_v28  ;;  %v1798_v50 = vpop.xlane.xlu1 %1797 }
 0x755   : > { %v1914_v20 = vmul.f32 %v3514_v38, %v1905_v47  ;;  %v1812_v31 = vmul.f32 %v1798_v50, %v2717_v22 }
 0x756   : > { %v1848_v33 = vsub.f32 1.5, %v1847_v11 }
 0x757   : > { %v2584_v27 = vpop.eup %2583  ;;  %v1923_v58 = vadd.f32 %v3518_v56, %v1914_v20  ;;  %v1820_v57 = vadd.f32 1e-05, %v1812_v31 }
 0x758   : > { %v1849_v55 = vmul.f32 %v2582_v45, %v1848_v33  ;;  %v1855_v23 = vmul.f32 %v2584_v27, %v1819_v4  ;;  %vm1861_vm8 = vweird.f32 %v2584_v27 }
 0x759   : > { %2585 = vrsqrt.f32 %v1820_v57  ;;  %v1930_v37 = vpack.c.bf16 %v1923_v58, %v1922_v17  ;;  %vm1862_vm10 = vmor %vm1860_vm9, %vm1861_vm8  ;;  %vm1870_vm12 = vweird.f32 %v1820_v57  ;;  %v2397_v58 = vld [vmem:[%s3634_s8 + $0x38] sm:$0xff] }
 0x75a   : > { %v1856_v0 = vmul.f32 %v2584_v27, %v1855_v23  ;;  %v1853_v8 = vsel %vm1852_vm7, %v2582_v45, %v1849_v55  ;;  %2139 = vmatpush.bf16.msrb.mxu0 %v2397_v58  ;;  %2398 = vmatpush.bf16.msra.mxu1 %v2397_v58  ;;  %v2396_v23 = vld [vmem:[%s3634_s8 + $0x30] sm:$0xff] }
 0x75b   : > { %2340 = vmatmul.msk.bf16.vlgmr.msrb.gmra.mxu3 %vm387_vm0, %v1930_v37  ;;  %v1906_v63 = vmul.f32 %v1853_v8, %v3458_v6 }
 0x75c   : > { %v1857_v5 = vmul.f32 0.5, %v1856_v0  ;;  %v1801_v39 = vpop.xlane.xlu2 %1800 }
 0x75d   : > { %v1813_v53 = vmul.f32 %v1801_v39, %v2717_v22  ;;  %v1915_v25 = vmul.f32 %v3514_v38, %v1906_v63 }
 0x75e   : > { %v1858_v16 = vsub.f32 1.5, %v1857_v5  ;;  %2140 = vmatpush.bf16.msrb.mxu0 %v2396_v23  ;;  %2399 = vmatpush.bf16.msra.mxu1 %v2396_v23  ;;  %v2395_v5 = vld [vmem:[%s3634_s8 + $0x28] sm:$0xff] }
 0x75f   : > { %v2586_v52 = vpop.eup %2585  ;;  %v1821_v59 = vadd.f32 1e-05, %v1813_v53  ;;  %v1924_v42 = vadd.f32 %v3518_v56, %v1915_v25  ;;  %v2392_v25 = vld [vmem:[%s3634_s8 + $0x10] sm:$0xff] }
 0x760   : > { %v1859_v12 = vmul.f32 %v2584_v27, %v1858_v16  ;;  %v1865_v29 = vmul.f32 %v2586_v52, %v1820_v57  ;;  %vm1871_vm11 = vweird.f32 %v2586_v52 }
 0x761   : > { %2587 = vrsqrt.f32 %v1821_v59  ;;  %vm1872_vm13 = vmor %vm1870_vm12, %vm1871_vm11  ;;  %vm1880_vm15 = vweird.f32 %v1821_v59 }
 0x762   : > { %v1863_v1 = vsel %vm1862_vm10, %v2584_v27, %v1859_v12  ;;  %v1866_v2 = vmul.f32 %v2586_v52, %v1865_v29  ;;  %2141 = vmatpush.bf16.msrb.mxu0 %v2395_v5  ;;  %2400 = vmatpush.bf16.msra.mxu1 %v2395_v5  ;;  %v2393_v29 = vld [vmem:[%s3634_s8 + $0x18] sm:$0xff] }
 0x763   : > { %v1907_v13 = vmul.f32 %v1863_v1, %v3470_v21 }
 0x764   : > { %v1867_v62 = vmul.f32 0.5, %v1866_v2 }
 0x765   : > { %v1916_v3 = vmul.f32 %v3514_v38, %v1907_v13 }
 0x766   : > { %v1868_v19 = vsub.f32 1.5, %v1867_v62 }
 0x767   : > { %v2588_v26 = vpop.eup %2587  ;;  %v1925_v6 = vadd.f32 %v3518_v56, %v1916_v3 }
 0x768   : > { %v1869_v14 = vmul.f32 %v2586_v52, %v1868_v19  ;;  %v1875_v54 = vmul.f32 %v2588_v26, %v1821_v59  ;;  %vm1881_vm14 = vweird.f32 %v2588_v26  ;;  %v3571_v19 = vld [vmem:[%s3633_s7] ss:$0 sm:$0xff] }
 0x769   : > { %v1931_v34 = vpack.c.bf16 %v1925_v6, %v1924_v42  ;;  %vm1882_vm1 = vmor %vm1880_vm15, %vm1881_vm14 }
 0x76a   : > { %v1876_v15 = vmul.f32 %v2588_v26, %v1875_v54  ;;  %v1873_v21 = vsel %vm1872_vm13, %v2586_v52, %v1869_v14  ;;  %v2394_v52 = vld [vmem:[%s3634_s8 + $0x20] sm:$0xff] }
 0x76b   : > { %2341 = vmatmul.msk.bf16.gmra.mxu3 %vm387_vm0, %v1931_v34  ;;  %v1908_v30 = vmul.f32 %v1873_v21, %v3477_v44  ;;  %2142 = vmatpush.bf16.msrb.mxu0 %v2394_v52 }
 0x76c   : > { %v1877_v7 = vmul.f32 0.5, %v1876_v15  ;;  %2401 = vmatpush.bf16.msra.mxu1 %v2394_v52 }
 0x76d   : > { %v1917_v36 = vmul.f32 %v3514_v38, %v1908_v30 }
 0x76e   : > { %v1878_v45 = vsub.f32 1.5, %v1877_v7 }
 0x76f   : > { %v1926_v32 = vadd.f32 %v3518_v56, %v1917_v36  ;;  %2143 = vmatpush.bf16.msrb.mxu0 %v2393_v29 }
 0x770   : > { %v1879_v4 = vmul.f32 %v2588_v26, %v1878_v45  ;;  %2402 = vmatpush.bf16.msra.mxu1 %v2393_v29 }
 0x772   : > { %v1883_v41 = vsel %vm1882_vm1, %v2588_v26, %v1879_v4 }
 0x773   : > { %v1909_v60 = vmul.f32 %v1883_v41, %v3484_v48  ;;  %2144 = vmatpush.bf16.msrb.mxu0 %v2392_v25 }
 0x774   : > { %2403 = vmatpush.bf16.msra.mxu1 %v2392_v25 }
 0x775   : > { %v1918_v28 = vmul.f32 %v3514_v38, %v1909_v60 }
 0x777   : > { %v1927_v47 = vadd.f32 %v3518_v56, %v1918_v28 }
 0x779   : > { %v1932_v11 = vpack.c.bf16 %v1927_v47, %v1926_v32 }
 0x77b   : > { %2342 = vmatmul.msk.bf16.gmra.mxu3 %vm387_vm0, %v1932_v11 }
 0x7b7   : > { %v1804_v50 = vpop.xlane.xlu1 %1803 }
 0x7b8   : > { %v1814_v44 = vmul.f32 %v1804_v50, %v2717_v22 }
 0x7ba   : > { %v1822_v20 = vadd.f32 1e-05, %v1814_v44 }
 0x7bc   : > { %2589 = vrsqrt.f32 %v1822_v20  ;;  %vm1890_vm3 = vweird.f32 %v1822_v20 }
 0x7bf   : > { %v1807_v31 = vpop.xlane.xlu2 %1806 }
 0x7c0   : > { %v1815_v33 = vmul.f32 %v1807_v31, %v2717_v22 }
 0x7c2   : > { %v2590_v48 = vpop.eup %2589  ;;  %v1823_v27 = vadd.f32 1e-05, %v1815_v33 }
 0x7c3   : > { %v1885_v17 = vmul.f32 %v2590_v48, %v1822_v20  ;;  %vm1891_vm2 = vweird.f32 %v2590_v48 }
 0x7c4   : > { %2591 = vrsqrt.f32 %v1823_v27  ;;  %vm1892_vm4 = vmor %vm1890_vm3, %vm1891_vm2  ;;  %vm1900_vm6 = vweird.f32 %v1823_v27 }
 0x7c5   : > { %v1886_v57 = vmul.f32 %v2590_v48, %v1885_v17 }
 0x7c7   : > { %v1887_v55 = vmul.f32 0.5, %v1886_v57 }
 0x7c9   : > { %v1888_v37 = vsub.f32 1.5, %v1887_v55 }
 0x7ca   : > { %v2592_v22 = vpop.eup %2591 }
 0x7cb   : > { %v1889_v0 = vmul.f32 %v2590_v48, %v1888_v37  ;;  %v1895_v8 = vmul.f32 %v2592_v22, %v1823_v27  ;;  %vm1901_vm5 = vweird.f32 %v2592_v22 }
 0x7cc   : > { %vm1902_vm7 = vmor %vm1900_vm6, %vm1901_vm5 }
 0x7cd   : > { %v1896_v39 = vmul.f32 %v2592_v22, %v1895_v8  ;;  %v1893_v53 = vsel %vm1892_vm4, %v2590_v48, %v1889_v0 }
 0x7ce   : > { %v1910_v59 = vmul.f32 %v1893_v53, %v3499_v46 }
 0x7cf   : > { %v1897_v16 = vmul.f32 0.5, %v1896_v39 }
 0x7d0   : > { %v1919_v13 = vmul.f32 %v3514_v38, %v1910_v59 }
 0x7d1   : > { %v1898_v63 = vsub.f32 1.5, %v1897_v16 }
 0x7d2   : > { %v1928_v62 = vadd.f32 %v3518_v56, %v1919_v13 }
 0x7d3   : > { %v1899_v12 = vmul.f32 %v2592_v22, %v1898_v63 }
 0x7d5   : > { %v1903_v1 = vsel %vm1902_vm7, %v2592_v22, %v1899_v12 }
 0x7d6   : > { %v1911_v2 = vmul.f32 %v1903_v1, %v3507_v61  ;;  %v2391_v61 = vld [vmem:[%s3634_s8 + $0x8] sm:$0xff] }
 0x7d7   : > { %2145 = vmatpush.bf16.msrb.mxu0 %v2391_v61  ;;  %2404 = vmatpush.bf16.msra.mxu1 %v2391_v61 }
 0x7d8   : > { %v1920_v46 = vmul.f32 %v3514_v38, %v1911_v2 }
 0x7da   : > { %v1929_v3 = vadd.f32 %v3518_v56, %v1920_v46  ;;  %v2390_v56 = vld [vmem:[%s3634_s8] sm:$0xff] }
 0x7db   : > { %2146 = vmatpush.bf16.msrb.mxu0 %v2390_v56  ;;  %2405 = vmatpush.bf16.msra.mxu1 %v2390_v56 }
 0x7dc   : > { %v1933_v26 = vpack.c.bf16 %v1929_v3, %v1928_v62 }
 0x7de   : > { %v1975_v42 = vpop.f32.mrf.mxu3  ;;  %2343 = vmatmul.msk.bf16.gmra.mxu3 %vm387_vm0, %v1933_v26 }
 0x7df   : > { %v1976_v38 = vadd.f32 %v3571_v19, %v1975_v42 }
 0x7e1   : > { %v1995_v6 = vmul.f32 %v1976_v38, %v1976_v38 }
 0x7e3   : > { %v2003_v14 = vmul.f32 %v1995_v6, %v1976_v38 }
 0x7e5   : > { %v2011_v54 = vmul.f32 0.044715, %v2003_v14 }
 0x7e6   : > { %v1977_v34 = vpop.f32.mrf.mxu3 }
 0x7e7   : > { %v2019_v15 = vadd.f32 %v2011_v54, %v1976_v38  ;;  %v1978_v21 = vadd.f32 %v3571_v19, %v1977_v34 }
 0x7e9   : > { %v2027_v7 = vmul.f32 0.7978846, %v2019_v15  ;;  %v1996_v45 = vmul.f32 %v1978_v21, %v1978_v21 }
 0x7eb   : > { %v2004_v30 = vmul.f32 %v1996_v45, %v1978_v21  ;;  %2593 = vtanh.f32 %v2027_v7 }
 0x7ed   : > { %v2012_v4 = vmul.f32 0.044715, %v2004_v30 }
 0x7ee   : > { %v1980_v41 = vpop.f32.mrf.mxu3 }
 0x7ef   : > { %v2020_v60 = vadd.f32 %v2012_v4, %v1978_v21  ;;  %v1981_v36 = vadd.f32 %v3571_v19, %v1980_v41 }
 0x7f1   : > { %v2028_v28 = vmul.f32 0.7978846, %v2020_v60  ;;  %v1997_v32 = vmul.f32 %v1981_v36, %v1981_v36  ;;  %v2594_v47 = vpop.eup %2593 }
 0x7f2   : > { %v2043_v20 = vadd.f32 1.0, %v2594_v47 }
 0x7f3   : > { %2595 = vtanh.f32 %v2028_v28  ;;  %v2005_v11 = vmul.f32 %v1997_v32, %v1981_v36 }
 0x7f4   : > { %v2051_v57 = vmul.f32 0.5, %v2043_v20 }
 0x7f5   : > { %v2013_v50 = vmul.f32 0.044715, %v2005_v11 }
 0x7f6   : > { %v1982_v44 = vpop.f32.mrf.mxu3  ;;  %v2059_v0 = vmul.f32 %v2051_v57, %v1976_v38 }
 0x7f7   : > { %v2021_v31 = vadd.f32 %v2013_v50, %v1981_v36  ;;  %v1983_v33 = vadd.f32 %v3571_v19, %v1982_v44 }
 0x7f9   : > { %v2596_v48 = vpop.eup %2595  ;;  %v1998_v27 = vmul.f32 %v1983_v33, %v1983_v33  ;;  %v2029_v17 = vmul.f32 0.7978846, %v2021_v31 }
 0x7fa   : > { %v2044_v58 = vadd.f32 1.0, %v2596_v48 }
 0x7fb   : > { %v2006_v55 = vmul.f32 %v1998_v27, %v1983_v33  ;;  %2597 = vtanh.f32 %v2029_v17 }
 0x7fc   : > { %v2052_v23 = vmul.f32 0.5, %v2044_v58 }
 0x7fd   : > { %v2014_v37 = vmul.f32 0.044715, %v2006_v55 }
 0x7fe   : > { %v1985_v22 = vpop.f32.mrf.mxu3  ;;  %v2060_v8 = vmul.f32 %v2052_v23, %v1978_v21 }
 0x7ff   : > { %v2022_v5 = vadd.f32 %v2014_v37, %v1983_v33  ;;  %v1986_v39 = vadd.f32 %v3571_v19, %v1985_v22  ;;  %v2430_v22 = vld [vmem:[%s3635_s9] ss:$0 sm:$0xff] }
 0x800   : > { %v2067_v53 = vpack.c.bf16 %v2060_v8, %v2059_v0 }
 0x801   : > { %v1999_v16 = vmul.f32 %v1986_v39, %v1986_v39  ;;  %v2030_v52 = vmul.f32 0.7978846, %v2022_v5  ;;  %v2598_v63 = vpop.eup %2597 }
 0x802   : > { %2147 = vmatmul.bf16.vlgmr.msrb.gmra.mxu0 %v2067_v53  ;;  %v2045_v1 = vadd.f32 1.0, %v2598_v63 }
 0x803   : > { %v2007_v59 = vmul.f32 %v1999_v16, %v1986_v39  ;;  %2599 = vtanh.f32 %v2030_v52 }
 0x804   : > { %v2053_v61 = vmul.f32 0.5, %v2045_v1 }
 0x805   : > { %v2015_v12 = vmul.f32 0.044715, %v2007_v59 }
 0x806   : > { %v1987_v29 = vpop.f32.mrf.mxu3  ;;  %v2061_v56 = vmul.f32 %v2053_v61, %v1981_v36 }
 0x807   : > { %v2023_v2 = vadd.f32 %v2015_v12, %v1986_v39  ;;  %v1988_v13 = vadd.f32 %v3571_v19, %v1987_v29 }
 0x809   : > { %v2600_v25 = vpop.eup %2599  ;;  %v2000_v46 = vmul.f32 %v1988_v13, %v1988_v13  ;;  %v2031_v62 = vmul.f32 0.7978846, %v2023_v2 }
 0x80a   : > { %v2046_v3 = vadd.f32 1.0, %v2600_v25 }
 0x80b   : > { %v2008_v26 = vmul.f32 %v2000_v46, %v1988_v13  ;;  %2601 = vtanh.f32 %v2031_v62 }
 0x80c   : > { %v2054_v42 = vmul.f32 0.5, %v2046_v3 }
 0x80d   : > { %v2016_v38 = vmul.f32 0.044715, %v2008_v26 }
 0x80e   : > { %v2062_v6 = vmul.f32 %v2054_v42, %v1983_v33 }
 0x80f   : > { %v2024_v14 = vadd.f32 %v2016_v38, %v1988_v13 }
 0x810   : > { %v2068_v54 = vpack.c.bf16 %v2062_v6, %v2061_v56 }
 0x811   : > { %v2032_v34 = vmul.f32 0.7978846, %v2024_v14  ;;  %v2602_v15 = vpop.eup %2601 }
 0x812   : > { %2152 = vmatmul.bf16.gmra.mxu0 %v2068_v54  ;;  %v2047_v21 = vadd.f32 1.0, %v2602_v15 }
 0x813   : > { %2603 = vtanh.f32 %v2032_v34 }
 0x814   : > { %v2055_v30 = vmul.f32 0.5, %v2047_v21 }
 0x816   : > { %v2063_v41 = vmul.f32 %v2055_v30, %v1986_v39 }
 0x819   : > { %v2604_v7 = vpop.eup %2603 }
 0x81a   : > { %v2048_v45 = vadd.f32 1.0, %v2604_v7 }
 0x81c   : > { %v2056_v4 = vmul.f32 0.5, %v2048_v45 }
 0x81e   : > { %v2064_v60 = vmul.f32 %v2056_v4, %v1988_v13 }
 0x820   : > { %v2069_v28 = vpack.c.bf16 %v2064_v60, %v2063_v41 }
 0x822   : > { %2157 = vmatmul.bf16.gmra.mxu0 %v2069_v28 }
 0x861   : > { %v1990_v32 = vpop.f32.mrf.mxu3 }
 0x862   : > { %v1991_v47 = vadd.f32 %v3571_v19, %v1990_v32 }
 0x864   : > { %v2001_v36 = vmul.f32 %v1991_v47, %v1991_v47 }
 0x866   : > { %v2009_v11 = vmul.f32 %v2001_v36, %v1991_v47 }
 0x868   : > { %v2017_v50 = vmul.f32 0.044715, %v2009_v11 }
 0x869   : > { %v1992_v44 = vpop.f32.mrf.mxu3 }
 0x86a   : > { %v2025_v20 = vadd.f32 %v2017_v50, %v1991_v47  ;;  %v1993_v31 = vadd.f32 %v3571_v19, %v1992_v44  ;;  %v2168_v19 = vperm.slane %v3404_v51, 5 }
 0x86c   : > { %v2033_v33 = vmul.f32 0.7978846, %v2025_v20  ;;  %v2002_v48 = vmul.f32 %v1993_v31, %v1993_v31 }
 0x86e   : > { %v2010_v27 = vmul.f32 %v2002_v48, %v1993_v31  ;;  %2605 = vtanh.f32 %v2033_v33 }
 0x870   : > { %v2018_v17 = vmul.f32 0.044715, %v2010_v27 }
 0x872   : > { %v2026_v58 = vadd.f32 %v2018_v17, %v1993_v31 }
 0x874   : > { %v2034_v57 = vmul.f32 0.7978846, %v2026_v58  ;;  %v2606_v55 = vpop.eup %2605 }
 0x875   : > { %v2049_v23 = vadd.f32 1.0, %v2606_v55 }
 0x876   : > { %2607 = vtanh.f32 %v2034_v57 }
 0x877   : > { %v2057_v0 = vmul.f32 0.5, %v2049_v23 }
 0x879   : > { %v2065_v16 = vmul.f32 %v2057_v0, %v1991_v47 }
 0x87c   : > { %v2608_v37 = vpop.eup %2607 }
 0x87d   : > { %v2050_v8 = vadd.f32 1.0, %v2608_v37 }
 0x87f   : > { %v2058_v5 = vmul.f32 0.5, %v2050_v8  ;;  %v2148_v39 = vpop.f32.mrf.mxu0 }
 0x880   : > { %v2149_v53 = vadd.f32 %v2430_v22, %v2148_v39 }
 0x881   : > { %v2066_v52 = vmul.f32 %v2058_v5, %v1993_v31 }
 0x882   : > { %v2169_v63 = vmul.f32 %v2168_v19, %v2149_v53 }
 0x883   : > { %v2070_v59 = vpack.c.bf16 %v2066_v52, %v2065_v16 }
 0x884   : > { %v2177_v12 = vadd.f32 %v2169_v63, %v3408_v24 }
 0x885   : > { %2162 = vmatmul.bf16.vlgmr.msra.gmra.mxu1 %v2070_v59 }
 0x886   : > { %2185 = vst.msk [vmem:[%s3597_s27] sm:$0xff] %vm387_vm0, %v2177_v12 }
 0x887   : > { %v2150_v51 = vpop.f32.mrf.mxu0 }
 0x888   : > { %v2151_v29 = vadd.f32 %v2430_v22, %v2150_v51 }
 0x88a   : > { %v2170_v1 = vmul.f32 %v2168_v19, %v2151_v29 }
 0x88c   : > { %v2178_v2 = vadd.f32 %v2170_v1, %v3413_v40 }
 0x88e   : > { %2186 = vst.msk [vmem:[%s3597_s27 + $0x8] sm:$0xff] %vm387_vm0, %v2178_v2 }
 0x88f   : > { %v2153_v13 = vpop.f32.mrf.mxu0 }
 0x890   : > { %v2154_v25 = vadd.f32 %v2430_v22, %v2153_v13 }
 0x892   : > { %v2171_v46 = vmul.f32 %v2168_v19, %v2154_v25 }
 0x894   : > { %v2179_v62 = vadd.f32 %v2171_v46, %v3418_v49 }
 0x896   : > { %2187 = vst.msk [vmem:[%s3597_s27 + $0x10] sm:$0xff] %vm387_vm0, %v2179_v62 }
 0x897   : > { %v2155_v24 = vpop.f32.mrf.mxu0 }
 0x898   : > { %v2156_v3 = vadd.f32 %v2430_v22, %v2155_v24 }
 0x89a   : > { %v2172_v61 = vmul.f32 %v2168_v19, %v2156_v3 }
 0x89c   : > { %v2180_v26 = vadd.f32 %v2172_v61, %v3423_v18 }
 0x89e   : > { %2188 = vst.msk [vmem:[%s3597_s27 + $0x18] sm:$0xff] %vm387_vm0, %v2180_v26 }
 0x89f   : > { %v2158_v40 = vpop.f32.mrf.mxu0 }
 0x8a0   : > { %v2159_v42 = vadd.f32 %v2430_v22, %v2158_v40 }
 0x8a2   : > { %v2173_v38 = vmul.f32 %v2168_v19, %v2159_v42 }
 0x8a4   : > { %v2181_v56 = vadd.f32 %v2173_v38, %v3428_v9 }
 0x8a6   : > { %2189 = vst.msk [vmem:[%s3597_s27 + $0x20] sm:$0xff] %vm387_vm0, %v2181_v56 }
 0x8a7   : > { %v2160_v49 = vpop.f32.mrf.mxu0 }
 0x8a8   : > { %v2161_v6 = vadd.f32 %v2430_v22, %v2160_v49 }
 0x8aa   : > { %v2174_v14 = vmul.f32 %v2168_v19, %v2161_v6 }
 0x8ac   : > { %v2182_v54 = vadd.f32 %v2174_v14, %v3433_v10 }
 0x8ae   : > { %2190 = vst.msk [vmem:[%s3597_s27 + $0x28] sm:$0xff] %vm387_vm0, %v2182_v54 }
 0x902   : > { %v2163_v34 = vpop.f32.mrf.mxu1 }
 0x903   : > { %v2164_v18 = vadd.f32 %v2430_v22, %v2163_v34 }
 0x905   : > { %v2175_v15 = vmul.f32 %v2168_v19, %v2164_v18 }
 0x907   : > { %v2183_v21 = vadd.f32 %v2175_v15, %v3446_v43 }
 0x909   : > { %2191 = vst.msk [vmem:[%s3597_s27 + $0x30] sm:$0xff] %vm387_vm0, %v2183_v21 }
 0x90a   : > { %v2165_v7 = vpop.f32.mrf.mxu1 }
 0x90b   : > { %v2166_v45 = vadd.f32 %v2430_v22, %v2165_v7 }
 0x90d   : > { %v2176_v9 = vmul.f32 %v2168_v19, %v2166_v45 }
 0x90f   : > { %v2184_v30 = vadd.f32 %v2176_v9, %v3461_v35 }
 0x911   : > { %2192 = vst.msk [vmem:[%s3597_s27 + $0x38] sm:$0xff] %vm387_vm0, %v2184_v30 }
 0x912 PF: > { %s20_s13 = sadd.s32 1, %s2624_s13  }
 0x913   : > { %p17_p4 = scmp.ge.s32.totalorder %s20_s13, 4  }
 0x915   :  { %19 = sbr.rel (!%p17_p4) target bundleno = 1 (0x1), region = 93 }

// kernel: squeeze.2
= control target key start
LH: loop header
LB: loop body
LE: loop exit
PB: predicated region body
PF: predicated region fallthrough
CT: control target
= control target key end

     0   :  { %vm11_vm0 = vcmask 261120   ;;  %s44_s11 = smov 96   ;;  %s45_s12 = smov 32   ;;  %s83_s0 = inlined_call_operand.vmem [shape: f32[1,2,192], index: 0, kind: input, shape index: {}]   ;;  %s84_s1 = inlined_call_operand.vmem [shape: f32[2,6,32], index: 1, kind: output, shape index: {}]  }
   0x1   :  { %v36_v0 = vld [vmem:[%s83_s0 + $0x2] sm:$0x3]  ;;  %v8_v1 = vld [vmem:[%s83_s0] sm:$0x3]  ;;  %s46_s15 = smov 64  }
   0x2   :  { %7 = vst [vmem:[#allocation0 + $0x8] sm:$0x3] %v36_v0 }
   0x3   :  { %9 = vst [vmem:[#allocation0] sm:$0x3] %v8_v1 }
   0x9   :  { %v14_v2 = vld [vmem:[#allocation0 + $0x8] sm:$0x3]  }
   0xa   :  { %v18_v3 = vld.sshfl [vmem:[#allocation0] sm:$0xff pattern:$0x99999180]   ;;  %37 = vst.msk [vmem:[%s84_s1 + $0x4] ss:$8 sm:$0x3] %vm11_vm0, %v14_v2  }
   0xb   :  { %19 = vrot.lane.b32.xlu0 %v18_v3, %s44_s11  ;;  %v30_v4 = vld [vmem:[#allocation0] sm:$0x3]  }
   0xc   :  { %v10_v5 = vld [vmem:[#allocation0] sm:$0x3]   ;;  %31 = vrot.lane.b32.xlu1 %v30_v4, %s45_s12 }
   0xd   :  { %12 = vst.msk [vmem:[%s84_s1] ss:$8 sm:$0x3] %vm11_vm0, %v10_v5   ;;  %v24_v6 = vld [vmem:[#allocation0] sm:$0x3]  }
  0x13   :  { %25 = vrot.lane.b32.xlu0 %v24_v6, %s46_s15 }
  0x7d   :  { %v20_v7 = vpop.permute.xlu0 %19  }
  0x7e   :  { %38 = vst.msk [vmem:[%s84_s1 + $0x1] ss:$4 sm:$0xf] %vm11_vm0, %v20_v7   ;;  %v32_v8 = vpop.permute.xlu1 %31  }
  0x7f   :  { %40 = vst.msk [vmem:[%s84_s1 + $0x3] ss:$8 sm:$0x3] %vm11_vm0, %v32_v8  }
  0x85   :  { %v26_v9 = vpop.permute.xlu0 %25  }
  0x86   :  { %39 = vst.msk [vmem:[%s84_s1 + $0x2] ss:$8 sm:$0x3] %vm11_vm0, %v26_v9  }

// kernel: dit_forward.6
= control target key start
LH: loop header
LB: loop body
LE: loop exit
PB: predicated region body
PF: predicated region fallthrough
CT: control target
= control target key end

     0   :  { %s1096_s30 = smov 0   ;;  %s1168_s0 = inlined_call_operand.vmem [shape: f32[2,256], index: 0, kind: input, shape index: {}]   ;;  %s1169_s1 = inlined_call_operand.vmem [shape: f32[2,2,32], index: 1, kind: input, shape index: {}]   ;;  %s1170_s2 = inlined_call_operand.vmem [shape: bf16[2,256,32], index: 2, kind: input, shape index: {}]   ;;  %s1171_s3 = inlined_call_operand.vmem [shape: f32[2,1,32], index: 3, kind: input, shape index: {}]   ;;  %s1172_s4 = inlined_call_operand.vmem [shape: bf16[2,32,32], index: 4, kind: input, shape index: {}]   ;;  %s1173_s5 = inlined_call_operand.vmem [shape: f32[2,1,32], index: 5, kind: input, shape index: {}]   ;;  %s1174_s6 = inlined_call_operand.vmem [shape: bf16[2,32,192], index: 6, kind: input, shape index: {}]   ;;  %s1175_s7 = inlined_call_operand.vmem [shape: f32[2,1,192], index: 7, kind: input, shape index: {}]   ;;  %s1176_s8 = inlined_call_operand.vmem [shape: f32[2,2,192], index: 8, kind: output, shape index: {0}]   ;;  %s1177_s9 = inlined_call_operand.vmem [shape: f32[2,32], index: 9, kind: output, shape index: {1}]  }
   0x1 LB: > { %s1102_s10 = sadd.s32 4294967295, %s1044_s30   ;;  %p887_p0 = scmp.ge.s32.totalorder %s1044_s30, 1  ;;  %s1044_s30 = sphi %s1096_s30, %s20_s30  }
   0x2   : > { %p339_p1 = scmp.lt.s32.totalorder %s1044_s30, 3 }
   0x4   : > { %p340_p2 = pnand %p887_p0, %p339_p1 }
   0x5   : > { %p399_p3 = scmp.lt.s32.totalorder (!%p340_p2), %s1102_s10, 1  ;;  %p991_p4 = scmp.ne.s32.totalorder (!%p340_p2), %s1102_s10, 0 }
   0x6   : > { %343 = sbr.rel (%p340_p2) target bundleno = 519 (0x207), region = 52 }
   0xb   : > { %v434_v0 = vld [vmem:[%s1168_s0] sm:$0xf]  ;;  %s1111_s13 = scalar_select %p399_p3, %s1102_s10, 1  ;;  %vm642_vm4 = vcmask 261120   ;;  %vm744_vm9 = vcmask 1041408   ;;  %vm747_vm10 = vcmask 519170  }
   0xc   : > { %436 = vst [vmem:[#allocation1] ss:$4 sm:$0xff] %v434_v0  ;;  %vm748_vm11 = vmor %vm747_vm10, %vm744_vm9 }
   0xd   : > { %s994_s14 = sshll.u32 %s1111_s13, 7  ;;  %s410_s17 = scalar_lea.vmem %s1171_s3, %s1111_s13 }
   0xe   : > { %s407_s20 = scalar_lea.vmem %s1170_s2, %s994_s14  ;;  %s418_s23 = scalar_lea.vmem %s1173_s5, %s1111_s13  ;;  %v1028_v22 = vld [vmem:[%s410_s17] ss:$0 sm:$0xff] }
   0xf   : > { %v1005_v1 = vld [vmem:[%s407_s20 + $0x38] sm:$0xff]  ;;  %v1004_v3 = vld [vmem:[%s407_s20 + $0x30] sm:$0xff]  ;;  %v1003_v5 = vld [vmem:[%s407_s20 + $0x28] sm:$0xff]  ;;  %s995_s24 = sshll.u32 %s1111_s13, 4  ;;  %s996_s11 = sshll.u32 %s1111_s13, 5 }
  0x10   : > { %v1013_v2 = vld [vmem:[%s407_s20 + $0x78] sm:$0xff]  ;;  %575 = vmatpush.bf16.msra.mxu0 %v1005_v1  ;;  %v1012_v4 = vld [vmem:[%s407_s20 + $0x70] sm:$0xff]  ;;  %v1011_v6 = vld [vmem:[%s407_s20 + $0x68] sm:$0xff]  ;;  %s415_s27 = scalar_lea.vmem %s1172_s4, %s995_s24  ;;  %s423_s15 = scalar_lea.vmem %s1174_s6, %s996_s11 }
  0x11   : > { %588 = vmatpush.bf16.msra.mxu1 %v1013_v2  ;;  %v1002_v7 = vld [vmem:[%s407_s20 + $0x20] sm:$0xff]  ;;  %v1001_v9 = vld [vmem:[%s407_s20 + $0x18] sm:$0xff]  ;;  %v1000_v11 = vld [vmem:[%s407_s20 + $0x10] sm:$0xff]  ;;  %s888_s16 = sshll.u32 %s1111_s13, 1  ;;  %s997_s25 = sshll.u32 %s1111_s13, 2 }
  0x12   : > { %v1010_v8 = vld [vmem:[%s407_s20 + $0x60] sm:$0xff]  ;;  %v1009_v10 = vld [vmem:[%s407_s20 + $0x58] sm:$0xff]  ;;  %v1008_v12 = vld [vmem:[%s407_s20 + $0x50] sm:$0xff]  ;;  %s402_s19 = scalar_lea.vmem %s1169_s1, %s888_s16  ;;  %s427_s24 = scalar_lea.vmem %s1175_s7, %s888_s16 }
  0x13   : > { %v999_v13 = vld [vmem:[%s407_s20 + $0x8] sm:$0xff]  ;;  %v998_v15 = vld [vmem:[%s407_s20] sm:$0xff]  ;;  %v1018_v45 = vld [vmem:[%s423_s15 + $0x14] sm:$0xf]  ;;  %s432_s28 = scalar_lea.vmem %s1176_s8, %s997_s25 }
  0x14   : > { %576 = vmatpush.bf16.msra.mxu0 %v1004_v3  ;;  %v1007_v14 = vld [vmem:[%s407_s20 + $0x48] sm:$0xff]  ;;  %v1006_v16 = vld [vmem:[%s407_s20 + $0x40] sm:$0xff]  ;;  %v985_v46 = vld [vmem:[%s423_s15 + $0x18] sm:$0xf0] }
  0x15   : > { %589 = vmatpush.bf16.msra.mxu1 %v1012_v4  ;;  %v437_v17 = vld.sshfl [vmem:[#allocation1] sm:$0xff pattern:$0x73625140]  ;;  %v438_v18 = vld.sshfl [vmem:[#allocation1 + $0x8] sm:$0xff pattern:$0x73625140]  ;;  %v988_v48 = vor.u32 %v1018_v45, %v985_v46 }
  0x16   : > { %v441_v19 = vpack.c.bf16 %v437_v17, %v437_v17  ;;  %v442_v20 = vpack.c.bf16 %v438_v18, %v438_v18  ;;  %v1015_v21 = vld [vmem:[%s415_s27 + $0x8] sm:$0xff]  ;;  %v1014_v25 = vld [vmem:[%s415_s27] sm:$0xff]  ;;  %v983_v50 = vld [vmem:[%s423_s15 + $0x10] sm:$0xf] }
  0x17   : > { %652 = vmatpush.bf16.msra.mxu2 %v1015_v21  ;;  %v1016_v47 = vld [vmem:[%s423_s15 + $0x4] sm:$0xf]  ;;  %v977_v49 = vld [vmem:[%s423_s15 + $0x8] sm:$0xf0]  ;;  %v1019_v51 = vld [vmem:[%s423_s15 + $0x14] sm:$0xf0] }
  0x18   : > { %577 = vmatpush.bf16.msra.mxu0 %v1003_v5  ;;  %v984_v52 = vor.u32 %v1019_v51, %v983_v50  ;;  %v975_v53 = vld [vmem:[%s423_s15] sm:$0xf]  ;;  %v1017_v54 = vld [vmem:[%s423_s15 + $0x4] sm:$0xf0]  ;;  %v980_v55 = vor.u32 %v1016_v47, %v977_v49 }
  0x19   : > { %590 = vmatpush.bf16.msra.mxu1 %v1011_v6  ;;  %v976_v56 = vor.u32 %v1017_v54, %v975_v53  ;;  %v1029_v57 = vld [vmem:[%s418_s23] ss:$0 sm:$0xff] }
  0x1a   : > { %721 = vmatpush.bf16.msra.mxu3 %v984_v52  ;;  %v659_v59 = vld [vmem:[%s402_s19] sm:$0x3] }
  0x1b   : > { %653 = vmatpush.bf16.msra.mxu2 %v1014_v25 }
  0x1c   : > { %578 = vmatpush.bf16.msra.mxu0 %v1002_v7 }
  0x1d   : > { %591 = vmatpush.bf16.msra.mxu1 %v1010_v8 }
  0x1e   : > { %722 = vmatpush.bf16.msra.mxu3 %v976_v56 }
  0x1f   : > { %734 = vmatpush.bf16.msrb.mxu2 %v988_v48 }
  0x20   : > { %579 = vmatpush.bf16.msra.mxu0 %v1001_v9 }
  0x21   : > { %592 = vmatpush.bf16.msra.mxu1 %v1009_v10 }
  0x23   : > { %735 = vmatpush.bf16.msrb.mxu2 %v980_v55 }
  0x24   : > { %580 = vmatpush.bf16.msra.mxu0 %v1000_v11 }
  0x25   : > { %593 = vmatpush.bf16.msra.mxu1 %v1008_v12 }
  0x28   : > { %581 = vmatpush.bf16.msra.mxu0 %v999_v13 }
  0x29   : > { %594 = vmatpush.bf16.msra.mxu1 %v1007_v14  ;;  %v686_v14 = vld [vmem:[%s427_s24] sm:$0x3] }
  0x2c   : > { %582 = vmatpush.bf16.msra.mxu0 %v998_v15  ;;  %v689_v15 = vperm.slane %v686_v14, 1 }
  0x2d   : > { %595 = vmatpush.bf16.msra.mxu1 %v1006_v16  ;;  %v688_v16 = vperm.slane %v686_v14, 0 }
  0x2f   : > { %583 = vmatmul.bf16.vlgmr.msra.gmra.mxu0 %v441_v19 }
  0x30   : > { %596 = vmatmul.bf16.vlgmr.msra.gmra.mxu1 %v442_v20 }
  0xac   : > { %v584_v23 = vpop.f32.mrf.mxu0 }
  0xad   : > { %v597_v24 = vpop.f32.mrf.mxu1  ;;  %v585_v26 = vadd.f32 %v1028_v22, %v584_v23 }
  0xaf   : > { %v598_v27 = vadd.f32 %v597_v24, %v585_v26 }
  0xb1   : > { %v962_v28 = vmul.f32 -1.442695, %v598_v27 }
  0xb3   : > { %1030 = vpow2.f32 %v962_v28 }
  0xb4   : > { %v586_v29 = vpop.f32.mrf.mxu0 }
  0xb5   : > { %v599_v30 = vpop.f32.mrf.mxu1 }
  0xb9   : > { %v1031_v31 = vpop.eup %1030 }
  0xba   : > { %v604_v32 = vadd.f32 1.0, %v1031_v31 }
  0xbc   : > { %1032 = vrcp.f32 %v604_v32  ;;  %v616_v36 = vand.u32 2147483648, %v604_v32  ;;  %v614_v38 = vand.u32 2147483647, %v604_v32  ;;  %vm610_vm1 = vweird.f32 %v604_v32 }
  0xbe   : > { %v617_v40 = vor.u32 1.1754944e-38, %v616_v36  ;;  %vm615_vm3 = vcmp.eq.f32.partialorder %v614_v38, 8.507059e+37 }
  0xc2   : > { %v1033_v33 = vpop.eup %1032 }
  0xc3   : > { %v606_v34 = vmul.f32 %v1033_v33, %v604_v32  ;;  %vm611_vm0 = vweird.f32 %v1033_v33 }
  0xc4   : > { %vm612_vm2 = vmor %vm610_vm1, %vm611_vm0 }
  0xc5   : > { %v607_v35 = vsub.f32 1.0, %v606_v34 }
  0xc7   : > { %v608_v37 = vmul.f32 %v1033_v33, %v607_v35 }
  0xc9   : > { %v609_v39 = vadd.f32 %v1033_v33, %v608_v37 }
  0xcb   : > { %v613_v41 = vsel %vm612_vm2, %v1033_v33, %v609_v39 }
  0xcc   : > { %v618_v42 = vsel %vm615_vm3, %v617_v40, %v613_v41 }
  0xcd   : > { %v620_v43 = vmul.f32 %v618_v42, %v598_v27 }
  0xcf   : > { %v621_v44 = vpack.c.bf16 %v620_v43, %v620_v43 }
  0xd1   : > { %971 = vmatmul.msk.bf16.vlgmr.msra.gmra.mxu2 %vm642_vm4, %v621_v44 }
 0x154   : > { %v655_v58 = vpop.f32.mrf.mxu2 }
 0x155   : > { %v656_v60 = vadd.f32 %v1029_v57, %v655_v58 }
 0x157   : > { %v660_v61 = vadd.f32 %v659_v59, %v656_v60 }
 0x159   : > { %v972_v62 = vmul.f32 -1.442695, %v660_v61 }
 0x15b   : > { %1034 = vpow2.f32 %v972_v62 }
 0x15c   : > { %v657_v63 = vpop.f32.mrf.mxu2 }
 0x161   : > { %v1035_v0 = vpop.eup %1034 }
 0x162   : > { %v664_v1 = vadd.f32 1.0, %v1035_v0 }
 0x164   : > { %1036 = vrcp.f32 %v664_v1  ;;  %v676_v5 = vand.u32 2147483648, %v664_v1  ;;  %v674_v7 = vand.u32 2147483647, %v664_v1  ;;  %vm670_vm6 = vweird.f32 %v664_v1 }
 0x166   : > { %v677_v9 = vor.u32 1.1754944e-38, %v676_v5  ;;  %vm675_vm8 = vcmp.eq.f32.partialorder %v674_v7, 8.507059e+37 }
 0x16a   : > { %v1037_v2 = vpop.eup %1036 }
 0x16b   : > { %v666_v3 = vmul.f32 %v1037_v2, %v664_v1  ;;  %vm671_vm5 = vweird.f32 %v1037_v2 }
 0x16c   : > { %vm672_vm7 = vmor %vm670_vm6, %vm671_vm5 }
 0x16d   : > { %v667_v4 = vsub.f32 1.0, %v666_v3 }
 0x16f   : > { %v668_v6 = vmul.f32 %v1037_v2, %v667_v4 }
 0x171   : > { %v669_v8 = vadd.f32 %v1037_v2, %v668_v6 }
 0x173   : > { %v673_v10 = vsel %vm672_vm7, %v1037_v2, %v669_v8 }
 0x174   : > { %v678_v11 = vsel %vm675_vm8, %v677_v9, %v673_v10 }
 0x175   : > { %v680_v12 = vmul.f32 %v678_v11, %v660_v61 }
 0x177   : > { %v681_v13 = vpack.c.bf16 %v680_v12, %v680_v12 }
 0x179   : > { %989 = vmatmul.msk.bf16.vlgmr.msra.gmra.mxu3 %vm642_vm4, %v681_v13  ;;  %990 = vmatmul.msk.bf16.vlgmr.msrb.gmra.mxu2 %vm642_vm4, %v681_v13 }
 0x1fc   : > { %v724_v17 = vpop.f32.mrf.mxu3  ;;  %v737_v18 = vpop.f32.mrf.mxu2 }
 0x1fd   : > { %v738_v19 = vadd.f32 %v737_v18, %v689_v15  ;;  %v725_v20 = vadd.f32 %v724_v17, %v688_v16 }
 0x1ff   : > { %v743_v21 = vrot.slane %v738_v19, 6 }
 0x200   : > { %753 = sbr.rel (%p991_p4) target bundleno = 519 (0x207), region = 56 }
 0x201   : > { %v745_v22 = vsel %vm744_vm9, %v725_v20, %v743_v21 }
 0x202   : > { %749 = vst.msk [vmem:[%s432_s28] sm:$0xf] %vm748_vm11, %v745_v22 }
 0x204   : > { %v726_v23 = vpop.f32.mrf.mxu3  ;;  %v739_v24 = vpop.f32.mrf.mxu2 }
 0x205   : > { %vm754_vm12 = vcmask 254976  }
 0x206   : > { %755 = vst.msk [vmem:[%s1177_s9] sm:$0x3] %vm754_vm12, %v680_v12 }
 0x207 PF: > { %s20_s30 = sadd.s32 1, %s1044_s30  }
 0x208   : > { %p17_p5 = scmp.ge.s32.totalorder %s20_s30, 4  }
 0x20a   :  { %19 = sbr.rel (!%p17_p5) target bundleno = 1 (0x1), region = 112 }

// kernel: dit_forward.5
= control target key start
LH: loop header
LB: loop body
LE: loop exit
PB: predicated region body
PF: predicated region fallthrough
CT: control target
= control target key end

     0   :  { %vm45_vm0 = vcmask 130048   ;;  %vm163_vm1 = vcmask 261120   ;;  %s353_s0 = inlined_call_operand.vmem [shape: f32[16,128], index: 0, kind: input, shape index: {}]   ;;  %s354_s1 = inlined_call_operand.vmem [shape: bf16[16,32], index: 1, kind: input, shape index: {}]   ;;  %s355_s2 = inlined_call_operand.vmem [shape: f32[1,32], index: 2, kind: input, shape index: {}]   ;;  %s356_s3 = inlined_call_operand.vmem [shape: f32[64,32], index: 3, kind: input, shape index: {}]   ;;  %s357_s4 = inlined_call_operand.vmem [shape: f32[2,64,32], index: 4, kind: output, shape index: {}]  }
   0x1   :  { %v18_v0 = vld [vmem:[%s353_s0] sm:$0xff]  ;;  %v19_v1 = vld [vmem:[%s353_s0 + $0x8] sm:$0xff]  ;;  %v141_v22 = vld [vmem:[%s356_s3 + $0x10] sm:$0xff] }
   0x2   :  { %v196_v2 = vld [vmem:[%s354_s1] sm:$0xff]  ;;  %v20_v3 = vpack.c.bf16 %v19_v1, %v18_v0  ;;  %v140_v18 = vld [vmem:[%s356_s3 + $0x8] sm:$0xff]  ;;  %v142_v26 = vld [vmem:[%s356_s3 + $0x18] sm:$0xff] }
   0x3   :  { %77 = vmatpush.bf16.msra.mxu0 %v196_v2  ;;  %197 = vmatpush.bf16.msra.mxu1 %v196_v2  ;;  %v247_v12 = vld [vmem:[%s355_s2] ss:$0 sm:$0xff]  ;;  %v144_v34 = vld [vmem:[%s356_s3 + $0x28] sm:$0xff]  ;;  %v145_v38 = vld [vmem:[%s356_s3 + $0x30] sm:$0xff] }
   0x4   :  { %23 = vxpose.xlu0.c.b16.start.end [1/1] (short) %v20_v3, 128  ;;  %198 = vmatpush.bf16.msra.mxu2 %v196_v2  ;;  %v139_v14 = vld [vmem:[%s356_s3] sm:$0xff]  ;;  %v146_v42 = vld [vmem:[%s356_s3 + $0x38] sm:$0xff] }
   0x5   :  { %199 = vmatpush.bf16.msra.mxu3 %v196_v2  ;;  %v143_v30 = vld [vmem:[%s356_s3 + $0x20] sm:$0xff] }
  0xb0   :  { %v31_v4 = vpop.trf.xlu0 }
  0xb1   :  { %188 = vmatmul.msk.bf16.vlgmr.msra.gmra.mxu0 %vm45_vm0, %v31_v4 }
  0xc0   :  { %v32_v5 = vpop.trf.xlu0 }
  0xc1   :  { %189 = vmatmul.msk.bf16.gmra.mxu0 %vm45_vm0, %v32_v5 }
  0xd0   :  { %v33_v6 = vpop.trf.xlu0 }
  0xd1   :  { %190 = vmatmul.msk.bf16.vlgmr.msra.gmra.mxu1 %vm45_vm0, %v33_v6 }
  0xe0   :  { %v34_v7 = vpop.trf.xlu0 }
  0xe1   :  { %191 = vmatmul.msk.bf16.gmra.mxu1 %vm45_vm0, %v34_v7 }
  0xf0   :  { %v35_v8 = vpop.trf.xlu0 }
  0xf1   :  { %192 = vmatmul.msk.bf16.vlgmr.msra.gmra.mxu2 %vm45_vm0, %v35_v8 }
 0x100   :  { %v36_v9 = vpop.trf.xlu0 }
 0x101   :  { %193 = vmatmul.msk.bf16.gmra.mxu2 %vm45_vm0, %v36_v9 }
 0x110   :  { %v37_v10 = vpop.trf.xlu0 }
 0x111   :  { %194 = vmatmul.msk.bf16.vlgmr.msra.gmra.mxu3 %vm45_vm0, %v37_v10 }
 0x120   :  { %v38_v11 = vpop.trf.xlu0 }
 0x121   :  { %195 = vmatmul.msk.bf16.gmra.mxu3 %vm45_vm0, %v38_v11 }
 0x12e   :  { %v79_v13 = vpop.f32.mrf.mxu0 }
 0x12f   :  { %v123_v15 = vadd.f32 %v247_v12, %v79_v13 }
 0x131   :  { %v147_v16 = vadd.f32 %v139_v14, %v123_v15 }
 0x133   :  { %164 = vst.msk [vmem:[%s357_s4] sm:$0xff] %vm163_vm1, %v147_v16 }
 0x136   :  { %v81_v17 = vpop.f32.mrf.mxu0 }
 0x137   :  { %v124_v19 = vadd.f32 %v247_v12, %v81_v17 }
 0x139   :  { %v148_v20 = vadd.f32 %v140_v18, %v124_v19 }
 0x13b   :  { %165 = vst.msk [vmem:[%s357_s4 + $0x8] sm:$0xff] %vm163_vm1, %v148_v20 }
 0x13e   :  { %v84_v21 = vpop.f32.mrf.mxu0 }
 0x13f   :  { %v125_v23 = vadd.f32 %v247_v12, %v84_v21 }
 0x141   :  { %v149_v24 = vadd.f32 %v141_v22, %v125_v23 }
 0x143   :  { %166 = vst.msk [vmem:[%s357_s4 + $0x10] sm:$0xff] %vm163_vm1, %v149_v24 }
 0x146   :  { %v86_v25 = vpop.f32.mrf.mxu0 }
 0x147   :  { %v126_v27 = vadd.f32 %v247_v12, %v86_v25 }
 0x149   :  { %v150_v28 = vadd.f32 %v142_v26, %v126_v27 }
 0x14b   :  { %167 = vst.msk [vmem:[%s357_s4 + $0x18] sm:$0xff] %vm163_vm1, %v150_v28 }
 0x14e   :  { %v89_v29 = vpop.f32.mrf.mxu1 }
 0x14f   :  { %v127_v31 = vadd.f32 %v247_v12, %v89_v29 }
 0x151   :  { %v151_v32 = vadd.f32 %v143_v30, %v127_v31 }
 0x153   :  { %168 = vst.msk [vmem:[%s357_s4 + $0x20] sm:$0xff] %vm163_vm1, %v151_v32 }
 0x156   :  { %v91_v33 = vpop.f32.mrf.mxu1 }
 0x157   :  { %v128_v35 = vadd.f32 %v247_v12, %v91_v33 }
 0x159   :  { %v152_v36 = vadd.f32 %v144_v34, %v128_v35 }
 0x15b   :  { %169 = vst.msk [vmem:[%s357_s4 + $0x28] sm:$0xff] %vm163_vm1, %v152_v36 }
 0x15e   :  { %v94_v37 = vpop.f32.mrf.mxu1 }
 0x15f   :  { %v129_v39 = vadd.f32 %v247_v12, %v94_v37 }
 0x161   :  { %v153_v40 = vadd.f32 %v145_v38, %v129_v39 }
 0x163   :  { %170 = vst.msk [vmem:[%s357_s4 + $0x30] sm:$0xff] %vm163_vm1, %v153_v40 }
 0x166   :  { %v96_v41 = vpop.f32.mrf.mxu1 }
 0x167   :  { %v130_v43 = vadd.f32 %v247_v12, %v96_v41 }
 0x169   :  { %v154_v44 = vadd.f32 %v146_v42, %v130_v43 }
 0x16b   :  { %171 = vst.msk [vmem:[%s357_s4 + $0x38] sm:$0xff] %vm163_vm1, %v154_v44 }
 0x174   :  { %v99_v45 = vpop.f32.mrf.mxu2 }
 0x175   :  { %v131_v46 = vadd.f32 %v247_v12, %v99_v45 }
 0x177   :  { %v155_v47 = vadd.f32 %v139_v14, %v131_v46 }
 0x179   :  { %172 = vst.msk [vmem:[%s357_s4 + $0x40] sm:$0xff] %vm163_vm1, %v155_v47 }
 0x17c   :  { %v101_v48 = vpop.f32.mrf.mxu2 }
 0x17d   :  { %v132_v49 = vadd.f32 %v247_v12, %v101_v48 }
 0x17f   :  { %v156_v50 = vadd.f32 %v140_v18, %v132_v49 }
 0x181   :  { %173 = vst.msk [vmem:[%s357_s4 + $0x48] sm:$0xff] %vm163_vm1, %v156_v50 }
 0x184   :  { %v104_v51 = vpop.f32.mrf.mxu2 }
 0x185   :  { %v133_v52 = vadd.f32 %v247_v12, %v104_v51 }
 0x187   :  { %v157_v53 = vadd.f32 %v141_v22, %v133_v52 }
 0x189   :  { %174 = vst.msk [vmem:[%s357_s4 + $0x50] sm:$0xff] %vm163_vm1, %v157_v53 }
 0x18c   :  { %v106_v54 = vpop.f32.mrf.mxu2 }
 0x18d   :  { %v134_v55 = vadd.f32 %v247_v12, %v106_v54 }
 0x18f   :  { %v158_v56 = vadd.f32 %v142_v26, %v134_v55 }
 0x191   :  { %175 = vst.msk [vmem:[%s357_s4 + $0x58] sm:$0xff] %vm163_vm1, %v158_v56 }
 0x194   :  { %v109_v57 = vpop.f32.mrf.mxu3 }
 0x195   :  { %v135_v58 = vadd.f32 %v247_v12, %v109_v57 }
 0x197   :  { %v159_v59 = vadd.f32 %v143_v30, %v135_v58 }
 0x199   :  { %176 = vst.msk [vmem:[%s357_s4 + $0x60] sm:$0xff] %vm163_vm1, %v159_v59 }
 0x19c   :  { %v111_v60 = vpop.f32.mrf.mxu3 }
 0x19d   :  { %v136_v61 = vadd.f32 %v247_v12, %v111_v60 }
 0x19f   :  { %v160_v62 = vadd.f32 %v144_v34, %v136_v61 }
 0x1a1   :  { %177 = vst.msk [vmem:[%s357_s4 + $0x68] sm:$0xff] %vm163_vm1, %v160_v62 }
 0x1a4   :  { %v114_v63 = vpop.f32.mrf.mxu3 }
 0x1a5   :  { %v137_v0 = vadd.f32 %v247_v12, %v114_v63 }
 0x1a7   :  { %v161_v1 = vadd.f32 %v145_v38, %v137_v0 }
 0x1a9   :  { %178 = vst.msk [vmem:[%s357_s4 + $0x70] sm:$0xff] %vm163_vm1, %v161_v1 }
 0x1ac   :  { %v116_v2 = vpop.f32.mrf.mxu3 }
 0x1ad   :  { %v138_v3 = vadd.f32 %v247_v12, %v116_v2 }
 0x1af   :  { %v162_v4 = vadd.f32 %v146_v42, %v138_v3 }
 0x1b1   :  { %179 = vst.msk [vmem:[%s357_s4 + $0x78] sm:$0xff] %vm163_vm1, %v162_v4 }

// kernel: dit_forward.9
= control target key start
LH: loop header
LB: loop body
LE: loop exit
PB: predicated region body
PF: predicated region fallthrough
CT: control target
= control target key end

     0   :  { %vm68_vm0 = vcmask 261120   ;;  %v729_v29 = vmov 32.0   ;;  %s1368_s0 = inlined_call_operand.vmem [shape: f32[2,64,32], index: 0, kind: input, shape index: {}]   ;;  %s1369_s4 = inlined_call_operand.vmem [shape: bf16[32,32], index: 4, kind: input, shape index: {}]   ;;  %s1370_s2 = inlined_call_operand.vmem [shape: bf16[32,32], index: 2, kind: input, shape index: {}]   ;;  %s1371_s1 = inlined_call_operand.vmem [shape: f32[2,32], index: 1, kind: input, shape index: {}]   ;;  %s1372_s5 = inlined_call_operand.vmem [shape: f32[1,32], index: 5, kind: input, shape index: {}]   ;;  %s1373_s3 = inlined_call_operand.vmem [shape: f32[1,32], index: 3, kind: input, shape index: {}]   ;;  %s1374_s6 = inlined_call_operand.vmem [shape: bf16[32,32], index: 6, kind: input, shape index: {}]   ;;  %s1375_s7 = inlined_call_operand.vmem [shape: f32[32,1], index: 7, kind: input, shape index: {}]   ;;  %s1376_s8 = inlined_call_operand.vmem [shape: f32[32,128], index: 8, kind: output, shape index: {}]  }
   0x1   :  { %v779_v0 = vld [vmem:[%s1368_s0 + $0x70] sm:$0xff]  ;;  %v784_v1 = vld [vmem:[%s1368_s0 + $0x60] sm:$0xff]  ;;  %v800_v6 = vld [vmem:[%s1368_s0 + $0x78] sm:$0xff]  ;;  %695 = vrcp.f32 %v729_v29 }
   0x2   :  { %v160_v2 = vsel %vm68_vm0, %v779_v0, 0.0  ;;  %v154_v3 = vsel %vm68_vm0, %v784_v1, 0.0  ;;  %v793_v4 = vld [vmem:[%s1368_s0 + $0x50] sm:$0xff]  ;;  %v805_v7 = vld [vmem:[%s1368_s0 + $0x68] sm:$0xff]  ;;  %v810_v8 = vld [vmem:[%s1368_s0 + $0x58] sm:$0xff]  ;;  %v163_v9 = vsel %vm68_vm0, %v800_v6, 0.0 }
   0x3   :  { %161 = vadd.xlane.f32.xlu0 %v160_v2  ;;  %155 = vadd.xlane.f32.xlu1 %v154_v3  ;;  %v148_v5 = vsel %vm68_vm0, %v793_v4, 0.0  ;;  %v157_v10 = vsel %vm68_vm0, %v805_v7, 0.0  ;;  %v151_v11 = vsel %vm68_vm0, %v810_v8, 0.0  ;;  %v821_v12 = vld [vmem:[%s1368_s0 + $0x48] sm:$0xff]  ;;  %v826_v13 = vld [vmem:[%s1368_s0 + $0x40] sm:$0xff]  ;;  %v831_v14 = vld [vmem:[%s1368_s0 + $0x30] sm:$0xff] }
   0x4   :  { %149 = vadd.xlane.f32.xlu2 %v148_v5  ;;  %v145_v15 = vsel %vm68_vm0, %v821_v12, 0.0  ;;  %v142_v16 = vsel %vm68_vm0, %v826_v13, 0.0  ;;  %v136_v17 = vsel %vm68_vm0, %v831_v14, 0.0  ;;  %v842_v18 = vld [vmem:[%s1368_s0 + $0x38] sm:$0xff]  ;;  %v847_v19 = vld [vmem:[%s1368_s0 + $0x20] sm:$0xff]  ;;  %v852_v20 = vld [vmem:[%s1368_s0 + $0x28] sm:$0xff] }
   0x5   :  { %v139_v21 = vsel %vm68_vm0, %v842_v18, 0.0  ;;  %v130_v22 = vsel %vm68_vm0, %v847_v19, 0.0  ;;  %v133_v23 = vsel %vm68_vm0, %v852_v20, 0.0  ;;  %v863_v24 = vld [vmem:[%s1368_s0 + $0x18] sm:$0xff]  ;;  %v868_v25 = vld [vmem:[%s1368_s0 + $0x10] sm:$0xff]  ;;  %v678_v28 = vld [vmem:[%s1369_s4 + $0x8] sm:$0xff] }
   0x6   :  { %v127_v26 = vsel %vm68_vm0, %v863_v24, 0.0  ;;  %v124_v27 = vsel %vm68_vm0, %v868_v25, 0.0  ;;  %111 = vmatpush.bf16.msra.mxu1 %v678_v28  ;;  %v676_v30 = vld [vmem:[%s1370_s2 + $0x8] sm:$0xff]  ;;  %v677_v31 = vld [vmem:[%s1369_s4] sm:$0xff] }
   0x7   :  { %v696_v32 = vpop.eup %695  ;;  %78 = vmatpush.bf16.msra.mxu0 %v676_v30  ;;  %v46_v33 = vld [vmem:[%s1371_s1] sm:$0x3] }
   0x8   :  { %v675_v34 = vld [vmem:[%s1370_s2] sm:$0xff]  ;;  %v47_v35 = vpack.c.bf16 %v46_v33, %v46_v33  ;;  %v167_v36 = vmul.f32 32.0, %v696_v32  ;;  %vm171_vm1 = vweird.f32 %v696_v32 }
   0x9   :  { %v914_v58 = vld [vmem:[%s1368_s0] sm:$0xff] }
   0xa   :  { %112 = vmatpush.bf16.msra.mxu1 %v677_v31  ;;  %v168_v37 = vsub.f32 1.0, %v167_v36 }
   0xb   :  { %164 = vadd.xlane.f32.xlu0 %v163_v9  ;;  %158 = vadd.xlane.f32.xlu1 %v157_v10 }
   0xc   :  { %152 = vadd.xlane.f32.xlu2 %v151_v11  ;;  %79 = vmatpush.bf16.msra.mxu0 %v675_v34  ;;  %v169_v38 = vmul.f32 %v696_v32, %v168_v37 }
   0xd   :  { %664 = vmatmul.msk.bf16.vlgmr.msra.gmra.mxu1 %vm68_vm0, %v47_v35 }
   0xe   :  { %v170_v39 = vadd.f32 %v696_v32, %v169_v38 }
   0xf   :  { %655 = vmatmul.msk.bf16.vlgmr.msra.gmra.mxu0 %vm68_vm0, %v47_v35 }
  0x10   :  { %v891_v40 = vsel %vm171_vm1, %v696_v32, %v170_v39 }
  0x13   :  { %146 = vadd.xlane.f32.xlu1 %v145_v15  ;;  %143 = vadd.xlane.f32.xlu0 %v142_v16 }
  0x14   :  { %137 = vadd.xlane.f32.xlu2 %v136_v17 }
  0x1b   :  { %140 = vadd.xlane.f32.xlu0 %v139_v21  ;;  %131 = vadd.xlane.f32.xlu1 %v130_v22 }
  0x1c   :  { %134 = vadd.xlane.f32.xlu2 %v133_v23 }
  0x23   :  { %128 = vadd.xlane.f32.xlu0 %v127_v26 }
  0x24   :  { %125 = vadd.xlane.f32.xlu2 %v124_v27 }
  0x76   :  { %v162_v41 = vpop.xlane.xlu0 %161  ;;  %v156_v42 = vpop.xlane.xlu1 %155 }
  0x77   :  { %v187_v43 = vmul.f32 %v891_v40, %v162_v41  ;;  %v150_v44 = vpop.xlane.xlu2 %149  ;;  %v185_v50 = vmul.f32 %v891_v40, %v156_v42 }
  0x78   :  { %v183_v53 = vmul.f32 %v891_v40, %v150_v44 }
  0x79   :  { %v895_v45 = vsub.f32 %v779_v0, %v187_v43  ;;  %v917_v59 = vsub.f32 %v784_v1, %v185_v50  ;;  %v118_v0 = vsel %vm68_vm0, %v914_v58, 0.0 }
  0x7a   :  { %v920_v60 = vsub.f32 %v793_v4, %v183_v53 }
  0x7b   :  { %v219_v46 = vmul.f32 %v895_v45, %v895_v45 }
  0x7d   :  { %v263_v47 = vsel %vm68_vm0, %v219_v46, 0.0 }
  0x7e   :  { %v165_v48 = vpop.xlane.xlu0 %164  ;;  %v159_v49 = vpop.xlane.xlu1 %158  ;;  %264 = vadd.xlane.f32.xlu0 %v263_v47 }
  0x7f   :  { %v188_v51 = vmul.f32 %v891_v40, %v165_v48  ;;  %v186_v52 = vmul.f32 %v891_v40, %v159_v49  ;;  %v153_v54 = vpop.xlane.xlu2 %152 }
  0x80   :  { %v184_v55 = vmul.f32 %v891_v40, %v153_v54  ;;  %v679_v54 = vld [vmem:[%s1374_s6] sm:$0xff] }
  0x81   :  { %v906_v56 = vsub.f32 %v800_v6, %v188_v51  ;;  %v909_v57 = vsub.f32 %v805_v7, %v186_v52  ;;  %v217_v7 = vmul.f32 %v917_v59, %v917_v59 }
  0x82   :  { %v927_v63 = vsub.f32 %v810_v8, %v184_v55  ;;  %v215_v8 = vmul.f32 %v920_v60, %v920_v60 }
  0x83   :  { %v220_v61 = vmul.f32 %v906_v56, %v906_v56  ;;  %v218_v62 = vmul.f32 %v909_v57, %v909_v57  ;;  %v257_v15 = vsel %vm68_vm0, %v217_v7, 0.0 }
  0x84   :  { %v216_v10 = vmul.f32 %v927_v63, %v927_v63  ;;  %v251_v16 = vsel %vm68_vm0, %v215_v8, 0.0 }
  0x85   :  { %v266_v2 = vsel %vm68_vm0, %v220_v61, 0.0  ;;  %v260_v1 = vsel %vm68_vm0, %v218_v62, 0.0 }
  0x86   :  { %267 = vadd.xlane.f32.xlu1 %v266_v2  ;;  %261 = vadd.xlane.f32.xlu2 %v260_v1  ;;  %v147_v3 = vpop.xlane.xlu1 %146  ;;  %v144_v4 = vpop.xlane.xlu0 %143  ;;  %v254_v21 = vsel %vm68_vm0, %v216_v10, 0.0 }
  0x87   :  { %119 = vadd.xlane.f32.xlu0 %v118_v0  ;;  %v182_v5 = vmul.f32 %v891_v40, %v147_v3  ;;  %v138_v6 = vpop.xlane.xlu2 %137  ;;  %v181_v26 = vmul.f32 %v891_v40, %v144_v4 }
  0x88   :  { %v179_v9 = vmul.f32 %v891_v40, %v138_v6 }
  0x89   :  { %v942_v11 = vsub.f32 %v821_v12, %v182_v5  ;;  %v963_v31 = vsub.f32 %v826_v13, %v181_v26 }
  0x8a   :  { %v947_v17 = vsub.f32 %v831_v14, %v179_v9  ;;  %v958_v14 = vld [vmem:[%s1368_s0 + $0x8] sm:$0xff]  ;;  %v114_v55 = vpop.f32.mrf.mxu1 }
  0x8b   :  { %v214_v28 = vmul.f32 %v942_v11, %v942_v11  ;;  %v121_v34 = vsel %vm68_vm0, %v958_v14, 0.0  ;;  %v213_v39 = vmul.f32 %v963_v31, %v963_v31 }
  0x8c   :  { %v211_v30 = vmul.f32 %v947_v17, %v947_v17  ;;  %v81_v61 = vpop.f32.mrf.mxu0 }
  0x8d   :  { %v248_v33 = vsel %vm68_vm0, %v214_v28, 0.0  ;;  %v245_v44 = vsel %vm68_vm0, %v213_v39, 0.0 }
  0x8e   :  { %258 = vadd.xlane.f32.xlu1 %v257_v15  ;;  %252 = vadd.xlane.f32.xlu2 %v251_v16  ;;  %v141_v22 = vpop.xlane.xlu0 %140  ;;  %v132_v23 = vpop.xlane.xlu1 %131  ;;  %v239_v36 = vsel %vm68_vm0, %v211_v30, 0.0 }
  0x8f   :  { %255 = vadd.xlane.f32.xlu0 %v254_v21  ;;  %v135_v27 = vpop.xlane.xlu2 %134  ;;  %v177_v12 = vmul.f32 %v891_v40, %v132_v23  ;;  %v180_v38 = vmul.f32 %v891_v40, %v141_v22  ;;  %v693_v21 = vld [vmem:[%s1372_s5] ss:$0 sm:$0xff] }
  0x90   :  { %v178_v29 = vmul.f32 %v891_v40, %v135_v27 }
  0x91   :  { %v966_v32 = vsub.f32 %v847_v19, %v177_v12  ;;  %v984_v41 = vsub.f32 %v842_v18, %v180_v38  ;;  %v1029_v12 = vadd.f32 %v693_v21, %v114_v55 }
  0x92   :  { %v972_v35 = vsub.f32 %v852_v20, %v178_v29  ;;  %v116_v62 = vpop.f32.mrf.mxu1 }
  0x93   :  { %v209_v19 = vmul.f32 %v966_v32, %v966_v32  ;;  %v212_v18 = vmul.f32 %v984_v41, %v984_v41  ;;  %v478_v39 = vrot.slane %v1029_v12, 1 }
  0x94   :  { %v210_v20 = vmul.f32 %v972_v35, %v972_v35  ;;  %v83_v0 = vpop.f32.mrf.mxu0 }
  0x95   :  { %v233_v43 = vsel %vm68_vm0, %v209_v19, 0.0  ;;  %v242_v51 = vsel %vm68_vm0, %v212_v18, 0.0 }
  0x96   :  { %249 = vadd.xlane.f32.xlu2 %v248_v33  ;;  %122 = vadd.xlane.f32.xlu1 %v121_v34  ;;  %v129_v37 = vpop.xlane.xlu0 %128  ;;  %v236_v46 = vsel %vm68_vm0, %v210_v20, 0.0 }
  0x97   :  { %240 = vadd.xlane.f32.xlu0 %v239_v36  ;;  %v176_v13 = vmul.f32 %v891_v40, %v129_v37  ;;  %v126_v47 = vpop.xlane.xlu2 %125  ;;  %v694_v37 = vld [vmem:[%s1373_s3] ss:$0 sm:$0xff] }
  0x98   :  { %v175_v49 = vmul.f32 %v891_v40, %v126_v47  ;;  %v1054_v18 = vadd.f32 %v694_v37, %v81_v61 }
  0x99   :  { %v987_v42 = vsub.f32 %v863_v24, %v176_v13 }
  0x9a   :  { %v999_v50 = vsub.f32 %v868_v25, %v175_v49  ;;  %v680_v25 = vld [vmem:[%s1374_s6 + $0x8] sm:$0xff]  ;;  %v505_v62 = vrot.slane %v1054_v18, 1 }
  0x9b   :  { %v208_v48 = vmul.f32 %v987_v42, %v987_v42 }
  0x9c   :  { %v207_v52 = vmul.f32 %v999_v50, %v999_v50 }
  0x9d   :  { %v230_v24 = vsel %vm68_vm0, %v208_v48, 0.0 }
  0x9e   :  { %234 = vadd.xlane.f32.xlu2 %v233_v43  ;;  %246 = vadd.xlane.f32.xlu1 %v245_v44  ;;  %v227_v53 = vsel %vm68_vm0, %v207_v52, 0.0 }
  0x9f   :  { %237 = vadd.xlane.f32.xlu0 %v236_v46 }
  0xa6   :  { %231 = vadd.xlane.f32.xlu2 %v230_v24  ;;  %243 = vadd.xlane.f32.xlu1 %v242_v51 }
  0xae   :  { %228 = vadd.xlane.f32.xlu1 %v227_v53  ;;  %v481_v53 = vadd.f32 1.0, %v478_v39 }
  0xcf   :  { %574 = vxpose.xlu2.c.b16.start [1/2] (short) (narrow) %v679_v54, 32 }
  0xdf   :  { %575 = vxpose.xlu2.c.b16.end [2/2] (short) (narrow) %v680_v25, 32 }
  0xf1   :  { %v265_v2 = vpop.xlane.xlu0 %264 }
  0xf2   :  { %v283_v1 = vmul.f32 %v265_v2, %v891_v40 }
  0xf4   :  { %v299_v3 = vadd.f32 1e-06, %v283_v1 }
  0xf6   :  { %697 = vrsqrt.f32 %v299_v3  ;;  %vm447_vm3 = vweird.f32 %v299_v3 }
  0xf9   :  { %v268_v4 = vpop.xlane.xlu1 %267  ;;  %v262_v5 = vpop.xlane.xlu2 %261 }
  0xfa   :  { %v284_v6 = vmul.f32 %v268_v4, %v891_v40  ;;  %v282_v7 = vmul.f32 %v262_v5, %v891_v40  ;;  %v120_v8 = vpop.xlane.xlu0 %119 }
  0xfb   :  { %v173_v9 = vmul.f32 %v891_v40, %v120_v8 }
  0xfc   :  { %v698_v10 = vpop.eup %697  ;;  %v1015_v15 = vadd.f32 1e-06, %v284_v6  ;;  %v1017_v16 = vadd.f32 1e-06, %v282_v7  ;;  %v1074_v7 = vperm.slane %v481_v53, 0 }
  0xfd   :  { %v442_v22 = vmul.f32 %v698_v10, %v299_v3  ;;  %v1023_v23 = vsub.f32 %v914_v58, %v173_v9  ;;  %vm448_vm2 = vweird.f32 %v698_v10 }
  0xfe   :  { %699 = vrsqrt.f32 %v1015_v15  ;;  %vm1058_vm4 = vmor %vm447_vm3, %vm448_vm2  ;;  %vm457_vm6 = vweird.f32 %v1015_v15  ;;  %vm437_vm8 = vweird.f32 %v1017_v16 }
  0xff   :  { %v443_v26 = vmul.f32 %v698_v10, %v442_v22  ;;  %701 = vrsqrt.f32 %v1017_v16  ;;  %v205_v27 = vmul.f32 %v1023_v23, %v1023_v23 }
 0x101   :  { %v444_v28 = vmul.f32 0.5, %v443_v26  ;;  %v259_v29 = vpop.xlane.xlu1 %258  ;;  %v253_v30 = vpop.xlane.xlu2 %252  ;;  %v221_v33 = vsel %vm68_vm0, %v205_v27, 0.0 }
 0x102   :  { %v281_v34 = vmul.f32 %v259_v29, %v891_v40  ;;  %v279_v58 = vmul.f32 %v253_v30, %v891_v40  ;;  %222 = vadd.xlane.f32.xlu0 %v221_v33  ;;  %v256_v36 = vpop.xlane.xlu0 %255  ;;  %v1097_v29 = vperm.slane %v505_v62, 0 }
 0x103   :  { %v445_v38 = vsub.f32 1.5, %v444_v28  ;;  %v280_v13 = vmul.f32 %v256_v36, %v891_v40 }
 0x104   :  { %v1038_v19 = vpop.eup %699  ;;  %v1041_v20 = vadd.f32 1e-06, %v281_v34  ;;  %v1043_v43 = vadd.f32 1e-06, %v279_v58 }
 0x105   :  { %v1045_v44 = vpop.eup %701  ;;  %v446_v46 = vmul.f32 %v698_v10, %v445_v38  ;;  %v452_v47 = vmul.f32 %v1038_v19, %v1015_v15  ;;  %v1049_v48 = vadd.f32 1e-06, %v280_v13  ;;  %vm458_vm5 = vweird.f32 %v1038_v19 }
 0x106   :  { %v432_v49 = vmul.f32 %v1045_v44, %v1017_v16  ;;  %703 = vrsqrt.f32 %v1041_v20  ;;  %vm1091_vm7 = vmor %vm457_vm6, %vm458_vm5  ;;  %vm438_vm9 = vweird.f32 %v1045_v44  ;;  %vm427_vm12 = vweird.f32 %v1041_v20 }
 0x107   :  { %v453_v24 = vmul.f32 %v1038_v19, %v452_v47  ;;  %705 = vrsqrt.f32 %v1043_v43  ;;  %v450_v54 = vsel %vm1058_vm4, %v698_v10, %v446_v46  ;;  %vm1131_vm11 = vmor %vm437_vm8, %vm438_vm9  ;;  %vm407_vm13 = vweird.f32 %v1043_v43 }
 0x108   :  { %v433_v52 = vmul.f32 %v1045_v44, %v432_v49  ;;  %707 = vrsqrt.f32 %v1049_v48  ;;  %v475_v9 = vmul.f32 %v450_v54, %v895_v45  ;;  %vm417_vm14 = vweird.f32 %v1049_v48 }
 0x109   :  { %v454_v55 = vmul.f32 0.5, %v453_v24  ;;  %v250_v61 = vpop.xlane.xlu2 %249  ;;  %v123_v25 = vpop.xlane.xlu1 %122 }
 0x10a   :  { %v278_v0 = vmul.f32 %v250_v61, %v891_v40  ;;  %v174_v2 = vmul.f32 %v891_v40, %v123_v25  ;;  %v241_v1 = vpop.xlane.xlu0 %240  ;;  %v434_v4 = vmul.f32 0.5, %v433_v52  ;;  %v502_v39 = vmul.f32 %v1074_v7, %v475_v9 }
 0x10b   :  { %v455_v3 = vsub.f32 1.5, %v454_v55  ;;  %v275_v5 = vmul.f32 %v241_v1, %v891_v40 }
 0x10c   :  { %v1071_v6 = vpop.eup %703  ;;  %v1076_v8 = vadd.f32 1e-06, %v278_v0  ;;  %v1085_v26 = vsub.f32 %v958_v14, %v174_v2  ;;  %v435_v30 = vsub.f32 1.5, %v434_v4 }
 0x10d   :  { %v1079_v10 = vpop.eup %705  ;;  %v456_v21 = vmul.f32 %v1038_v19, %v455_v3  ;;  %v422_v22 = vmul.f32 %v1071_v6, %v1041_v20  ;;  %v1087_v27 = vadd.f32 1e-06, %v275_v5  ;;  %vm428_vm10 = vweird.f32 %v1071_v6 }
 0x10e   :  { %v1089_v28 = vpop.eup %707  ;;  %v402_v45 = vmul.f32 %v1079_v10, %v1043_v43  ;;  %709 = vrsqrt.f32 %v1076_v8  ;;  %v206_v13 = vmul.f32 %v1085_v26, %v1085_v26  ;;  %v436_v52 = vmul.f32 %v1045_v44, %v435_v30  ;;  %vm1155_vm1 = vmor %vm427_vm12, %vm428_vm10 }
 0x10f   :  { %v460_v14 = vsel %vm1091_vm7, %v1038_v19, %v456_v21  ;;  %v423_v33 = vmul.f32 %v1071_v6, %v422_v22  ;;  %v412_v34 = vmul.f32 %v1089_v28, %v1049_v48  ;;  %711 = vrsqrt.f32 %v1087_v27 }
 0x110   :  { %v403_v58 = vmul.f32 %v1079_v10, %v402_v45  ;;  %v476_v51 = vmul.f32 %v460_v14, %v906_v56  ;;  %v224_v54 = vsel %vm68_vm0, %v206_v13, 0.0  ;;  %vm408_vm15 = vweird.f32 %v1079_v10 }
 0x111   :  { %v424_v36 = vmul.f32 0.5, %v423_v33  ;;  %v413_v37 = vmul.f32 %v1089_v28, %v412_v34  ;;  %v235_v38 = vpop.xlane.xlu2 %234  ;;  %v247_v19 = vpop.xlane.xlu1 %246  ;;  %225 = vadd.xlane.f32.xlu1 %v224_v54  ;;  %v524_v21 = vadd.f32 %v1097_v29, %v502_v39  ;;  %v440_v22 = vsel %vm1131_vm11, %v1045_v44, %v436_v52  ;;  %vm1171_vm2 = vmor %vm407_vm13, %vm408_vm15 }
 0x112   :  { %v404_v46 = vmul.f32 0.5, %v403_v58  ;;  %v273_v47 = vmul.f32 %v235_v38, %v891_v40  ;;  %v277_v49 = vmul.f32 %v247_v19, %v891_v40  ;;  %v238_v24 = vpop.xlane.xlu0 %237  ;;  %v503_v4 = vmul.f32 %v1074_v7, %v476_v51 }
 0x113   :  { %v425_v53 = vsub.f32 1.5, %v424_v36  ;;  %v414_v61 = vmul.f32 0.5, %v413_v37  ;;  %v274_v0 = vmul.f32 %v238_v24, %v891_v40  ;;  %vm418_vm3 = vweird.f32 %v1089_v28 }
 0x114   :  { %v1120_v55 = vpop.eup %709  ;;  %v1122_v25 = vadd.f32 1e-06, %v273_v47  ;;  %v1124_v62 = vadd.f32 1e-06, %v277_v49  ;;  %v405_v1 = vsub.f32 1.5, %v404_v46  ;;  %v525_v44 = vadd.f32 %v1097_v29, %v503_v4  ;;  %vm1198_vm6 = vmor %vm417_vm14, %vm418_vm3 }
 0x115   :  { %v426_v2 = vmul.f32 %v1071_v6, %v425_v53  ;;  %v392_v3 = vmul.f32 %v1120_v55, %v1076_v8  ;;  %v1139_v5 = vpop.eup %711  ;;  %v415_v15 = vsub.f32 1.5, %v414_v61  ;;  %v1160_v45 = vadd.f32 1e-06, %v274_v0 }
 0x116   :  { %713 = vrsqrt.f32 %v1122_v25  ;;  %v362_v9 = vmul.f32 %v1139_v5, %v1087_v27  ;;  %v406_v30 = vmul.f32 %v1079_v10, %v405_v1  ;;  %vm397_vm4 = vweird.f32 %v1076_v8 }
 0x117   :  { %v393_v16 = vmul.f32 %v1120_v55, %v392_v3  ;;  %715 = vrsqrt.f32 %v1124_v62  ;;  %v430_v14 = vsel %vm1155_vm1, %v1071_v6, %v426_v2  ;;  %v533_v19 = vpack.c.bf16 %v525_v44, %v524_v21 }
 0x118   :  { %v363_v37 = vmul.f32 %v1139_v5, %v362_v9  ;;  %717 = vrsqrt.f32 %v1160_v45  ;;  %v473_v47 = vmul.f32 %v430_v14, %v917_v59  ;;  %v474_v49 = vmul.f32 %v440_v22, %v909_v57 }
 0x119   :  { %v394_v33 = vmul.f32 0.5, %v393_v16  ;;  %v232_v34 = vpop.xlane.xlu2 %231  ;;  %v244_v58 = vpop.xlane.xlu1 %243  ;;  %v410_v24 = vsel %vm1171_vm2, %v1079_v10, %v406_v30  ;;  %v416_v51 = vmul.f32 %v1089_v28, %v415_v15  ;;  %vm398_vm5 = vweird.f32 %v1120_v55 }
 0x11a   :  { %v272_v6 = vmul.f32 %v232_v34, %v891_v40  ;;  %v276_v38 = vmul.f32 %v244_v58, %v891_v40  ;;  %v364_v59 = vmul.f32 0.5, %v363_v37  ;;  %v618_v57 = vsel %vm68_vm0, %v533_v19, 0  ;;  %vm1211_vm8 = vmor %vm397_vm4, %vm398_vm5 }
 0x11b   :  { %v395_v13 = vsub.f32 1.5, %v394_v33  ;;  %vm387_vm7 = vweird.f32 %v1124_v62  ;;  %620 = vmatpush.bf16.xpose.msra.mxu2 %v618_v57  ;;  %681 = vmatpush.bf16.xpose.msra.mxu3 %v618_v57  ;;  %v500_v56 = vmul.f32 %v1074_v7, %v473_v47  ;;  %v501_v2 = vmul.f32 %v1074_v7, %v474_v49 }
 0x11c   :  { %v1181_v39 = vpop.eup %713  ;;  %v1183_v43 = vadd.f32 1e-06, %v272_v6  ;;  %v1185_v46 = vadd.f32 1e-06, %v276_v38  ;;  %v471_v1 = vmul.f32 %v410_v24, %v920_v60  ;;  %v420_v3 = vsel %vm1198_vm6, %v1089_v28, %v416_v51 }
 0x11d   :  { %v342_v52 = vmul.f32 %v1181_v39, %v1122_v25  ;;  %v716_v53 = vpop.eup %715  ;;  %v396_v61 = vmul.f32 %v1120_v55, %v395_v13  ;;  %v365_v21 = vsub.f32 1.5, %v364_v59  ;;  %v522_v22 = vadd.f32 %v1097_v29, %v500_v56 }
 0x11e   :  { %v382_v10 = vmul.f32 %v716_v53, %v1124_v62  ;;  %719 = vrsqrt.f32 %v1183_v43  ;;  %v1207_v0 = vpop.eup %717  ;;  %v523_v20 = vadd.f32 %v1097_v29, %v501_v2  ;;  %vm388_vm9 = vweird.f32 %v716_v53 }
 0x11f   :  { %721 = vrsqrt.f32 %v1185_v46  ;;  %v343_v4 = vmul.f32 %v1181_v39, %v342_v52  ;;  %v352_v16 = vmul.f32 %v1207_v0, %v1160_v45  ;;  %v400_v60 = vsel %vm1211_vm8, %v1120_v55, %v396_v61  ;;  %vm1242_vm12 = vmor %vm387_vm7, %vm388_vm9 }
 0x120   :  { %v383_v8 = vmul.f32 %v716_v53, %v382_v10  ;;  %v532_v30 = vpack.c.bf16 %v523_v20, %v522_v22  ;;  %v472_v44 = vmul.f32 %v420_v3, %v927_v63  ;;  %v498_v34 = vmul.f32 %v1074_v7, %v471_v1 }
 0x121   :  { %v229_v9 = vpop.xlane.xlu1 %228  ;;  %v353_v28 = vmul.f32 %v1207_v0, %v352_v16  ;;  %vm367_vm10 = vweird.f32 %v1087_v27  ;;  %vm368_vm11 = vweird.f32 %v1139_v5  ;;  %v344_v36 = vmul.f32 0.5, %v343_v4 }
 0x122   :  { %v271_v15 = vmul.f32 %v229_v9, %v891_v40  ;;  %v384_v14 = vmul.f32 0.5, %v383_v8  ;;  %v615_v38 = vsel %vm68_vm0, %v532_v30, 0  ;;  %v470_v63 = vmul.f32 %v400_v60, %v942_v11  ;;  %vm1251_vm13 = vmor %vm367_vm10, %vm368_vm11 }
 0x123   :  { %v480_v13 = vadd.f32 1.0, %v1029_v12  ;;  %v366_v27 = vmul.f32 %v1139_v5, %v365_v21  ;;  %v354_v47 = vmul.f32 0.5, %v353_v28  ;;  %621 = vmatpush.bf16.xpose.msra.mxu2 %v615_v38  ;;  %vm347_vm14 = vweird.f32 %v1122_v25  ;;  %682 = vmatpush.bf16.xpose.msra.mxu3 %v615_v38 }
 0x124   :  { %v1232_v33 = vadd.f32 1e-06, %v271_v15  ;;  %v1236_v58 = vpop.eup %719  ;;  %v385_v37 = vsub.f32 1.5, %v384_v14  ;;  %v499_v24 = vmul.f32 %v1074_v7, %v472_v44  ;;  %v520_v11 = vadd.f32 %v1097_v29, %v498_v34 }
 0x125   :  { %v722_v55 = vpop.eup %721  ;;  %v345_v51 = vsub.f32 1.5, %v344_v36  ;;  %vm357_vm15 = vweird.f32 %v1160_v45  ;;  %v332_v52 = vmul.f32 %v1236_v58, %v1183_v43  ;;  %v497_v61 = vmul.f32 %v1074_v7, %v470_v63 }
 0x126   :  { %723 = vrsqrt.f32 %v1232_v33  ;;  %v386_v19 = vmul.f32 %v716_v53, %v385_v37  ;;  %v372_v62 = vmul.f32 %v722_v55, %v1185_v46  ;;  %v521_v59 = vadd.f32 %v1097_v29, %v499_v24 }
 0x127   :  { %v370_v10 = vsel %vm1251_vm13, %v1139_v5, %v366_v27  ;;  %vm348_vm1 = vweird.f32 %v1181_v39  ;;  %v355_v48 = vsub.f32 1.5, %v354_v47  ;;  %vm377_vm2 = vweird.f32 %v1185_v46  ;;  %v538_v5 = vld [vmem:[%s1375_s7] sm:$0xff] }
 0x128   :  { %v390_v12 = vsel %vm1242_vm12, %v716_v53, %v386_v19  ;;  %v373_v54 = vmul.f32 %v722_v55, %v372_v62  ;;  %vm378_vm3 = vweird.f32 %v722_v55  ;;  %v531_v2 = vpack.c.bf16 %v521_v59, %v520_v11  ;;  %vm1279_vm5 = vmor %vm347_vm14, %vm348_vm1 }
 0x129   :  { %v469_v57 = vmul.f32 %v390_v12, %v963_v31  ;;  %v346_v3 = vmul.f32 %v1181_v39, %v345_v51  ;;  %vm358_vm4 = vweird.f32 %v1207_v0  ;;  %v333_v31 = vmul.f32 %v1236_v58, %v332_v52  ;;  %vm379_vm6 = vmor %vm377_vm2, %vm378_vm3 }
 0x12a   :  { %v374_v56 = vmul.f32 0.5, %v373_v54  ;;  %v612_v16 = vsel %vm68_vm0, %v531_v2, 0  ;;  %v1286_v21 = vperm.slane %v480_v13, 0  ;;  %v356_v22 = vmul.f32 %v1207_v0, %v355_v48  ;;  %vm1294_vm7 = vmor %vm357_vm15, %vm358_vm4 }
 0x12b   :  { %v496_v1 = vmul.f32 %v1074_v7, %v469_v57  ;;  %v519_v7 = vadd.f32 %v1097_v29, %v497_v61  ;;  %622 = vmatpush.bf16.xpose.msra.mxu2 %v612_v16  ;;  %v467_v25 = vmul.f32 %v370_v10, %v947_v17  ;;  %683 = vmatpush.bf16.xpose.msra.mxu3 %v612_v16  ;;  %v334_v14 = vmul.f32 0.5, %v333_v31  ;;  %v539_v61 = vld [vmem:[%s1375_s7 + $0x8] sm:$0xff] }
 0x12c   :  { %v724_v53 = vpop.eup %723  ;;  %v375_v8 = vsub.f32 1.5, %v374_v56  ;;  %v1299_v30 = vperm.slane %v1054_v18, 0  ;;  %v350_v46 = vsel %vm1279_vm5, %v1181_v39, %v346_v3  ;;  %v360_v17 = vsel %vm1294_vm7, %v1207_v0, %v356_v22 }
 0x12d   :  { %v322_v4 = vmul.f32 %v724_v53, %v1232_v33  ;;  %v518_v9 = vadd.f32 %v1097_v29, %v496_v1  ;;  %v494_v36 = vmul.f32 %v1286_v21, %v467_v25  ;;  %v335_v6 = vsub.f32 1.5, %v334_v14 }
 0x12e   :  { %v376_v60 = vmul.f32 %v722_v55, %v375_v8  ;;  %vm327_vm8 = vweird.f32 %v1232_v33  ;;  %vm328_vm9 = vweird.f32 %v724_v53  ;;  %vm337_vm10 = vweird.f32 %v1183_v43 }
 0x12f   :  { %v323_v20 = vmul.f32 %v724_v53, %v322_v4  ;;  %v530_v29 = vpack.c.bf16 %v519_v7, %v518_v9  ;;  %v465_v39 = vmul.f32 %v350_v46, %v966_v32  ;;  %vm338_vm11 = vweird.f32 %v1236_v58  ;;  %vm329_vm12 = vmor %vm327_vm8, %vm328_vm9  ;;  %v540_v4 = vld [vmem:[%s1375_s7 + $0x10] sm:$0xff] }
 0x130   :  { %v380_v44 = vsel %vm379_vm6, %v722_v55, %v376_v60  ;;  %v466_v55 = vmul.f32 %v360_v17, %v972_v35  ;;  %v336_v33 = vmul.f32 %v1236_v58, %v335_v6  ;;  %vm339_vm13 = vmor %vm337_vm10, %vm338_vm11  ;;  %v730_v10 = vmov 0  }
 0x131   :  { %v324_v28 = vmul.f32 0.5, %v323_v20  ;;  %v468_v34 = vmul.f32 %v380_v44, %v984_v41  ;;  %v609_v37 = vsel %vm68_vm0, %v530_v29, 0  ;;  %v516_v41 = vadd.f32 %v1299_v30, %v494_v36  ;;  %692 = vset.pattern.permute.xlu1 %v730_v10  ;;  %691 = vset.pattern.permute.xlu0 %v730_v10 }
 0x132   :  { %v492_v43 = vmul.f32 %v1286_v21, %v465_v39  ;;  %v493_v32 = vmul.f32 %v1286_v21, %v466_v55  ;;  %v340_v27 = vsel %vm339_vm13, %v1236_v58, %v336_v33  ;;  %549 = vperm.xlu1 %692, %v539_v61   ;;  %544 = vperm.xlu0 %691, %v538_v5  }
 0x133   :  { %v325_v45 = vsub.f32 1.5, %v324_v28  ;;  %v495_v18 = vmul.f32 %v1286_v21, %v468_v34  ;;  %623 = vmatpush.bf16.xpose.msra.mxu2 %v609_v37  ;;  %684 = vmatpush.bf16.xpose.msra.mxu3 %v609_v37  ;;  %v464_v62 = vmul.f32 %v340_v27, %v987_v42 }
 0x134   :  { %v514_v19 = vadd.f32 %v1299_v30, %v492_v43  ;;  %v515_v47 = vadd.f32 %v1299_v30, %v493_v32 }
 0x135   :  { %v326_v0 = vmul.f32 %v724_v53, %v325_v45  ;;  %v517_v38 = vadd.f32 %v1299_v30, %v495_v18  ;;  %v491_v51 = vmul.f32 %v1286_v21, %v464_v62 }
 0x136   :  { %v528_v24 = vpack.c.bf16 %v515_v47, %v514_v19 }
 0x137   :  { %v529_v63 = vpack.c.bf16 %v517_v38, %v516_v41  ;;  %v330_v13 = vsel %vm329_vm12, %v724_v53, %v326_v0  ;;  %v513_v58 = vadd.f32 %v1299_v30, %v491_v51 }
 0x138   :  { %v463_v49 = vmul.f32 %v330_v13, %v999_v50  ;;  %v603_v12 = vsel %vm68_vm0, %v528_v24, 0 }
 0x139   :  { %v606_v35 = vsel %vm68_vm0, %v529_v63, 0 }
 0x13a   :  { %v490_v11 = vmul.f32 %v1286_v21, %v463_v49  ;;  %554 = vperm.xlu1 %692, %v540_v4  }
 0x13b   :  { %624 = vmatpush.bf16.xpose.msra.mxu2 %v606_v35  ;;  %685 = vmatpush.bf16.xpose.msra.mxu3 %v606_v35 }
 0x13c   :  { %v512_v52 = vadd.f32 %v1299_v30, %v490_v11 }
 0x13e   :  { %v527_v54 = vpack.c.bf16 %v513_v58, %v512_v52 }
 0x140   :  { %v600_v50 = vsel %vm68_vm0, %v527_v54, 0 }
 0x143   :  { %625 = vmatpush.bf16.xpose.msra.mxu2 %v603_v12  ;;  %686 = vmatpush.bf16.xpose.msra.mxu3 %v603_v12 }
 0x14b   :  { %626 = vmatpush.bf16.xpose.msra.mxu2 %v600_v50  ;;  %687 = vmatpush.bf16.xpose.msra.mxu3 %v600_v50 }
 0x170   :  { %v582_v17 = vpop.trf.xlu2 }
 0x175   :  { %v223_v59 = vpop.xlane.xlu0 %222 }
 0x176   :  { %v269_v42 = vmul.f32 %v223_v59, %v891_v40 }
 0x178   :  { %v285_v57 = vadd.f32 1e-06, %v269_v42 }
 0x17a   :  { %725 = vrsqrt.f32 %v285_v57  ;;  %vm307_vm14 = vweird.f32 %v285_v57 }
 0x180   :  { %v726_v48 = vpop.eup %725 }
 0x181   :  { %v302_v53 = vmul.f32 %v726_v48, %v285_v57  ;;  %vm308_vm15 = vweird.f32 %v726_v48 }
 0x182   :  { %vm309_vm1 = vmor %vm307_vm14, %vm308_vm15 }
 0x183   :  { %v303_v56 = vmul.f32 %v726_v48, %v302_v53 }
 0x184   :  { %v226_v2 = vpop.xlane.xlu1 %225 }
 0x185   :  { %v270_v1 = vmul.f32 %v226_v2, %v891_v40  ;;  %v304_v31 = vmul.f32 0.5, %v303_v56  ;;  %v541_v40 = vld [vmem:[%s1375_s7 + $0x18] sm:$0xff] }
 0x186   :  { %559 = vperm.xlu1 %692, %v541_v40  }
 0x187   :  { %v286_v3 = vadd.f32 1e-06, %v270_v1  ;;  %v305_v8 = vsub.f32 1.5, %v304_v31 }
 0x189   :  { %727 = vrsqrt.f32 %v286_v3  ;;  %v306_v9 = vmul.f32 %v726_v48, %v305_v8  ;;  %vm317_vm3 = vweird.f32 %v286_v3 }
 0x18b   :  { %v310_v20 = vsel %vm309_vm1, %v726_v48, %v306_v9 }
 0x18c   :  { %v461_v60 = vmul.f32 %v310_v20, %v1023_v23  ;;  %v583_v23 = vpop.trf.xlu2 }
 0x18e   :  { %v488_v46 = vmul.f32 %v1286_v21, %v461_v60 }
 0x18f   :  { %v728_v16 = vpop.eup %727 }
 0x190   :  { %v312_v7 = vmul.f32 %v728_v16, %v286_v3  ;;  %vm318_vm2 = vweird.f32 %v728_v16  ;;  %v510_v45 = vadd.f32 %v1299_v30, %v488_v46 }
 0x191   :  { %vm319_vm4 = vmor %vm317_vm3, %vm318_vm2 }
 0x192   :  { %v313_v22 = vmul.f32 %v728_v16, %v312_v7 }
 0x194   :  { %v314_v25 = vmul.f32 0.5, %v313_v22 }
 0x196   :  { %v315_v15 = vsub.f32 1.5, %v314_v25 }
 0x198   :  { %v316_v29 = vmul.f32 %v728_v16, %v315_v15 }
 0x19a   :  { %v320_v14 = vsel %vm319_vm4, %v728_v16, %v316_v29 }
 0x19b   :  { %v462_v28 = vmul.f32 %v320_v14, %v1085_v26 }
 0x19d   :  { %v489_v44 = vmul.f32 %v1286_v21, %v462_v28 }
 0x19f   :  { %v511_v34 = vadd.f32 %v1299_v30, %v489_v44 }
 0x1a1   :  { %v526_v36 = vpack.c.bf16 %v511_v34, %v510_v45 }
 0x1a3   :  { %v597_v37 = vsel %vm68_vm0, %v526_v36, 0 }
 0x1a4   :  { %627 = vmatpush.bf16.xpose.msra.mxu2 %v597_v37  ;;  %688 = vmatpush.bf16.xpose.msra.mxu3 %v597_v37  ;;  %v550_v26 = vpop.permute.xlu1 %549  ;;  %v545_v18 = vpop.permute.xlu0 %544 }
 0x1ab   :  { %673 = vmatmul.msk.bf16.vlgmr.msra.gmra.mxu2 %vm68_vm0, %v582_v17  ;;  %674 = vmatmul.msk.bf16.vlgmr.msra.gmra.mxu3 %vm68_vm0, %v583_v23 }
 0x1ac   :  { %v555_v6 = vpop.permute.xlu1 %554 }
 0x1f8   :  { %v560_v30 = vpop.permute.xlu1 %559 }
 0x22e   :  { %v629_v39 = vpop.f32.mrf.mxu2  ;;  %v634_v21 = vpop.f32.mrf.mxu3 }
 0x22f   :  { %v635_v55 = vadd.f32 %v634_v21, %v555_v6  ;;  %v630_v0 = vadd.f32 %v629_v39, %v545_v18 }
 0x231   :  { %641 = vst [vmem:[%s1376_s8 + $0x10] sm:$0xff] %v635_v55 }
 0x232   :  { %639 = vst [vmem:[%s1376_s8] sm:$0xff] %v630_v0 }
 0x236   :  { %v631_v41 = vpop.f32.mrf.mxu2  ;;  %v636_v38 = vpop.f32.mrf.mxu3 }
 0x237   :  { %v632_v33 = vadd.f32 %v631_v41, %v550_v26  ;;  %v637_v63 = vadd.f32 %v636_v38, %v560_v30 }
 0x239   :  { %640 = vst [vmem:[%s1376_s8 + $0x8] sm:$0xff] %v632_v33 }
 0x23a   :  { %642 = vst [vmem:[%s1376_s8 + $0x18] sm:$0xff] %v637_v63 }

// kernel: dit_forward.7
= control target key start
LH: loop header
LB: loop body
LE: loop exit
PB: predicated region body
PF: predicated region fallthrough
CT: control target
= control target key end

     0   :  { %s2589_s13 = smov 0   ;;  %s3486_s0 = inlined_call_operand.vmem [shape: f32[2,64,32], index: 0, kind: input, shape index: {}, may-alias: {0,10}]   ;;  %s3487_s1 = inlined_call_operand.vmem [shape: f32[2,6,32], index: 1, kind: input, shape index: {}]   ;;  %s3488_s2 = inlined_call_operand.vmem [shape: bf16[96,32], index: 2, kind: input, shape index: {}]   ;;  %s3489_s3 = inlined_call_operand.vmem [shape: f32[96,1], index: 3, kind: input, shape index: {}]   ;;  %s3490_s4 = inlined_call_operand.vmem [shape: bf16[32,32], index: 4, kind: input, shape index: {}]   ;;  %s3491_s5 = inlined_call_operand.vmem [shape: f32[1,32], index: 5, kind: input, shape index: {}]   ;;  %s3492_s6 = inlined_call_operand.vmem [shape: bf16[32,128], index: 6, kind: input, shape index: {}]   ;;  %s3493_s7 = inlined_call_operand.vmem [shape: f32[1,128], index: 7, kind: input, shape index: {}]   ;;  %s3494_s8 = inlined_call_operand.vmem [shape: bf16[128,32], index: 8, kind: input, shape index: {}]   ;;  %s3495_s9 = inlined_call_operand.vmem [shape: f32[1,32], index: 9, kind: input, shape index: {}]   ;;  %s3496_s10 = inlined_call_operand.vmem [shape: f32[2,64,32], index: 10, kind: output, shape index: {}, may-alias: {0,10}]  }
   0x1 LB: > { %s2164_s14 = sadd.s32 4294967295, %s2530_s13   ;;  %p2168_p0 = scmp.ge.s32.totalorder %s2530_s13, 1  ;;  %s2530_s13 = sphi %s2589_s13, %s20_s13  }
   0x2   : > { %p321_p1 = scmp.lt.s32.totalorder %s2530_s13, 3 }
   0x4   : > { %p322_p2 = pnand %p2168_p0, %p321_p1 }
   0x5   : > { %p363_p3 = scmp.lt.s32.totalorder (!%p322_p2), %s2164_s14, 1 }
   0x6   : > { %325 = sbr.rel (%p322_p2) target bundleno = 3108 (0xc24), region = 60 }
   0xb   : > { %s3506_s14 = smov (!%p363_p3, %s2164_s14), 1  ;;  %vm387_vm0 = vcmask 261120   ;;  %v2532_v16 = vmov 32.0  }
   0xc   : > { %s2282_s15 = sshll.u32 %s3506_s14, 6  ;;  %2337 = vrcp.f32 %v2532_v16  ;;  %s2171_s19 = sshll.u32 %s3506_s14, 3 }
   0xd   : > { %s2605_s18 = scalar_lea.vmem %s3486_s0, %s2282_s15  ;;  %s2706_s22 = scalar_lea.vmem %s3487_s1, %s2171_s19 }
   0xe   : > { %v384_v0 = vld [vmem:[%s2605_s18 + $0x30] sm:$0xff]  ;;  %v382_v1 = vld [vmem:[%s2605_s18 + $0x20] sm:$0xff]  ;;  %v385_v6 = vld [vmem:[%s2605_s18 + $0x38] sm:$0xff]  ;;  %s3457_s27 = scalar_lea.vmem %s3496_s10, %s2282_s15 }
   0xf   : > { %v380_v2 = vld [vmem:[%s2605_s18 + $0x10] sm:$0xff]  ;;  %v406_v3 = vsel %vm387_vm0, %v384_v0, 0.0  ;;  %v400_v4 = vsel %vm387_vm0, %v382_v1, 0.0  ;;  %v383_v7 = vld [vmem:[%s2605_s18 + $0x28] sm:$0xff]  ;;  %v381_v8 = vld [vmem:[%s2605_s18 + $0x18] sm:$0xff]  ;;  %v409_v9 = vsel %vm387_vm0, %v385_v6, 0.0 }
  0x10   : > { %v394_v5 = vsel %vm387_vm0, %v380_v2, 0.0  ;;  %407 = vadd.xlane.f32.xlu0 %v406_v3  ;;  %401 = vadd.xlane.f32.xlu1 %v400_v4  ;;  %v403_v10 = vsel %vm387_vm0, %v383_v7, 0.0  ;;  %v397_v11 = vsel %vm387_vm0, %v381_v8, 0.0  ;;  %v378_v12 = vld [vmem:[%s2605_s18] sm:$0xff]  ;;  %v379_v13 = vld [vmem:[%s2605_s18 + $0x8] sm:$0xff] }
  0x11   : > { %395 = vadd.xlane.f32.xlu2 %v394_v5  ;;  %v388_v14 = vsel %vm387_vm0, %v378_v12, 0.0  ;;  %v391_v15 = vsel %vm387_vm0, %v379_v13, 0.0 }
  0x12   : > { %v2338_v17 = vpop.eup %2337 }
  0x13   : > { %v413_v18 = vmul.f32 32.0, %v2338_v17  ;;  %vm417_vm1 = vweird.f32 %v2338_v17 }
  0x15   : > { %v414_v19 = vsub.f32 1.0, %v413_v18 }
  0x17   : > { %v415_v20 = vmul.f32 %v2338_v17, %v414_v19 }
  0x18   : > { %410 = vadd.xlane.f32.xlu0 %v409_v9  ;;  %404 = vadd.xlane.f32.xlu1 %v403_v10 }
  0x19   : > { %398 = vadd.xlane.f32.xlu2 %v397_v11  ;;  %v416_v21 = vadd.f32 %v2338_v17, %v415_v20 }
  0x1b   : > { %v2623_v22 = vsel %vm417_vm1, %v2338_v17, %v416_v21 }
  0x20   : > { %389 = vadd.xlane.f32.xlu0 %v388_v14  ;;  %392 = vadd.xlane.f32.xlu1 %v391_v15 }
  0x83   : > { %v408_v23 = vpop.xlane.xlu0 %407  ;;  %v402_v24 = vpop.xlane.xlu1 %401 }
  0x84   : > { %v425_v25 = vmul.f32 %v2623_v22, %v408_v23  ;;  %v423_v26 = vmul.f32 %v2623_v22, %v402_v24  ;;  %v396_v27 = vpop.xlane.xlu2 %395 }
  0x85   : > { %v421_v36 = vmul.f32 %v2623_v22, %v396_v27 }
  0x86   : > { %v2627_v28 = vsub.f32 %v384_v0, %v425_v25  ;;  %v2629_v29 = vsub.f32 %v382_v1, %v423_v26 }
  0x87   : > { %v2647_v44 = vsub.f32 %v380_v2, %v421_v36 }
  0x88   : > { %v441_v30 = vmul.f32 %v2627_v28, %v2627_v28  ;;  %v439_v31 = vmul.f32 %v2629_v29, %v2629_v29 }
  0x89   : > { %v437_v55 = vmul.f32 %v2647_v44, %v2647_v44 }
  0x8a   : > { %v461_v32 = vsel %vm387_vm0, %v441_v30, 0.0  ;;  %v455_v33 = vsel %vm387_vm0, %v439_v31, 0.0 }
  0x8b   : > { %v411_v34 = vpop.xlane.xlu0 %410  ;;  %v405_v35 = vpop.xlane.xlu1 %404  ;;  %462 = vadd.xlane.f32.xlu2 %v461_v32  ;;  %456 = vadd.xlane.f32.xlu1 %v455_v33  ;;  %v449_v58 = vsel %vm387_vm0, %v437_v55, 0.0 }
  0x8c   : > { %v426_v37 = vmul.f32 %v2623_v22, %v411_v34  ;;  %v424_v38 = vmul.f32 %v2623_v22, %v405_v35  ;;  %v399_v39 = vpop.xlane.xlu2 %398 }
  0x8d   : > { %v422_v40 = vmul.f32 %v2623_v22, %v399_v39 }
  0x8e   : > { %v2641_v41 = vsub.f32 %v385_v6, %v426_v37  ;;  %v2643_v42 = vsub.f32 %v383_v7, %v424_v38 }
  0x8f   : > { %v2645_v43 = vsub.f32 %v381_v8, %v422_v40  ;;  %v386_v40 = vld [vmem:[%s2706_s22] sm:$0x3f] }
  0x90   : > { %v440_v45 = vmul.f32 %v2643_v42, %v2643_v42  ;;  %v442_v46 = vmul.f32 %v2641_v41, %v2641_v41 }
  0x91   : > { %v438_v47 = vmul.f32 %v2645_v43, %v2645_v43 }
  0x92   : > { %v458_v48 = vsel %vm387_vm0, %v440_v45, 0.0  ;;  %v464_v49 = vsel %vm387_vm0, %v442_v46, 0.0 }
  0x93   : > { %459 = vadd.xlane.f32.xlu2 %v458_v48  ;;  %v452_v50 = vsel %vm387_vm0, %v438_v47, 0.0  ;;  %465 = vadd.xlane.f32.xlu0 %v464_v49  ;;  %v390_v51 = vpop.xlane.xlu0 %389  ;;  %v393_v52 = vpop.xlane.xlu1 %392 }
  0x94   : > { %453 = vadd.xlane.f32.xlu1 %v452_v50  ;;  %v419_v53 = vmul.f32 %v2623_v22, %v390_v51  ;;  %v420_v54 = vmul.f32 %v2623_v22, %v393_v52  ;;  %v2725_v52 = vadd.f32 1.0, %v386_v40 }
  0x96   : > { %v2662_v56 = vsub.f32 %v378_v12, %v419_v53  ;;  %v2664_v57 = vsub.f32 %v379_v13, %v420_v54 }
  0x98   : > { %v435_v59 = vmul.f32 %v2662_v56, %v2662_v56  ;;  %v436_v61 = vmul.f32 %v2664_v57, %v2664_v57 }
  0x9a   : > { %v443_v60 = vsel %vm387_vm0, %v435_v59, 0.0  ;;  %v446_v62 = vsel %vm387_vm0, %v436_v61, 0.0 }
  0x9b   : > { %450 = vadd.xlane.f32.xlu0 %v449_v58  ;;  %444 = vadd.xlane.f32.xlu2 %v443_v60 }
  0xa3   : > { %447 = vadd.xlane.f32.xlu0 %v446_v62 }
  0xfe   : > { %v463_v63 = vpop.xlane.xlu2 %462  ;;  %v457_v0 = vpop.xlane.xlu1 %456 }
  0xff   : > { %v473_v1 = vmul.f32 %v463_v63, %v2623_v22  ;;  %v471_v2 = vmul.f32 %v457_v0, %v2623_v22 }
 0x101   : > { %v481_v3 = vadd.f32 1e-06, %v473_v1  ;;  %v2675_v4 = vadd.f32 1e-06, %v471_v2 }
 0x103   : > { %2339 = vrsqrt.f32 %v481_v3  ;;  %vm549_vm3 = vweird.f32 %v481_v3  ;;  %vm529_vm5 = vweird.f32 %v2675_v4 }
 0x104   : > { %2341 = vrsqrt.f32 %v2675_v4 }
 0x106   : > { %v460_v5 = vpop.xlane.xlu2 %459  ;;  %v466_v6 = vpop.xlane.xlu0 %465 }
 0x107   : > { %v472_v7 = vmul.f32 %v460_v5, %v2623_v22  ;;  %v454_v8 = vpop.xlane.xlu1 %453  ;;  %v474_v9 = vmul.f32 %v466_v6, %v2623_v22  ;;  %v2746_v5 = vperm.slane %v2725_v52, 1 }
 0x108   : > { %v470_v10 = vmul.f32 %v454_v8, %v2623_v22 }
 0x109   : > { %v2681_v11 = vpop.eup %2339  ;;  %v480_v12 = vadd.f32 1e-06, %v472_v7  ;;  %v2683_v13 = vadd.f32 1e-06, %v474_v9 }
 0x10a   : > { %v2685_v14 = vpop.eup %2341  ;;  %v544_v15 = vmul.f32 %v2681_v11, %v481_v3  ;;  %v2688_v16 = vadd.f32 1e-06, %v470_v10  ;;  %vm550_vm2 = vweird.f32 %v2681_v11 }
 0x10b   : > { %v524_v17 = vmul.f32 %v2685_v14, %v2675_v4  ;;  %2343 = vrsqrt.f32 %v480_v12  ;;  %vm2719_vm4 = vmor %vm549_vm3, %vm550_vm2  ;;  %vm539_vm6 = vweird.f32 %v480_v12  ;;  %vm530_vm8 = vweird.f32 %v2685_v14 }
 0x10c   : > { %v545_v18 = vmul.f32 %v2681_v11, %v544_v15  ;;  %2345 = vrsqrt.f32 %v2688_v16  ;;  %vm2750_vm11 = vmor %vm529_vm5, %vm530_vm8  ;;  %vm559_vm12 = vweird.f32 %v2683_v13  ;;  %vm519_vm14 = vweird.f32 %v2688_v16 }
 0x10d   : > { %v525_v19 = vmul.f32 %v2685_v14, %v524_v17  ;;  %2347 = vrsqrt.f32 %v2683_v13 }
 0x10e   : > { %v546_v20 = vmul.f32 0.5, %v545_v18  ;;  %v445_v21 = vpop.xlane.xlu2 %444  ;;  %v451_v23 = vpop.xlane.xlu0 %450  ;;  %v2764_v18 = vperm.slane %v386_v40, 0 }
 0x10f   : > { %v467_v24 = vmul.f32 %v445_v21, %v2623_v22  ;;  %v469_v25 = vmul.f32 %v451_v23, %v2623_v22  ;;  %v526_v30 = vmul.f32 0.5, %v525_v19 }
 0x110   : > { %v547_v26 = vsub.f32 1.5, %v546_v20 }
 0x111   : > { %v2344_v27 = vpop.eup %2343  ;;  %v2699_v31 = vadd.f32 1e-06, %v467_v24  ;;  %v2701_v32 = vadd.f32 1e-06, %v469_v25  ;;  %v527_v45 = vsub.f32 1.5, %v526_v30 }
 0x112   : > { %v2708_v33 = vpop.eup %2345  ;;  %v534_v34 = vmul.f32 %v2344_v27, %v480_v12  ;;  %v548_v37 = vmul.f32 %v2681_v11, %v547_v26  ;;  %vm540_vm7 = vweird.f32 %v2344_v27 }
 0x113   : > { %v2348_v35 = vpop.eup %2347  ;;  %v514_v36 = vmul.f32 %v2708_v33, %v2688_v16  ;;  %2349 = vrsqrt.f32 %v2699_v31  ;;  %v528_v59 = vmul.f32 %v2685_v14, %v527_v45  ;;  %vm2739_vm10 = vmor %vm539_vm6, %vm540_vm7  ;;  %vm520_vm15 = vweird.f32 %v2708_v33 }
 0x114   : > { %v535_v38 = vmul.f32 %v2344_v27, %v534_v34  ;;  %v554_v39 = vmul.f32 %v2348_v35, %v2683_v13  ;;  %2351 = vrsqrt.f32 %v2701_v32  ;;  %v552_v55 = vsel %vm2719_vm4, %v2681_v11, %v548_v37  ;;  %vm2773_vm2 = vmor %vm519_vm14, %vm520_vm15 }
 0x115   : > { %v515_v46 = vmul.f32 %v2708_v33, %v514_v36  ;;  %vm560_vm9 = vweird.f32 %v2348_v35  ;;  %v569_v3 = vmul.f32 %v552_v55, %v2627_v28  ;;  %v532_v28 = vsel %vm2750_vm11, %v2685_v14, %v528_v59 }
 0x116   : > { %v536_v47 = vmul.f32 0.5, %v535_v38  ;;  %v555_v48 = vmul.f32 %v2348_v35, %v554_v39  ;;  %v448_v49 = vpop.xlane.xlu0 %447  ;;  %vm561_vm13 = vmor %vm559_vm12, %vm560_vm9  ;;  %v567_v23 = vmul.f32 %v532_v28, %v2629_v29  ;;  %vm509_vm3 = vweird.f32 %v2701_v32 }
 0x117   : > { %v468_v51 = vmul.f32 %v448_v49, %v2623_v22  ;;  %v516_v60 = vmul.f32 0.5, %v515_v46  ;;  %v579_v17 = vmul.f32 %v2746_v5, %v569_v3  ;;  %vm489_vm4 = vweird.f32 %v2699_v31  ;;  %v606_v46 = vld [vmem:[%s3489_s3] sm:$0xff] }
 0x118   : > { %v537_v53 = vsub.f32 1.5, %v536_v47  ;;  %v556_v54 = vmul.f32 0.5, %v555_v48  ;;  %v2533_v48 = vmov 0   ;;  %vm808_vm11 = vcmask 1043456  }
 0x119   : > { %v2730_v58 = vpop.eup %2349  ;;  %v2734_v61 = vadd.f32 1e-06, %v468_v51  ;;  %v517_v10 = vsub.f32 1.5, %v516_v60  ;;  %2313 = vset.pattern.permute.xlu1 %v2533_v48  ;;  %2314 = vset.pattern.permute.xlu2 %v2533_v48  ;;  %vm795_vm12 = vcmask 64512  }
 0x11a   : > { %v538_v62 = vmul.f32 %v2344_v27, %v537_v53  ;;  %v557_v63 = vsub.f32 1.5, %v556_v54  ;;  %v484_v0 = vmul.f32 %v2730_v58, %v2699_v31  ;;  %v2352_v1 = vpop.eup %2351  ;;  %vm490_vm5 = vweird.f32 %v2730_v58  ;;  %620 = vperm.xlu1 %2313, %v606_v46   ;;  %2315 = vset.pattern.permute.xlu0 %v2533_v48  ;;  %v2288_v48 = vld [vmem:[%s3488_s2 + $0x20] sm:$0xff] }
 0x11b   : > { %2353 = vrsqrt.f32 %v2734_v61  ;;  %v504_v9 = vmul.f32 %v2352_v1, %v2701_v32  ;;  %v518_v14 = vmul.f32 %v2708_v33, %v517_v10  ;;  %vm510_vm1 = vweird.f32 %v2352_v1  ;;  %vm491_vm9 = vmor %vm489_vm4, %vm490_vm5 }
 0x11c   : > { %v542_v7 = vsel %vm2739_vm10, %v2344_v27, %v538_v62  ;;  %v558_v8 = vmul.f32 %v2348_v35, %v557_v63  ;;  %v485_v4 = vmul.f32 %v2730_v58, %v484_v0  ;;  %vm511_vm6 = vmor %vm509_vm3, %vm510_vm1  ;;  %vm499_vm7 = vweird.f32 %v2734_v61 }
 0x11d   : > { %v505_v11 = vmul.f32 %v2352_v1, %v504_v9  ;;  %v568_v13 = vmul.f32 %v542_v7, %v2643_v42  ;;  %v588_v42 = vadd.f32 %v2764_v18, %v579_v17  ;;  %v522_v36 = vsel %vm2773_vm2, %v2708_v33, %v518_v14  ;;  %v611_v7 = vld [vmem:[%s3489_s3 + $0x28] sm:$0xff]  ;;  %v2286_v9 = vld [vmem:[%s3488_s2 + $0x10] sm:$0xff] }
 0x11e   : > { %v562_v12 = vsel %vm561_vm13, %v2348_v35, %v558_v8  ;;  %v486_v24 = vmul.f32 0.5, %v485_v4  ;;  %v577_v35 = vmul.f32 %v2746_v5, %v567_v23  ;;  %v566_v49 = vmul.f32 %v522_v36, %v2645_v43  ;;  %v2285_v8 = vld [vmem:[%s3488_s2 + $0x8] sm:$0xff] }
 0x11f   : > { %v570_v15 = vmul.f32 %v562_v12, %v2641_v41  ;;  %v506_v19 = vmul.f32 0.5, %v505_v11  ;;  %v578_v27 = vmul.f32 %v2746_v5, %v568_v13  ;;  %v610_v13 = vld [vmem:[%s3489_s3 + $0x20] sm:$0xff]  ;;  %vm849_vm13 = vcmask 523264  }
 0x120   : > { %v487_v37 = vsub.f32 1.5, %v486_v24  ;;  %v586_v33 = vadd.f32 %v2764_v18, %v577_v35  ;;  %v576_v55 = vmul.f32 %v2746_v5, %v566_v49  ;;  %640 = vperm.xlu0 %2315, %v610_v13  }
 0x121   : > { %v2354_v20 = vpop.eup %2353  ;;  %v580_v21 = vmul.f32 %v2746_v5, %v570_v15  ;;  %v507_v41 = vsub.f32 1.5, %v506_v19  ;;  %v587_v32 = vadd.f32 %v2764_v18, %v578_v27 }
 0x122   : > { %v494_v25 = vmul.f32 %v2354_v20, %v2734_v61  ;;  %vm500_vm8 = vweird.f32 %v2354_v20  ;;  %v488_v50 = vmul.f32 %v2730_v58, %v487_v37  ;;  %v585_v31 = vadd.f32 %v2764_v18, %v576_v55 }
 0x123   : > { %v589_v16 = vadd.f32 %v2764_v18, %v580_v21  ;;  %v508_v30 = vmul.f32 %v2352_v1, %v507_v41  ;;  %vm501_vm10 = vmor %vm499_vm7, %vm500_vm8  ;;  %v604_v51 = vpack.c.bf16 %v587_v32, %v586_v33 }
 0x124   : > { %v495_v34 = vmul.f32 %v2354_v20, %v494_v25  ;;  %v492_v43 = vsel %vm491_vm9, %v2730_v58, %v488_v50 }
 0x125   : > { %v605_v29 = vpack.c.bf16 %v589_v16, %v588_v42  ;;  %v512_v38 = vsel %vm511_vm6, %v2352_v1, %v508_v30  ;;  %v733_v59 = vsel %vm387_vm0, %v604_v51, 0  ;;  %v563_v62 = vmul.f32 %v492_v43, %v2662_v56  ;;  %v2284_v56 = vld [vmem:[%s3488_s2] sm:$0xff] }
 0x126   : > { %v496_v39 = vmul.f32 0.5, %v495_v34  ;;  %v565_v45 = vmul.f32 %v512_v38, %v2647_v44 }
 0x127   : > { %v736_v40 = vsel %vm387_vm0, %v605_v29, 0  ;;  %v573_v1 = vmul.f32 %v2746_v5, %v563_v62 }
 0x128   : > { %v497_v47 = vsub.f32 1.5, %v496_v39  ;;  %742 = vmatpush.bf16.xpose.msra.mxu0 %v736_v40  ;;  %v575_v53 = vmul.f32 %v2746_v5, %v565_v45  ;;  %v2287_v45 = vld [vmem:[%s3488_s2 + $0x18] sm:$0xff] }
 0x129   : > { %v582_v3 = vadd.f32 %v2764_v18, %v573_v1 }
 0x12a   : > { %v498_v44 = vmul.f32 %v2354_v20, %v497_v47  ;;  %v584_v60 = vadd.f32 %v2764_v18, %v575_v53 }
 0x12c   : > { %v502_v54 = vsel %vm501_vm10, %v2354_v20, %v498_v44  ;;  %v603_v63 = vpack.c.bf16 %v585_v31, %v584_v60 }
 0x12d   : > { %v564_v61 = vmul.f32 %v502_v54, %v2664_v57 }
 0x12e   : > { %v730_v2 = vsel %vm387_vm0, %v603_v63, 0 }
 0x12f   : > { %v574_v0 = vmul.f32 %v2746_v5, %v564_v61  ;;  %v607_v5 = vld [vmem:[%s3489_s3 + $0x8] sm:$0xff] }
 0x130   : > { %743 = vmatpush.bf16.xpose.msra.mxu0 %v733_v59  ;;  %625 = vperm.xlu2 %2314, %v607_v5  }
 0x131   : > { %v583_v58 = vadd.f32 %v2764_v18, %v574_v0 }
 0x133   : > { %v602_v6 = vpack.c.bf16 %v583_v58, %v582_v3 }
 0x135   : > { %v727_v57 = vsel %vm387_vm0, %v602_v6, 0  ;;  %v614_v6 = vld [vmem:[%s3489_s3 + $0x40] sm:$0xff] }
 0x138   : > { %744 = vmatpush.bf16.xpose.msra.mxu0 %v730_v2  ;;  %645 = vperm.xlu2 %2314, %v611_v7  }
 0x140   : > { %745 = vmatpush.bf16.xpose.msra.mxu0 %v727_v57 }
 0x147   : > { %2198 = vmatmul.msk.bf16.vlgmr.msra.gmra.mxu0 %vm387_vm0, %v2284_v56 }
 0x157   : > { %2199 = vmatmul.msk.bf16.gmra.mxu0 %vm387_vm0, %v2285_v8  ;;  %v613_v8 = vld [vmem:[%s3489_s3 + $0x38] sm:$0xff] }
 0x167   : > { %2200 = vmatmul.msk.bf16.gmra.mxu0 %vm387_vm0, %v2286_v9 }
 0x177   : > { %2201 = vmatmul.msk.bf16.gmra.mxu0 %vm387_vm0, %v2287_v45 }
 0x187   : > { %2202 = vmatmul.msk.bf16.gmra.mxu0 %vm387_vm0, %v2288_v48 }
 0x18a   : > { %v626_v11 = vpop.permute.xlu2 %625 }
 0x18c   : > { %v621_v28 = vpop.permute.xlu1 %620 }
 0x192   : > { %v646_v21 = vpop.permute.xlu2 %645  ;;  %v641_v26 = vpop.permute.xlu0 %640 }
 0x1c4   : > { %v747_v10 = vpop.f32.mrf.mxu0 }
 0x1c5   : > { %v748_v4 = vadd.f32 %v747_v10, %v621_v28 }
 0x1c7   : > { %v777_v17 = vpack.c.bf16 %v748_v4, %v748_v4 }
 0x1cc   : > { %v749_v12 = vpop.f32.mrf.mxu0 }
 0x1cd   : > { %v750_v15 = vadd.f32 %v749_v12, %v626_v11 }
 0x1cf   : > { %v971_v18 = vpack.c.bf16 %v750_v15, %v750_v15 }
 0x1d1   : > { %2316 = vxpose.binary.xlu1.c.b16.start.end [1/2] (short) (narrow) %v971_v18, %v777_v17, 64 }
 0x1d4   : > { %v2836_v19 = vpop.f32.mrf.mxu0 }
 0x1dc   : > { %v2838_v20 = vpop.f32.mrf.mxu0 }
 0x1e4   : > { %v757_v14 = vpop.f32.mrf.mxu0 }
 0x1e5   : > { %v758_v42 = vadd.f32 %v757_v14, %v641_v26 }
 0x1e7   : > { %v778_v16 = vpack.c.bf16 %v758_v42, %v758_v42 }
 0x1e9   : > { %v810_v27 = vsel %vm808_vm11, %v778_v16, 0 }
 0x1ea   : > { %819 = vmatpush.bf16.msra.mxu1 %v810_v27  ;;  %2302 = vmatpush.bf16.msra.mxu2 %v810_v27 }
 0x1ec   : > { %v759_v23 = vpop.f32.mrf.mxu0 }
 0x1ed   : > { %v760_v24 = vadd.f32 %v759_v23, %v646_v21 }
 0x1ef   : > { %v972_v41 = vpack.c.bf16 %v760_v24, %v760_v24 }
 0x1f1   : > { %v1002_v25 = vsel %vm808_vm11, %v972_v41, 0 }
 0x1f2   : > { %1011 = vmatpush.bf16.msra.mxu3 %v1002_v25 }
 0x27d   : > { %v2317_v30 = vpop.trf.xlu1 }
 0x27e   : > { %2204 = vmatmul.msk.bf16.vlgmr.msra.gmra.mxu1 %vm795_vm12, %v2317_v30 }
 0x285   : > { %v2318_v34 = vpop.trf.xlu1 }
 0x286   : > { %2209 = vmatmul.msk.bf16.vlgmr.msra.gmra.mxu3 %vm795_vm12, %v2318_v34 }
 0x28d   : > { %v2319_v29 = vpop.trf.xlu1 }
 0x28e   : > { %2205 = vmatmul.msk.bf16.vlgmr.msra.gmra.mxu2 %vm795_vm12, %v2319_v29 }
 0x295   : > { %v2320_v35 = vpop.trf.xlu1 }
 0x296   : > { %2210 = vmatmul.msk.bf16.gmra.mxu3 %vm795_vm12, %v2320_v35 }
 0x29d   : > { %v2321_v36 = vpop.trf.xlu1 }
 0x29e   : > { %2206 = vmatmul.msk.bf16.gmra.mxu2 %vm795_vm12, %v2321_v36 }
 0x2a5   : > { %v2322_v37 = vpop.trf.xlu1 }
 0x2a6   : > { %2211 = vmatmul.msk.bf16.gmra.mxu3 %vm795_vm12, %v2322_v37 }
 0x2ad   : > { %v2323_v38 = vpop.trf.xlu1 }
 0x2ae   : > { %2207 = vmatmul.msk.bf16.gmra.mxu2 %vm795_vm12, %v2323_v38 }
 0x2b5   : > { %v2324_v39 = vpop.trf.xlu1 }
 0x2b6   : > { %2212 = vmatmul.msk.bf16.gmra.mxu3 %vm795_vm12, %v2324_v39 }
 0x2fb   : > { %v821_v40 = vpop.f32.mrf.mxu1 }
 0x2fc   : > { %v2850_v32 = vmul.f32 0.35355338, %v821_v40 }
 0x2fe   : > { %v850_v46 = vsel %vm849_vm13, %v2850_v32, -inf }
 0x2ff   : > { %851 = vmax.xlane.f32.xlu0 %v850_v46 }
 0x303   : > { %v823_v58 = vpop.f32.mrf.mxu1 }
 0x304   : > { %v2886_v57 = vmul.f32 0.35355338, %v823_v58 }
 0x306   : > { %v853_v56 = vsel %vm849_vm13, %v2886_v57, -inf }
 0x309   : > { %v1013_v47 = vpop.f32.mrf.mxu3 }
 0x30a   : > { %v2866_v54 = vmul.f32 0.35355338, %v1013_v47 }
 0x30c   : > { %v1041_v60 = vsel %vm849_vm13, %v2866_v54, -inf }
 0x311   : > { %v826_v33 = vpop.f32.mrf.mxu2  ;;  %v1015_v49 = vpop.f32.mrf.mxu3 }
 0x312   : > { %v843_v61 = vmul.f32 0.35355338, %v826_v33  ;;  %v2897_v28 = vmul.f32 0.35355338, %v1015_v49 }
 0x314   : > { %v856_v63 = vsel %vm849_vm13, %v843_v61, -inf  ;;  %v1044_v11 = vsel %vm849_vm13, %v2897_v28, -inf }
 0x319   : > { %v828_v50 = vpop.f32.mrf.mxu2  ;;  %v1018_v44 = vpop.f32.mrf.mxu3 }
 0x31a   : > { %v2862_v51 = vmul.f32 0.35355338, %v1018_v44  ;;  %v2879_v1 = vmul.f32 0.35355338, %v828_v50 }
 0x31c   : > { %v1047_v53 = vsel %vm849_vm13, %v2862_v51, -inf  ;;  %v859_v2 = vsel %vm849_vm13, %v2879_v1, -inf }
 0x31d   : > { %1048 = vmax.xlane.f32.xlu0 %v1047_v53 }
 0x321   : > { %v831_v55 = vpop.f32.mrf.mxu2  ;;  %v1020_v3 = vpop.f32.mrf.mxu3 }
 0x322   : > { %v2868_v43 = vmul.f32 0.35355338, %v831_v55  ;;  %v2890_v7 = vmul.f32 0.35355338, %v1020_v3 }
 0x324   : > { %v862_v59 = vsel %vm849_vm13, %v2868_v43, -inf  ;;  %v1050_v9 = vsel %vm849_vm13, %v2890_v7, -inf }
 0x325   : > { %863 = vmax.xlane.f32.xlu2 %v862_v59  ;;  %1042 = vmax.xlane.f32.xlu0 %v1041_v60 }
 0x329   : > { %v833_v31 = vpop.f32.mrf.mxu2  ;;  %v1023_v5 = vpop.f32.mrf.mxu3 }
 0x32a   : > { %v2874_v62 = vmul.f32 0.35355338, %v833_v31  ;;  %v2909_v21 = vmul.f32 0.35355338, %v1023_v5 }
 0x32c   : > { %v865_v0 = vsel %vm849_vm13, %v2874_v62, -inf  ;;  %v1053_v24 = vsel %vm849_vm13, %v2909_v21, -inf }
 0x32d   : > { %857 = vmax.xlane.f32.xlu2 %v856_v63  ;;  %866 = vmax.xlane.f32.xlu1 %v865_v0 }
 0x331   : > { %v1025_v10 = vpop.f32.mrf.mxu3  ;;  %v836_v4 = vpop.f32.mrf.mxu2 }
 0x332   : > { %v2901_v12 = vmul.f32 0.35355338, %v836_v4  ;;  %v2905_v18 = vmul.f32 0.35355338, %v1025_v10 }
 0x334   : > { %v868_v17 = vsel %vm849_vm13, %v2901_v12, -inf  ;;  %v1056_v14 = vsel %vm849_vm13, %v2905_v18, -inf }
 0x335   : > { %860 = vmax.xlane.f32.xlu2 %v859_v2 }
 0x339   : > { %660 = vperm.xlu0 %2315, %v614_v6   ;;  %v1028_v15 = vpop.f32.mrf.mxu3  ;;  %v838_v25 = vpop.f32.mrf.mxu2 }
 0x33a   : > { %v2917_v26 = vmul.f32 0.35355338, %v838_v25  ;;  %v2921_v16 = vmul.f32 0.35355338, %v1028_v15 }
 0x33c   : > { %v871_v42 = vsel %vm849_vm13, %v2917_v26, -inf  ;;  %v1059_v27 = vsel %vm849_vm13, %v2921_v16, -inf }
 0x33d   : > { %854 = vmax.xlane.f32.xlu2 %v853_v56 }
 0x341   : > { %v1030_v13 = vpop.f32.mrf.mxu3 }
 0x342   : > { %v2911_v23 = vmul.f32 0.35355338, %v1030_v13 }
 0x344   : > { %v1062_v41 = vsel %vm849_vm13, %v2911_v23, -inf }
 0x345   : > { %1051 = vmax.xlane.f32.xlu2 %v1050_v9 }
 0x346   : > { %655 = vperm.xlu1 %2313, %v613_v8  }
 0x34d   : > { %1045 = vmax.xlane.f32.xlu2 %v1044_v11 }
 0x355   : > { %869 = vmax.xlane.f32.xlu2 %v868_v17 }
 0x35d   : > { %1057 = vmax.xlane.f32.xlu2 %v1056_v14 }
 0x363   : > { %1054 = vmax.xlane.f32.xlu0 %v1053_v24 }
 0x365   : > { %1063 = vmax.xlane.f32.xlu2 %v1062_v41 }
 0x36b   : > { %872 = vmax.xlane.f32.xlu0 %v871_v42 }
 0x372   : > { %v852_v30 = vpop.xlane.xlu0 %851 }
 0x373   : > { %v874_v34 = vsub.f32 %v2850_v32, %v852_v30  ;;  %1060 = vmax.xlane.f32.xlu0 %v1059_v27 }
 0x375   : > { %v882_v29 = vmul.f32 1.442695, %v874_v34 }
 0x377   : > { %2355 = vpow2.f32 %v882_v29 }
 0x37d   : > { %v2926_v35 = vpop.eup %2355 }
 0x37e   : > { %v898_v36 = vsel %vm849_vm13, %v2926_v35, 0.0 }
 0x37f   : > { %899 = vadd.xlane.f32.xlu0 %v898_v36 }
 0x390   : > { %v1049_v38 = vpop.xlane.xlu0 %1048 }
 0x391   : > { %v1067_v45 = vsub.f32 %v2862_v51, %v1049_v38 }
 0x393   : > { %v1077_v47 = vmul.f32 1.442695, %v1067_v45 }
 0x398   : > { %v864_v37 = vpop.xlane.xlu2 %863  ;;  %v1043_v44 = vpop.xlane.xlu0 %1042 }
 0x399   : > { %v878_v33 = vsub.f32 %v2868_v43, %v864_v37  ;;  %v1065_v59 = vsub.f32 %v2866_v54, %v1043_v44 }
 0x39b   : > { %v890_v50 = vmul.f32 1.442695, %v878_v33  ;;  %v1073_v43 = vmul.f32 1.442695, %v1065_v59  ;;  %v609_v59 = vld [vmem:[%s3489_s3 + $0x18] sm:$0xff] }
 0x3a0   : > { %v858_v39 = vpop.xlane.xlu2 %857  ;;  %v867_v8 = vpop.xlane.xlu1 %866 }
 0x3a1   : > { %v876_v40 = vsub.f32 %v843_v61, %v858_v39  ;;  %v879_v4 = vsub.f32 %v2874_v62, %v867_v8  ;;  %v615_v8 = vld [vmem:[%s3489_s3 + $0x48] sm:$0xff] }
 0x3a3   : > { %v886_v46 = vmul.f32 1.442695, %v876_v40  ;;  %v892_v17 = vmul.f32 1.442695, %v879_v4 }
 0x3a5   : > { %2357 = vpow2.f32 %v886_v46 }
 0x3a6   : > { %2359 = vpow2.f32 %v1077_v47 }
 0x3a7   : > { %2361 = vpow2.f32 %v890_v50 }
 0x3a8   : > { %v861_v48 = vpop.xlane.xlu2 %860 }
 0x3a9   : > { %v877_v2 = vsub.f32 %v2879_v1, %v861_v48 }
 0x3ab   : > { %v2931_v32 = vpop.eup %2357  ;;  %v888_v3 = vmul.f32 1.442695, %v877_v2  ;;  %v2961_v15 = vpop.permute.xlu0 %660 }
 0x3ac   : > { %v904_v49 = vsel %vm849_vm13, %v2931_v32, 0.0  ;;  %v2936_v55 = vpop.eup %2359 }
 0x3ad   : > { %905 = vadd.xlane.f32.xlu0 %v904_v49  ;;  %v1095_v61 = vsel %vm849_vm13, %v2936_v55, 0.0  ;;  %v2942_v63 = vpop.eup %2361 }
 0x3ae   : > { %v910_v58 = vsel %vm849_vm13, %v2942_v63, 0.0 }
 0x3b0   : > { %v855_v53 = vpop.xlane.xlu2 %854 }
 0x3b1   : > { %v875_v51 = vsub.f32 %v2886_v57, %v855_v53 }
 0x3b3   : > { %v884_v60 = vmul.f32 1.442695, %v875_v51 }
 0x3b5   : > { %2363 = vpow2.f32 %v884_v60  ;;  %1096 = vadd.xlane.f32.xlu0 %v1095_v61 }
 0x3b6   : > { %2365 = vpow2.f32 %v1073_v43 }
 0x3b7   : > { %2367 = vpow2.f32 %v888_v3 }
 0x3b8   : > { %v1052_v31 = vpop.xlane.xlu2 %1051 }
 0x3b9   : > { %v1068_v56 = vsub.f32 %v2890_v7, %v1052_v31 }
 0x3bb   : > { %v2944_v0 = vpop.eup %2363  ;;  %v1079_v1 = vmul.f32 1.442695, %v1068_v56 }
 0x3bc   : > { %v901_v54 = vsel %vm849_vm13, %v2944_v0, 0.0  ;;  %v2951_v57 = vpop.eup %2365 }
 0x3bd   : > { %911 = vadd.xlane.f32.xlu0 %v910_v58  ;;  %902 = vadd.xlane.f32.xlu2 %v901_v54  ;;  %v1089_v5 = vsel %vm849_vm13, %v2951_v57, 0.0  ;;  %v2956_v10 = vpop.eup %2367  ;;  %2369 = vpow2.f32 %v1079_v1 }
 0x3be   : > { %v907_v11 = vsel %vm849_vm13, %v2956_v10, 0.0  ;;  %2371 = vpow2.f32 %v892_v17 }
 0x3c0   : > { %v1046_v6 = vpop.xlane.xlu2 %1045 }
 0x3c1   : > { %v1066_v39 = vsub.f32 %v2897_v28, %v1046_v6 }
 0x3c3   : > { %v2963_v13 = vpop.eup %2369 }
 0x3c4   : > { %v1098_v24 = vsel %vm849_vm13, %v2963_v13, 0.0  ;;  %v2969_v42 = vpop.eup %2371 }
 0x3c5   : > { %1090 = vadd.xlane.f32.xlu2 %v1089_v5  ;;  %v913_v34 = vsel %vm849_vm13, %v2969_v42, 0.0 }
 0x3c8   : > { %v870_v9 = vpop.xlane.xlu2 %869 }
 0x3c9   : > { %v880_v27 = vsub.f32 %v2901_v12, %v870_v9 }
 0x3cd   : > { %908 = vadd.xlane.f32.xlu2 %v907_v11  ;;  %v612_v11 = vld [vmem:[%s3489_s3 + $0x30] sm:$0xff] }
 0x3d0   : > { %v1058_v7 = vpop.xlane.xlu2 %1057 }
 0x3d1   : > { %v1070_v14 = vsub.f32 %v2905_v18, %v1058_v7  ;;  %v894_v18 = vmul.f32 1.442695, %v880_v27 }
 0x3d3   : > { %v1083_v41 = vmul.f32 1.442695, %v1070_v14 }
 0x3d5   : > { %1099 = vadd.xlane.f32.xlu2 %v1098_v24  ;;  %2373 = vpow2.f32 %v1083_v41 }
 0x3d6   : > { %v1055_v62 = vpop.xlane.xlu0 %1054 }
 0x3d7   : > { %v1069_v25 = vsub.f32 %v2909_v21, %v1055_v62 }
 0x3d8   : > { %v1064_v46 = vpop.xlane.xlu2 %1063 }
 0x3d9   : > { %v1081_v30 = vmul.f32 1.442695, %v1069_v25  ;;  %v1072_v33 = vsub.f32 %v2911_v23, %v1064_v46  ;;  %v608_v23 = vld [vmem:[%s3489_s3 + $0x10] sm:$0xff] }
 0x3db   : > { %2375 = vpow2.f32 %v1081_v30  ;;  %v2975_v37 = vpop.eup %2373  ;;  %v1087_v49 = vmul.f32 1.442695, %v1072_v33 }
 0x3dc   : > { %2377 = vpow2.f32 %v894_v18  ;;  %v1104_v40 = vsel %vm849_vm13, %v2975_v37, 0.0 }
 0x3dd   : > { %914 = vadd.xlane.f32.xlu2 %v913_v34 }
 0x3de   : > { %v873_v29 = vpop.xlane.xlu0 %872 }
 0x3df   : > { %v881_v36 = vsub.f32 %v2917_v26, %v873_v29  ;;  %v1075_v26 = vmul.f32 1.442695, %v1066_v39 }
 0x3e1   : > { %v2977_v38 = vpop.eup %2375  ;;  %v896_v21 = vmul.f32 1.442695, %v881_v36 }
 0x3e2   : > { %v1101_v12 = vsel %vm849_vm13, %v2977_v38, 0.0  ;;  %v2984_v45 = vpop.eup %2377 }
 0x3e3   : > { %2379 = vpow2.f32 %v896_v21  ;;  %1102 = vadd.xlane.f32.xlu0 %v1101_v12  ;;  %v916_v48 = vsel %vm849_vm13, %v2984_v45, 0.0 }
 0x3e4   : > { %2381 = vpow2.f32 %v1075_v26 }
 0x3e5   : > { %1105 = vadd.xlane.f32.xlu2 %v1104_v40  ;;  %2383 = vpow2.f32 %v1087_v49 }
 0x3e6   : > { %v1061_v60 = vpop.xlane.xlu0 %1060 }
 0x3e7   : > { %v1071_v61 = vsub.f32 %v2921_v16, %v1061_v60 }
 0x3e9   : > { %v2986_v47 = vpop.eup %2379  ;;  %v1085_v43 = vmul.f32 1.442695, %v1071_v61 }
 0x3ea   : > { %v919_v28 = vsel %vm849_vm13, %v2986_v47, 0.0  ;;  %v2993_v50 = vpop.eup %2381 }
 0x3eb   : > { %917 = vadd.xlane.f32.xlu0 %v916_v48  ;;  %v1092_v44 = vsel %vm849_vm13, %v2993_v50, 0.0  ;;  %v2997_v53 = vpop.eup %2383  ;;  %2385 = vpow2.f32 %v1085_v43 }
 0x3ec   : > { %v1110_v51 = vsel %vm849_vm13, %v2997_v53, 0.0 }
 0x3ed   : > { %920 = vadd.xlane.f32.xlu2 %v919_v28 }
 0x3f1   : > { %v3008_v31 = vpop.eup %2385 }
 0x3f2   : > { %v1107_v2 = vsel %vm849_vm13, %v3008_v31, 0.0  ;;  %v900_v58 = vpop.xlane.xlu0 %899 }
 0x3f3   : > { %2387 = vrcp.f32 %v900_v58 }
 0x3f5   : > { %1093 = vadd.xlane.f32.xlu2 %v1092_v44 }
 0x3f9   : > { %v2388_v3 = vpop.eup %2387 }
 0x3fa   : > { %v3013_v5 = vmul.f32 %v2388_v3, %v2926_v35 }
 0x3fd   : > { %1111 = vadd.xlane.f32.xlu2 %v1110_v51 }
 0x3ff   : > { %630 = vperm.xlu0 %2315, %v608_v23   ;;  %v762_v23 = vpop.f32.mrf.mxu0 }
 0x415   : > { %635 = vperm.xlu2 %2314, %v609_v59  }
 0x420   : > { %v906_v1 = vpop.xlane.xlu0 %905 }
 0x428   : > { %v1097_v17 = vpop.xlane.xlu0 %1096 }
 0x429   : > { %1108 = vadd.xlane.f32.xlu0 %v1107_v2 }
 0x430   : > { %v903_v54 = vpop.xlane.xlu2 %902  ;;  %v912_v7 = vpop.xlane.xlu0 %911 }
 0x431   : > { %2389 = vrcp.f32 %v903_v54 }
 0x432   : > { %2391 = vrcp.f32 %v1097_v17 }
 0x437   : > { %v2390_v6 = vpop.eup %2389 }
 0x438   : > { %v1091_v56 = vpop.xlane.xlu2 %1090  ;;  %v3016_v16 = vmul.f32 %v2390_v6, %v2944_v0  ;;  %v2392_v0 = vpop.eup %2391 }
 0x439   : > { %v3027_v41 = vmul.f32 %v2392_v0, %v2936_v55 }
 0x43a   : > { %v939_v9 = vpack.c.bf16 %v3016_v16, %v3013_v5 }
 0x43d   : > { %665 = vperm.xlu0 %2315, %v615_v8  }
 0x440   : > { %v909_v4 = vpop.xlane.xlu2 %908 }
 0x445   : > { %650 = vperm.xlu0 %2315, %v612_v11  }
 0x448   : > { %v1100_v35 = vpop.xlane.xlu2 %1099 }
 0x449   : > { %2393 = vrcp.f32 %v1100_v35 }
 0x44f   : > { %v2394_v14 = vpop.eup %2393 }
 0x450   : > { %v915_v24 = vpop.xlane.xlu2 %914  ;;  %v3030_v62 = vmul.f32 %v2394_v14, %v2963_v13 }
 0x452   : > { %v1131_v25 = vpack.c.bf16 %v3030_v62, %v3027_v41 }
 0x456   : > { %v1103_v27 = vpop.xlane.xlu0 %1102 }
 0x457   : > { %2395 = vrcp.f32 %v1103_v27 }
 0x458   : > { %v1106_v30 = vpop.xlane.xlu2 %1105 }
 0x459   : > { %2397 = vrcp.f32 %v1106_v30  ;;  %v1141_v30 = vsel %vm849_vm13, %v1131_v25, 0 }
 0x45d   : > { %v2396_v34 = vpop.eup %2395 }
 0x45e   : > { %v918_v18 = vpop.xlane.xlu0 %917  ;;  %v3035_v21 = vmul.f32 %v2396_v34, %v2977_v38 }
 0x45f   : > { %v2398_v29 = vpop.eup %2397  ;;  %2399 = vrcp.f32 %v918_v18 }
 0x460   : > { %v921_v36 = vpop.xlane.xlu2 %920  ;;  %v3038_v55 = vmul.f32 %v2398_v29, %v2975_v37 }
 0x461   : > { %2401 = vrcp.f32 %v921_v36 }
 0x462   : > { %v1132_v13 = vpack.c.bf16 %v3038_v55, %v3035_v21  ;;  %2403 = vrcp.f32 %v915_v24 }
 0x463   : > { %2405 = vrcp.f32 %v912_v7 }
 0x464   : > { %2407 = vrcp.f32 %v1091_v56 }
 0x465   : > { %v2400_v12 = vpop.eup %2399 }
 0x466   : > { %v936_v26 = vmul.f32 %v2400_v12, %v2984_v45 }
 0x467   : > { %v2402_v39 = vpop.eup %2401 }
 0x468   : > { %v1094_v40 = vpop.xlane.xlu2 %1093  ;;  %v937_v46 = vmul.f32 %v2402_v39, %v2986_v47  ;;  %v2404_v48 = vpop.eup %2403 }
 0x469   : > { %2409 = vrcp.f32 %v1094_v40  ;;  %v2406_v33 = vpop.eup %2405  ;;  %v935_v28 = vmul.f32 %v2404_v48, %v2969_v42 }
 0x46a   : > { %v942_v38 = vpack.c.bf16 %v937_v46, %v936_v26  ;;  %2411 = vrcp.f32 %v909_v4  ;;  %v2408_v49 = vpop.eup %2407  ;;  %v934_v44 = vmul.f32 %v2406_v33, %v2942_v63 }
 0x46b   : > { %2413 = vrcp.f32 %v906_v1  ;;  %v1121_v47 = vmul.f32 %v2408_v49, %v2951_v57  ;;  %v764_v1 = vpop.f32.mrf.mxu0 }
 0x46c   : > { %v956_v37 = vsel %vm849_vm13, %v942_v38, 0  ;;  %v941_v45 = vpack.c.bf16 %v935_v28, %v934_v44 }
 0x46d   : > { %962 = vmatpush.bf16.xpose.msrb.mxu2 %v956_v37 }
 0x46e   : > { %v953_v58 = vsel %vm849_vm13, %v941_v45, 0 }
 0x46f   : > { %v2410_v51 = vpop.eup %2409 }
 0x470   : > { %v1112_v59 = vpop.xlane.xlu2 %1111  ;;  %v1122_v60 = vmul.f32 %v2410_v51, %v2993_v50  ;;  %v2412_v61 = vpop.eup %2411 }
 0x471   : > { %v2414_v2 = vpop.eup %2413  ;;  %v933_v42 = vmul.f32 %v2412_v61, %v2956_v10  ;;  %v631_v54 = vpop.permute.xlu0 %630  ;;  %v947_v10 = vsel %vm849_vm13, %v939_v9, 0  ;;  %2415 = vrcp.f32 %v1112_v59  ;;  %v1144_v9 = vsel %vm849_vm13, %v1132_v13, 0 }
 0x472   : > { %v1130_v43 = vpack.c.bf16 %v1122_v60, %v1121_v47  ;;  %v932_v3 = vmul.f32 %v2414_v2, %v2931_v32  ;;  %v753_v63 = vadd.f32 %v2836_v19, %v631_v54 }
 0x473   : > { %v767_v11 = vpop.f32.mrf.mxu0 }
 0x474   : > { %v940_v56 = vpack.c.bf16 %v933_v42, %v932_v3  ;;  %v1162_v50 = vpack.c.bf16 %v753_v63, %v753_v63  ;;  %v768_v19 = vadd.f32 %v767_v11, %v2961_v15  ;;  %v656_v15 = vpop.permute.xlu1 %655  ;;  %v1138_v36 = vsel %vm849_vm13, %v1130_v43, 0 }
 0x475   : > { %963 = vmatpush.bf16.xpose.msrb.mxu2 %v953_v58  ;;  %v765_v34 = vadd.f32 %v764_v1, %v656_v15 }
 0x476   : > { %v950_v4 = vsel %vm849_vm13, %v940_v56, 0  ;;  %v938_v32 = vpack.c.bf16 %v768_v19, %v768_v19 }
 0x477   : > { %v2416_v17 = vpop.eup %2415  ;;  %v1354_v18 = vpack.c.bf16 %v765_v34, %v765_v34 }
 0x478   : > { %v636_v6 = vpop.permute.xlu2 %635  ;;  %v1128_v7 = vmul.f32 %v2416_v17, %v2997_v53 }
 0x479   : > { %v755_v57 = vadd.f32 %v2838_v20, %v636_v6  ;;  %v1384_v21 = vsel %vm808_vm11, %v1354_v18, 0 }
 0x47b   : > { %v1353_v8 = vpack.c.bf16 %v755_v57, %v755_v57  ;;  %v769_v29 = vpop.f32.mrf.mxu0 }
 0x47d   : > { %964 = vmatpush.bf16.xpose.msrb.mxu2 %v950_v4 }
 0x47e   : > { %2325 = vxpose.binary.xlu0.c.b16.start.end [1/2] (short) (narrow) %v1353_v8, %v1162_v50, 64 }
 0x485   : > { %965 = vmatpush.bf16.xpose.msrb.mxu2 %v947_v10 }
 0x48c   : > { %2208 = vmatmul.msk.bf16.vlgmr.msrb.gmra.mxu2 %vm849_vm13, %v938_v32 }
 0x49c   : > { %v1109_v20 = vpop.xlane.xlu0 %1108 }
 0x49d   : > { %2417 = vrcp.f32 %v1109_v20 }
 0x4a3   : > { %v2418_v35 = vpop.eup %2417 }
 0x4a4   : > { %v1127_v0 = vmul.f32 %v2418_v35, %v3008_v31 }
 0x4a6   : > { %v1133_v14 = vpack.c.bf16 %v1128_v7, %v1127_v0 }
 0x4a8   : > { %v1147_v5 = vsel %vm849_vm13, %v1133_v14, 0 }
 0x4a9   : > { %1153 = vmatpush.bf16.xpose.msra.mxu2 %v1147_v5 }
 0x4af   : > { %v666_v16 = vpop.permute.xlu0 %665 }
 0x4b0   : > { %v770_v55 = vadd.f32 %v769_v29, %v666_v16 }
 0x4b1   : > { %1154 = vmatpush.bf16.xpose.msra.mxu2 %v1144_v9 }
 0x4b2   : > { %v1129_v13 = vpack.c.bf16 %v770_v55, %v770_v55 }
 0x4b7   : > { %v651_v24 = vpop.permute.xlu0 %650 }
 0x4b8   : > { %v763_v27 = vadd.f32 %v762_v23, %v651_v24 }
 0x4b9   : > { %1155 = vmatpush.bf16.xpose.msra.mxu2 %v1141_v30 }
 0x4ba   : > { %v1163_v31 = vpack.c.bf16 %v763_v27, %v763_v27 }
 0x4bc   : > { %v1193_v53 = vsel %vm808_vm11, %v1163_v31, 0 }
 0x4bd   : > { %1202 = vmatpush.bf16.msrb.mxu1 %v1193_v53 }
 0x4c1   : > { %1156 = vmatpush.bf16.xpose.msra.mxu2 %v1138_v36 }
 0x4c8   : > { %2213 = vmatmul.msk.bf16.vlgmr.msra.gmra.mxu2 %vm849_vm13, %v1129_v13 }
 0x4c9   : > { %1393 = vmatpush.bf16.msrb.mxu2 %v1384_v21 }
 0x50f   : > { %v3073_v41 = vpop.f32.mrf.mxu2 }
 0x517   : > { %v969_v62 = vpop.f32.mrf.mxu2 }
 0x52a   : > { %v2326_v25 = vpop.trf.xlu0 }
 0x52b   : > { %2214 = vmatmul.msk.bf16.vlgmr.msrb.gmra.mxu1 %vm795_vm12, %v2326_v25 }
 0x532   : > { %v2327_v12 = vpop.trf.xlu0 }
 0x533   : > { %2219 = vmatmul.msk.bf16.vlgmr.msrb.gmra.mxu2 %vm795_vm12, %v2327_v12 }
 0x53a   : > { %v2328_v39 = vpop.trf.xlu0 }
 0x53b   : > { %2215 = vmatmul.msk.bf16.gmra.mxu1 %vm795_vm12, %v2328_v39 }
 0x542   : > { %v2329_v40 = vpop.trf.xlu0 }
 0x543   : > { %2220 = vmatmul.msk.bf16.gmra.mxu2 %vm795_vm12, %v2329_v40 }
 0x54a   : > { %v2330_v26 = vpop.trf.xlu0 }
 0x54b   : > { %2216 = vmatmul.msk.bf16.gmra.mxu1 %vm795_vm12, %v2330_v26  ;;  %v3080_v46 = vpop.f32.mrf.mxu2 }
 0x54c   : > { %v1544_v48 = vpack.c.bf16 %v3080_v46, %v3073_v41 }
 0x552   : > { %v2331_v38 = vpop.trf.xlu0 }
 0x553   : > { %2221 = vmatmul.msk.bf16.gmra.mxu2 %vm795_vm12, %v2331_v38  ;;  %v1160_v33 = vpop.f32.mrf.mxu2 }
 0x55a   : > { %v2332_v37 = vpop.trf.xlu0 }
 0x55b   : > { %2217 = vmatmul.msk.bf16.gmra.mxu1 %vm795_vm12, %v2332_v37 }
 0x562   : > { %v2333_v60 = vpop.trf.xlu0 }
 0x563   : > { %2222 = vmatmul.msk.bf16.gmra.mxu2 %vm795_vm12, %v2333_v60 }
 0x5a8   : > { %v1204_v28 = vpop.f32.mrf.mxu1 }
 0x5a9   : > { %v3099_v8 = vmul.f32 0.35355338, %v1204_v28 }
 0x5ab   : > { %v1232_v4 = vsel %vm849_vm13, %v3099_v8, -inf }
 0x5b0   : > { %v1206_v49 = vpop.f32.mrf.mxu1 }
 0x5b1   : > { %v3101_v50 = vmul.f32 0.35355338, %v1206_v49 }
 0x5b3   : > { %v1235_v11 = vsel %vm849_vm13, %v3101_v50, -inf }
 0x5b6   : > { %v1395_v10 = vpop.f32.mrf.mxu2 }
 0x5b7   : > { %v3119_v55 = vmul.f32 0.35355338, %v1395_v10 }
 0x5b8   : > { %v1209_v44 = vpop.f32.mrf.mxu1 }
 0x5b9   : > { %v3091_v6 = vmul.f32 0.35355338, %v1209_v44  ;;  %v1423_v25 = vsel %vm849_vm13, %v3119_v55, -inf }
 0x5bb   : > { %v1238_v1 = vsel %vm849_vm13, %v3091_v6, -inf }
 0x5be   : > { %v1397_v19 = vpop.f32.mrf.mxu2 }
 0x5bf   : > { %v3127_v12 = vmul.f32 0.35355338, %v1397_v19 }
 0x5c0   : > { %v1211_v51 = vpop.f32.mrf.mxu1 }
 0x5c1   : > { %v3093_v56 = vmul.f32 0.35355338, %v1211_v51  ;;  %v1426_v26 = vsel %vm849_vm13, %v3127_v12, -inf }
 0x5c3   : > { %v1241_v57 = vsel %vm849_vm13, %v3093_v56, -inf }
 0x5c6   : > { %v1400_v35 = vpop.f32.mrf.mxu2 }
 0x5c7   : > { %v3129_v39 = vmul.f32 0.35355338, %v1400_v35 }
 0x5c8   : > { %v1214_v23 = vpop.f32.mrf.mxu1 }
 0x5c9   : > { %v1228_v59 = vmul.f32 0.35355338, %v1214_v23  ;;  %v1429_v38 = vsel %vm849_vm13, %v3129_v39, -inf }
 0x5cb   : > { %v1244_v45 = vsel %vm849_vm13, %v1228_v59, -inf }
 0x5cc   : > { %1245 = vmax.xlane.f32.xlu0 %v1244_v45 }
 0x5ce   : > { %v1402_v34 = vpop.f32.mrf.mxu2 }
 0x5cf   : > { %v3135_v37 = vmul.f32 0.35355338, %v1402_v34 }
 0x5d0   : > { %v1216_v47 = vpop.f32.mrf.mxu1 }
 0x5d1   : > { %v1229_v58 = vmul.f32 0.35355338, %v1216_v47  ;;  %v1432_v51 = vsel %vm849_vm13, %v3135_v37, -inf }
 0x5d3   : > { %v1247_v3 = vsel %vm849_vm13, %v1229_v58, -inf }
 0x5d6   : > { %v1405_v21 = vpop.f32.mrf.mxu2 }
 0x5d7   : > { %v3137_v28 = vmul.f32 0.35355338, %v1405_v21 }
 0x5d8   : > { %v1219_v61 = vpop.f32.mrf.mxu1 }
 0x5d9   : > { %v1230_v43 = vmul.f32 0.35355338, %v1219_v61  ;;  %v1435_v23 = vsel %vm849_vm13, %v3137_v28, -inf }
 0x5db   : > { %v1250_v2 = vsel %vm849_vm13, %v1230_v43, -inf }
 0x5dc   : > { %1251 = vmax.xlane.f32.xlu2 %v1250_v2 }
 0x5de   : > { %v1407_v40 = vpop.f32.mrf.mxu2 }
 0x5df   : > { %v3146_v60 = vmul.f32 0.35355338, %v1407_v40 }
 0x5e0   : > { %v1221_v42 = vpop.f32.mrf.mxu1 }
 0x5e1   : > { %v1231_v54 = vmul.f32 0.35355338, %v1221_v42 }
 0x5e3   : > { %v1253_v63 = vsel %vm849_vm13, %v1231_v54, -inf }
 0x5e4   : > { %1248 = vmax.xlane.f32.xlu2 %v1247_v3  ;;  %1254 = vmax.xlane.f32.xlu1 %v1253_v63 }
 0x5e6   : > { %v1410_v49 = vpop.f32.mrf.mxu2 }
 0x5e7   : > { %v3144_v45 = vmul.f32 0.35355338, %v1410_v49 }
 0x5e9   : > { %v1441_v2 = vsel %vm849_vm13, %v3144_v45, -inf }
 0x5ec   : > { %1239 = vmax.xlane.f32.xlu2 %v1238_v1  ;;  %1242 = vmax.xlane.f32.xlu1 %v1241_v57 }
 0x5ee   : > { %v1412_v42 = vpop.f32.mrf.mxu2 }
 0x5ef   : > { %v3154_v63 = vmul.f32 0.35355338, %v1412_v42 }
 0x5f4   : > { %1233 = vmax.xlane.f32.xlu2 %v1232_v4  ;;  %1236 = vmax.xlane.f32.xlu1 %v1235_v11 }
 0x63f   : > { %v1246_v32 = vpop.xlane.xlu0 %1245 }
 0x640   : > { %v1260_v0 = vsub.f32 %v1228_v59, %v1246_v32 }
 0x642   : > { %v1272_v14 = vmul.f32 1.442695, %v1260_v0 }
 0x64f   : > { %v1252_v20 = vpop.xlane.xlu2 %1251 }
 0x650   : > { %v1262_v17 = vsub.f32 %v1230_v43, %v1252_v20 }
 0x652   : > { %v1276_v7 = vmul.f32 1.442695, %v1262_v17 }
 0x654   : > { %2419 = vpow2.f32 %v1276_v7 }
 0x655   : > { %2421 = vpow2.f32 %v1272_v14 }
 0x657   : > { %v1249_v5 = vpop.xlane.xlu2 %1248  ;;  %v1255_v16 = vpop.xlane.xlu1 %1254 }
 0x658   : > { %v1261_v9 = vsub.f32 %v1229_v58, %v1249_v5  ;;  %v1263_v27 = vsub.f32 %v1231_v54, %v1255_v16  ;;  %v1438_v54 = vsel %vm849_vm13, %v3146_v60, -inf  ;;  %v2289_v16 = vld [vmem:[%s3488_s2 + $0x28] sm:$0xff] }
 0x659   : > { %2203 = vmatmul.msk.bf16.gmra.mxu0 %vm387_vm0, %v2289_v16 }
 0x65a   : > { %v3107_v15 = vpop.eup %2419  ;;  %v1274_v24 = vmul.f32 1.442695, %v1261_v9  ;;  %v1278_v31 = vmul.f32 1.442695, %v1263_v27 }
 0x65b   : > { %v1298_v30 = vsel %vm849_vm13, %v3107_v15, 0.0  ;;  %v3111_v53 = vpop.eup %2421 }
 0x65c   : > { %2423 = vpow2.f32 %v1274_v24  ;;  %1299 = vadd.xlane.f32.xlu2 %v1298_v30  ;;  %v1292_v36 = vsel %vm849_vm13, %v3111_v53, 0.0 }
 0x65d   : > { %2425 = vpow2.f32 %v1278_v31 }
 0x65f   : > { %v1240_v33 = vpop.xlane.xlu2 %1239  ;;  %v1243_v59 = vpop.xlane.xlu1 %1242 }
 0x660   : > { %v1258_v44 = vsub.f32 %v3091_v6, %v1240_v33  ;;  %v1259_v43 = vsub.f32 %v3093_v56, %v1243_v59  ;;  %v1444_v56 = vsel %vm849_vm13, %v3154_v63, -inf }
 0x662   : > { %v3113_v18 = vpop.eup %2423  ;;  %v1268_v47 = vmul.f32 1.442695, %v1258_v44  ;;  %v1270_v3 = vmul.f32 1.442695, %v1259_v43 }
 0x663   : > { %v1295_v29 = vsel %vm849_vm13, %v3113_v18, 0.0  ;;  %v3121_v13 = vpop.eup %2425 }
 0x664   : > { %1296 = vadd.xlane.f32.xlu1 %v1295_v29  ;;  %1293 = vadd.xlane.f32.xlu2 %v1292_v36  ;;  %v1301_v62 = vsel %vm849_vm13, %v3121_v13, 0.0  ;;  %2427 = vpow2.f32 %v1268_v47 }
 0x665   : > { %2429 = vpow2.f32 %v1270_v3 }
 0x667   : > { %v1234_v61 = vpop.xlane.xlu2 %1233  ;;  %v1237_v1 = vpop.xlane.xlu1 %1236 }
 0x668   : > { %v1256_v58 = vsub.f32 %v3099_v8, %v1234_v61  ;;  %v1257_v8 = vsub.f32 %v3101_v50, %v1237_v1 }
 0x66a   : > { %v1264_v6 = vmul.f32 1.442695, %v1256_v58  ;;  %v3156_v57 = vpop.eup %2427  ;;  %v1266_v11 = vmul.f32 1.442695, %v1257_v8 }
 0x66b   : > { %v1286_v4 = vsel %vm849_vm13, %v3156_v57, 0.0  ;;  %v3163_v10 = vpop.eup %2429 }
 0x66c   : > { %1302 = vadd.xlane.f32.xlu1 %v1301_v62  ;;  %1424 = vmax.xlane.f32.xlu2 %v1423_v25  ;;  %2431 = vpow2.f32 %v1264_v6  ;;  %v1289_v32 = vsel %vm849_vm13, %v3163_v10, 0.0 }
 0x66d   : > { %2433 = vpow2.f32 %v1266_v11 }
 0x672   : > { %v3165_v19 = vpop.eup %2431 }
 0x673   : > { %v1280_v20 = vsel %vm849_vm13, %v3165_v19, 0.0  ;;  %v3171_v50 = vpop.eup %2433 }
 0x674   : > { %1427 = vmax.xlane.f32.xlu1 %v1426_v26  ;;  %1430 = vmax.xlane.f32.xlu2 %v1429_v38  ;;  %v1283_v17 = vsel %vm849_vm13, %v3171_v50, 0.0 }
 0x67c   : > { %1433 = vmax.xlane.f32.xlu1 %v1432_v51  ;;  %1436 = vmax.xlane.f32.xlu2 %v1435_v23 }
 0x684   : > { %1439 = vmax.xlane.f32.xlu1 %v1438_v54  ;;  %1442 = vmax.xlane.f32.xlu2 %v1441_v2 }
 0x68c   : > { %1445 = vmax.xlane.f32.xlu1 %v1444_v56  ;;  %1287 = vadd.xlane.f32.xlu2 %v1286_v4 }
 0x694   : > { %1290 = vadd.xlane.f32.xlu1 %v1289_v32  ;;  %1281 = vadd.xlane.f32.xlu2 %v1280_v20 }
 0x69c   : > { %1284 = vadd.xlane.f32.xlu1 %v1283_v17 }
 0x6cf   : > { %v1300_v35 = vpop.xlane.xlu2 %1299 }
 0x6d0   : > { %2435 = vrcp.f32 %v1300_v35 }
 0x6d6   : > { %v2436_v9 = vpop.eup %2435 }
 0x6d7   : > { %v1297_v0 = vpop.xlane.xlu1 %1296  ;;  %v1294_v7 = vpop.xlane.xlu2 %1293  ;;  %v1318_v31 = vmul.f32 %v2436_v9, %v3107_v15 }
 0x6df   : > { %v1303_v14 = vpop.xlane.xlu1 %1302  ;;  %v1425_v5 = vpop.xlane.xlu2 %1424 }
 0x6e0   : > { %2437 = vrcp.f32 %v1303_v14  ;;  %v1447_v43 = vsub.f32 %v3119_v55, %v1425_v5 }
 0x6e1   : > { %2439 = vrcp.f32 %v1297_v0 }
 0x6e2   : > { %2441 = vrcp.f32 %v1294_v7 }
 0x6e6   : > { %v2438_v24 = vpop.eup %2437 }
 0x6e7   : > { %v2440_v27 = vpop.eup %2439  ;;  %v1428_v30 = vpop.xlane.xlu1 %1427  ;;  %v1319_v29 = vmul.f32 %v2438_v24, %v3121_v13 }
 0x6e8   : > { %v1431_v34 = vpop.xlane.xlu2 %1430  ;;  %v2442_v36 = vpop.eup %2441  ;;  %v1317_v38 = vmul.f32 %v2440_v27, %v3113_v18  ;;  %v1448_v55 = vsub.f32 %v3127_v12, %v1428_v30 }
 0x6e9   : > { %v1449_v21 = vsub.f32 %v3129_v39, %v1431_v34  ;;  %v1324_v62 = vpack.c.bf16 %v1319_v29, %v1318_v31  ;;  %v1316_v26 = vmul.f32 %v2442_v36, %v3111_v53 }
 0x6ea   : > { %v1457_v11 = vmul.f32 1.442695, %v1448_v55 }
 0x6eb   : > { %v1459_v25 = vmul.f32 1.442695, %v1449_v21  ;;  %v1338_v40 = vsel %vm849_vm13, %v1324_v62, 0  ;;  %v1323_v44 = vpack.c.bf16 %v1317_v38, %v1316_v26  ;;  %v616_v21 = vld [vmem:[%s3489_s3 + $0x50] sm:$0xff] }
 0x6ec   : > { %1344 = vmatpush.bf16.xpose.msrb.mxu3 %v1338_v40  ;;  %v617_v40 = vld [vmem:[%s3489_s3 + $0x58] sm:$0xff] }
 0x6ed   : > { %2443 = vpow2.f32 %v1459_v25  ;;  %v1335_v59 = vsel %vm849_vm13, %v1323_v44, 0 }
 0x6ef   : > { %v1434_v33 = vpop.xlane.xlu1 %1433 }
 0x6f0   : > { %v1437_v49 = vpop.xlane.xlu2 %1436  ;;  %v1450_v15 = vsub.f32 %v3135_v37, %v1434_v33 }
 0x6f1   : > { %v1451_v13 = vsub.f32 %v3137_v28, %v1437_v49  ;;  %v772_v49 = vpop.f32.mrf.mxu0 }
 0x6f2   : > { %v1461_v51 = vmul.f32 1.442695, %v1450_v15 }
 0x6f3   : > { %v1463_v23 = vmul.f32 1.442695, %v1451_v13  ;;  %v3187_v39 = vpop.eup %2443 }
 0x6f4   : > { %2445 = vpow2.f32 %v1461_v51  ;;  %1345 = vmatpush.bf16.xpose.msrb.mxu3 %v1335_v59  ;;  %v1477_v53 = vsel %vm849_vm13, %v3187_v39, 0.0 }
 0x6f5   : > { %2447 = vpow2.f32 %v1463_v23  ;;  %1478 = vadd.xlane.f32.xlu2 %v1477_v53 }
 0x6f7   : > { %v1440_v18 = vpop.xlane.xlu1 %1439 }
 0x6f8   : > { %v1443_v47 = vpop.xlane.xlu2 %1442  ;;  %v1452_v61 = vsub.f32 %v3146_v60, %v1440_v18  ;;  %v1455_v60 = vmul.f32 1.442695, %v1447_v43 }
 0x6f9   : > { %v1453_v37 = vsub.f32 %v3144_v45, %v1443_v47 }
 0x6fa   : > { %v3194_v28 = vpop.eup %2445  ;;  %v1465_v2 = vmul.f32 1.442695, %v1452_v61 }
 0x6fb   : > { %v1467_v58 = vmul.f32 1.442695, %v1453_v37  ;;  %v3197_v42 = vpop.eup %2447  ;;  %v1480_v54 = vsel %vm849_vm13, %v3194_v28, 0.0 }
 0x6fc   : > { %2449 = vpow2.f32 %v1465_v2  ;;  %1481 = vadd.xlane.f32.xlu1 %v1480_v54  ;;  %v1483_v3 = vsel %vm849_vm13, %v3197_v42, 0.0 }
 0x6fd   : > { %2451 = vpow2.f32 %v1467_v58  ;;  %1484 = vadd.xlane.f32.xlu2 %v1483_v3 }
 0x6fe   : > { %2453 = vpow2.f32 %v1455_v60 }
 0x6ff   : > { %v1446_v45 = vpop.xlane.xlu1 %1445 }
 0x700   : > { %v1288_v6 = vpop.xlane.xlu2 %1287  ;;  %v1454_v17 = vsub.f32 %v3154_v63, %v1446_v45 }
 0x701   : > { %2455 = vrcp.f32 %v1288_v6 }
 0x702   : > { %v3203_v1 = vpop.eup %2449  ;;  %v1469_v14 = vmul.f32 1.442695, %v1454_v17 }
 0x703   : > { %v3206_v56 = vpop.eup %2451  ;;  %v1486_v8 = vsel %vm849_vm13, %v3203_v1, 0.0 }
 0x704   : > { %1487 = vadd.xlane.f32.xlu1 %v1486_v8  ;;  %v1489_v4 = vsel %vm849_vm13, %v3206_v56, 0.0  ;;  %v3212_v20 = vpop.eup %2453 }
 0x705   : > { %1490 = vadd.xlane.f32.xlu2 %v1489_v4  ;;  %v1471_v35 = vsel %vm849_vm13, %v3212_v20, 0.0 }
 0x707   : > { %v1291_v32 = vpop.xlane.xlu1 %1290  ;;  %v2456_v0 = vpop.eup %2455 }
 0x708   : > { %2457 = vrcp.f32 %v1291_v32  ;;  %v1282_v12 = vpop.xlane.xlu2 %1281  ;;  %v1314_v16 = vmul.f32 %v2456_v0, %v3156_v57  ;;  %v774_v32 = vpop.f32.mrf.mxu0 }
 0x709   : > { %2459 = vpow2.f32 %v1457_v11 }
 0x70a   : > { %2461 = vrcp.f32 %v1282_v12 }
 0x70c   : > { %1472 = vadd.xlane.f32.xlu1 %v1471_v35 }
 0x70e   : > { %v2458_v7 = vpop.eup %2457 }
 0x70f   : > { %v1285_v5 = vpop.xlane.xlu1 %1284  ;;  %v1315_v9 = vmul.f32 %v2458_v7, %v3163_v10  ;;  %v3219_v24 = vpop.eup %2459  ;;  %v2291_v7 = vld [vmem:[%s3490_s4 + $0x8] sm:$0xff] }
 0x710   : > { %2463 = vrcp.f32 %v1285_v5  ;;  %v1474_v63 = vsel %vm849_vm13, %v3219_v24, 0.0  ;;  %v2462_v34 = vpop.eup %2461 }
 0x711   : > { %v1322_v27 = vpack.c.bf16 %v1315_v9, %v1314_v16  ;;  %2465 = vpow2.f32 %v1469_v14  ;;  %v1312_v29 = vmul.f32 %v2462_v34, %v3165_v19  ;;  %v3264_v34 = vld [vmem:[%s2706_s22] sm:$0x3f] }
 0x713   : > { %v1332_v30 = vsel %vm849_vm13, %v1322_v27, 0 }
 0x714   : > { %1475 = vadd.xlane.f32.xlu1 %v1474_v63  ;;  %1346 = vmatpush.bf16.xpose.msrb.mxu3 %v1332_v30  ;;  %v2334_v30 = vld [vmem:[%s3491_s5] ss:$0 sm:$0xff] }
 0x716   : > { %v2464_v31 = vpop.eup %2463 }
 0x717   : > { %v1313_v57 = vmul.f32 %v2464_v31, %v3171_v50  ;;  %v2466_v36 = vpop.eup %2465  ;;  %v1623_v31 = vperm.slane %v3264_v34, 2 }
 0x718   : > { %v1492_v62 = vsel %vm849_vm13, %v2466_v36, 0.0 }
 0x719   : > { %v1321_v10 = vpack.c.bf16 %v1313_v57, %v1312_v29 }
 0x71b   : > { %v1329_v25 = vsel %vm849_vm13, %v1321_v10, 0  ;;  %v2516_v10 = vld [vmem:[%s2605_s18] sm:$0xff] }
 0x71c   : > { %1493 = vadd.xlane.f32.xlu1 %v1492_v62  ;;  %1347 = vmatpush.bf16.xpose.msrb.mxu3 %v1329_v25 }
 0x71d   : > { %670 = vperm.xlu2 %2314, %v616_v21  }
 0x735   : > { %675 = vperm.xlu1 %2313, %v617_v40  }
 0x743   : > { %1554 = vxpose.xlu2.c.b16.start [1/2] (short) (narrow) %v1544_v48, 64 }
 0x768   : > { %v1479_v19 = vpop.xlane.xlu2 %1478 }
 0x76f   : > { %v1482_v50 = vpop.xlane.xlu1 %1481 }
 0x770   : > { %v1485_v26 = vpop.xlane.xlu2 %1484 }
 0x777   : > { %v1488_v38 = vpop.xlane.xlu1 %1487 }
 0x778   : > { %v1491_v33 = vpop.xlane.xlu2 %1490 }
 0x779   : > { %2467 = vrcp.f32 %v1491_v33 }
 0x77f   : > { %v1473_v44 = vpop.xlane.xlu1 %1472  ;;  %v2468_v53 = vpop.eup %2467 }
 0x780   : > { %v671_v15 = vpop.permute.xlu2 %670  ;;  %v1509_v46 = vmul.f32 %v2468_v53, %v3206_v56 }
 0x781   : > { %v773_v13 = vadd.f32 %v772_v49, %v671_v15  ;;  %v2518_v15 = vld [vmem:[%s2605_s18 + $0x10] sm:$0xff] }
 0x783   : > { %v1320_v51 = vpack.c.bf16 %v773_v13, %v773_v13 }
 0x785   : > { %2218 = vmatmul.msk.bf16.vlgmr.msrb.gmra.mxu3 %vm849_vm13, %v1320_v51 }
 0x787   : > { %v1476_v23 = vpop.xlane.xlu1 %1475 }
 0x78f   : > { %v1494_v59 = vpop.xlane.xlu1 %1493 }
 0x790   : > { %2469 = vrcp.f32 %v1494_v59 }
 0x791   : > { %2471 = vrcp.f32 %v1488_v38 }
 0x792   : > { %2473 = vrcp.f32 %v1485_v26 }
 0x793   : > { %2475 = vrcp.f32 %v1482_v50  ;;  %v2517_v50 = vld [vmem:[%s2605_s18 + $0x8] sm:$0xff] }
 0x794   : > { %2477 = vrcp.f32 %v1479_v19 }
 0x795   : > { %2479 = vrcp.f32 %v1476_v23 }
 0x796   : > { %v2470_v41 = vpop.eup %2469  ;;  %2481 = vrcp.f32 %v1473_v44 }
 0x797   : > { %v1510_v48 = vmul.f32 %v2470_v41, %v2466_v36  ;;  %v2472_v18 = vpop.eup %2471  ;;  %v2519_v41 = vld [vmem:[%s2605_s18 + $0x18] sm:$0xff] }
 0x798   : > { %v2474_v61 = vpop.eup %2473  ;;  %v1508_v43 = vmul.f32 %v2472_v18, %v3203_v1 }
 0x799   : > { %v1515_v47 = vpack.c.bf16 %v1510_v48, %v1509_v46  ;;  %v1507_v2 = vmul.f32 %v2474_v61, %v3197_v42  ;;  %v2476_v54 = vpop.eup %2475 }
 0x79a   : > { %v2478_v3 = vpop.eup %2477  ;;  %v1506_v45 = vmul.f32 %v2476_v54, %v3194_v28 }
 0x79b   : > { %v1529_v37 = vsel %vm849_vm13, %v1515_v47, 0  ;;  %v1514_v58 = vpack.c.bf16 %v1508_v43, %v1507_v2  ;;  %v1505_v6 = vmul.f32 %v2478_v3, %v3187_v39  ;;  %v2480_v56 = vpop.eup %2479 }
 0x79c   : > { %1535 = vmatpush.bf16.xpose.msra.mxu3 %v1529_v37  ;;  %v2482_v8 = vpop.eup %2481  ;;  %v1504_v4 = vmul.f32 %v2480_v56, %v3219_v24  ;;  %v2520_v37 = vld [vmem:[%s2605_s18 + $0x20] sm:$0xff] }
 0x79d   : > { %v1526_v60 = vsel %vm849_vm13, %v1514_v58, 0  ;;  %v1513_v55 = vpack.c.bf16 %v1506_v45, %v1505_v6  ;;  %v1503_v42 = vmul.f32 %v2482_v8, %v3212_v20  ;;  %v2290_v20 = vld [vmem:[%s3490_s4] sm:$0xff] }
 0x79f   : > { %v1523_v1 = vsel %vm849_vm13, %v1513_v55, 0  ;;  %v1512_v11 = vpack.c.bf16 %v1504_v4, %v1503_v42 }
 0x7a1   : > { %v1520_v12 = vsel %vm849_vm13, %v1512_v11, 0  ;;  %v2522_v11 = vld [vmem:[%s2605_s18 + $0x38] sm:$0xff] }
 0x7a4   : > { %1536 = vmatpush.bf16.xpose.msra.mxu3 %v1526_v60  ;;  %v2521_v60 = vld [vmem:[%s2605_s18 + $0x28] sm:$0xff] }
 0x7a7   : > { %v676_v17 = vpop.permute.xlu1 %675 }
 0x7a8   : > { %v775_v28 = vadd.f32 %v774_v32, %v676_v17 }
 0x7aa   : > { %v1511_v35 = vpack.c.bf16 %v775_v28, %v775_v28 }
 0x7ac   : > { %1537 = vmatpush.bf16.xpose.msra.mxu3 %v1523_v1 }
 0x7b4   : > { %1538 = vmatpush.bf16.xpose.msra.mxu3 %v1520_v12 }
 0x7bb   : > { %2223 = vmatmul.msk.bf16.vlgmr.msra.gmra.mxu3 %vm849_vm13, %v1511_v35 }
 0x7bc   : > { %1600 = vmatpush.bf16.msrb.mxu3 %v2291_v7 }
 0x7c0   : > { %1601 = vmatpush.bf16.msrb.mxu3 %v2290_v20 }
 0x808   : > { %v1349_v39 = vpop.f32.mrf.mxu3 }
 0x810   : > { %v1351_v0 = vpop.f32.mrf.mxu3 }
 0x83e   : > { %v1540_v14 = vpop.f32.mrf.mxu3 }
 0x83f   : > { %v1545_v5 = vpack.c.bf16 %v1540_v14, %v1349_v39 }
 0x841   : > { %1555 = vxpose.xlu2.c.b16.end [2/2] (short) (narrow) %v1545_v5, 64 }
 0x846   : > { %v1542_v16 = vpop.f32.mrf.mxu3 }
 0x8d2   : > { %v1562_v9 = vpop.trf.xlu2 }
 0x8d3   : > { %2232 = vmatmul.msk.bf16.vlgmr.msrb.gmra.mxu3 %vm387_vm0, %v1562_v9 }
 0x8e2   : > { %v1563_v24 = vpop.trf.xlu2 }
 0x8e3   : > { %2233 = vmatmul.msk.bf16.gmra.mxu3 %vm387_vm0, %v1563_v24  ;;  %v2523_v24 = vld [vmem:[%s2605_s18 + $0x30] sm:$0xff] }
 0x8f2   : > { %v1564_v27 = vpop.trf.xlu2 }
 0x8f3   : > { %2234 = vmatmul.msk.bf16.gmra.mxu3 %vm387_vm0, %v1564_v27 }
 0x902   : > { %v1565_v63 = vpop.trf.xlu2 }
 0x903   : > { %2235 = vmatmul.msk.bf16.gmra.mxu3 %vm387_vm0, %v1565_v63 }
 0x956   : > { %v1603_v29 = vpop.f32.mrf.mxu3 }
 0x957   : > { %v1604_v57 = vadd.f32 %v2334_v30, %v1603_v29 }
 0x959   : > { %v1624_v36 = vmul.f32 %v1623_v31, %v1604_v57 }
 0x95b   : > { %v3268_v21 = vadd.f32 %v2516_v10, %v1624_v36 }
 0x95d   : > { %v1640_v62 = vsel %vm387_vm0, %v3268_v21, 0.0 }
 0x95e   : > { %v1605_v25 = vpop.f32.mrf.mxu3  ;;  %1641 = vadd.xlane.f32.xlu0 %v1640_v62 }
 0x95f   : > { %v1606_v40 = vadd.f32 %v2334_v30, %v1605_v25 }
 0x961   : > { %v1625_v19 = vmul.f32 %v1623_v31, %v1606_v40 }
 0x963   : > { %v3273_v26 = vadd.f32 %v2517_v50, %v1625_v19 }
 0x965   : > { %v1643_v38 = vsel %vm387_vm0, %v3273_v26, 0.0 }
 0x966   : > { %v1608_v33 = vpop.f32.mrf.mxu3  ;;  %1644 = vadd.xlane.f32.xlu0 %v1643_v38 }
 0x967   : > { %v1609_v49 = vadd.f32 %v2334_v30, %v1608_v33 }
 0x969   : > { %v1626_v44 = vmul.f32 %v1623_v31, %v1609_v49 }
 0x96b   : > { %v3278_v13 = vadd.f32 %v2518_v15, %v1626_v44 }
 0x96d   : > { %v1646_v51 = vsel %vm387_vm0, %v3278_v13, 0.0 }
 0x96e   : > { %v1610_v23 = vpop.f32.mrf.mxu3  ;;  %1647 = vadd.xlane.f32.xlu1 %v1646_v51 }
 0x96f   : > { %v1611_v59 = vadd.f32 %v2334_v30, %v1610_v23 }
 0x971   : > { %v1627_v53 = vmul.f32 %v1623_v31, %v1611_v59 }
 0x973   : > { %v3283_v46 = vadd.f32 %v2519_v41, %v1627_v53 }
 0x975   : > { %v1649_v48 = vsel %vm387_vm0, %v3283_v46, 0.0 }
 0x976   : > { %v1613_v18 = vpop.f32.mrf.mxu3  ;;  %1650 = vadd.xlane.f32.xlu0 %v1649_v48 }
 0x977   : > { %v1614_v47 = vadd.f32 %v2334_v30, %v1613_v18 }
 0x979   : > { %v1628_v61 = vmul.f32 %v1623_v31, %v1614_v47 }
 0x97b   : > { %v3288_v43 = vadd.f32 %v2520_v37, %v1628_v61  ;;  %v2293_v61 = vld [vmem:[%s3492_s6 + $0x8] sm:$0xff] }
 0x97c   : > { %1876 = vmatpush.bf16.msrb.mxu0 %v2293_v61 }
 0x97d   : > { %v1652_v2 = vsel %vm387_vm0, %v3288_v43, 0.0 }
 0x97e   : > { %v1615_v58 = vpop.f32.mrf.mxu3  ;;  %1653 = vadd.xlane.f32.xlu0 %v1652_v2 }
 0x97f   : > { %v1616_v54 = vadd.f32 %v2334_v30, %v1615_v58 }
 0x981   : > { %v1629_v3 = vmul.f32 %v1623_v31, %v1616_v54  ;;  %v2292_v54 = vld [vmem:[%s3492_s6] sm:$0xff] }
 0x982   : > { %1877 = vmatpush.bf16.msrb.mxu0 %v2292_v54 }
 0x983   : > { %v3293_v45 = vadd.f32 %v2521_v60, %v1629_v3 }
 0x985   : > { %v1655_v6 = vsel %vm387_vm0, %v3293_v45, 0.0 }
 0x986   : > { %v1618_v55 = vpop.f32.mrf.mxu3  ;;  %1656 = vadd.xlane.f32.xlu0 %v1655_v6 }
 0x987   : > { %v1619_v56 = vadd.f32 %v2334_v30, %v1618_v55 }
 0x989   : > { %v1630_v8 = vmul.f32 %v1623_v31, %v1619_v56 }
 0x98b   : > { %v3317_v27 = vadd.f32 %v2523_v24, %v1630_v8 }
 0x98e   : > { %v1620_v1 = vpop.f32.mrf.mxu3 }
 0x98f   : > { %v1621_v4 = vadd.f32 %v2334_v30, %v1620_v1 }
 0x991   : > { %v1631_v42 = vmul.f32 %v1623_v31, %v1621_v4  ;;  %v1658_v31 = vsel %vm387_vm0, %v3317_v27, 0.0 }
 0x993   : > { %v3298_v32 = vadd.f32 %v2522_v11, %v1631_v42 }
 0x995   : > { %v1661_v17 = vsel %vm387_vm0, %v3298_v32, 0.0 }
 0x996   : > { %1662 = vadd.xlane.f32.xlu1 %v1661_v17 }
 0x9d1   : > { %v1642_v12 = vpop.xlane.xlu0 %1641 }
 0x9d2   : > { %v1664_v28 = vmul.f32 %v1642_v12, %v2623_v22 }
 0x9d4   : > { %v3304_v35 = vsub.f32 %v3268_v21, %v1664_v28 }
 0x9d6   : > { %v1680_v39 = vmul.f32 %v3304_v35, %v3304_v35 }
 0x9d8   : > { %v1688_v0 = vsel %vm387_vm0, %v1680_v39, 0.0 }
 0x9d9   : > { %1689 = vadd.xlane.f32.xlu2 %v1688_v0  ;;  %v1645_v7 = vpop.xlane.xlu0 %1644 }
 0x9da   : > { %v1665_v20 = vmul.f32 %v1645_v7, %v2623_v22 }
 0x9dc   : > { %v3311_v14 = vsub.f32 %v3273_v26, %v1665_v20 }
 0x9de   : > { %v1681_v5 = vmul.f32 %v3311_v14, %v3311_v14 }
 0x9e0   : > { %v1691_v16 = vsel %vm387_vm0, %v1681_v5, 0.0 }
 0x9e1   : > { %v1648_v9 = vpop.xlane.xlu1 %1647  ;;  %1692 = vadd.xlane.f32.xlu0 %v1691_v16 }
 0x9e2   : > { %v1666_v63 = vmul.f32 %v1648_v9, %v2623_v22 }
 0x9e4   : > { %v3321_v30 = vsub.f32 %v3278_v13, %v1666_v63 }
 0x9e6   : > { %v1682_v10 = vmul.f32 %v3321_v30, %v3321_v30 }
 0x9e8   : > { %v1694_v25 = vsel %vm387_vm0, %v1682_v10, 0.0 }
 0x9e9   : > { %1659 = vadd.xlane.f32.xlu0 %v1658_v31  ;;  %v1651_v29 = vpop.xlane.xlu0 %1650 }
 0x9ea   : > { %v1667_v57 = vmul.f32 %v1651_v29, %v2623_v22 }
 0x9ec   : > { %v3327_v36 = vsub.f32 %v3283_v46, %v1667_v57 }
 0x9ee   : > { %v1683_v62 = vmul.f32 %v3327_v36, %v3327_v36 }
 0x9f0   : > { %v1697_v40 = vsel %vm387_vm0, %v1683_v62, 0.0  ;;  %v3374_v62 = vperm.slane %v2725_v52, 4 }
 0x9f1   : > { %1695 = vadd.xlane.f32.xlu0 %v1694_v25  ;;  %1698 = vadd.xlane.f32.xlu1 %v1697_v40  ;;  %v1654_v19 = vpop.xlane.xlu0 %1653 }
 0x9f2   : > { %v1668_v50 = vmul.f32 %v1654_v19, %v2623_v22 }
 0x9f4   : > { %v3337_v38 = vsub.f32 %v3288_v43, %v1668_v50 }
 0x9f6   : > { %v1684_v33 = vmul.f32 %v3337_v38, %v3337_v38 }
 0x9f8   : > { %v1700_v49 = vsel %vm387_vm0, %v1684_v33, 0.0 }
 0x9f9   : > { %1701 = vadd.xlane.f32.xlu0 %v1700_v49  ;;  %v1657_v44 = vpop.xlane.xlu0 %1656 }
 0x9fa   : > { %v1669_v15 = vmul.f32 %v1657_v44, %v2623_v22  ;;  %v3380_v44 = vperm.slane %v3264_v34, 3 }
 0x9fc   : > { %v3344_v51 = vsub.f32 %v3293_v45, %v1669_v15 }
 0x9fe   : > { %v1685_v23 = vmul.f32 %v3344_v51, %v3344_v51 }
 0xa00   : > { %v1703_v59 = vsel %vm387_vm0, %v1685_v23, 0.0 }
 0xa01   : > { %1704 = vadd.xlane.f32.xlu1 %v1703_v59 }
 0xa09   : > { %v1663_v53 = vpop.xlane.xlu1 %1662 }
 0xa0a   : > { %v1671_v41 = vmul.f32 %v1663_v53, %v2623_v22 }
 0xa0c   : > { %v3351_v48 = vsub.f32 %v3298_v32, %v1671_v41 }
 0xa0e   : > { %v1687_v18 = vmul.f32 %v3351_v48, %v3351_v48 }
 0xa10   : > { %v1709_v47 = vsel %vm387_vm0, %v1687_v18, 0.0 }
 0xa11   : > { %1710 = vadd.xlane.f32.xlu1 %v1709_v47 }
 0xa4c   : > { %v1690_v37 = vpop.xlane.xlu2 %1689 }
 0xa4d   : > { %v1712_v2 = vmul.f32 %v1690_v37, %v2623_v22 }
 0xa4f   : > { %v1720_v58 = vadd.f32 1e-05, %v1712_v2 }
 0xa51   : > { %2483 = vrsqrt.f32 %v1720_v58  ;;  %vm1734_vm15 = vweird.f32 %v1720_v58 }
 0xa54   : > { %v1693_v3 = vpop.xlane.xlu0 %1692 }
 0xa55   : > { %v1713_v60 = vmul.f32 %v1693_v3, %v2623_v22 }
 0xa57   : > { %v2484_v6 = vpop.eup %2483  ;;  %v1721_v55 = vadd.f32 1e-05, %v1713_v60 }
 0xa58   : > { %v1729_v56 = vmul.f32 %v2484_v6, %v1720_v58  ;;  %vm1735_vm14 = vweird.f32 %v2484_v6 }
 0xa59   : > { %2485 = vrsqrt.f32 %v1721_v55  ;;  %vm1736_vm1 = vmor %vm1734_vm15, %vm1735_vm14  ;;  %vm1744_vm3 = vweird.f32 %v1721_v55 }
 0xa5a   : > { %v1730_v8 = vmul.f32 %v2484_v6, %v1729_v56 }
 0xa5c   : > { %v1731_v1 = vmul.f32 0.5, %v1730_v8  ;;  %v1660_v4 = vpop.xlane.xlu0 %1659 }
 0xa5d   : > { %v1670_v42 = vmul.f32 %v1660_v4, %v2623_v22 }
 0xa5e   : > { %v1732_v11 = vsub.f32 1.5, %v1731_v1 }
 0xa5f   : > { %v2486_v17 = vpop.eup %2485  ;;  %v3366_v12 = vsub.f32 %v3317_v27, %v1670_v42 }
 0xa60   : > { %v1739_v28 = vmul.f32 %v2486_v17, %v1721_v55  ;;  %v1733_v39 = vmul.f32 %v2484_v6, %v1732_v11  ;;  %vm1745_vm2 = vweird.f32 %v2486_v17 }
 0xa61   : > { %v1686_v0 = vmul.f32 %v3366_v12, %v3366_v12  ;;  %vm1746_vm4 = vmor %vm1744_vm3, %vm1745_vm2 }
 0xa62   : > { %v1740_v7 = vmul.f32 %v2486_v17, %v1739_v28  ;;  %v1737_v24 = vsel %vm1736_vm1, %v2484_v6, %v1733_v39 }
 0xa63   : > { %v1706_v20 = vsel %vm387_vm0, %v1686_v0, 0.0  ;;  %v1808_v25 = vmul.f32 %v1737_v24, %v3304_v35 }
 0xa64   : > { %v1741_v5 = vmul.f32 0.5, %v1740_v7  ;;  %v1699_v16 = vpop.xlane.xlu1 %1698  ;;  %1707 = vadd.xlane.f32.xlu0 %v1706_v20  ;;  %v1696_v9 = vpop.xlane.xlu0 %1695 }
 0xa65   : > { %v1715_v63 = vmul.f32 %v1699_v16, %v2623_v22  ;;  %v1714_v31 = vmul.f32 %v1696_v9, %v2623_v22  ;;  %v1817_v49 = vmul.f32 %v3374_v62, %v1808_v25 }
 0xa66   : > { %v1742_v29 = vsub.f32 1.5, %v1741_v5 }
 0xa67   : > { %v1723_v57 = vadd.f32 1e-05, %v1715_v63  ;;  %v1722_v10 = vadd.f32 1e-05, %v1714_v31  ;;  %v1826_v18 = vadd.f32 %v3380_v44, %v1817_v49 }
 0xa68   : > { %v1743_v40 = vmul.f32 %v2486_v17, %v1742_v29 }
 0xa69   : > { %2487 = vrsqrt.f32 %v1723_v57  ;;  %vm1764_vm7 = vweird.f32 %v1723_v57  ;;  %vm1754_vm9 = vweird.f32 %v1722_v10 }
 0xa6a   : > { %v1747_v19 = vsel %vm1746_vm4, %v2486_v17, %v1743_v40  ;;  %2489 = vrsqrt.f32 %v1722_v10 }
 0xa6b   : > { %v1809_v50 = vmul.f32 %v1747_v19, %v3311_v14 }
 0xa6c   : > { %v1702_v33 = vpop.xlane.xlu0 %1701 }
 0xa6d   : > { %v1716_v15 = vmul.f32 %v1702_v33, %v2623_v22  ;;  %v1818_v52 = vmul.f32 %v3374_v62, %v1809_v50 }
 0xa6f   : > { %v2488_v23 = vpop.eup %2487  ;;  %v1724_v35 = vadd.f32 1e-05, %v1716_v15  ;;  %v1827_v59 = vadd.f32 %v3380_v44, %v1818_v52 }
 0xa70   : > { %v2490_v53 = vpop.eup %2489  ;;  %v1759_v41 = vmul.f32 %v2488_v23, %v1723_v57  ;;  %vm1765_vm5 = vweird.f32 %v2488_v23 }
 0xa71   : > { %v1749_v47 = vmul.f32 %v2490_v53, %v1722_v10  ;;  %2491 = vrsqrt.f32 %v1724_v35  ;;  %v1834_v61 = vpack.c.bf16 %v1827_v59, %v1826_v18  ;;  %vm1755_vm6 = vweird.f32 %v2490_v53  ;;  %vm1766_vm8 = vmor %vm1764_vm7, %vm1765_vm5 }
 0xa72   : > { %v1760_v14 = vmul.f32 %v2488_v23, %v1759_v41  ;;  %vm1756_vm10 = vmor %vm1754_vm9, %vm1755_vm6  ;;  %vm1774_vm12 = vweird.f32 %v1724_v35 }
 0xa73   : > { %v1750_v37 = vmul.f32 %v2490_v53, %v1749_v47  ;;  %2244 = vmatmul.msk.bf16.vlgmr.msrb.gmra.mxu0 %vm387_vm0, %v1834_v61  ;;  %v2300_v61 = vld [vmem:[%s3494_s8 + $0x30] sm:$0xff] }
 0xa74   : > { %v1761_v2 = vmul.f32 0.5, %v1760_v14  ;;  %v1705_v58 = vpop.xlane.xlu1 %1704 }
 0xa75   : > { %v1751_v54 = vmul.f32 0.5, %v1750_v37  ;;  %v1717_v3 = vmul.f32 %v1705_v58, %v2623_v22  ;;  %v2299_v58 = vld [vmem:[%s3494_s8 + $0x28] sm:$0xff] }
 0xa76   : > { %v1762_v60 = vsub.f32 1.5, %v1761_v2 }
 0xa77   : > { %v2492_v6 = vpop.eup %2491  ;;  %v1752_v55 = vsub.f32 1.5, %v1751_v54  ;;  %v1725_v56 = vadd.f32 1e-05, %v1717_v3  ;;  %v2298_v3 = vld [vmem:[%s3494_s8 + $0x20] sm:$0xff] }
 0xa78   : > { %v1763_v8 = vmul.f32 %v2488_v23, %v1762_v60  ;;  %v1769_v1 = vmul.f32 %v2492_v6, %v1724_v35  ;;  %vm1775_vm11 = vweird.f32 %v2492_v6 }
 0xa79   : > { %v1753_v4 = vmul.f32 %v2490_v53, %v1752_v55  ;;  %2493 = vrsqrt.f32 %v1725_v56  ;;  %vm1776_vm13 = vmor %vm1774_vm12, %vm1775_vm11  ;;  %vm1784_vm15 = vweird.f32 %v1725_v56  ;;  %v2297_v55 = vld [vmem:[%s3494_s8 + $0x18] sm:$0xff] }
 0xa7a   : > { %v1767_v42 = vsel %vm1766_vm8, %v2488_v23, %v1763_v8  ;;  %v1770_v11 = vmul.f32 %v2492_v6, %v1769_v1 }
 0xa7b   : > { %v1811_v17 = vmul.f32 %v1767_v42, %v3327_v36  ;;  %v1757_v28 = vsel %vm1756_vm10, %v2490_v53, %v1753_v4  ;;  %v2296_v4 = vld [vmem:[%s3494_s8 + $0x10] sm:$0xff] }
 0xa7c   : > { %v1810_v39 = vmul.f32 %v1757_v28, %v3321_v30  ;;  %v1771_v0 = vmul.f32 0.5, %v1770_v11  ;;  %v2295_v28 = vld [vmem:[%s3494_s8 + $0x8] sm:$0xff] }
 0xa7d   : > { %v1820_v7 = vmul.f32 %v3374_v62, %v1811_v17 }
 0xa7e   : > { %v1772_v20 = vsub.f32 1.5, %v1771_v0  ;;  %v1819_v5 = vmul.f32 %v3374_v62, %v1810_v39 }
 0xa7f   : > { %v2494_v16 = vpop.eup %2493  ;;  %v1829_v9 = vadd.f32 %v3380_v44, %v1820_v7  ;;  %v3430_v7 = vld [vmem:[%s3493_s7] ss:$0 sm:$0xff] }
 0xa80   : > { %v1773_v24 = vmul.f32 %v2492_v6, %v1772_v20  ;;  %v1779_v63 = vmul.f32 %v2494_v16, %v1725_v56  ;;  %v1828_v31 = vadd.f32 %v3380_v44, %v1819_v5  ;;  %vm1785_vm14 = vweird.f32 %v2494_v16  ;;  %v2294_v5 = vld [vmem:[%s3494_s8] sm:$0xff] }
 0xa81   : > { %vm1786_vm1 = vmor %vm1784_vm15, %vm1785_vm14 }
 0xa82   : > { %v1780_v29 = vmul.f32 %v2494_v16, %v1779_v63  ;;  %v1835_v36 = vpack.c.bf16 %v1829_v9, %v1828_v31  ;;  %v1777_v57 = vsel %vm1776_vm13, %v2492_v6, %v1773_v24 }
 0xa83   : > { %v1812_v25 = vmul.f32 %v1777_v57, %v3337_v38 }
 0xa84   : > { %v1781_v30 = vmul.f32 0.5, %v1780_v29  ;;  %2245 = vmatmul.msk.bf16.gmra.mxu0 %vm387_vm0, %v1835_v36  ;;  %v1711_v35 = vpop.xlane.xlu1 %1710 }
 0xa85   : > { %v1821_v33 = vmul.f32 %v3374_v62, %v1812_v25  ;;  %v1719_v38 = vmul.f32 %v1711_v35, %v2623_v22 }
 0xa86   : > { %v1782_v10 = vsub.f32 1.5, %v1781_v30 }
 0xa87   : > { %v1830_v15 = vadd.f32 %v3380_v44, %v1821_v33  ;;  %v1727_v59 = vadd.f32 1e-05, %v1719_v38 }
 0xa88   : > { %v1783_v40 = vmul.f32 %v2494_v16, %v1782_v10 }
 0xa89   : > { %2495 = vrsqrt.f32 %v1727_v59  ;;  %vm1804_vm3 = vweird.f32 %v1727_v59 }
 0xa8a   : > { %v1787_v19 = vsel %vm1786_vm1, %v2494_v16, %v1783_v40 }
 0xa8b   : > { %v1813_v50 = vmul.f32 %v1787_v19, %v3344_v51  ;;  %v2301_v51 = vld [vmem:[%s3494_s8 + $0x38] sm:$0xff] }
 0xa8c   : > { %2043 = vmatpush.bf16.msra.mxu1 %v2301_v51 }
 0xa8d   : > { %v1822_v49 = vmul.f32 %v3374_v62, %v1813_v50 }
 0xa8f   : > { %v1831_v52 = vadd.f32 %v3380_v44, %v1822_v49  ;;  %v2496_v53 = vpop.eup %2495 }
 0xa90   : > { %v1799_v41 = vmul.f32 %v2496_v53, %v1727_v59  ;;  %2044 = vmatpush.bf16.msra.mxu1 %v2300_v61  ;;  %vm1805_vm2 = vweird.f32 %v2496_v53 }
 0xa91   : > { %v1836_v23 = vpack.c.bf16 %v1831_v52, %v1830_v15  ;;  %vm1806_vm4 = vmor %vm1804_vm3, %vm1805_vm2 }
 0xa92   : > { %v1800_v18 = vmul.f32 %v2496_v53, %v1799_v41 }
 0xa94   : > { %2246 = vmatmul.msk.bf16.gmra.mxu0 %vm387_vm0, %v1836_v23  ;;  %v1801_v2 = vmul.f32 0.5, %v1800_v18  ;;  %2045 = vmatpush.bf16.msra.mxu1 %v2299_v58 }
 0xa96   : > { %v1802_v54 = vsub.f32 1.5, %v1801_v2 }
 0xa98   : > { %2046 = vmatpush.bf16.msra.mxu1 %v2298_v3 }
 0xa9c   : > { %2047 = vmatpush.bf16.msra.mxu1 %v2297_v55 }
 0xaa0   : > { %2048 = vmatpush.bf16.msra.mxu1 %v2296_v4 }
 0xaa4   : > { %2049 = vmatpush.bf16.msra.mxu1 %v2295_v28 }
 0xaa8   : > { %2050 = vmatpush.bf16.msra.mxu1 %v2294_v5 }
 0xad7   : > { %v1708_v47 = vpop.xlane.xlu0 %1707 }
 0xad8   : > { %v1718_v14 = vmul.f32 %v1708_v47, %v2623_v22  ;;  %v1803_v22 = vmul.f32 %v2496_v53, %v1802_v54 }
 0xada   : > { %v1726_v37 = vadd.f32 1e-05, %v1718_v14  ;;  %v1807_v8 = vsel %vm1806_vm4, %v2496_v53, %v1803_v22 }
 0xadb   : > { %v1815_v11 = vmul.f32 %v1807_v8, %v3351_v48 }
 0xadc   : > { %2497 = vrsqrt.f32 %v1726_v37  ;;  %vm1794_vm6 = vweird.f32 %v1726_v37 }
 0xadd   : > { %v1824_v20 = vmul.f32 %v3374_v62, %v1815_v11 }
 0xae2   : > { %v2498_v60 = vpop.eup %2497 }
 0xae3   : > { %v1789_v6 = vmul.f32 %v2498_v60, %v1726_v37  ;;  %vm1795_vm5 = vweird.f32 %v2498_v60 }
 0xae4   : > { %vm1796_vm7 = vmor %vm1794_vm6, %vm1795_vm5 }
 0xae5   : > { %v1790_v56 = vmul.f32 %v2498_v60, %v1789_v6 }
 0xae7   : > { %v1791_v1 = vmul.f32 0.5, %v1790_v56 }
 0xae9   : > { %v1792_v42 = vsub.f32 1.5, %v1791_v1 }
 0xaeb   : > { %v1793_v17 = vmul.f32 %v2498_v60, %v1792_v42 }
 0xaed   : > { %v1797_v39 = vsel %vm1796_vm7, %v2498_v60, %v1793_v17 }
 0xaee   : > { %v1814_v0 = vmul.f32 %v1797_v39, %v3366_v12  ;;  %v1833_v12 = vadd.f32 %v3380_v44, %v1824_v20 }
 0xaf0   : > { %v1823_v48 = vmul.f32 %v3374_v62, %v1814_v0  ;;  %v1879_v16 = vpop.f32.mrf.mxu0 }
 0xaf1   : > { %v1880_v9 = vadd.f32 %v3430_v7, %v1879_v16 }
 0xaf2   : > { %v1832_v24 = vadd.f32 %v3380_v44, %v1823_v48 }
 0xaf3   : > { %v1899_v63 = vmul.f32 %v1880_v9, %v1880_v9 }
 0xaf4   : > { %v1837_v31 = vpack.c.bf16 %v1833_v12, %v1832_v24 }
 0xaf5   : > { %v1907_v29 = vmul.f32 %v1899_v63, %v1880_v9 }
 0xaf6   : > { %2247 = vmatmul.msk.bf16.gmra.mxu0 %vm387_vm0, %v1837_v31 }
 0xaf7   : > { %v1915_v36 = vmul.f32 0.044715, %v1907_v29 }
 0xaf8   : > { %v1881_v57 = vpop.f32.mrf.mxu0 }
 0xaf9   : > { %v1923_v62 = vadd.f32 %v1915_v36, %v1880_v9  ;;  %v1882_v30 = vadd.f32 %v3430_v7, %v1881_v57 }
 0xafb   : > { %v1931_v10 = vmul.f32 0.7978846, %v1923_v62  ;;  %v1900_v25 = vmul.f32 %v1882_v30, %v1882_v30 }
 0xafd   : > { %v1908_v40 = vmul.f32 %v1900_v25, %v1882_v30  ;;  %2499 = vtanh.f32 %v1931_v10 }
 0xaff   : > { %v1916_v19 = vmul.f32 0.044715, %v1908_v40 }
 0xb01   : > { %v1884_v50 = vpop.f32.mrf.mxu0  ;;  %v1924_v33 = vadd.f32 %v1916_v19, %v1882_v30 }
 0xb02   : > { %v1885_v44 = vadd.f32 %v3430_v7, %v1884_v50 }
 0xb03   : > { %v1932_v49 = vmul.f32 0.7978846, %v1924_v33  ;;  %v2500_v52 = vpop.eup %2499 }
 0xb04   : > { %v1901_v15 = vmul.f32 %v1885_v44, %v1885_v44  ;;  %v1947_v38 = vadd.f32 1.0, %v2500_v52 }
 0xb05   : > { %2501 = vtanh.f32 %v1932_v49 }
 0xb06   : > { %v1909_v23 = vmul.f32 %v1901_v15, %v1885_v44  ;;  %v1955_v14 = vmul.f32 0.5, %v1947_v38 }
 0xb08   : > { %v1917_v35 = vmul.f32 0.044715, %v1909_v23  ;;  %v1963_v54 = vmul.f32 %v1955_v14, %v1880_v9 }
 0xb09   : > { %v1886_v59 = vpop.f32.mrf.mxu0 }
 0xb0a   : > { %v1925_v53 = vadd.f32 %v1917_v35, %v1885_v44  ;;  %v1887_v41 = vadd.f32 %v3430_v7, %v1886_v59 }
 0xb0b   : > { %v2502_v51 = vpop.eup %2501 }
 0xb0c   : > { %v1902_v18 = vmul.f32 %v1887_v41, %v1887_v41  ;;  %v1933_v47 = vmul.f32 0.7978846, %v1925_v53  ;;  %v1948_v61 = vadd.f32 1.0, %v2502_v51 }
 0xb0e   : > { %v1910_v37 = vmul.f32 %v1902_v18, %v1887_v41  ;;  %v1956_v2 = vmul.f32 0.5, %v1948_v61  ;;  %2503 = vtanh.f32 %v1933_v47 }
 0xb10   : > { %v1918_v58 = vmul.f32 0.044715, %v1910_v37  ;;  %v1964_v3 = vmul.f32 %v1956_v2, %v1882_v30 }
 0xb11   : > { %v1889_v60 = vpop.f32.mrf.mxu0 }
 0xb12   : > { %v1926_v22 = vadd.f32 %v1918_v58, %v1887_v41  ;;  %v1890_v6 = vadd.f32 %v3430_v7, %v1889_v60  ;;  %v1971_v55 = vpack.c.bf16 %v1964_v3, %v1963_v54  ;;  %v2336_v54 = vld [vmem:[%s3495_s9] ss:$0 sm:$0xff] }
 0xb14   : > { %v1903_v56 = vmul.f32 %v1890_v6, %v1890_v6  ;;  %v1934_v8 = vmul.f32 0.7978846, %v1926_v22  ;;  %2051 = vmatmul.bf16.vlgmr.msra.gmra.mxu1 %v1971_v55  ;;  %v2504_v1 = vpop.eup %2503 }
 0xb15   : > { %v1949_v17 = vadd.f32 1.0, %v2504_v1 }
 0xb16   : > { %v1911_v4 = vmul.f32 %v1903_v56, %v1890_v6  ;;  %2505 = vtanh.f32 %v1934_v8 }
 0xb17   : > { %v1957_v16 = vmul.f32 0.5, %v1949_v17 }
 0xb18   : > { %v1919_v42 = vmul.f32 0.044715, %v1911_v4 }
 0xb19   : > { %v1891_v11 = vpop.f32.mrf.mxu0  ;;  %v1965_v63 = vmul.f32 %v1957_v16, %v1885_v44 }
 0xb1a   : > { %v1927_v28 = vadd.f32 %v1919_v42, %v1890_v6  ;;  %v1892_v39 = vadd.f32 %v3430_v7, %v1891_v11 }
 0xb1c   : > { %v2506_v0 = vpop.eup %2505  ;;  %v1904_v20 = vmul.f32 %v1892_v39, %v1892_v39  ;;  %v1935_v48 = vmul.f32 0.7978846, %v1927_v28 }
 0xb1d   : > { %v1950_v5 = vadd.f32 1.0, %v2506_v0 }
 0xb1e   : > { %v1912_v9 = vmul.f32 %v1904_v20, %v1892_v39  ;;  %2507 = vtanh.f32 %v1935_v48 }
 0xb1f   : > { %v1958_v24 = vmul.f32 0.5, %v1950_v5 }
 0xb20   : > { %v1920_v12 = vmul.f32 0.044715, %v1912_v9 }
 0xb21   : > { %v1966_v31 = vmul.f32 %v1958_v24, %v1887_v41 }
 0xb22   : > { %v1928_v29 = vadd.f32 %v1920_v12, %v1892_v39 }
 0xb23   : > { %v1972_v36 = vpack.c.bf16 %v1966_v31, %v1965_v63 }
 0xb24   : > { %v1936_v57 = vmul.f32 0.7978846, %v1928_v29  ;;  %v2508_v62 = vpop.eup %2507 }
 0xb25   : > { %2056 = vmatmul.bf16.gmra.mxu1 %v1972_v36  ;;  %v1951_v30 = vadd.f32 1.0, %v2508_v62 }
 0xb26   : > { %2509 = vtanh.f32 %v1936_v57 }
 0xb27   : > { %v1959_v40 = vmul.f32 0.5, %v1951_v30 }
 0xb29   : > { %v1967_v50 = vmul.f32 %v1959_v40, %v1890_v6 }
 0xb2c   : > { %v2510_v10 = vpop.eup %2509 }
 0xb2d   : > { %v1952_v25 = vadd.f32 1.0, %v2510_v10 }
 0xb2f   : > { %v1960_v19 = vmul.f32 0.5, %v1952_v25 }
 0xb31   : > { %v1968_v33 = vmul.f32 %v1960_v19, %v1892_v39 }
 0xb33   : > { %v1973_v49 = vpack.c.bf16 %v1968_v33, %v1967_v50 }
 0xb35   : > { %2061 = vmatmul.bf16.gmra.mxu1 %v1973_v49 }
 0xb73   : > { %v1894_v15 = vpop.f32.mrf.mxu0 }
 0xb74   : > { %v1895_v52 = vadd.f32 %v3430_v7, %v1894_v15 }
 0xb76   : > { %v1905_v44 = vmul.f32 %v1895_v52, %v1895_v52 }
 0xb78   : > { %v1913_v23 = vmul.f32 %v1905_v44, %v1895_v52 }
 0xb7a   : > { %v1921_v35 = vmul.f32 0.044715, %v1913_v23 }
 0xb7b   : > { %v1896_v38 = vpop.f32.mrf.mxu0 }
 0xb7c   : > { %v1929_v59 = vadd.f32 %v1921_v35, %v1895_v52  ;;  %v1897_v53 = vadd.f32 %v3430_v7, %v1896_v38  ;;  %v2072_v7 = vperm.slane %v3264_v34, 5 }
 0xb7e   : > { %v1906_v41 = vmul.f32 %v1897_v53, %v1897_v53  ;;  %v1937_v51 = vmul.f32 0.7978846, %v1929_v59 }
 0xb80   : > { %v1914_v18 = vmul.f32 %v1906_v41, %v1897_v53  ;;  %2511 = vtanh.f32 %v1937_v51 }
 0xb82   : > { %v1922_v47 = vmul.f32 0.044715, %v1914_v18 }
 0xb84   : > { %v1930_v14 = vadd.f32 %v1922_v47, %v1897_v53 }
 0xb86   : > { %v1938_v61 = vmul.f32 0.7978846, %v1930_v14  ;;  %v2512_v37 = vpop.eup %2511 }
 0xb87   : > { %v1953_v2 = vadd.f32 1.0, %v2512_v37 }
 0xb88   : > { %2513 = vtanh.f32 %v1938_v61 }
 0xb89   : > { %v1961_v60 = vmul.f32 0.5, %v1953_v2 }
 0xb8b   : > { %v1969_v56 = vmul.f32 %v1961_v60, %v1895_v52 }
 0xb8e   : > { %v2514_v58 = vpop.eup %2513 }
 0xb8f   : > { %v1954_v3 = vadd.f32 1.0, %v2514_v58 }
 0xb91   : > { %v1962_v22 = vmul.f32 0.5, %v1954_v3  ;;  %v2052_v6 = vpop.f32.mrf.mxu1 }
 0xb92   : > { %v2053_v55 = vadd.f32 %v2336_v54, %v2052_v6 }
 0xb93   : > { %v1970_v8 = vmul.f32 %v1962_v22, %v1897_v53 }
 0xb94   : > { %v2073_v1 = vmul.f32 %v2072_v7, %v2053_v55 }
 0xb95   : > { %v1974_v4 = vpack.c.bf16 %v1970_v8, %v1969_v56 }
 0xb96   : > { %v2081_v42 = vadd.f32 %v2073_v1, %v3268_v21 }
 0xb97   : > { %2066 = vmatmul.bf16.gmra.mxu1 %v1974_v4 }
 0xb98   : > { %2089 = vst.msk [vmem:[%s3457_s27] sm:$0xff] %vm387_vm0, %v2081_v42 }
 0xb99   : > { %v2054_v34 = vpop.f32.mrf.mxu1 }
 0xb9a   : > { %v2055_v11 = vadd.f32 %v2336_v54, %v2054_v34 }
 0xb9c   : > { %v2074_v17 = vmul.f32 %v2072_v7, %v2055_v11 }
 0xb9e   : > { %v2082_v28 = vadd.f32 %v2074_v17, %v3273_v26 }
 0xba0   : > { %2090 = vst.msk [vmem:[%s3457_s27 + $0x8] sm:$0xff] %vm387_vm0, %v2082_v28 }
 0xba2   : > { %v2057_v39 = vpop.f32.mrf.mxu1 }
 0xba3   : > { %v2058_v0 = vadd.f32 %v2336_v54, %v2057_v39 }
 0xba5   : > { %v2075_v20 = vmul.f32 %v2072_v7, %v2058_v0 }
 0xba7   : > { %v2083_v48 = vadd.f32 %v2075_v20, %v3278_v13 }
 0xba9   : > { %2091 = vst.msk [vmem:[%s3457_s27 + $0x10] sm:$0xff] %vm387_vm0, %v2083_v48 }
 0xbaa   : > { %v2059_v21 = vpop.f32.mrf.mxu1 }
 0xbab   : > { %v2060_v5 = vadd.f32 %v2336_v54, %v2059_v21 }
 0xbad   : > { %v2076_v16 = vmul.f32 %v2072_v7, %v2060_v5 }
 0xbaf   : > { %v2084_v9 = vadd.f32 %v2076_v16, %v3283_v46 }
 0xbb1   : > { %2092 = vst.msk [vmem:[%s3457_s27 + $0x18] sm:$0xff] %vm387_vm0, %v2084_v9 }
 0xbb2   : > { %v2062_v26 = vpop.f32.mrf.mxu1 }
 0xbb3   : > { %v2063_v24 = vadd.f32 %v2336_v54, %v2062_v26 }
 0xbb5   : > { %v2077_v12 = vmul.f32 %v2072_v7, %v2063_v24 }
 0xbb7   : > { %v2085_v63 = vadd.f32 %v2077_v12, %v3288_v43 }
 0xbb9   : > { %2093 = vst.msk [vmem:[%s3457_s27 + $0x20] sm:$0xff] %vm387_vm0, %v2085_v63 }
 0xbba   : > { %v2064_v13 = vpop.f32.mrf.mxu1 }
 0xbbb   : > { %v2065_v31 = vadd.f32 %v2336_v54, %v2064_v13 }
 0xbbd   : > { %v2078_v29 = vmul.f32 %v2072_v7, %v2065_v31 }
 0xbbf   : > { %v2086_v36 = vadd.f32 %v2078_v29, %v3293_v45 }
 0xbc1   : > { %2094 = vst.msk [vmem:[%s3457_s27 + $0x28] sm:$0xff] %vm387_vm0, %v2086_v36 }
 0xc14   : > { %v2067_v57 = vpop.f32.mrf.mxu1 }
 0xc15   : > { %v2068_v46 = vadd.f32 %v2336_v54, %v2067_v57 }
 0xc17   : > { %v2079_v62 = vmul.f32 %v2072_v7, %v2068_v46 }
 0xc19   : > { %v2087_v30 = vadd.f32 %v2079_v62, %v3317_v27 }
 0xc1b   : > { %2095 = vst.msk [vmem:[%s3457_s27 + $0x30] sm:$0xff] %vm387_vm0, %v2087_v30 }
 0xc1c   : > { %v2069_v10 = vpop.f32.mrf.mxu1 }
 0xc1d   : > { %v2070_v25 = vadd.f32 %v2336_v54, %v2069_v10 }
 0xc1f   : > { %v2080_v43 = vmul.f32 %v2072_v7, %v2070_v25 }
 0xc21   : > { %v2088_v40 = vadd.f32 %v2080_v43, %v3298_v32 }
 0xc23   : > { %2096 = vst.msk [vmem:[%s3457_s27 + $0x38] sm:$0xff] %vm387_vm0, %v2088_v40 }
 0xc24 PF: > { %s20_s13 = sadd.s32 1, %s2530_s13  }
 0xc25   : > { %p17_p4 = scmp.ge.s32.totalorder %s20_s13, 4  }
 0xc27   :  { %19 = sbr.rel (!%p17_p4) target bundleno = 1 (0x1), region = 93 }

</bundles_post_ra>
